<compile_context>
chip_gen: v5e
topology: v5e:2x2
jax: 0.10.0
libtpu: 0.0.40
codegen_flags: <defaults>
</compile_context>

<pallas_src>
import functools

import jax
import jax.numpy as jnp
from jax.experimental import pallas as pl
from jax.experimental.pallas import tpu as pltpu

VMEM_LIMIT = 64 * 1024 * 1024  # <= physical VMEM on v5e/v6e/v7x


# ----------------------------- tiling helpers --------------------------------

def _round_up(x, m):
    return ((x + m - 1) // m) * m


def _row_tiling(M, target=512, align=16, min_tile=256):
    """Pick (row_tile, padded_M).  Small M -> single 16-aligned block; large M
    -> tile in [min_tile, target] (16-aligned) minimizing row padding, tie-
    breaking toward the largest tile.  Always: padded_M % row_tile == 0."""
    Mp = _round_up(M, align)
    if Mp <= target:
        return Mp, Mp
    best_t, best_mp = target, _round_up(M, target)
    t = target - align
    while t >= min_tile:
        mp = _round_up(M, t)
        if mp < best_mp or (mp == best_mp and t > best_t):
            best_mp, best_t = mp, t
        t -= align
    return best_t, best_mp


def _col_tile(dim, target, align=128):
    """Largest tile <= target that divides `dim` and is a multiple of `align`;
    falls back to the full dimension (always a legal Pallas block)."""
    if dim <= target:
        return dim
    t = (target // align) * align
    while t >= align:
        if dim % t == 0:
            return t
        t -= align
    return dim


def _apply_activation(y, activation):
    if activation == "quick_gelu":          # QuickGELU: x * sigmoid(1.702 x)
        return y * jax.nn.sigmoid(1.702 * y)
    if activation == "relu":
        return jnp.maximum(y, 0.0)
    return y


# ------------------------------ matmul kernels --------------------------------

def _make_matmul_kernel(has_bias, activation, n_res):
    """Tiled matmul: o = act(x @ w [+ b]) [+ residuals], f32 accumulation."""

    def kernel(*refs):
        x_ref, w_ref = refs[0], refs[1]
        pos = 2
        bias_ref = None
        if has_bias:
            bias_ref = refs[pos]
            pos += 1
        res_refs = refs[pos:pos + n_res]
        o_ref = refs[pos + n_res]
        acc_ref = refs[pos + n_res + 1]

        @pl.when(pl.program_id(2) == 0)
        def _init():
            acc_ref[...] = jnp.zeros_like(acc_ref)

        acc_ref[...] += jnp.dot(x_ref[...], w_ref[...],
                                preferred_element_type=jnp.float32)

        @pl.when(pl.program_id(2) == pl.num_programs(2) - 1)
        def _finalize():
            y = acc_ref[...]
            if has_bias:
                y = y + bias_ref[...].astype(jnp.float32)
            y = _apply_activation(y, activation)
            for r in res_refs:
                y = y + r[...].astype(jnp.float32)
            o_ref[...] = y.astype(o_ref.dtype)

    return kernel


def matmul(x, w, bias=None, *, activation="none", residuals=(), out_dtype=None,
           tm=512, tn=1024, tk=512):
    """y = act(x @ w + bias) + sum(residuals); native-dtype MXU, f32 accum.
    Rows are padded (and the output sliced back) when M doesn't tile cleanly."""
    M, K = x.shape
    K2, N = w.shape
    assert K == K2
    out_dtype = out_dtype or x.dtype

    tm, Mp = _row_tiling(M, tm)
    tn = _col_tile(N, tn)
    tk = _col_tile(K, tk)
    for r in residuals:
        assert r.shape == (M, N)
    if Mp != M:
        pad = ((0, Mp - M), (0, 0))
        x = jnp.pad(x, pad)
        residuals = tuple(jnp.pad(r, pad) for r in residuals)
    grid = (Mp // tm, N // tn, K // tk)

    in_specs = [pl.BlockSpec((tm, tk), lambda i, j, k: (i, k)),
                pl.BlockSpec((tk, tn), lambda i, j, k: (k, j))]
    args = [x, w]
    if bias is not None:
        in_specs.append(pl.BlockSpec((1, tn), lambda i, j, k: (0, j)))
        args.append(bias.reshape(1, N))
    for r in residuals:
        in_specs.append(pl.BlockSpec((tm, tn), lambda i, j, k: (i, j)))
        args.append(r)

    out = pl.pallas_call(
        _make_matmul_kernel(bias is not None, activation, len(residuals)),
        grid=grid,
        in_specs=in_specs,
        out_specs=pl.BlockSpec((tm, tn), lambda i, j, k: (i, j)),
        out_shape=jax.ShapeDtypeStruct((Mp, N), out_dtype),
        scratch_shapes=[pltpu.VMEM((tm, tn), jnp.float32)],
        compiler_params=pltpu.CompilerParams(
            dimension_semantics=("parallel", "parallel", "arbitrary"),
            vmem_limit_bytes=VMEM_LIMIT),
    )(*args)
    return out[:M] if Mp != M else out


def _ln_matmul_kernel(x_ref, g_ref, b_ref, w_ref, bias_ref, o_ref, xn_ref, *,
                      eps, activation):
    # fp32 LayerNorm over the full feature dim, computed once per row tile
    # (first column tile only) and cached in VMEM for the remaining N tiles.
    @pl.when(pl.program_id(1) == 0)
    def _normalize():
        x = x_ref[...].astype(jnp.float32)
        mean = jnp.mean(x, axis=-1, keepdims=True)
        var = jnp.mean(jnp.square(x - mean), axis=-1, keepdims=True)
        xn = (x - mean) * jax.lax.rsqrt(var + eps)
        xn = xn * g_ref[...].astype(jnp.float32) + b_ref[...].astype(jnp.float32)
        xn_ref[...] = xn.astype(xn_ref.dtype)

    y = jnp.dot(xn_ref[...], w_ref[...], preferred_element_type=jnp.float32)
    y = y + bias_ref[...].astype(jnp.float32)
    y = _apply_activation(y, activation)
    o_ref[...] = y.astype(o_ref.dtype)


def ln_matmul(x, gamma, beta, w, bias, *, activation="none", eps=1e-5,
              out_dtype=None, tm=512, tn=1024):
    """act(LayerNorm(x) @ w + bias) with LN fused into the matmul prologue.
    K (= feature dim) stays whole so LN statistics see the full row."""
    M, D = x.shape
    D2, N = w.shape
    assert D == D2
    out_dtype = out_dtype or x.dtype

    tm, Mp = _row_tiling(M, tm)
    tn = _col_tile(N, tn)
    if Mp != M:
        x = jnp.pad(x, ((0, Mp - M), (0, 0)))
    grid = (Mp // tm, N // tn)

    out = pl.pallas_call(
        functools.partial(_ln_matmul_kernel, eps=eps, activation=activation),
        grid=grid,
        in_specs=[pl.BlockSpec((tm, D), lambda i, j: (i, 0)),
                  pl.BlockSpec((1, D), lambda i, j: (0, 0)),
                  pl.BlockSpec((1, D), lambda i, j: (0, 0)),
                  pl.BlockSpec((D, tn), lambda i, j: (0, j)),
                  pl.BlockSpec((1, tn), lambda i, j: (0, j))],
        out_specs=pl.BlockSpec((tm, tn), lambda i, j: (i, j)),
        out_shape=jax.ShapeDtypeStruct((Mp, N), out_dtype),
        scratch_shapes=[pltpu.VMEM((tm, D), w.dtype)],
        compiler_params=pltpu.CompilerParams(
            dimension_semantics=("parallel", "arbitrary"),
            vmem_limit_bytes=VMEM_LIMIT),
    )(x, gamma.reshape(1, D), beta.reshape(1, D), w, bias.reshape(1, N))
    return out[:M] if Mp != M else out


# ------------------------------ LayerNorm kernel ------------------------------

def _layernorm_kernel(x_ref, g_ref, b_ref, o_ref, *, eps):
    x = x_ref[...].astype(jnp.float32)           # matches fp32 LayerNorm subclass
    mean = jnp.mean(x, axis=-1, keepdims=True)
    var = jnp.mean(jnp.square(x - mean), axis=-1, keepdims=True)
    y = (x - mean) * jax.lax.rsqrt(var + eps)
    y = y * g_ref[...].astype(jnp.float32) + b_ref[...].astype(jnp.float32)
    o_ref[...] = y.astype(o_ref.dtype)


def layernorm(x, gamma, beta, eps=1e-5, tm=512):
    M, D = x.shape
    tm, Mp = _row_tiling(M, tm)
    xi = jnp.pad(x, ((0, Mp - M), (0, 0))) if Mp != M else x
    out = pl.pallas_call(
        functools.partial(_layernorm_kernel, eps=eps),
        grid=(Mp // tm,),
        in_specs=[pl.BlockSpec((tm, D), lambda i: (i, 0)),
                  pl.BlockSpec((1, D), lambda i: (0, 0)),
                  pl.BlockSpec((1, D), lambda i: (0, 0))],
        out_specs=pl.BlockSpec((tm, D), lambda i: (i, 0)),
        out_shape=jax.ShapeDtypeStruct((Mp, D), x.dtype),
        compiler_params=pltpu.CompilerParams(
            dimension_semantics=("parallel",),
            vmem_limit_bytes=VMEM_LIMIT),
    )(xi, gamma.reshape(1, D), beta.reshape(1, D))
    return out[:M] if Mp != M else out


# ------------------------------ attention kernels -----------------------------

def _one_head_attention(q, k, v, *, scale, s_valid):
    """Single-head attention on (Sp, dh) slices; f32 softmax, masked pad keys."""
    q = q * scale                                   # fold scale into q (O(S*dh))
    s = jax.lax.dot_general(q, k, (((1,), (1,)), ((), ())),
                            preferred_element_type=jnp.float32)
    if s_valid < s.shape[-1]:                       # static sequence-pad mask
        key_idx = jax.lax.broadcasted_iota(jnp.int32, s.shape, 1)
        s = jnp.where(key_idx < s_valid, s, -1e30)
    s = s - jnp.max(s, axis=-1, keepdims=True)
    p = jnp.exp(s)
    inv = pl.reciprocal(jnp.sum(p, axis=-1, keepdims=True), approx=True)
    p = p * inv
    return jax.lax.dot_general(p.astype(v.dtype), v, (((1,), (0,)), ((), ())),
                               preferred_element_type=jnp.float32)


def _attention_group_kernel(q_ref, k_ref, v_ref, o_ref, *, heads, scale, s_valid):
    # q/k/v refs: (1, Sp, heads*dh) lane-dense slabs for one head group.
    gd = q_ref.shape[2]
    dh = gd // heads
    outs = []
    for h in range(heads):
        sl = slice(h * dh, (h + 1) * dh)
        outs.append(_one_head_attention(q_ref[0, :, sl], k_ref[0, :, sl],
                                        v_ref[0, :, sl],
                                        scale=scale, s_valid=s_valid))
    o = outs[0] if heads == 1 else jnp.concatenate(outs, axis=-1)
    o_ref[0] = o.astype(o_ref.dtype)                # one lane-dense store


def _attention_packed_kernel(qkv_ref, o_ref, *, n_head, scale, s_valid):
    # Fallback: whole (1, Sp, 3D) slab per batch element (D not 128-aligned).
    D = qkv_ref.shape[2] // 3
    dh = D // n_head
    outs = []
    for h in range(n_head):
        q = qkv_ref[0, :, h * dh:(h + 1) * dh]
        k = qkv_ref[0, :, D + h * dh:D + (h + 1) * dh]
        v = qkv_ref[0, :, 2 * D + h * dh:2 * D + (h + 1) * dh]
        outs.append(_one_head_attention(q, k, v, scale=scale, s_valid=s_valid))
    o_ref[0] = jnp.concatenate(outs, axis=-1).astype(o_ref.dtype)


def attention(qkv, n_head, s_valid):
    """qkv: (B, Sp, 3D) -> (B, Sp, D).  Grid = (batch, head-groups); each step
    reads lane-dense 128-multiple q/k/v slabs straight out of the packed qkv
    array (same operand, three BlockSpecs) — no host-side split/transpose."""
    B, Sp, threeD = qkv.shape
    D = threeD // 3
    dh = D // n_head
    scale = dh ** -0.5

    # Smallest head-group whose width is a multiple of 128 lanes.
    hg = None
    for cand in range(1, n_head + 1):
        if n_head % cand == 0 and (cand * dh) % 128 == 0:
            hg = cand
            break

    if hg is not None:
        gd = hg * dh
        n_groups = D // gd
        return pl.pallas_call(
            functools.partial(_attention_group_kernel, heads=hg, scale=scale,
                              s_valid=s_valid),
            grid=(B, n_groups),
            in_specs=[
                pl.BlockSpec((1, Sp, gd), lambda b, g: (b, 0, g)),
                pl.BlockSpec((1, Sp, gd), lambda b, g, ng=n_groups: (b, 0, ng + g)),
                pl.BlockSpec((1, Sp, gd), lambda b, g, ng=n_groups: (b, 0, 2 * ng + g)),
            ],
            out_specs=pl.BlockSpec((1, Sp, gd), lambda b, g: (b, 0, g)),
            out_shape=jax.ShapeDtypeStruct((B, Sp, D), qkv.dtype),
            compiler_params=pltpu.CompilerParams(
                dimension_semantics=("parallel", "parallel"),
                vmem_limit_bytes=VMEM_LIMIT),
        )(qkv, qkv, qkv)

    # Fallback for head dims that can't form a 128-lane group.
    return pl.pallas_call(
        functools.partial(_attention_packed_kernel, n_head=n_head, scale=scale,
                          s_valid=s_valid),
        grid=(B,),
        in_specs=[pl.BlockSpec((1, Sp, threeD), lambda b: (b, 0, 0))],
        out_specs=pl.BlockSpec((1, Sp, D), lambda b: (b, 0, 0)),
        out_shape=jax.ShapeDtypeStruct((B, Sp, D), qkv.dtype),
        compiler_params=pltpu.CompilerParams(
            dimension_semantics=("parallel",),
            vmem_limit_bytes=VMEM_LIMIT),
    )(qkv)


# --------------------------- model composition ------------------------------

def residual_block(x2d, blk, B, Sp, s_valid, n_head, adptr):
    M, D = x2d.shape                          # M = B*Sp, batch-major token rows

    # attention branch: LN1 fused into the QKV projection
    qkv = ln_matmul(x2d, blk["ln1_g"], blk["ln1_b"], blk["in_w"], blk["in_b"])
    attn = attention(qkv.reshape(B, Sp, 3 * D), n_head, s_valid).reshape(M, D)
    if adptr:
        temp = matmul(attn, blk["out_w"], blk["out_b"])                 # out_proj
        a1 = matmul(temp, blk["ad_atn_w1"], blk["ad_atn_b1"], activation="relu")
        # x + temp + adapter_atn(temp), fused into the adapter's 2nd matmul
        x2d = matmul(a1, blk["ad_atn_w2"], blk["ad_atn_b2"],
                     residuals=(temp, x2d))
    else:
        x2d = matmul(attn, blk["out_w"], blk["out_b"], residuals=(x2d,))

    # MLP branch: LN2 + c_fc + QuickGELU fused into one kernel
    h = ln_matmul(x2d, blk["ln2_g"], blk["ln2_b"], blk["fc_w"], blk["fc_b"],
                  activation="quick_gelu")
    if adptr:
        temp = matmul(h, blk["cproj_w"], blk["cproj_b"])                # c_proj
        a1 = matmul(temp, blk["ad_mlp_w1"], blk["ad_mlp_b1"], activation="relu")
        x2d = matmul(a1, blk["ad_mlp_w2"], blk["ad_mlp_b2"],
                     residuals=(temp, x2d))
    else:
        x2d = matmul(h, blk["cproj_w"], blk["cproj_b"], residuals=(x2d,))
    return x2d


def vision_transformer_forward(x, params, *, patch_size, n_head, adptr):
    B, C, H, W = x.shape
    P = patch_size
    gh, gw = H // P, W // P
    width = params["conv_w"].shape[1]
    dtype = params["conv_w"].dtype

    # conv1 (kernel=stride=patch, bias=False) as patch flatten + tiled matmul.
    # Patch flattening order is (c, kh, kw) to match Conv2d weight layout.
    patches = x.astype(dtype).reshape(B, C, gh, P, gw, P)
    patches = patches.transpose(0, 2, 4, 1, 3, 5).reshape(B * gh * gw, C * P * P)
    emb = matmul(patches, params["conv_w"]).reshape(B, gh * gw, width)

    cls = jnp.broadcast_to(params["cls"].astype(dtype), (B, 1, width))
    tok = jnp.concatenate([cls, emb], axis=1) + params["pos"].astype(dtype)[None]
    S = tok.shape[1]

    # Pad the sequence once so the token-row count tiles cleanly everywhere.
    # Padded rows are zero; they never affect real tokens (keys are masked in
    # attention, everything else is row-local) and are dropped at the end.
    Sp = _round_up(S, 16)
    if Sp != S:
        tok = jnp.pad(tok, ((0, 0), (0, Sp - S), (0, 0)))
    tok2d = tok.reshape(B * Sp, width)        # (B*Sp, D) batch-major, kept flat

    tok2d = layernorm(tok2d, params["ln_pre_g"], params["ln_pre_b"])
    for blk in params["blocks"]:
        tok2d = residual_block(tok2d, blk, B, Sp, S, n_head, adptr)

    cls_out = tok2d.reshape(B, Sp, width)[:, 0, :]          # CLS token per batch
    cls_out = layernorm(cls_out, params["ln_post_g"], params["ln_post_b"])
    return matmul(cls_out, params["proj"])                  # x @ proj (no bias)


# --------------------------- deterministic init ------------------------------

def init_params(key, *, input_resolution, patch_size, width, layers, output_dim,
                dtype=jnp.bfloat16):
    scale = width ** -0.5
    n_patches = (input_resolution // patch_size) ** 2
    keys = iter(jax.random.split(key, 8 + layers * 12))
    nk = lambda: next(keys)
    norm = lambda k, shape, std: (std * jax.random.normal(k, shape,
                                                          jnp.float32)).astype(dtype)

    params = {
        "conv_w": norm(nk(), (3 * patch_size * patch_size, width), 0.02),
        "cls": norm(nk(), (width,), scale),
        "pos": norm(nk(), (n_patches + 1, width), scale),
        "ln_pre_g": jnp.ones((width,), jnp.float32),
        "ln_pre_b": jnp.zeros((width,), jnp.float32),
        "ln_post_g": jnp.ones((width,), jnp.float32),
        "ln_post_b": jnp.zeros((width,), jnp.float32),
        "proj": norm(nk(), (width, output_dim), scale),
        "blocks": [],
    }
    for _ in range(layers):
        blk = {
            "ln1_g": jnp.ones((width,), jnp.float32),
            "ln1_b": jnp.zeros((width,), jnp.float32),
            "ln2_g": jnp.ones((width,), jnp.float32),
            "ln2_b": jnp.zeros((width,), jnp.float32),
            "in_w": norm(nk(), (width, 3 * width), 0.02),      # in_proj_weight.T
            "in_b": jnp.zeros((3 * width,), dtype),
            "out_w": norm(nk(), (width, width), 0.02),         # out_proj.weight.T
            "out_b": jnp.zeros((width,), dtype),
            "fc_w": norm(nk(), (width, 4 * width), 0.02),      # c_fc
            "fc_b": jnp.zeros((4 * width,), dtype),
            "cproj_w": norm(nk(), (4 * width, width), 0.02),   # c_proj
            "cproj_b": jnp.zeros((width,), dtype),
            # adapters: weight ~ N(0, 0.001), bias = 0  (init_adptr)
            "ad_atn_w1": norm(nk(), (width, width // 2), 0.001),
            "ad_atn_b1": jnp.zeros((width // 2,), dtype),
            "ad_atn_w2": norm(nk(), (width // 2, width), 0.001),
            "ad_atn_b2": jnp.zeros((width,), dtype),
            "ad_mlp_w1": norm(nk(), (width, width // 2), 0.001),
            "ad_mlp_b1": jnp.zeros((width // 2,), dtype),
            "ad_mlp_w2": norm(nk(), (width // 2, width), 0.001),
            "ad_mlp_b2": jnp.zeros((width,), dtype),
        }
        params["blocks"].append(blk)
    return params


if __name__ == "__main__":
    key = jax.random.PRNGKey(0)
    k_img, k_par = jax.random.split(key)

    input_resolution, patch_size = 16, 4        # 16 patches -> 17 tokens
    width, layers, heads, output_dim = 128, 2, 4, 16
    batch = 2

    x = jax.random.normal(k_img, (batch, 3, input_resolution, input_resolution),
                          jnp.float32)
    params = init_params(k_par, input_resolution=input_resolution,
                         patch_size=patch_size, width=width, layers=layers,
                         output_dim=output_dim, dtype=jnp.bfloat16)

    fwd = jax.jit(functools.partial(vision_transformer_forward,
                                    patch_size=patch_size, n_head=heads,
                                    adptr=True))
    out = jax.block_until_ready(fwd(x, params))
    assert out.shape == (batch, output_dim)
    assert bool(jnp.all(jnp.isfinite(out.astype(jnp.float32))))
    print("KERNEL_OK")
</pallas_src>

<mosaic_0001>
module attributes {stable_mosaic.version = 11 : i64} {
  func.func @kernel(%arg0: i32, %arg1: i32, %arg2: i32, %arg3: memref<32x48xbf16, #tpu.memory_space<vmem>>, %arg4: memref<48x128xbf16, #tpu.memory_space<vmem>>, %arg5: memref<32x128xbf16, #tpu.memory_space<vmem>>, %arg6: memref<32x128xf32, #tpu.memory_space<vmem>>) attributes {dimension_semantics = [#tpu.dimension_semantics<parallel>, #tpu.dimension_semantics<parallel>, #tpu.dimension_semantics<arbitrary>], iteration_bounds = array<i64: 1, 1, 1>, scalar_prefetch = 0 : i64, scratch_operands = 1 : i64, tpu.core_type = #tpu.core_type<tc>, window_params = [{transform_indices = @transform_0, window_bounds = array<i64: 32, 48>}, {transform_indices = @transform_1, window_bounds = array<i64: 48, 128>}, {transform_indices = @transform_2, window_bounds = array<i64: 32, 128>}]} {
    %c0_i32 = arith.constant 0 : i32
    %0 = arith.cmpi eq, %arg2, %c0_i32 : i32
    %1 = arith.extui %0 : i1 to i32
    %c0_i32_0 = arith.constant 0 : i32
    %2 = arith.cmpi ne, %1, %c0_i32_0 : i32
    scf.if %2 {
      %cst_10 = arith.constant 0.000000e+00 : f32
      %12 = vector.broadcast %cst_10 : f32 to vector<32x128xf32>
      %c0_11 = arith.constant 0 : index
      %c0_12 = arith.constant 0 : index
      %13 = vector.load %arg6[%c0_11, %c0_12] : memref<32x128xf32, #tpu.memory_space<vmem>>, vector<32x128xf32>
      tpu.vector_store %arg6[%c0_11, %c0_12], %12 {strides = array<i32>} : memref<32x128xf32, #tpu.memory_space<vmem>>, vector<32x128xf32>,
    } else {
    }
    %c0 = arith.constant 0 : index
    %c0_1 = arith.constant 0 : index
    %3 = vector.load %arg6[%c0, %c0_1] : memref<32x128xf32, #tpu.memory_space<vmem>>, vector<32x128xf32>
    %c0_2 = arith.constant 0 : index
    %c0_3 = arith.constant 0 : index
    %4 = vector.load %arg3[%c0_2, %c0_3] : memref<32x48xbf16, #tpu.memory_space<vmem>>, vector<32x48xbf16>
    %c0_4 = arith.constant 0 : index
    %c0_5 = arith.constant 0 : index
    %5 = vector.load %arg4[%c0_4, %c0_5] : memref<48x128xbf16, #tpu.memory_space<vmem>>, vector<48x128xbf16>
    %cst = arith.constant dense<0.000000e+00> : vector<32x128xf32>
    %6 = tpu.matmul %4, %5, %cst {dimension_numbers = #tpu.dot_dimension_numbers<[1], [0], [0], [1], [0, 0, 1, 1], [], []>} : vector<32x48xbf16>, vector<48x128xbf16>, vector<32x128xf32> -> vector<32x128xf32>
    %7 = arith.addf %3, %6 : vector<32x128xf32>
    %c0_6 = arith.constant 0 : index
    %c0_7 = arith.constant 0 : index
    %8 = vector.load %arg6[%c0_6, %c0_7] : memref<32x128xf32, #tpu.memory_space<vmem>>, vector<32x128xf32>
    tpu.vector_store %arg6[%c0_6, %c0_7], %7 {strides = array<i32>} : memref<32x128xf32, #tpu.memory_space<vmem>>, vector<32x128xf32>,
    %c0_i32_8 = arith.constant 0 : i32
    %9 = arith.cmpi eq, %arg2, %c0_i32_8 : i32
    %10 = arith.extui %9 : i1 to i32
    %c0_i32_9 = arith.constant 0 : i32
    %11 = arith.cmpi ne, %10, %c0_i32_9 : i32
    scf.if %11 {
      %c0_10 = arith.constant 0 : index
      %c0_11 = arith.constant 0 : index
      %12 = vector.load %arg6[%c0_10, %c0_11] : memref<32x128xf32, #tpu.memory_space<vmem>>, vector<32x128xf32>
      %13 = arith.truncf %12 : vector<32x128xf32> to vector<32x128xbf16>
      %c0_12 = arith.constant 0 : index
      %c0_13 = arith.constant 0 : index
      %14 = vector.load %arg5[%c0_12, %c0_13] : memref<32x128xbf16, #tpu.memory_space<vmem>>, vector<32x128xbf16>
      tpu.vector_store %arg5[%c0_12, %c0_13], %13 {strides = array<i32>} : memref<32x128xbf16, #tpu.memory_space<vmem>>, vector<32x128xbf16>,
    } else {
    }
    return
  }
  func.func @transform_0(%arg0: i32, %arg1: i32, %arg2: i32) -> (i32, i32) {
    %c0_i32 = arith.constant 0 : i32
    return %arg0, %arg2 : i32, i32
  }
  func.func @transform_1(%arg0: i32, %arg1: i32, %arg2: i32) -> (i32, i32) {
    %c0_i32 = arith.constant 0 : i32
    return %arg2, %arg1 : i32, i32
  }
  func.func @transform_2(%arg0: i32, %arg1: i32, %arg2: i32) -> (i32, i32) {
    %c0_i32 = arith.constant 0 : i32
    return %arg0, %arg1 : i32, i32
  }
}

module attributes {stable_mosaic.version = 11 : i64} {
  func.func @_layernorm_kernel(%arg0: i32, %arg1: memref<64x128xbf16, #tpu.memory_space<vmem>>, %arg2: memref<1x128xf32, #tpu.memory_space<vmem>>, %arg3: memref<1x128xf32, #tpu.memory_space<vmem>>, %arg4: memref<64x128xbf16, #tpu.memory_space<vmem>>) attributes {dimension_semantics = [#tpu.dimension_semantics<parallel>], iteration_bounds = array<i64: 1>, scalar_prefetch = 0 : i64, scratch_operands = 0 : i64, tpu.core_type = #tpu.core_type<tc>, window_params = [{transform_indices = @transform_0, window_bounds = array<i64: 64, 128>}, {pipeline_mode = #tpu.pipeline_mode<synchronous>, transform_indices = @transform_1, window_bounds = array<i64: 1, 128>}, {pipeline_mode = #tpu.pipeline_mode<synchronous>, transform_indices = @transform_2, window_bounds = array<i64: 1, 128>}, {transform_indices = @transform_3, window_bounds = array<i64: 64, 128>}]} {
    %c0 = arith.constant 0 : index
    %c0_0 = arith.constant 0 : index
    %0 = vector.load %arg1[%c0, %c0_0] : memref<64x128xbf16, #tpu.memory_space<vmem>>, vector<64x128xbf16>
    %1 = arith.extf %0 : vector<64x128xbf16> to vector<64x128xf32>
    %cst = arith.constant dense<0.000000e+00> : vector<64xf32>
    %2 = vector.multi_reduction <add>, %1, %cst [1] : vector<64x128xf32> to vector<64xf32>
    %3 = vector.shape_cast %2 : vector<64xf32> to vector<64x1xf32>
    %cst_1 = arith.constant 1.280000e+02 : f32
    %4 = vector.broadcast %cst_1 : f32 to vector<64x1xf32>
    %5 = arith.divf %3, %4 : vector<64x1xf32>
    %6 = vector.broadcast %5 : vector<64x1xf32> to vector<64x128xf32>
    %7 = arith.subf %1, %6 : vector<64x128xf32>
    %8 = arith.mulf %7, %7 : vector<64x128xf32>
    %cst_2 = arith.constant dense<0.000000e+00> : vector<64xf32>
    %9 = vector.multi_reduction <add>, %8, %cst_2 [1] : vector<64x128xf32> to vector<64xf32>
    %10 = vector.shape_cast %9 : vector<64xf32> to vector<64x1xf32>
    %cst_3 = arith.constant 1.280000e+02 : f32
    %11 = vector.broadcast %cst_3 : f32 to vector<64x1xf32>
    %12 = arith.divf %10, %11 : vector<64x1xf32>
    %13 = vector.broadcast %5 : vector<64x1xf32> to vector<64x128xf32>
    %14 = arith.subf %1, %13 : vector<64x128xf32>
    %cst_4 = arith.constant 9.99999974E-6 : f32
    %15 = vector.broadcast %cst_4 : f32 to vector<64x1xf32>
    %16 = arith.addf %12, %15 : vector<64x1xf32>
    %17 = math.rsqrt %16 : vector<64x1xf32>
    %18 = vector.broadcast %17 : vector<64x1xf32> to vector<64x128xf32>
    %19 = arith.mulf %14, %18 : vector<64x128xf32>
    %c0_5 = arith.constant 0 : index
    %c0_6 = arith.constant 0 : index
    %20 = vector.load %arg2[%c0_5, %c0_6] : memref<1x128xf32, #tpu.memory_space<vmem>>, vector<1x128xf32>
    %21 = vector.broadcast %20 : vector<1x128xf32> to vector<64x128xf32>
    %22 = arith.mulf %19, %21 : vector<64x128xf32>
    %c0_7 = arith.constant 0 : index
    %c0_8 = arith.constant 0 : index
    %23 = vector.load %arg3[%c0_7, %c0_8] : memref<1x128xf32, #tpu.memory_space<vmem>>, vector<1x128xf32>
    %24 = vector.broadcast %23 : vector<1x128xf32> to vector<64x128xf32>
    %25 = arith.addf %22, %24 : vector<64x128xf32>
    %26 = arith.truncf %25 : vector<64x128xf32> to vector<64x128xbf16>
    %c0_9 = arith.constant 0 : index
    %c0_10 = arith.constant 0 : index
    %27 = vector.load %arg4[%c0_9, %c0_10] : memref<64x128xbf16, #tpu.memory_space<vmem>>, vector<64x128xbf16>
    tpu.vector_store %arg4[%c0_9, %c0_10], %26 {strides = array<i32>} : memref<64x128xbf16, #tpu.memory_space<vmem>>, vector<64x128xbf16>,
    return
  }
  func.func @transform_0(%arg0: i32) -> (i32, i32) {
    %c0_i32 = arith.constant 0 : i32
    %c0_i32_0 = arith.constant 0 : i32
    return %arg0, %c0_i32 : i32, i32
  }
  func.func @transform_1(%arg0: i32) -> (i32, i32) {
    %c0_i32 = arith.constant 0 : i32
    %c0_i32_0 = arith.constant 0 : i32
    %c0_i32_1 = arith.constant 0 : i32
    return %c0_i32, %c0_i32_0 : i32, i32
  }
  func.func @transform_2(%arg0: i32) -> (i32, i32) {
    %c0_i32 = arith.constant 0 : i32
    %c0_i32_0 = arith.constant 0 : i32
    %c0_i32_1 = arith.constant 0 : i32
    return %c0_i32, %c0_i32_0 : i32, i32
  }
  func.func @transform_3(%arg0: i32) -> (i32, i32) {
    %c0_i32 = arith.constant 0 : i32
    %c0_i32_0 = arith.constant 0 : i32
    return %arg0, %c0_i32 : i32, i32
  }
}

module attributes {stable_mosaic.version = 11 : i64} {
  func.func @_attention_group_kernel(%arg0: i32, %arg1: i32, %arg2: memref<1x32x128xbf16, #tpu.memory_space<vmem>>, %arg3: memref<1x32x128xbf16, #tpu.memory_space<vmem>>, %arg4: memref<1x32x128xbf16, #tpu.memory_space<vmem>>, %arg5: memref<1x32x128xbf16, #tpu.memory_space<vmem>>) attributes {dimension_semantics = [#tpu.dimension_semantics<parallel>, #tpu.dimension_semantics<parallel>], iteration_bounds = array<i64: 2, 1>, scalar_prefetch = 0 : i64, scratch_operands = 0 : i64, tpu.core_type = #tpu.core_type<tc>, window_params = [{transform_indices = @transform_0, window_bounds = array<i64: 1, 32, 128>}, {transform_indices = @transform_1, window_bounds = array<i64: 1, 32, 128>}, {transform_indices = @transform_2, window_bounds = array<i64: 1, 32, 128>}, {transform_indices = @transform_3, window_bounds = array<i64: 1, 32, 128>}]} {
    %c0 = arith.constant 0 : index
    %c0_0 = arith.constant 0 : index
    %c0_1 = arith.constant 0 : index
    %0 = vector.load %arg2[%c0, %c0_0, %c0_1] : memref<1x32x128xbf16, #tpu.memory_space<vmem>>, vector<1x32x32xbf16>
    %1 = vector.shape_cast %0 : vector<1x32x32xbf16> to vector<32x32xbf16>
    %c0_2 = arith.constant 0 : index
    %c0_3 = arith.constant 0 : index
    %c0_4 = arith.constant 0 : index
    %2 = vector.load %arg3[%c0_2, %c0_3, %c0_4] : memref<1x32x128xbf16, #tpu.memory_space<vmem>>, vector<1x32x32xbf16>
    %3 = vector.shape_cast %2 : vector<1x32x32xbf16> to vector<32x32xbf16>
    %c0_5 = arith.constant 0 : index
    %c0_6 = arith.constant 0 : index
    %c0_7 = arith.constant 0 : index
    %4 = vector.load %arg4[%c0_5, %c0_6, %c0_7] : memref<1x32x128xbf16, #tpu.memory_space<vmem>>, vector<1x32x32xbf16>
    %5 = vector.shape_cast %4 : vector<1x32x32xbf16> to vector<32x32xbf16>
    %cst = arith.constant 1.767580e-01 : bf16
    %6 = vector.broadcast %cst : bf16 to vector<32x32xbf16>
    %7 = arith.mulf %1, %6 : vector<32x32xbf16>
    %cst_8 = arith.constant dense<0.000000e+00> : vector<32x32xf32>
    %8 = tpu.matmul %7, %3, %cst_8 {dimension_numbers = #tpu.dot_dimension_numbers<[1], [1], [0], [0], [0, 0, 1, 0], [], []>} : vector<32x32xbf16>, vector<32x32xbf16>, vector<32x32xf32> -> vector<32x32xf32>
    %9 = tpu.iota {dimensions = array<i32: 1>} : vector<32x32xi32>
    %c17_i32 = arith.constant 17 : i32
    %10 = vector.broadcast %c17_i32 : i32 to vector<32x32xi32>
    %11 = arith.cmpi slt, %9, %10 : vector<32x32xi32>
    %cst_9 = arith.constant -1.000000e+30 : f32
    %12 = vector.broadcast %cst_9 : f32 to vector<32x32xf32>
    %13 = arith.select %11, %8, %12 : vector<32x32xi1>, vector<32x32xf32>
    %cst_10 = arith.constant dense<0xFF800000> : vector<32xf32>
    %14 = vector.multi_reduction <maximumf>, %13, %cst_10 [1] : vector<32x32xf32> to vector<32xf32>
    %15 = vector.shape_cast %14 : vector<32xf32> to vector<32x1xf32>
    %16 = vector.broadcast %15 : vector<32x1xf32> to vector<32x32xf32>
    %17 = arith.subf %13, %16 : vector<32x32xf32>
    %18 = math.exp %17 : vector<32x32xf32>
    %cst_11 = arith.constant dense<0.000000e+00> : vector<32xf32>
    %19 = vector.multi_reduction <add>, %18, %cst_11 [1] : vector<32x32xf32> to vector<32xf32>
    %20 = vector.shape_cast %19 : vector<32xf32> to vector<32x1xf32>
    %21 = tpu.reciprocal %20 {approx = true} : vector<32x1xf32> -> vector<32x1xf32>
    %22 = vector.broadcast %21 : vector<32x1xf32> to vector<32x32xf32>
    %23 = arith.mulf %18, %22 : vector<32x32xf32>
    %24 = arith.truncf %23 : vector<32x32xf32> to vector<32x32xbf16>
    %cst_12 = arith.constant dense<0.000000e+00> : vector<32x32xf32>
    %25 = tpu.matmul %24, %5, %cst_12 {dimension_numbers = #tpu.dot_dimension_numbers<[1], [0], [0], [1], [0, 0, 1, 1], [], []>} : vector<32x32xbf16>, vector<32x32xbf16>, vector<32x32xf32> -> vector<32x32xf32>
    %c0_13 = arith.constant 0 : index
    %c0_14 = arith.constant 0 : index
    %c32 = arith.constant 32 : index
    %26 = vector.load %arg2[%c0_13, %c0_14, %c32] : memref<1x32x128xbf16, #tpu.memory_space<vmem>>, vector<1x32x32xbf16>
    %27 = vector.shape_cast %26 : vector<1x32x32xbf16> to vector<32x32xbf16>
    %c0_15 = arith.constant 0 : index
    %c0_16 = arith.constant 0 : index
    %c32_17 = arith.constant 32 : index
    %28 = vector.load %arg3[%c0_15, %c0_16, %c32_17] : memref<1x32x128xbf16, #tpu.memory_space<vmem>>, vector<1x32x32xbf16>
    %29 = vector.shape_cast %28 : vector<1x32x32xbf16> to vector<32x32xbf16>
    %c0_18 = arith.constant 0 : index
    %c0_19 = arith.constant 0 : index
    %c32_20 = arith.constant 32 : index
    %30 = vector.load %arg4[%c0_18, %c0_19, %c32_20] : memref<1x32x128xbf16, #tpu.memory_space<vmem>>, vector<1x32x32xbf16>
    %31 = vector.shape_cast %30 : vector<1x32x32xbf16> to vector<32x32xbf16>
    %cst_21 = arith.constant 1.767580e-01 : bf16
    %32 = vector.broadcast %cst_21 : bf16 to vector<32x32xbf16>
    %33 = arith.mulf %27, %32 : vector<32x32xbf16>
    %cst_22 = arith.constant dense<0.000000e+00> : vector<32x32xf32>
    %34 = tpu.matmul %33, %29, %cst_22 {dimension_numbers = #tpu.dot_dimension_numbers<[1], [1], [0], [0], [0, 0, 1, 0], [], []>} : vector<32x32xbf16>, vector<32x32xbf16>, vector<32x32xf32> -> vector<32x32xf32>
    %35 = tpu.iota {dimensions = array<i32: 1>} : vector<32x32xi32>
    %c17_i32_23 = arith.constant 17 : i32
    %36 = vector.broadcast %c17_i32_23 : i32 to vector<32x32xi32>
    %37 = arith.cmpi slt, %35, %36 : vector<32x32xi32>
    %cst_24 = arith.constant -1.000000e+30 : f32
    %38 = vector.broadcast %cst_24 : f32 to vector<32x32xf32>
    %39 = arith.select %37, %34, %38 : vector<32x32xi1>, vector<32x32xf32>
    %cst_25 = arith.constant dense<0xFF800000> : vector<32xf32>
    %40 = vector.multi_reduction <maximumf>, %39, %cst_25 [1] : vector<32x32xf32> to vector<32xf32>
    %41 = vector.shape_cast %40 : vector<32xf32> to vector<32x1xf32>
    %42 = vector.broadcast %41 : vector<32x1xf32> to vector<32x32xf32>
    %43 = arith.subf %39, %42 : vector<32x32xf32>
    %44 = math.exp %43 : vector<32x32xf32>
    %cst_26 = arith.constant dense<0.000000e+00> : vector<32xf32>
    %45 = vector.multi_reduction <add>, %44, %cst_26 [1] : vector<32x32xf32> to vector<32xf32>
    %46 = vector.shape_cast %45 : vector<32xf32> to vector<32x1xf32>
    %47 = tpu.reciprocal %46 {approx = true} : vector<32x1xf32> -> vector<32x1xf32>
    %48 = vector.broadcast %47 : vector<32x1xf32> to vector<32x32xf32>
    %49 = arith.mulf %44, %48 : vector<32x32xf32>
    %50 = arith.truncf %49 : vector<32x32xf32> to vector<32x32xbf16>
    %cst_27 = arith.constant dense<0.000000e+00> : vector<32x32xf32>
    %51 = tpu.matmul %50, %31, %cst_27 {dimension_numbers = #tpu.dot_dimension_numbers<[1], [0], [0], [1], [0, 0, 1, 1], [], []>} : vector<32x32xbf16>, vector<32x32xbf16>, vector<32x32xf32> -> vector<32x32xf32>
    %c0_28 = arith.constant 0 : index
    %c0_29 = arith.constant 0 : index
    %c64 = arith.constant 64 : index
    %52 = vector.load %arg2[%c0_28, %c0_29, %c64] : memref<1x32x128xbf16, #tpu.memory_space<vmem>>, vector<1x32x32xbf16>
    %53 = vector.shape_cast %52 : vector<1x32x32xbf16> to vector<32x32xbf16>
    %c0_30 = arith.constant 0 : index
    %c0_31 = arith.constant 0 : index
    %c64_32 = arith.constant 64 : index
    %54 = vector.load %arg3[%c0_30, %c0_31, %c64_32] : memref<1x32x128xbf16, #tpu.memory_space<vmem>>, vector<1x32x32xbf16>
    %55 = vector.shape_cast %54 : vector<1x32x32xbf16> to vector<32x32xbf16>
    %c0_33 = arith.constant 0 : index
    %c0_34 = arith.constant 0 : index
    %c64_35 = arith.constant 64 : index
    %56 = vector.load %arg4[%c0_33, %c0_34, %c64_35] : memref<1x32x128xbf16, #tpu.memory_space<vmem>>, vector<1x32x32xbf16>
    %57 = vector.shape_cast %56 : vector<1x32x32xbf16> to vector<32x32xbf16>
    %cst_36 = arith.constant 1.767580e-01 : bf16
    %58 = vector.broadcast %cst_36 : bf16 to vector<32x32xbf16>
    %59 = arith.mulf %53, %58 : vector<32x32xbf16>
    %cst_37 = arith.constant dense<0.000000e+00> : vector<32x32xf32>
    %60 = tpu.matmul %59, %55, %cst_37 {dimension_numbers = #tpu.dot_dimension_numbers<[1], [1], [0], [0], [0, 0, 1, 0], [], []>} : vector<32x32xbf16>, vector<32x32xbf16>, vector<32x32xf32> -> vector<32x32xf32>
    %61 = tpu.iota {dimensions = array<i32: 1>} : vector<32x32xi32>
    %c17_i32_38 = arith.constant 17 : i32
    %62 = vector.broadcast %c17_i32_38 : i32 to vector<32x32xi32>
    %63 = arith.cmpi slt, %61, %62 : vector<32x32xi32>
    %cst_39 = arith.constant -1.000000e+30 : f32
    %64 = vector.broadcast %cst_39 : f32 to vector<32x32xf32>
    %65 = arith.select %63, %60, %64 : vector<32x32xi1>, vector<32x32xf32>
    %cst_40 = arith.constant dense<0xFF800000> : vector<32xf32>
    %66 = vector.multi_reduction <maximumf>, %65, %cst_40 [1] : vector<32x32xf32> to vector<32xf32>
    %67 = vector.shape_cast %66 : vector<32xf32> to vector<32x1xf32>
    %68 = vector.broadcast %67 : vector<32x1xf32> to vector<32x32xf32>
    %69 = arith.subf %65, %68 : vector<32x32xf32>
    %70 = math.exp %69 : vector<32x32xf32>
    %cst_41 = arith.constant dense<0.000000e+00> : vector<32xf32>
    %71 = vector.multi_reduction <add>, %70, %cst_41 [1] : vector<32x32xf32> to vector<32xf32>
    %72 = vector.shape_cast %71 : vector<32xf32> to vector<32x1xf32>
    %73 = tpu.reciprocal %72 {approx = true} : vector<32x1xf32> -> vector<32x1xf32>
    %74 = vector.broadcast %73 : vector<32x1xf32> to vector<32x32xf32>
    %75 = arith.mulf %70, %74 : vector<32x32xf32>
    %76 = arith.truncf %75 : vector<32x32xf32> to vector<32x32xbf16>
    %cst_42 = arith.constant dense<0.000000e+00> : vector<32x32xf32>
    %77 = tpu.matmul %76, %57, %cst_42 {dimension_numbers = #tpu.dot_dimension_numbers<[1], [0], [0], [1], [0, 0, 1, 1], [], []>} : vector<32x32xbf16>, vector<32x32xbf16>, vector<32x32xf32> -> vector<32x32xf32>
    %c0_43 = arith.constant 0 : index
    %c0_44 = arith.constant 0 : index
    %c96 = arith.constant 96 : index
    %78 = vector.load %arg2[%c0_43, %c0_44, %c96] : memref<1x32x128xbf16, #tpu.memory_space<vmem>>, vector<1x32x32xbf16>
    %79 = vector.shape_cast %78 : vector<1x32x32xbf16> to vector<32x32xbf16>
    %c0_45 = arith.constant 0 : index
    %c0_46 = arith.constant 0 : index
    %c96_47 = arith.constant 96 : index
    %80 = vector.load %arg3[%c0_45, %c0_46, %c96_47] : memref<1x32x128xbf16, #tpu.memory_space<vmem>>, vector<1x32x32xbf16>
    %81 = vector.shape_cast %80 : vector<1x32x32xbf16> to vector<32x32xbf16>
    %c0_48 = arith.constant 0 : index
    %c0_49 = arith.constant 0 : index
    %c96_50 = arith.constant 96 : index
    %82 = vector.load %arg4[%c0_48, %c0_49, %c96_50] : memref<1x32x128xbf16, #tpu.memory_space<vmem>>, vector<1x32x32xbf16>
    %83 = vector.shape_cast %82 : vector<1x32x32xbf16> to vector<32x32xbf16>
    %cst_51 = arith.constant 1.767580e-01 : bf16
    %84 = vector.broadcast %cst_51 : bf16 to vector<32x32xbf16>
    %85 = arith.mulf %79, %84 : vector<32x32xbf16>
    %cst_52 = arith.constant dense<0.000000e+00> : vector<32x32xf32>
    %86 = tpu.matmul %85, %81, %cst_52 {dimension_numbers = #tpu.dot_dimension_numbers<[1], [1], [0], [0], [0, 0, 1, 0], [], []>} : vector<32x32xbf16>, vector<32x32xbf16>, vector<32x32xf32> -> vector<32x32xf32>
    %87 = tpu.iota {dimensions = array<i32: 1>} : vector<32x32xi32>
    %c17_i32_53 = arith.constant 17 : i32
    %88 = vector.broadcast %c17_i32_53 : i32 to vector<32x32xi32>
    %89 = arith.cmpi slt, %87, %88 : vector<32x32xi32>
    %cst_54 = arith.constant -1.000000e+30 : f32
    %90 = vector.broadcast %cst_54 : f32 to vector<32x32xf32>
    %91 = arith.select %89, %86, %90 : vector<32x32xi1>, vector<32x32xf32>
    %cst_55 = arith.constant dense<0xFF800000> : vector<32xf32>
    %92 = vector.multi_reduction <maximumf>, %91, %cst_55 [1] : vector<32x32xf32> to vector<32xf32>
    %93 = vector.shape_cast %92 : vector<32xf32> to vector<32x1xf32>
    %94 = vector.broadcast %93 : vector<32x1xf32> to vector<32x32xf32>
    %95 = arith.subf %91, %94 : vector<32x32xf32>
    %96 = math.exp %95 : vector<32x32xf32>
    %cst_56 = arith.constant dense<0.000000e+00> : vector<32xf32>
    %97 = vector.multi_reduction <add>, %96, %cst_56 [1] : vector<32x32xf32> to vector<32xf32>
    %98 = vector.shape_cast %97 : vector<32xf32> to vector<32x1xf32>
    %99 = tpu.reciprocal %98 {approx = true} : vector<32x1xf32> -> vector<32x1xf32>
    %100 = vector.broadcast %99 : vector<32x1xf32> to vector<32x32xf32>
    %101 = arith.mulf %96, %100 : vector<32x32xf32>
    %102 = arith.truncf %101 : vector<32x32xf32> to vector<32x32xbf16>
    %cst_57 = arith.constant dense<0.000000e+00> : vector<32x32xf32>
    %103 = tpu.matmul %102, %83, %cst_57 {dimension_numbers = #tpu.dot_dimension_numbers<[1], [0], [0], [1], [0, 0, 1, 1], [], []>} : vector<32x32xbf16>, vector<32x32xbf16>, vector<32x32xf32> -> vector<32x32xf32>
    %104 = tpu.concatenate %25, %51, %77, %103 in 1 : vector<32x32xf32>, vector<32x32xf32>, vector<32x32xf32>, vector<32x32xf32> -> vector<32x128xf32>
    %105 = arith.truncf %104 : vector<32x128xf32> to vector<32x128xbf16>
    %c0_58 = arith.constant 0 : index
    %c0_59 = arith.constant 0 : index
    %c0_60 = arith.constant 0 : index
    %106 = vector.load %arg5[%c0_58, %c0_59, %c0_60] : memref<1x32x128xbf16, #tpu.memory_space<vmem>>, vector<1x32x128xbf16>
    %107 = vector.shape_cast %106 : vector<1x32x128xbf16> to vector<32x128xbf16>
    %108 = vector.shape_cast %105 : vector<32x128xbf16> to vector<1x32x128xbf16>
    tpu.vector_store %arg5[%c0_58, %c0_59, %c0_60], %108 {strides = array<i32>} : memref<1x32x128xbf16, #tpu.memory_space<vmem>>, vector<1x32x128xbf16>,
    return
  }
  func.func @transform_0(%arg0: i32, %arg1: i32) -> (i32, i32, i32) {
    %c0_i32 = arith.constant 0 : i32
    %c0_i32_0 = arith.constant 0 : i32
    return %arg0, %c0_i32, %arg1 : i32, i32, i32
  }
  func.func @transform_1(%arg0: i32, %arg1: i32) -> (i32, i32, i32) {
    %c1_i32 = arith.constant 1 : i32
    %0 = arith.addi %c1_i32, %arg1 : i32
    %c0_i32 = arith.constant 0 : i32
    %c0_i32_0 = arith.constant 0 : i32
    return %arg0, %c0_i32, %0 : i32, i32, i32
  }
  func.func @transform_2(%arg0: i32, %arg1: i32) -> (i32, i32, i32) {
    %c2_i32 = arith.constant 2 : i32
    %0 = arith.addi %c2_i32, %arg1 : i32
    %c0_i32 = arith.constant 0 : i32
    %c0_i32_0 = arith.constant 0 : i32
    return %arg0, %c0_i32, %0 : i32, i32, i32
  }
  func.func @transform_3(%arg0: i32, %arg1: i32) -> (i32, i32, i32) {
    %c0_i32 = arith.constant 0 : i32
    %c0_i32_0 = arith.constant 0 : i32
    return %arg0, %c0_i32, %arg1 : i32, i32, i32
  }
}

module attributes {stable_mosaic.version = 11 : i64} {
  func.func @_ln_matmul_kernel(%arg0: i32, %arg1: i32, %arg2: memref<64x128xbf16, #tpu.memory_space<vmem>>, %arg3: memref<1x128xf32, #tpu.memory_space<vmem>>, %arg4: memref<1x128xf32, #tpu.memory_space<vmem>>, %arg5: memref<128x384xbf16, #tpu.memory_space<vmem>>, %arg6: memref<1x384xbf16, #tpu.memory_space<vmem>>, %arg7: memref<64x384xbf16, #tpu.memory_space<vmem>>, %arg8: memref<64x128xbf16, #tpu.memory_space<vmem>>) attributes {dimension_semantics = [#tpu.dimension_semantics<parallel>, #tpu.dimension_semantics<arbitrary>], iteration_bounds = array<i64: 1, 1>, scalar_prefetch = 0 : i64, scratch_operands = 1 : i64, tpu.core_type = #tpu.core_type<tc>, window_params = [{transform_indices = @transform_0, window_bounds = array<i64: 64, 128>}, {pipeline_mode = #tpu.pipeline_mode<synchronous>, transform_indices = @transform_1, window_bounds = array<i64: 1, 128>}, {pipeline_mode = #tpu.pipeline_mode<synchronous>, transform_indices = @transform_2, window_bounds = array<i64: 1, 128>}, {transform_indices = @transform_3, window_bounds = array<i64: 128, 384>}, {transform_indices = @transform_4, window_bounds = array<i64: 1, 384>}, {transform_indices = @transform_5, window_bounds = array<i64: 64, 384>}]} {
    %c0_i32 = arith.constant 0 : i32
    %0 = arith.cmpi eq, %arg1, %c0_i32 : i32
    %1 = arith.extui %0 : i1 to i32
    %c0_i32_0 = arith.constant 0 : i32
    %2 = arith.cmpi ne, %1, %c0_i32_0 : i32
    scf.if %2 {
      %c0_8 = arith.constant 0 : index
      %c0_9 = arith.constant 0 : index
      %12 = vector.load %arg2[%c0_8, %c0_9] : memref<64x128xbf16, #tpu.memory_space<vmem>>, vector<64x128xbf16>
      %13 = arith.extf %12 : vector<64x128xbf16> to vector<64x128xf32>
      %cst_10 = arith.constant dense<0.000000e+00> : vector<64xf32>
      %14 = vector.multi_reduction <add>, %13, %cst_10 [1] : vector<64x128xf32> to vector<64xf32>
      %15 = vector.shape_cast %14 : vector<64xf32> to vector<64x1xf32>
      %cst_11 = arith.constant 1.280000e+02 : f32
      %16 = vector.broadcast %cst_11 : f32 to vector<64x1xf32>
      %17 = arith.divf %15, %16 : vector<64x1xf32>
      %18 = vector.broadcast %17 : vector<64x1xf32> to vector<64x128xf32>
      %19 = arith.subf %13, %18 : vector<64x128xf32>
      %20 = arith.mulf %19, %19 : vector<64x128xf32>
      %cst_12 = arith.constant dense<0.000000e+00> : vector<64xf32>
      %21 = vector.multi_reduction <add>, %20, %cst_12 [1] : vector<64x128xf32> to vector<64xf32>
      %22 = vector.shape_cast %21 : vector<64xf32> to vector<64x1xf32>
      %cst_13 = arith.constant 1.280000e+02 : f32
      %23 = vector.broadcast %cst_13 : f32 to vector<64x1xf32>
      %24 = arith.divf %22, %23 : vector<64x1xf32>
      %25 = vector.broadcast %17 : vector<64x1xf32> to vector<64x128xf32>
      %26 = arith.subf %13, %25 : vector<64x128xf32>
      %cst_14 = arith.constant 9.99999974E-6 : f32
      %27 = vector.broadcast %cst_14 : f32 to vector<64x1xf32>
      %28 = arith.addf %24, %27 : vector<64x1xf32>
      %29 = math.rsqrt %28 : vector<64x1xf32>
      %30 = vector.broadcast %29 : vector<64x1xf32> to vector<64x128xf32>
      %31 = arith.mulf %26, %30 : vector<64x128xf32>
      %c0_15 = arith.constant 0 : index
      %c0_16 = arith.constant 0 : index
      %32 = vector.load %arg3[%c0_15, %c0_16] : memref<1x128xf32, #tpu.memory_space<vmem>>, vector<1x128xf32>
      %33 = vector.broadcast %32 : vector<1x128xf32> to vector<64x128xf32>
      %34 = arith.mulf %31, %33 : vector<64x128xf32>
      %c0_17 = arith.constant 0 : index
      %c0_18 = arith.constant 0 : index
      %35 = vector.load %arg4[%c0_17, %c0_18] : memref<1x128xf32, #tpu.memory_space<vmem>>, vector<1x128xf32>
      %36 = vector.broadcast %35 : vector<1x128xf32> to vector<64x128xf32>
      %37 = arith.addf %34, %36 : vector<64x128xf32>
      %38 = arith.truncf %37 : vector<64x128xf32> to vector<64x128xbf16>
      %c0_19 = arith.constant 0 : index
      %c0_20 = arith.constant 0 : index
      %39 = vector.load %arg8[%c0_19, %c0_20] : memref<64x128xbf16, #tpu.memory_space<vmem>>, vector<64x128xbf16>
      tpu.vector_store %arg8[%c0_19, %c0_20], %38 {strides = array<i32>} : memref<64x128xbf16, #tpu.memory_space<vmem>>, vector<64x128xbf16>,
    } else {
    }
    %c0 = arith.constant 0 : index
    %c0_1 = arith.constant 0 : index
    %3 = vector.load %arg8[%c0, %c0_1] : memref<64x128xbf16, #tpu.memory_space<vmem>>, vector<64x128xbf16>
    %c0_2 = arith.constant 0 : index
    %c0_3 = arith.constant 0 : index
    %4 = vector.load %arg5[%c0_2, %c0_3] : memref<128x384xbf16, #tpu.memory_space<vmem>>, vector<128x384xbf16>
    %cst = arith.constant dense<0.000000e+00> : vector<64x384xf32>
    %5 = tpu.matmul %3, %4, %cst {dimension_numbers = #tpu.dot_dimension_numbers<[1], [0], [0], [1], [0, 0, 1, 1], [], []>} : vector<64x128xbf16>, vector<128x384xbf16>, vector<64x384xf32> -> vector<64x384xf32>
    %c0_4 = arith.constant 0 : index
    %c0_5 = arith.constant 0 : index
    %6 = vector.load %arg6[%c0_4, %c0_5] : memref<1x384xbf16, #tpu.memory_space<vmem>>, vector<1x384xbf16>
    %7 = arith.extf %6 : vector<1x384xbf16> to vector<1x384xf32>
    %8 = vector.broadcast %7 : vector<1x384xf32> to vector<64x384xf32>
    %9 = arith.addf %5, %8 : vector<64x384xf32>
    %10 = arith.truncf %9 : vector<64x384xf32> to vector<64x384xbf16>
    %c0_6 = arith.constant 0 : index
    %c0_7 = arith.constant 0 : index
    %11 = vector.load %arg7[%c0_6, %c0_7] : memref<64x384xbf16, #tpu.memory_space<vmem>>, vector<64x384xbf16>
    tpu.vector_store %arg7[%c0_6, %c0_7], %10 {strides = array<i32>} : memref<64x384xbf16, #tpu.memory_space<vmem>>, vector<64x384xbf16>,
    return
  }
  func.func @transform_0(%arg0: i32, %arg1: i32) -> (i32, i32) {
    %c0_i32 = arith.constant 0 : i32
    %c0_i32_0 = arith.constant 0 : i32
    return %arg0, %c0_i32 : i32, i32
  }
  func.func @transform_1(%arg0: i32, %arg1: i32) -> (i32, i32) {
    %c0_i32 = arith.constant 0 : i32
    %c0_i32_0 = arith.constant 0 : i32
    %c0_i32_1 = arith.constant 0 : i32
    return %c0_i32, %c0_i32_0 : i32, i32
  }
  func.func @transform_2(%arg0: i32, %arg1: i32) -> (i32, i32) {
    %c0_i32 = arith.constant 0 : i32
    %c0_i32_0 = arith.constant 0 : i32
    %c0_i32_1 = arith.constant 0 : i32
    return %c0_i32, %c0_i32_0 : i32, i32
  }
  func.func @transform_3(%arg0: i32, %arg1: i32) -> (i32, i32) {
    %c0_i32 = arith.constant 0 : i32
    %c0_i32_0 = arith.constant 0 : i32
    return %c0_i32, %arg1 : i32, i32
  }
  func.func @transform_4(%arg0: i32, %arg1: i32) -> (i32, i32) {
    %c0_i32 = arith.constant 0 : i32
    %c0_i32_0 = arith.constant 0 : i32
    return %c0_i32, %arg1 : i32, i32
  }
  func.func @transform_5(%arg0: i32, %arg1: i32) -> (i32, i32) {
    %c0_i32 = arith.constant 0 : i32
    return %arg0, %arg1 : i32, i32
  }
}

module attributes {stable_mosaic.version = 11 : i64} {
  func.func @kernel(%arg0: i32, %arg1: i32, %arg2: i32, %arg3: memref<64x128xbf16, #tpu.memory_space<vmem>>, %arg4: memref<128x128xbf16, #tpu.memory_space<vmem>>, %arg5: memref<1x128xbf16, #tpu.memory_space<vmem>>, %arg6: memref<64x128xbf16, #tpu.memory_space<vmem>>, %arg7: memref<64x128xf32, #tpu.memory_space<vmem>>) attributes {dimension_semantics = [#tpu.dimension_semantics<parallel>, #tpu.dimension_semantics<parallel>, #tpu.dimension_semantics<arbitrary>], iteration_bounds = array<i64: 1, 1, 1>, scalar_prefetch = 0 : i64, scratch_operands = 1 : i64, tpu.core_type = #tpu.core_type<tc>, window_params = [{transform_indices = @transform_0, window_bounds = array<i64: 64, 128>}, {transform_indices = @transform_1, window_bounds = array<i64: 128, 128>}, {transform_indices = @transform_2, window_bounds = array<i64: 1, 128>}, {transform_indices = @transform_3, window_bounds = array<i64: 64, 128>}]} {
    %c0_i32 = arith.constant 0 : i32
    %0 = arith.cmpi eq, %arg2, %c0_i32 : i32
    %1 = arith.extui %0 : i1 to i32
    %c0_i32_0 = arith.constant 0 : i32
    %2 = arith.cmpi ne, %1, %c0_i32_0 : i32
    scf.if %2 {
      %cst_10 = arith.constant 0.000000e+00 : f32
      %12 = vector.broadcast %cst_10 : f32 to vector<64x128xf32>
      %c0_11 = arith.constant 0 : index
      %c0_12 = arith.constant 0 : index
      %13 = vector.load %arg7[%c0_11, %c0_12] : memref<64x128xf32, #tpu.memory_space<vmem>>, vector<64x128xf32>
      tpu.vector_store %arg7[%c0_11, %c0_12], %12 {strides = array<i32>} : memref<64x128xf32, #tpu.memory_space<vmem>>, vector<64x128xf32>,
    } else {
    }
    %c0 = arith.constant 0 : index
    %c0_1 = arith.constant 0 : index
    %3 = vector.load %arg7[%c0, %c0_1] : memref<64x128xf32, #tpu.memory_space<vmem>>, vector<64x128xf32>
    %c0_2 = arith.constant 0 : index
    %c0_3 = arith.constant 0 : index
    %4 = vector.load %arg3[%c0_2, %c0_3] : memref<64x128xbf16, #tpu.memory_space<vmem>>, vector<64x128xbf16>
    %c0_4 = arith.constant 0 : index
    %c0_5 = arith.constant 0 : index
    %5 = vector.load %arg4[%c0_4, %c0_5] : memref<128x128xbf16, #tpu.memory_space<vmem>>, vector<128x128xbf16>
    %cst = arith.constant dense<0.000000e+00> : vector<64x128xf32>
    %6 = tpu.matmul %4, %5, %cst {dimension_numbers = #tpu.dot_dimension_numbers<[1], [0], [0], [1], [0, 0, 1, 1], [], []>} : vector<64x128xbf16>, vector<128x128xbf16>, vector<64x128xf32> -> vector<64x128xf32>
    %7 = arith.addf %3, %6 : vector<64x128xf32>
    %c0_6 = arith.constant 0 : index
    %c0_7 = arith.constant 0 : index
    %8 = vector.load %arg7[%c0_6, %c0_7] : memref<64x128xf32, #tpu.memory_space<vmem>>, vector<64x128xf32>
    tpu.vector_store %arg7[%c0_6, %c0_7], %7 {strides = array<i32>} : memref<64x128xf32, #tpu.memory_space<vmem>>, vector<64x128xf32>,
    %c0_i32_8 = arith.constant 0 : i32
    %9 = arith.cmpi eq, %arg2, %c0_i32_8 : i32
    %10 = arith.extui %9 : i1 to i32
    %c0_i32_9 = arith.constant 0 : i32
    %11 = arith.cmpi ne, %10, %c0_i32_9 : i32
    scf.if %11 {
      %c0_10 = arith.constant 0 : index
      %c0_11 = arith.constant 0 : index
      %12 = vector.load %arg7[%c0_10, %c0_11] : memref<64x128xf32, #tpu.memory_space<vmem>>, vector<64x128xf32>
      %c0_12 = arith.constant 0 : index
      %c0_13 = arith.constant 0 : index
      %13 = vector.load %arg5[%c0_12, %c0_13] : memref<1x128xbf16, #tpu.memory_space<vmem>>, vector<1x128xbf16>
      %14 = arith.extf %13 : vector<1x128xbf16> to vector<1x128xf32>
      %15 = vector.broadcast %14 : vector<1x128xf32> to vector<64x128xf32>
      %16 = arith.addf %12, %15 : vector<64x128xf32>
      %17 = arith.truncf %16 : vector<64x128xf32> to vector<64x128xbf16>
      %c0_14 = arith.constant 0 : index
      %c0_15 = arith.constant 0 : index
      %18 = vector.load %arg6[%c0_14, %c0_15] : memref<64x128xbf16, #tpu.memory_space<vmem>>, vector<64x128xbf16>
      tpu.vector_store %arg6[%c0_14, %c0_15], %17 {strides = array<i32>} : memref<64x128xbf16, #tpu.memory_space<vmem>>, vector<64x128xbf16>,
    } else {
    }
    return
  }
  func.func @transform_0(%arg0: i32, %arg1: i32, %arg2: i32) -> (i32, i32) {
    %c0_i32 = arith.constant 0 : i32
    return %arg0, %arg2 : i32, i32
  }
  func.func @transform_1(%arg0: i32, %arg1: i32, %arg2: i32) -> (i32, i32) {
    %c0_i32 = arith.constant 0 : i32
    return %arg2, %arg1 : i32, i32
  }
  func.func @transform_2(%arg0: i32, %arg1: i32, %arg2: i32) -> (i32, i32) {
    %c0_i32 = arith.constant 0 : i32
    %c0_i32_0 = arith.constant 0 : i32
    return %c0_i32, %arg1 : i32, i32
  }
  func.func @transform_3(%arg0: i32, %arg1: i32, %arg2: i32) -> (i32, i32) {
    %c0_i32 = arith.constant 0 : i32
    return %arg0, %arg1 : i32, i32
  }
}

module attributes {stable_mosaic.version = 11 : i64} {
  func.func @kernel(%arg0: i32, %arg1: i32, %arg2: i32, %arg3: memref<64x128xbf16, #tpu.memory_space<vmem>>, %arg4: memref<128x64xbf16, #tpu.memory_space<vmem>>, %arg5: memref<1x64xbf16, #tpu.memory_space<vmem>>, %arg6: memref<64x64xbf16, #tpu.memory_space<vmem>>, %arg7: memref<64x64xf32, #tpu.memory_space<vmem>>) attributes {dimension_semantics = [#tpu.dimension_semantics<parallel>, #tpu.dimension_semantics<parallel>, #tpu.dimension_semantics<arbitrary>], iteration_bounds = array<i64: 1, 1, 1>, scalar_prefetch = 0 : i64, scratch_operands = 1 : i64, tpu.core_type = #tpu.core_type<tc>, window_params = [{transform_indices = @transform_0, window_bounds = array<i64: 64, 128>}, {transform_indices = @transform_1, window_bounds = array<i64: 128, 64>}, {transform_indices = @transform_2, window_bounds = array<i64: 1, 64>}, {transform_indices = @transform_3, window_bounds = array<i64: 64, 64>}]} {
    %c0_i32 = arith.constant 0 : i32
    %0 = arith.cmpi eq, %arg2, %c0_i32 : i32
    %1 = arith.extui %0 : i1 to i32
    %c0_i32_0 = arith.constant 0 : i32
    %2 = arith.cmpi ne, %1, %c0_i32_0 : i32
    scf.if %2 {
      %cst_10 = arith.constant 0.000000e+00 : f32
      %12 = vector.broadcast %cst_10 : f32 to vector<64x64xf32>
      %c0_11 = arith.constant 0 : index
      %c0_12 = arith.constant 0 : index
      %13 = vector.load %arg7[%c0_11, %c0_12] : memref<64x64xf32, #tpu.memory_space<vmem>>, vector<64x64xf32>
      tpu.vector_store %arg7[%c0_11, %c0_12], %12 {strides = array<i32>} : memref<64x64xf32, #tpu.memory_space<vmem>>, vector<64x64xf32>,
    } else {
    }
    %c0 = arith.constant 0 : index
    %c0_1 = arith.constant 0 : index
    %3 = vector.load %arg7[%c0, %c0_1] : memref<64x64xf32, #tpu.memory_space<vmem>>, vector<64x64xf32>
    %c0_2 = arith.constant 0 : index
    %c0_3 = arith.constant 0 : index
    %4 = vector.load %arg3[%c0_2, %c0_3] : memref<64x128xbf16, #tpu.memory_space<vmem>>, vector<64x128xbf16>
    %c0_4 = arith.constant 0 : index
    %c0_5 = arith.constant 0 : index
    %5 = vector.load %arg4[%c0_4, %c0_5] : memref<128x64xbf16, #tpu.memory_space<vmem>>, vector<128x64xbf16>
    %cst = arith.constant dense<0.000000e+00> : vector<64x64xf32>
    %6 = tpu.matmul %4, %5, %cst {dimension_numbers = #tpu.dot_dimension_numbers<[1], [0], [0], [1], [0, 0, 1, 1], [], []>} : vector<64x128xbf16>, vector<128x64xbf16>, vector<64x64xf32> -> vector<64x64xf32>
    %7 = arith.addf %3, %6 : vector<64x64xf32>
    %c0_6 = arith.constant 0 : index
    %c0_7 = arith.constant 0 : index
    %8 = vector.load %arg7[%c0_6, %c0_7] : memref<64x64xf32, #tpu.memory_space<vmem>>, vector<64x64xf32>
    tpu.vector_store %arg7[%c0_6, %c0_7], %7 {strides = array<i32>} : memref<64x64xf32, #tpu.memory_space<vmem>>, vector<64x64xf32>,
    %c0_i32_8 = arith.constant 0 : i32
    %9 = arith.cmpi eq, %arg2, %c0_i32_8 : i32
    %10 = arith.extui %9 : i1 to i32
    %c0_i32_9 = arith.constant 0 : i32
    %11 = arith.cmpi ne, %10, %c0_i32_9 : i32
    scf.if %11 {
      %c0_10 = arith.constant 0 : index
      %c0_11 = arith.constant 0 : index
      %12 = vector.load %arg7[%c0_10, %c0_11] : memref<64x64xf32, #tpu.memory_space<vmem>>, vector<64x64xf32>
      %c0_12 = arith.constant 0 : index
      %c0_13 = arith.constant 0 : index
      %13 = vector.load %arg5[%c0_12, %c0_13] : memref<1x64xbf16, #tpu.memory_space<vmem>>, vector<1x64xbf16>
      %14 = arith.extf %13 : vector<1x64xbf16> to vector<1x64xf32>
      %15 = vector.broadcast %14 : vector<1x64xf32> to vector<64x64xf32>
      %16 = arith.addf %12, %15 : vector<64x64xf32>
      %cst_14 = arith.constant 0.000000e+00 : f32
      %17 = vector.broadcast %cst_14 : f32 to vector<64x64xf32>
      %18 = arith.maximumf %16, %17 : vector<64x64xf32>
      %19 = arith.truncf %18 : vector<64x64xf32> to vector<64x64xbf16>
      %c0_15 = arith.constant 0 : index
      %c0_16 = arith.constant 0 : index
      %20 = vector.load %arg6[%c0_15, %c0_16] : memref<64x64xbf16, #tpu.memory_space<vmem>>, vector<64x64xbf16>
      tpu.vector_store %arg6[%c0_15, %c0_16], %19 {strides = array<i32>} : memref<64x64xbf16, #tpu.memory_space<vmem>>, vector<64x64xbf16>,
    } else {
    }
    return
  }
  func.func @transform_0(%arg0: i32, %arg1: i32, %arg2: i32) -> (i32, i32) {
    %c0_i32 = arith.constant 0 : i32
    return %arg0, %arg2 : i32, i32
  }
  func.func @transform_1(%arg0: i32, %arg1: i32, %arg2: i32) -> (i32, i32) {
    %c0_i32 = arith.constant 0 : i32
    return %arg2, %arg1 : i32, i32
  }
  func.func @transform_2(%arg0: i32, %arg1: i32, %arg2: i32) -> (i32, i32) {
    %c0_i32 = arith.constant 0 : i32
    %c0_i32_0 = arith.constant 0 : i32
    return %c0_i32, %arg1 : i32, i32
  }
  func.func @transform_3(%arg0: i32, %arg1: i32, %arg2: i32) -> (i32, i32) {
    %c0_i32 = arith.constant 0 : i32
    return %arg0, %arg1 : i32, i32
  }
}

module attributes {stable_mosaic.version = 11 : i64} {
  func.func @kernel(%arg0: i32, %arg1: i32, %arg2: i32, %arg3: memref<64x64xbf16, #tpu.memory_space<vmem>>, %arg4: memref<64x128xbf16, #tpu.memory_space<vmem>>, %arg5: memref<1x128xbf16, #tpu.memory_space<vmem>>, %arg6: memref<64x128xbf16, #tpu.memory_space<vmem>>, %arg7: memref<64x128xbf16, #tpu.memory_space<vmem>>, %arg8: memref<64x128xbf16, #tpu.memory_space<vmem>>, %arg9: memref<64x128xf32, #tpu.memory_space<vmem>>) attributes {dimension_semantics = [#tpu.dimension_semantics<parallel>, #tpu.dimension_semantics<parallel>, #tpu.dimension_semantics<arbitrary>], iteration_bounds = array<i64: 1, 1, 1>, scalar_prefetch = 0 : i64, scratch_operands = 1 : i64, tpu.core_type = #tpu.core_type<tc>, window_params = [{transform_indices = @transform_0, window_bounds = array<i64: 64, 64>}, {transform_indices = @transform_1, window_bounds = array<i64: 64, 128>}, {transform_indices = @transform_2, window_bounds = array<i64: 1, 128>}, {transform_indices = @transform_3, window_bounds = array<i64: 64, 128>}, {transform_indices = @transform_4, window_bounds = array<i64: 64, 128>}, {transform_indices = @transform_5, window_bounds = array<i64: 64, 128>}]} {
    %c0_i32 = arith.constant 0 : i32
    %0 = arith.cmpi eq, %arg2, %c0_i32 : i32
    %1 = arith.extui %0 : i1 to i32
    %c0_i32_0 = arith.constant 0 : i32
    %2 = arith.cmpi ne, %1, %c0_i32_0 : i32
    scf.if %2 {
      %cst_10 = arith.constant 0.000000e+00 : f32
      %12 = vector.broadcast %cst_10 : f32 to vector<64x128xf32>
      %c0_11 = arith.constant 0 : index
      %c0_12 = arith.constant 0 : index
      %13 = vector.load %arg9[%c0_11, %c0_12] : memref<64x128xf32, #tpu.memory_space<vmem>>, vector<64x128xf32>
      tpu.vector_store %arg9[%c0_11, %c0_12], %12 {strides = array<i32>} : memref<64x128xf32, #tpu.memory_space<vmem>>, vector<64x128xf32>,
    } else {
    }
    %c0 = arith.constant 0 : index
    %c0_1 = arith.constant 0 : index
    %3 = vector.load %arg9[%c0, %c0_1] : memref<64x128xf32, #tpu.memory_space<vmem>>, vector<64x128xf32>
    %c0_2 = arith.constant 0 : index
    %c0_3 = arith.constant 0 : index
    %4 = vector.load %arg3[%c0_2, %c0_3] : memref<64x64xbf16, #tpu.memory_space<vmem>>, vector<64x64xbf16>
    %c0_4 = arith.constant 0 : index
    %c0_5 = arith.constant 0 : index
    %5 = vector.load %arg4[%c0_4, %c0_5] : memref<64x128xbf16, #tpu.memory_space<vmem>>, vector<64x128xbf16>
    %cst = arith.constant dense<0.000000e+00> : vector<64x128xf32>
    %6 = tpu.matmul %4, %5, %cst {dimension_numbers = #tpu.dot_dimension_numbers<[1], [0], [0], [1], [0, 0, 1, 1], [], []>} : vector<64x64xbf16>, vector<64x128xbf16>, vector<64x128xf32> -> vector<64x128xf32>
    %7 = arith.addf %3, %6 : vector<64x128xf32>
    %c0_6 = arith.constant 0 : index
    %c0_7 = arith.constant 0 : index
    %8 = vector.load %arg9[%c0_6, %c0_7] : memref<64x128xf32, #tpu.memory_space<vmem>>, vector<64x128xf32>
    tpu.vector_store %arg9[%c0_6, %c0_7], %7 {strides = array<i32>} : memref<64x128xf32, #tpu.memory_space<vmem>>, vector<64x128xf32>,
    %c0_i32_8 = arith.constant 0 : i32
    %9 = arith.cmpi eq, %arg2, %c0_i32_8 : i32
    %10 = arith.extui %9 : i1 to i32
    %c0_i32_9 = arith.constant 0 : i32
    %11 = arith.cmpi ne, %10, %c0_i32_9 : i32
    scf.if %11 {
      %c0_10 = arith.constant 0 : index
      %c0_11 = arith.constant 0 : index
      %12 = vector.load %arg9[%c0_10, %c0_11] : memref<64x128xf32, #tpu.memory_space<vmem>>, vector<64x128xf32>
      %c0_12 = arith.constant 0 : index
      %c0_13 = arith.constant 0 : index
      %13 = vector.load %arg5[%c0_12, %c0_13] : memref<1x128xbf16, #tpu.memory_space<vmem>>, vector<1x128xbf16>
      %14 = arith.extf %13 : vector<1x128xbf16> to vector<1x128xf32>
      %15 = vector.broadcast %14 : vector<1x128xf32> to vector<64x128xf32>
      %16 = arith.addf %12, %15 : vector<64x128xf32>
      %c0_14 = arith.constant 0 : index
      %c0_15 = arith.constant 0 : index
      %17 = vector.load %arg6[%c0_14, %c0_15] : memref<64x128xbf16, #tpu.memory_space<vmem>>, vector<64x128xbf16>
      %18 = arith.extf %17 : vector<64x128xbf16> to vector<64x128xf32>
      %19 = arith.addf %16, %18 : vector<64x128xf32>
      %c0_16 = arith.constant 0 : index
      %c0_17 = arith.constant 0 : index
      %20 = vector.load %arg7[%c0_16, %c0_17] : memref<64x128xbf16, #tpu.memory_space<vmem>>, vector<64x128xbf16>
      %21 = arith.extf %20 : vector<64x128xbf16> to vector<64x128xf32>
      %22 = arith.addf %19, %21 : vector<64x128xf32>
      %23 = arith.truncf %22 : vector<64x128xf32> to vector<64x128xbf16>
      %c0_18 = arith.constant 0 : index
      %c0_19 = arith.constant 0 : index
      %24 = vector.load %arg8[%c0_18, %c0_19] : memref<64x128xbf16, #tpu.memory_space<vmem>>, vector<64x128xbf16>
      tpu.vector_store %arg8[%c0_18, %c0_19], %23 {strides = array<i32>} : memref<64x128xbf16, #tpu.memory_space<vmem>>, vector<64x128xbf16>,
    } else {
    }
    return
  }
  func.func @transform_0(%arg0: i32, %arg1: i32, %arg2: i32) -> (i32, i32) {
    %c0_i32 = arith.constant 0 : i32
    return %arg0, %arg2 : i32, i32
  }
  func.func @transform_1(%arg0: i32, %arg1: i32, %arg2: i32) -> (i32, i32) {
    %c0_i32 = arith.constant 0 : i32
    return %arg2, %arg1 : i32, i32
  }
  func.func @transform_2(%arg0: i32, %arg1: i32, %arg2: i32) -> (i32, i32) {
    %c0_i32 = arith.constant 0 : i32
    %c0_i32_0 = arith.constant 0 : i32
    return %c0_i32, %arg1 : i32, i32
  }
  func.func @transform_3(%arg0: i32, %arg1: i32, %arg2: i32) -> (i32, i32) {
    %c0_i32 = arith.constant 0 : i32
    return %arg0, %arg1 : i32, i32
  }
  func.func @transform_4(%arg0: i32, %arg1: i32, %arg2: i32) -> (i32, i32) {
    %c0_i32 = arith.constant 0 : i32
    return %arg0, %arg1 : i32, i32
  }
  func.func @transform_5(%arg0: i32, %arg1: i32, %arg2: i32) -> (i32, i32) {
    %c0_i32 = arith.constant 0 : i32
    return %arg0, %arg1 : i32, i32
  }
}

module attributes {stable_mosaic.version = 11 : i64} {
  func.func @_ln_matmul_kernel(%arg0: i32, %arg1: i32, %arg2: memref<64x128xbf16, #tpu.memory_space<vmem>>, %arg3: memref<1x128xf32, #tpu.memory_space<vmem>>, %arg4: memref<1x128xf32, #tpu.memory_space<vmem>>, %arg5: memref<128x512xbf16, #tpu.memory_space<vmem>>, %arg6: memref<1x512xbf16, #tpu.memory_space<vmem>>, %arg7: memref<64x512xbf16, #tpu.memory_space<vmem>>, %arg8: memref<64x128xbf16, #tpu.memory_space<vmem>>) attributes {dimension_semantics = [#tpu.dimension_semantics<parallel>, #tpu.dimension_semantics<arbitrary>], iteration_bounds = array<i64: 1, 1>, scalar_prefetch = 0 : i64, scratch_operands = 1 : i64, tpu.core_type = #tpu.core_type<tc>, window_params = [{transform_indices = @transform_0, window_bounds = array<i64: 64, 128>}, {pipeline_mode = #tpu.pipeline_mode<synchronous>, transform_indices = @transform_1, window_bounds = array<i64: 1, 128>}, {pipeline_mode = #tpu.pipeline_mode<synchronous>, transform_indices = @transform_2, window_bounds = array<i64: 1, 128>}, {transform_indices = @transform_3, window_bounds = array<i64: 128, 512>}, {transform_indices = @transform_4, window_bounds = array<i64: 1, 512>}, {transform_indices = @transform_5, window_bounds = array<i64: 64, 512>}]} {
    %c0_i32 = arith.constant 0 : i32
    %0 = arith.cmpi eq, %arg1, %c0_i32 : i32
    %1 = arith.extui %0 : i1 to i32
    %c0_i32_0 = arith.constant 0 : i32
    %2 = arith.cmpi ne, %1, %c0_i32_0 : i32
    scf.if %2 {
      %c0_10 = arith.constant 0 : index
      %c0_11 = arith.constant 0 : index
      %20 = vector.load %arg2[%c0_10, %c0_11] : memref<64x128xbf16, #tpu.memory_space<vmem>>, vector<64x128xbf16>
      %21 = arith.extf %20 : vector<64x128xbf16> to vector<64x128xf32>
      %cst_12 = arith.constant dense<0.000000e+00> : vector<64xf32>
      %22 = vector.multi_reduction <add>, %21, %cst_12 [1] : vector<64x128xf32> to vector<64xf32>
      %23 = vector.shape_cast %22 : vector<64xf32> to vector<64x1xf32>
      %cst_13 = arith.constant 1.280000e+02 : f32
      %24 = vector.broadcast %cst_13 : f32 to vector<64x1xf32>
      %25 = arith.divf %23, %24 : vector<64x1xf32>
      %26 = vector.broadcast %25 : vector<64x1xf32> to vector<64x128xf32>
      %27 = arith.subf %21, %26 : vector<64x128xf32>
      %28 = arith.mulf %27, %27 : vector<64x128xf32>
      %cst_14 = arith.constant dense<0.000000e+00> : vector<64xf32>
      %29 = vector.multi_reduction <add>, %28, %cst_14 [1] : vector<64x128xf32> to vector<64xf32>
      %30 = vector.shape_cast %29 : vector<64xf32> to vector<64x1xf32>
      %cst_15 = arith.constant 1.280000e+02 : f32
      %31 = vector.broadcast %cst_15 : f32 to vector<64x1xf32>
      %32 = arith.divf %30, %31 : vector<64x1xf32>
      %33 = vector.broadcast %25 : vector<64x1xf32> to vector<64x128xf32>
      %34 = arith.subf %21, %33 : vector<64x128xf32>
      %cst_16 = arith.constant 9.99999974E-6 : f32
      %35 = vector.broadcast %cst_16 : f32 to vector<64x1xf32>
      %36 = arith.addf %32, %35 : vector<64x1xf32>
      %37 = math.rsqrt %36 : vector<64x1xf32>
      %38 = vector.broadcast %37 : vector<64x1xf32> to vector<64x128xf32>
      %39 = arith.mulf %34, %38 : vector<64x128xf32>
      %c0_17 = arith.constant 0 : index
      %c0_18 = arith.constant 0 : index
      %40 = vector.load %arg3[%c0_17, %c0_18] : memref<1x128xf32, #tpu.memory_space<vmem>>, vector<1x128xf32>
      %41 = vector.broadcast %40 : vector<1x128xf32> to vector<64x128xf32>
      %42 = arith.mulf %39, %41 : vector<64x128xf32>
      %c0_19 = arith.constant 0 : index
      %c0_20 = arith.constant 0 : index
      %43 = vector.load %arg4[%c0_19, %c0_20] : memref<1x128xf32, #tpu.memory_space<vmem>>, vector<1x128xf32>
      %44 = vector.broadcast %43 : vector<1x128xf32> to vector<64x128xf32>
      %45 = arith.addf %42, %44 : vector<64x128xf32>
      %46 = arith.truncf %45 : vector<64x128xf32> to vector<64x128xbf16>
      %c0_21 = arith.constant 0 : index
      %c0_22 = arith.constant 0 : index
      %47 = vector.load %arg8[%c0_21, %c0_22] : memref<64x128xbf16, #tpu.memory_space<vmem>>, vector<64x128xbf16>
      tpu.vector_store %arg8[%c0_21, %c0_22], %46 {strides = array<i32>} : memref<64x128xbf16, #tpu.memory_space<vmem>>, vector<64x128xbf16>,
    } else {
    }
    %c0 = arith.constant 0 : index
    %c0_1 = arith.constant 0 : index
    %3 = vector.load %arg8[%c0, %c0_1] : memref<64x128xbf16, #tpu.memory_space<vmem>>, vector<64x128xbf16>
    %c0_2 = arith.constant 0 : index
    %c0_3 = arith.constant 0 : index
    %4 = vector.load %arg5[%c0_2, %c0_3] : memref<128x512xbf16, #tpu.memory_space<vmem>>, vector<128x512xbf16>
    %cst = arith.constant dense<0.000000e+00> : vector<64x512xf32>
    %5 = tpu.matmul %3, %4, %cst {dimension_numbers = #tpu.dot_dimension_numbers<[1], [0], [0], [1], [0, 0, 1, 1], [], []>} : vector<64x128xbf16>, vector<128x512xbf16>, vector<64x512xf32> -> vector<64x512xf32>
    %c0_4 = arith.constant 0 : index
    %c0_5 = arith.constant 0 : index
    %6 = vector.load %arg6[%c0_4, %c0_5] : memref<1x512xbf16, #tpu.memory_space<vmem>>, vector<1x512xbf16>
    %7 = arith.extf %6 : vector<1x512xbf16> to vector<1x512xf32>
    %8 = vector.broadcast %7 : vector<1x512xf32> to vector<64x512xf32>
    %9 = arith.addf %5, %8 : vector<64x512xf32>
    %cst_6 = arith.constant 1.702000e+00 : f32
    %10 = vector.broadcast %cst_6 : f32 to vector<64x512xf32>
    %11 = arith.mulf %10, %9 : vector<64x512xf32>
    %12 = arith.negf %11 : vector<64x512xf32>
    %13 = math.exp %12 : vector<64x512xf32>
    %cst_7 = arith.constant 1.000000e+00 : f32
    %14 = vector.broadcast %cst_7 : f32 to vector<64x512xf32>
    %15 = arith.addf %14, %13 : vector<64x512xf32>
    %16 = arith.divf %14, %15 : vector<64x512xf32>
    %17 = arith.mulf %9, %16 : vector<64x512xf32>
    %18 = arith.truncf %17 : vector<64x512xf32> to vector<64x512xbf16>
    %c0_8 = arith.constant 0 : index
    %c0_9 = arith.constant 0 : index
    %19 = vector.load %arg7[%c0_8, %c0_9] : memref<64x512xbf16, #tpu.memory_space<vmem>>, vector<64x512xbf16>
    tpu.vector_store %arg7[%c0_8, %c0_9], %18 {strides = array<i32>} : memref<64x512xbf16, #tpu.memory_space<vmem>>, vector<64x512xbf16>,
    return
  }
  func.func @transform_0(%arg0: i32, %arg1: i32) -> (i32, i32) {
    %c0_i32 = arith.constant 0 : i32
    %c0_i32_0 = arith.constant 0 : i32
    return %arg0, %c0_i32 : i32, i32
  }
  func.func @transform_1(%arg0: i32, %arg1: i32) -> (i32, i32) {
    %c0_i32 = arith.constant 0 : i32
    %c0_i32_0 = arith.constant 0 : i32
    %c0_i32_1 = arith.constant 0 : i32
    return %c0_i32, %c0_i32_0 : i32, i32
  }
  func.func @transform_2(%arg0: i32, %arg1: i32) -> (i32, i32) {
    %c0_i32 = arith.constant 0 : i32
    %c0_i32_0 = arith.constant 0 : i32
    %c0_i32_1 = arith.constant 0 : i32
    return %c0_i32, %c0_i32_0 : i32, i32
  }
  func.func @transform_3(%arg0: i32, %arg1: i32) -> (i32, i32) {
    %c0_i32 = arith.constant 0 : i32
    %c0_i32_0 = arith.constant 0 : i32
    return %c0_i32, %arg1 : i32, i32
  }
  func.func @transform_4(%arg0: i32, %arg1: i32) -> (i32, i32) {
    %c0_i32 = arith.constant 0 : i32
    %c0_i32_0 = arith.constant 0 : i32
    return %c0_i32, %arg1 : i32, i32
  }
  func.func @transform_5(%arg0: i32, %arg1: i32) -> (i32, i32) {
    %c0_i32 = arith.constant 0 : i32
    return %arg0, %arg1 : i32, i32
  }
}

module attributes {stable_mosaic.version = 11 : i64} {
  func.func @kernel(%arg0: i32, %arg1: i32, %arg2: i32, %arg3: memref<64x512xbf16, #tpu.memory_space<vmem>>, %arg4: memref<512x128xbf16, #tpu.memory_space<vmem>>, %arg5: memref<1x128xbf16, #tpu.memory_space<vmem>>, %arg6: memref<64x128xbf16, #tpu.memory_space<vmem>>, %arg7: memref<64x128xf32, #tpu.memory_space<vmem>>) attributes {dimension_semantics = [#tpu.dimension_semantics<parallel>, #tpu.dimension_semantics<parallel>, #tpu.dimension_semantics<arbitrary>], iteration_bounds = array<i64: 1, 1, 1>, scalar_prefetch = 0 : i64, scratch_operands = 1 : i64, tpu.core_type = #tpu.core_type<tc>, window_params = [{transform_indices = @transform_0, window_bounds = array<i64: 64, 512>}, {transform_indices = @transform_1, window_bounds = array<i64: 512, 128>}, {transform_indices = @transform_2, window_bounds = array<i64: 1, 128>}, {transform_indices = @transform_3, window_bounds = array<i64: 64, 128>}]} {
    %c0_i32 = arith.constant 0 : i32
    %0 = arith.cmpi eq, %arg2, %c0_i32 : i32
    %1 = arith.extui %0 : i1 to i32
    %c0_i32_0 = arith.constant 0 : i32
    %2 = arith.cmpi ne, %1, %c0_i32_0 : i32
    scf.if %2 {
      %cst_10 = arith.constant 0.000000e+00 : f32
      %12 = vector.broadcast %cst_10 : f32 to vector<64x128xf32>
      %c0_11 = arith.constant 0 : index
      %c0_12 = arith.constant 0 : index
      %13 = vector.load %arg7[%c0_11, %c0_12] : memref<64x128xf32, #tpu.memory_space<vmem>>, vector<64x128xf32>
      tpu.vector_store %arg7[%c0_11, %c0_12], %12 {strides = array<i32>} : memref<64x128xf32, #tpu.memory_space<vmem>>, vector<64x128xf32>,
    } else {
    }
    %c0 = arith.constant 0 : index
    %c0_1 = arith.constant 0 : index
    %3 = vector.load %arg7[%c0, %c0_1] : memref<64x128xf32, #tpu.memory_space<vmem>>, vector<64x128xf32>
    %c0_2 = arith.constant 0 : index
    %c0_3 = arith.constant 0 : index
    %4 = vector.load %arg3[%c0_2, %c0_3] : memref<64x512xbf16, #tpu.memory_space<vmem>>, vector<64x512xbf16>
    %c0_4 = arith.constant 0 : index
    %c0_5 = arith.constant 0 : index
    %5 = vector.load %arg4[%c0_4, %c0_5] : memref<512x128xbf16, #tpu.memory_space<vmem>>, vector<512x128xbf16>
    %cst = arith.constant dense<0.000000e+00> : vector<64x128xf32>
    %6 = tpu.matmul %4, %5, %cst {dimension_numbers = #tpu.dot_dimension_numbers<[1], [0], [0], [1], [0, 0, 1, 1], [], []>} : vector<64x512xbf16>, vector<512x128xbf16>, vector<64x128xf32> -> vector<64x128xf32>
    %7 = arith.addf %3, %6 : vector<64x128xf32>
    %c0_6 = arith.constant 0 : index
    %c0_7 = arith.constant 0 : index
    %8 = vector.load %arg7[%c0_6, %c0_7] : memref<64x128xf32, #tpu.memory_space<vmem>>, vector<64x128xf32>
    tpu.vector_store %arg7[%c0_6, %c0_7], %7 {strides = array<i32>} : memref<64x128xf32, #tpu.memory_space<vmem>>, vector<64x128xf32>,
    %c0_i32_8 = arith.constant 0 : i32
    %9 = arith.cmpi eq, %arg2, %c0_i32_8 : i32
    %10 = arith.extui %9 : i1 to i32
    %c0_i32_9 = arith.constant 0 : i32
    %11 = arith.cmpi ne, %10, %c0_i32_9 : i32
    scf.if %11 {
      %c0_10 = arith.constant 0 : index
      %c0_11 = arith.constant 0 : index
      %12 = vector.load %arg7[%c0_10, %c0_11] : memref<64x128xf32, #tpu.memory_space<vmem>>, vector<64x128xf32>
      %c0_12 = arith.constant 0 : index
      %c0_13 = arith.constant 0 : index
      %13 = vector.load %arg5[%c0_12, %c0_13] : memref<1x128xbf16, #tpu.memory_space<vmem>>, vector<1x128xbf16>
      %14 = arith.extf %13 : vector<1x128xbf16> to vector<1x128xf32>
      %15 = vector.broadcast %14 : vector<1x128xf32> to vector<64x128xf32>
      %16 = arith.addf %12, %15 : vector<64x128xf32>
      %17 = arith.truncf %16 : vector<64x128xf32> to vector<64x128xbf16>
      %c0_14 = arith.constant 0 : index
      %c0_15 = arith.constant 0 : index
      %18 = vector.load %arg6[%c0_14, %c0_15] : memref<64x128xbf16, #tpu.memory_space<vmem>>, vector<64x128xbf16>
      tpu.vector_store %arg6[%c0_14, %c0_15], %17 {strides = array<i32>} : memref<64x128xbf16, #tpu.memory_space<vmem>>, vector<64x128xbf16>,
    } else {
    }
    return
  }
  func.func @transform_0(%arg0: i32, %arg1: i32, %arg2: i32) -> (i32, i32) {
    %c0_i32 = arith.constant 0 : i32
    return %arg0, %arg2 : i32, i32
  }
  func.func @transform_1(%arg0: i32, %arg1: i32, %arg2: i32) -> (i32, i32) {
    %c0_i32 = arith.constant 0 : i32
    return %arg2, %arg1 : i32, i32
  }
  func.func @transform_2(%arg0: i32, %arg1: i32, %arg2: i32) -> (i32, i32) {
    %c0_i32 = arith.constant 0 : i32
    %c0_i32_0 = arith.constant 0 : i32
    return %c0_i32, %arg1 : i32, i32
  }
  func.func @transform_3(%arg0: i32, %arg1: i32, %arg2: i32) -> (i32, i32) {
    %c0_i32 = arith.constant 0 : i32
    return %arg0, %arg1 : i32, i32
  }
}

module attributes {stable_mosaic.version = 11 : i64} {
  func.func @_ln_matmul_kernel(%arg0: i32, %arg1: i32, %arg2: memref<64x128xbf16, #tpu.memory_space<vmem>>, %arg3: memref<1x128xf32, #tpu.memory_space<vmem>>, %arg4: memref<1x128xf32, #tpu.memory_space<vmem>>, %arg5: memref<128x384xbf16, #tpu.memory_space<vmem>>, %arg6: memref<1x384xbf16, #tpu.memory_space<vmem>>, %arg7: memref<64x384xbf16, #tpu.memory_space<vmem>>, %arg8: memref<64x128xbf16, #tpu.memory_space<vmem>>) attributes {dimension_semantics = [#tpu.dimension_semantics<parallel>, #tpu.dimension_semantics<arbitrary>], iteration_bounds = array<i64: 1, 1>, scalar_prefetch = 0 : i64, scratch_operands = 1 : i64, tpu.core_type = #tpu.core_type<tc>, window_params = [{transform_indices = @transform_0, window_bounds = array<i64: 64, 128>}, {pipeline_mode = #tpu.pipeline_mode<synchronous>, transform_indices = @transform_1, window_bounds = array<i64: 1, 128>}, {pipeline_mode = #tpu.pipeline_mode<synchronous>, transform_indices = @transform_2, window_bounds = array<i64: 1, 128>}, {transform_indices = @transform_3, window_bounds = array<i64: 128, 384>}, {transform_indices = @transform_4, window_bounds = array<i64: 1, 384>}, {transform_indices = @transform_5, window_bounds = array<i64: 64, 384>}]} {
    %c0_i32 = arith.constant 0 : i32
    %0 = arith.cmpi eq, %arg1, %c0_i32 : i32
    %1 = arith.extui %0 : i1 to i32
    %c0_i32_0 = arith.constant 0 : i32
    %2 = arith.cmpi ne, %1, %c0_i32_0 : i32
    scf.if %2 {
      %c0_8 = arith.constant 0 : index
      %c0_9 = arith.constant 0 : index
      %12 = vector.load %arg2[%c0_8, %c0_9] : memref<64x128xbf16, #tpu.memory_space<vmem>>, vector<64x128xbf16>
      %13 = arith.extf %12 : vector<64x128xbf16> to vector<64x128xf32>
      %cst_10 = arith.constant dense<0.000000e+00> : vector<64xf32>
      %14 = vector.multi_reduction <add>, %13, %cst_10 [1] : vector<64x128xf32> to vector<64xf32>
      %15 = vector.shape_cast %14 : vector<64xf32> to vector<64x1xf32>
      %cst_11 = arith.constant 1.280000e+02 : f32
      %16 = vector.broadcast %cst_11 : f32 to vector<64x1xf32>
      %17 = arith.divf %15, %16 : vector<64x1xf32>
      %18 = vector.broadcast %17 : vector<64x1xf32> to vector<64x128xf32>
      %19 = arith.subf %13, %18 : vector<64x128xf32>
      %20 = arith.mulf %19, %19 : vector<64x128xf32>
      %cst_12 = arith.constant dense<0.000000e+00> : vector<64xf32>
      %21 = vector.multi_reduction <add>, %20, %cst_12 [1] : vector<64x128xf32> to vector<64xf32>
      %22 = vector.shape_cast %21 : vector<64xf32> to vector<64x1xf32>
      %cst_13 = arith.constant 1.280000e+02 : f32
      %23 = vector.broadcast %cst_13 : f32 to vector<64x1xf32>
      %24 = arith.divf %22, %23 : vector<64x1xf32>
      %25 = vector.broadcast %17 : vector<64x1xf32> to vector<64x128xf32>
      %26 = arith.subf %13, %25 : vector<64x128xf32>
      %cst_14 = arith.constant 9.99999974E-6 : f32
      %27 = vector.broadcast %cst_14 : f32 to vector<64x1xf32>
      %28 = arith.addf %24, %27 : vector<64x1xf32>
      %29 = math.rsqrt %28 : vector<64x1xf32>
      %30 = vector.broadcast %29 : vector<64x1xf32> to vector<64x128xf32>
      %31 = arith.mulf %26, %30 : vector<64x128xf32>
      %c0_15 = arith.constant 0 : index
      %c0_16 = arith.constant 0 : index
      %32 = vector.load %arg3[%c0_15, %c0_16] : memref<1x128xf32, #tpu.memory_space<vmem>>, vector<1x128xf32>
      %33 = vector.broadcast %32 : vector<1x128xf32> to vector<64x128xf32>
      %34 = arith.mulf %31, %33 : vector<64x128xf32>
      %c0_17 = arith.constant 0 : index
      %c0_18 = arith.constant 0 : index
      %35 = vector.load %arg4[%c0_17, %c0_18] : memref<1x128xf32, #tpu.memory_space<vmem>>, vector<1x128xf32>
      %36 = vector.broadcast %35 : vector<1x128xf32> to vector<64x128xf32>
      %37 = arith.addf %34, %36 : vector<64x128xf32>
      %38 = arith.truncf %37 : vector<64x128xf32> to vector<64x128xbf16>
      %c0_19 = arith.constant 0 : index
      %c0_20 = arith.constant 0 : index
      %39 = vector.load %arg8[%c0_19, %c0_20] : memref<64x128xbf16, #tpu.memory_space<vmem>>, vector<64x128xbf16>
      tpu.vector_store %arg8[%c0_19, %c0_20], %38 {strides = array<i32>} : memref<64x128xbf16, #tpu.memory_space<vmem>>, vector<64x128xbf16>,
    } else {
    }
    %c0 = arith.constant 0 : index
    %c0_1 = arith.constant 0 : index
    %3 = vector.load %arg8[%c0, %c0_1] : memref<64x128xbf16, #tpu.memory_space<vmem>>, vector<64x128xbf16>
    %c0_2 = arith.constant 0 : index
    %c0_3 = arith.constant 0 : index
    %4 = vector.load %arg5[%c0_2, %c0_3] : memref<128x384xbf16, #tpu.memory_space<vmem>>, vector<128x384xbf16>
    %cst = arith.constant dense<0.000000e+00> : vector<64x384xf32>
    %5 = tpu.matmul %3, %4, %cst {dimension_numbers = #tpu.dot_dimension_numbers<[1], [0], [0], [1], [0, 0, 1, 1], [], []>} : vector<64x128xbf16>, vector<128x384xbf16>, vector<64x384xf32> -> vector<64x384xf32>
    %c0_4 = arith.constant 0 : index
    %c0_5 = arith.constant 0 : index
    %6 = vector.load %arg6[%c0_4, %c0_5] : memref<1x384xbf16, #tpu.memory_space<vmem>>, vector<1x384xbf16>
    %7 = arith.extf %6 : vector<1x384xbf16> to vector<1x384xf32>
    %8 = vector.broadcast %7 : vector<1x384xf32> to vector<64x384xf32>
    %9 = arith.addf %5, %8 : vector<64x384xf32>
    %10 = arith.truncf %9 : vector<64x384xf32> to vector<64x384xbf16>
    %c0_6 = arith.constant 0 : index
    %c0_7 = arith.constant 0 : index
    %11 = vector.load %arg7[%c0_6, %c0_7] : memref<64x384xbf16, #tpu.memory_space<vmem>>, vector<64x384xbf16>
    tpu.vector_store %arg7[%c0_6, %c0_7], %10 {strides = array<i32>} : memref<64x384xbf16, #tpu.memory_space<vmem>>, vector<64x384xbf16>,
    return
  }
  func.func @transform_0(%arg0: i32, %arg1: i32) -> (i32, i32) {
    %c0_i32 = arith.constant 0 : i32
    %c0_i32_0 = arith.constant 0 : i32
    return %arg0, %c0_i32 : i32, i32
  }
  func.func @transform_1(%arg0: i32, %arg1: i32) -> (i32, i32) {
    %c0_i32 = arith.constant 0 : i32
    %c0_i32_0 = arith.constant 0 : i32
    %c0_i32_1 = arith.constant 0 : i32
    return %c0_i32, %c0_i32_0 : i32, i32
  }
  func.func @transform_2(%arg0: i32, %arg1: i32) -> (i32, i32) {
    %c0_i32 = arith.constant 0 : i32
    %c0_i32_0 = arith.constant 0 : i32
    %c0_i32_1 = arith.constant 0 : i32
    return %c0_i32, %c0_i32_0 : i32, i32
  }
  func.func @transform_3(%arg0: i32, %arg1: i32) -> (i32, i32) {
    %c0_i32 = arith.constant 0 : i32
    %c0_i32_0 = arith.constant 0 : i32
    return %c0_i32, %arg1 : i32, i32
  }
  func.func @transform_4(%arg0: i32, %arg1: i32) -> (i32, i32) {
    %c0_i32 = arith.constant 0 : i32
    %c0_i32_0 = arith.constant 0 : i32
    return %c0_i32, %arg1 : i32, i32
  }
  func.func @transform_5(%arg0: i32, %arg1: i32) -> (i32, i32) {
    %c0_i32 = arith.constant 0 : i32
    return %arg0, %arg1 : i32, i32
  }
}

module attributes {stable_mosaic.version = 11 : i64} {
  func.func @kernel(%arg0: i32, %arg1: i32, %arg2: i32, %arg3: memref<64x512xbf16, #tpu.memory_space<vmem>>, %arg4: memref<512x128xbf16, #tpu.memory_space<vmem>>, %arg5: memref<1x128xbf16, #tpu.memory_space<vmem>>, %arg6: memref<64x128xbf16, #tpu.memory_space<vmem>>, %arg7: memref<64x128xf32, #tpu.memory_space<vmem>>) attributes {dimension_semantics = [#tpu.dimension_semantics<parallel>, #tpu.dimension_semantics<parallel>, #tpu.dimension_semantics<arbitrary>], iteration_bounds = array<i64: 1, 1, 1>, scalar_prefetch = 0 : i64, scratch_operands = 1 : i64, tpu.core_type = #tpu.core_type<tc>, window_params = [{transform_indices = @transform_0, window_bounds = array<i64: 64, 512>}, {transform_indices = @transform_1, window_bounds = array<i64: 512, 128>}, {transform_indices = @transform_2, window_bounds = array<i64: 1, 128>}, {transform_indices = @transform_3, window_bounds = array<i64: 64, 128>}]} {
    %c0_i32 = arith.constant 0 : i32
    %0 = arith.cmpi eq, %arg2, %c0_i32 : i32
    %1 = arith.extui %0 : i1 to i32
    %c0_i32_0 = arith.constant 0 : i32
    %2 = arith.cmpi ne, %1, %c0_i32_0 : i32
    scf.if %2 {
      %cst_10 = arith.constant 0.000000e+00 : f32
      %12 = vector.broadcast %cst_10 : f32 to vector<64x128xf32>
      %c0_11 = arith.constant 0 : index
      %c0_12 = arith.constant 0 : index
      %13 = vector.load %arg7[%c0_11, %c0_12] : memref<64x128xf32, #tpu.memory_space<vmem>>, vector<64x128xf32>
      tpu.vector_store %arg7[%c0_11, %c0_12], %12 {strides = array<i32>} : memref<64x128xf32, #tpu.memory_space<vmem>>, vector<64x128xf32>,
    } else {
    }
    %c0 = arith.constant 0 : index
    %c0_1 = arith.constant 0 : index
    %3 = vector.load %arg7[%c0, %c0_1] : memref<64x128xf32, #tpu.memory_space<vmem>>, vector<64x128xf32>
    %c0_2 = arith.constant 0 : index
    %c0_3 = arith.constant 0 : index
    %4 = vector.load %arg3[%c0_2, %c0_3] : memref<64x512xbf16, #tpu.memory_space<vmem>>, vector<64x512xbf16>
    %c0_4 = arith.constant 0 : index
    %c0_5 = arith.constant 0 : index
    %5 = vector.load %arg4[%c0_4, %c0_5] : memref<512x128xbf16, #tpu.memory_space<vmem>>, vector<512x128xbf16>
    %cst = arith.constant dense<0.000000e+00> : vector<64x128xf32>
    %6 = tpu.matmul %4, %5, %cst {dimension_numbers = #tpu.dot_dimension_numbers<[1], [0], [0], [1], [0, 0, 1, 1], [], []>} : vector<64x512xbf16>, vector<512x128xbf16>, vector<64x128xf32> -> vector<64x128xf32>
    %7 = arith.addf %3, %6 : vector<64x128xf32>
    %c0_6 = arith.constant 0 : index
    %c0_7 = arith.constant 0 : index
    %8 = vector.load %arg7[%c0_6, %c0_7] : memref<64x128xf32, #tpu.memory_space<vmem>>, vector<64x128xf32>
    tpu.vector_store %arg7[%c0_6, %c0_7], %7 {strides = array<i32>} : memref<64x128xf32, #tpu.memory_space<vmem>>, vector<64x128xf32>,
    %c0_i32_8 = arith.constant 0 : i32
    %9 = arith.cmpi eq, %arg2, %c0_i32_8 : i32
    %10 = arith.extui %9 : i1 to i32
    %c0_i32_9 = arith.constant 0 : i32
    %11 = arith.cmpi ne, %10, %c0_i32_9 : i32
    scf.if %11 {
      %c0_10 = arith.constant 0 : index
      %c0_11 = arith.constant 0 : index
      %12 = vector.load %arg7[%c0_10, %c0_11] : memref<64x128xf32, #tpu.memory_space<vmem>>, vector<64x128xf32>
      %c0_12 = arith.constant 0 : index
      %c0_13 = arith.constant 0 : index
      %13 = vector.load %arg5[%c0_12, %c0_13] : memref<1x128xbf16, #tpu.memory_space<vmem>>, vector<1x128xbf16>
      %14 = arith.extf %13 : vector<1x128xbf16> to vector<1x128xf32>
      %15 = vector.broadcast %14 : vector<1x128xf32> to vector<64x128xf32>
      %16 = arith.addf %12, %15 : vector<64x128xf32>
      %17 = arith.truncf %16 : vector<64x128xf32> to vector<64x128xbf16>
      %c0_14 = arith.constant 0 : index
      %c0_15 = arith.constant 0 : index
      %18 = vector.load %arg6[%c0_14, %c0_15] : memref<64x128xbf16, #tpu.memory_space<vmem>>, vector<64x128xbf16>
      tpu.vector_store %arg6[%c0_14, %c0_15], %17 {strides = array<i32>} : memref<64x128xbf16, #tpu.memory_space<vmem>>, vector<64x128xbf16>,
    } else {
    }
    return
  }
  func.func @transform_0(%arg0: i32, %arg1: i32, %arg2: i32) -> (i32, i32) {
    %c0_i32 = arith.constant 0 : i32
    return %arg0, %arg2 : i32, i32
  }
  func.func @transform_1(%arg0: i32, %arg1: i32, %arg2: i32) -> (i32, i32) {
    %c0_i32 = arith.constant 0 : i32
    return %arg2, %arg1 : i32, i32
  }
  func.func @transform_2(%arg0: i32, %arg1: i32, %arg2: i32) -> (i32, i32) {
    %c0_i32 = arith.constant 0 : i32
    %c0_i32_0 = arith.constant 0 : i32
    return %c0_i32, %arg1 : i32, i32
  }
  func.func @transform_3(%arg0: i32, %arg1: i32, %arg2: i32) -> (i32, i32) {
    %c0_i32 = arith.constant 0 : i32
    return %arg0, %arg1 : i32, i32
  }
}

module attributes {stable_mosaic.version = 11 : i64} {
  func.func @_layernorm_kernel(%arg0: i32, %arg1: memref<16x128xbf16, #tpu.memory_space<vmem>>, %arg2: memref<1x128xf32, #tpu.memory_space<vmem>>, %arg3: memref<1x128xf32, #tpu.memory_space<vmem>>, %arg4: memref<16x128xbf16, #tpu.memory_space<vmem>>) attributes {dimension_semantics = [#tpu.dimension_semantics<parallel>], iteration_bounds = array<i64: 1>, scalar_prefetch = 0 : i64, scratch_operands = 0 : i64, tpu.core_type = #tpu.core_type<tc>, window_params = [{transform_indices = @transform_0, window_bounds = array<i64: 16, 128>}, {pipeline_mode = #tpu.pipeline_mode<synchronous>, transform_indices = @transform_1, window_bounds = array<i64: 1, 128>}, {pipeline_mode = #tpu.pipeline_mode<synchronous>, transform_indices = @transform_2, window_bounds = array<i64: 1, 128>}, {transform_indices = @transform_3, window_bounds = array<i64: 16, 128>}]} {
    %c0 = arith.constant 0 : index
    %c0_0 = arith.constant 0 : index
    %0 = vector.load %arg1[%c0, %c0_0] : memref<16x128xbf16, #tpu.memory_space<vmem>>, vector<16x128xbf16>
    %1 = arith.extf %0 : vector<16x128xbf16> to vector<16x128xf32>
    %cst = arith.constant dense<0.000000e+00> : vector<16xf32>
    %2 = vector.multi_reduction <add>, %1, %cst [1] : vector<16x128xf32> to vector<16xf32>
    %3 = vector.shape_cast %2 : vector<16xf32> to vector<16x1xf32>
    %cst_1 = arith.constant 1.280000e+02 : f32
    %4 = vector.broadcast %cst_1 : f32 to vector<16x1xf32>
    %5 = arith.divf %3, %4 : vector<16x1xf32>
    %6 = vector.broadcast %5 : vector<16x1xf32> to vector<16x128xf32>
    %7 = arith.subf %1, %6 : vector<16x128xf32>
    %8 = arith.mulf %7, %7 : vector<16x128xf32>
    %cst_2 = arith.constant dense<0.000000e+00> : vector<16xf32>
    %9 = vector.multi_reduction <add>, %8, %cst_2 [1] : vector<16x128xf32> to vector<16xf32>
    %10 = vector.shape_cast %9 : vector<16xf32> to vector<16x1xf32>
    %cst_3 = arith.constant 1.280000e+02 : f32
    %11 = vector.broadcast %cst_3 : f32 to vector<16x1xf32>
    %12 = arith.divf %10, %11 : vector<16x1xf32>
    %13 = vector.broadcast %5 : vector<16x1xf32> to vector<16x128xf32>
    %14 = arith.subf %1, %13 : vector<16x128xf32>
    %cst_4 = arith.constant 9.99999974E-6 : f32
    %15 = vector.broadcast %cst_4 : f32 to vector<16x1xf32>
    %16 = arith.addf %12, %15 : vector<16x1xf32>
    %17 = math.rsqrt %16 : vector<16x1xf32>
    %18 = vector.broadcast %17 : vector<16x1xf32> to vector<16x128xf32>
    %19 = arith.mulf %14, %18 : vector<16x128xf32>
    %c0_5 = arith.constant 0 : index
    %c0_6 = arith.constant 0 : index
    %20 = vector.load %arg2[%c0_5, %c0_6] : memref<1x128xf32, #tpu.memory_space<vmem>>, vector<1x128xf32>
    %21 = vector.broadcast %20 : vector<1x128xf32> to vector<16x128xf32>
    %22 = arith.mulf %19, %21 : vector<16x128xf32>
    %c0_7 = arith.constant 0 : index
    %c0_8 = arith.constant 0 : index
    %23 = vector.load %arg3[%c0_7, %c0_8] : memref<1x128xf32, #tpu.memory_space<vmem>>, vector<1x128xf32>
    %24 = vector.broadcast %23 : vector<1x128xf32> to vector<16x128xf32>
    %25 = arith.addf %22, %24 : vector<16x128xf32>
    %26 = arith.truncf %25 : vector<16x128xf32> to vector<16x128xbf16>
    %c0_9 = arith.constant 0 : index
    %c0_10 = arith.constant 0 : index
    %27 = vector.load %arg4[%c0_9, %c0_10] : memref<16x128xbf16, #tpu.memory_space<vmem>>, vector<16x128xbf16>
    tpu.vector_store %arg4[%c0_9, %c0_10], %26 {strides = array<i32>} : memref<16x128xbf16, #tpu.memory_space<vmem>>, vector<16x128xbf16>,
    return
  }
  func.func @transform_0(%arg0: i32) -> (i32, i32) {
    %c0_i32 = arith.constant 0 : i32
    %c0_i32_0 = arith.constant 0 : i32
    return %arg0, %c0_i32 : i32, i32
  }
  func.func @transform_1(%arg0: i32) -> (i32, i32) {
    %c0_i32 = arith.constant 0 : i32
    %c0_i32_0 = arith.constant 0 : i32
    %c0_i32_1 = arith.constant 0 : i32
    return %c0_i32, %c0_i32_0 : i32, i32
  }
  func.func @transform_2(%arg0: i32) -> (i32, i32) {
    %c0_i32 = arith.constant 0 : i32
    %c0_i32_0 = arith.constant 0 : i32
    %c0_i32_1 = arith.constant 0 : i32
    return %c0_i32, %c0_i32_0 : i32, i32
  }
  func.func @transform_3(%arg0: i32) -> (i32, i32) {
    %c0_i32 = arith.constant 0 : i32
    %c0_i32_0 = arith.constant 0 : i32
    return %arg0, %c0_i32 : i32, i32
  }
}

module attributes {stable_mosaic.version = 11 : i64} {
  func.func @kernel(%arg0: i32, %arg1: i32, %arg2: i32, %arg3: memref<16x128xbf16, #tpu.memory_space<vmem>>, %arg4: memref<128x16xbf16, #tpu.memory_space<vmem>>, %arg5: memref<16x16xbf16, #tpu.memory_space<vmem>>, %arg6: memref<16x16xf32, #tpu.memory_space<vmem>>) attributes {dimension_semantics = [#tpu.dimension_semantics<parallel>, #tpu.dimension_semantics<parallel>, #tpu.dimension_semantics<arbitrary>], iteration_bounds = array<i64: 1, 1, 1>, scalar_prefetch = 0 : i64, scratch_operands = 1 : i64, tpu.core_type = #tpu.core_type<tc>, window_params = [{transform_indices = @transform_0, window_bounds = array<i64: 16, 128>}, {transform_indices = @transform_1, window_bounds = array<i64: 128, 16>}, {transform_indices = @transform_2, window_bounds = array<i64: 16, 16>}]} {
    %c0_i32 = arith.constant 0 : i32
    %0 = arith.cmpi eq, %arg2, %c0_i32 : i32
    %1 = arith.extui %0 : i1 to i32
    %c0_i32_0 = arith.constant 0 : i32
    %2 = arith.cmpi ne, %1, %c0_i32_0 : i32
    scf.if %2 {
      %cst_10 = arith.constant 0.000000e+00 : f32
      %12 = vector.broadcast %cst_10 : f32 to vector<16x16xf32>
      %c0_11 = arith.constant 0 : index
      %c0_12 = arith.constant 0 : index
      %13 = vector.load %arg6[%c0_11, %c0_12] : memref<16x16xf32, #tpu.memory_space<vmem>>, vector<16x16xf32>
      tpu.vector_store %arg6[%c0_11, %c0_12], %12 {strides = array<i32>} : memref<16x16xf32, #tpu.memory_space<vmem>>, vector<16x16xf32>,
    } else {
    }
    %c0 = arith.constant 0 : index
    %c0_1 = arith.constant 0 : index
    %3 = vector.load %arg6[%c0, %c0_1] : memref<16x16xf32, #tpu.memory_space<vmem>>, vector<16x16xf32>
    %c0_2 = arith.constant 0 : index
    %c0_3 = arith.constant 0 : index
    %4 = vector.load %arg3[%c0_2, %c0_3] : memref<16x128xbf16, #tpu.memory_space<vmem>>, vector<16x128xbf16>
    %c0_4 = arith.constant 0 : index
    %c0_5 = arith.constant 0 : index
    %5 = vector.load %arg4[%c0_4, %c0_5] : memref<128x16xbf16, #tpu.memory_space<vmem>>, vector<128x16xbf16>
    %cst = arith.constant dense<0.000000e+00> : vector<16x16xf32>
    %6 = tpu.matmul %4, %5, %cst {dimension_numbers = #tpu.dot_dimension_numbers<[1], [0], [0], [1], [0, 0, 1, 1], [], []>} : vector<16x128xbf16>, vector<128x16xbf16>, vector<16x16xf32> -> vector<16x16xf32>
    %7 = arith.addf %3, %6 : vector<16x16xf32>
    %c0_6 = arith.constant 0 : index
    %c0_7 = arith.constant 0 : index
    %8 = vector.load %arg6[%c0_6, %c0_7] : memref<16x16xf32, #tpu.memory_space<vmem>>, vector<16x16xf32>
    tpu.vector_store %arg6[%c0_6, %c0_7], %7 {strides = array<i32>} : memref<16x16xf32, #tpu.memory_space<vmem>>, vector<16x16xf32>,
    %c0_i32_8 = arith.constant 0 : i32
    %9 = arith.cmpi eq, %arg2, %c0_i32_8 : i32
    %10 = arith.extui %9 : i1 to i32
    %c0_i32_9 = arith.constant 0 : i32
    %11 = arith.cmpi ne, %10, %c0_i32_9 : i32
    scf.if %11 {
      %c0_10 = arith.constant 0 : index
      %c0_11 = arith.constant 0 : index
      %12 = vector.load %arg6[%c0_10, %c0_11] : memref<16x16xf32, #tpu.memory_space<vmem>>, vector<16x16xf32>
      %13 = arith.truncf %12 : vector<16x16xf32> to vector<16x16xbf16>
      %c0_12 = arith.constant 0 : index
      %c0_13 = arith.constant 0 : index
      %14 = vector.load %arg5[%c0_12, %c0_13] : memref<16x16xbf16, #tpu.memory_space<vmem>>, vector<16x16xbf16>
      tpu.vector_store %arg5[%c0_12, %c0_13], %13 {strides = array<i32>} : memref<16x16xbf16, #tpu.memory_space<vmem>>, vector<16x16xbf16>,
    } else {
    }
    return
  }
  func.func @transform_0(%arg0: i32, %arg1: i32, %arg2: i32) -> (i32, i32) {
    %c0_i32 = arith.constant 0 : i32
    return %arg0, %arg2 : i32, i32
  }
  func.func @transform_1(%arg0: i32, %arg1: i32, %arg2: i32) -> (i32, i32) {
    %c0_i32 = arith.constant 0 : i32
    return %arg2, %arg1 : i32, i32
  }
  func.func @transform_2(%arg0: i32, %arg1: i32, %arg2: i32) -> (i32, i32) {
    %c0_i32 = arith.constant 0 : i32
    return %arg0, %arg1 : i32, i32
  }
}

</mosaic_0001>

<bundles_post_ra>
// kernel: vision_transformer_forward.22
= control target key start
LH: loop header
LB: loop body
LE: loop exit
PB: predicated region body
PF: predicated region fallthrough
CT: control target
= control target key end

     0   :  { %vm62_vm0 = vcmask 392192   ;;  %s192_s1 = inlined_call_operand.vmem [shape: bf16[48,128], index: 1, kind: input, shape index: {}]   ;;  %s193_s0 = inlined_call_operand.vmem [shape: bf16[32,48], index: 0, kind: input, shape index: {}]   ;;  %s194_s2 = inlined_call_operand.vmem [shape: bf16[32,128], index: 2, kind: output, shape index: {}]  }
   0x1   :  { %v141_v0 = vld [vmem:[%s192_s1 + $0x10] sm:$0xff]  ;;  %v140_v1 = vld [vmem:[%s192_s1 + $0x8] sm:$0xff]  ;;  %v139_v2 = vld [vmem:[%s192_s1] sm:$0xff] }
   0x2   :  { %74 = vmatpush.bf16.msra.mxu0 %v141_v0  ;;  %153 = vmatpush.bf16.msra.mxu1 %v141_v0  ;;  %v137_v3 = vld [vmem:[%s193_s0] sm:$0xff]  ;;  %v138_v4 = vld [vmem:[%s193_s0 + $0x8] sm:$0xff] }
   0x6   :  { %75 = vmatpush.bf16.msra.mxu0 %v140_v1  ;;  %154 = vmatpush.bf16.msra.mxu1 %v140_v1 }
   0xa   :  { %76 = vmatpush.bf16.msra.mxu0 %v139_v2  ;;  %155 = vmatpush.bf16.msra.mxu1 %v139_v2 }
   0xd   :  { %135 = vmatmul.msk.bf16.vlgmr.msra.gmra.mxu0 %vm62_vm0, %v137_v3  ;;  %136 = vmatmul.msk.bf16.vlgmr.msra.gmra.mxu1 %vm62_vm0, %v138_v4 }
  0x8a   :  { %v78_v5 = vpop.f32.mrf.mxu0  ;;  %v83_v6 = vpop.f32.mrf.mxu1 }
  0x92   :  { %v80_v7 = vpop.f32.mrf.mxu0  ;;  %v85_v8 = vpop.f32.mrf.mxu1 }
  0x93   :  { %v145_v9 = vpack.c.bf16 %v80_v7, %v78_v5  ;;  %v150_v10 = vpack.c.bf16 %v85_v8, %v83_v6 }
  0x95   :  { %146 = vst [vmem:[%s194_s2] sm:$0xff] %v145_v9  }
  0x96   :  { %152 = vst [vmem:[%s194_s2 + $0x8] sm:$0xff] %v150_v10  }

// kernel: vision_transformer_forward.23
= control target key start
LH: loop header
LB: loop body
LE: loop exit
PB: predicated region body
PF: predicated region fallthrough
CT: control target
= control target key end

     0   :  { %v304_v12 = vmov 128.0   ;;  %s491_s0 = inlined_call_operand.vmem [shape: bf16[64,128], index: 0, kind: input, shape index: {}]   ;;  %s492_s1 = inlined_call_operand.vmem [shape: f32[1,128], index: 1, kind: input, shape index: {}]   ;;  %s493_s2 = inlined_call_operand.vmem [shape: f32[1,128], index: 2, kind: input, shape index: {}]   ;;  %s494_s3 = inlined_call_operand.vmem [shape: bf16[64,128], index: 3, kind: output, shape index: {}]  }
   0x1   :  { %v278_v0 = vld [vmem:[%s491_s0 + $0x10] sm:$0xff]   ;;  %v277_v1 = vld [vmem:[%s491_s0 + $0x8] sm:$0xff]   ;;  %v242_v2 = vld [vmem:[%s491_s0] sm:$0xff]   ;;  %286 = vrcp.f32 %v304_v12 }
   0x2   :  { %v251_v3 = vunpack.c.l.bf16 %v278_v0  ;;  %v247_v4 = vunpack.c.l.bf16 %v277_v1  ;;  %v243_v5 = vunpack.c.l.bf16 %v242_v2  ;;  %v252_v6 = vunpack.c.h.bf16 %v278_v0  ;;  %v279_v9 = vld [vmem:[%s491_s0 + $0x18] sm:$0xff]  }
   0x3   :  { %v248_v7 = vunpack.c.h.bf16 %v277_v1  ;;  %v244_v8 = vunpack.c.h.bf16 %v242_v2  ;;  %v256_v10 = vunpack.c.h.bf16 %v279_v9  ;;  %v255_v11 = vunpack.c.l.bf16 %v279_v9 }
   0x4   :  { %38 = vadd.xlane.f32.xlu2 %v251_v3  ;;  %34 = vadd.xlane.f32.xlu1 %v247_v4 }
   0x5   :  { %30 = vadd.xlane.f32.xlu0 %v243_v5 }
   0x7   :  { %v287_v13 = vpop.eup %286 }
   0x8   :  { %v47_v14 = vmul.f32 128.0, %v287_v13  ;;  %vm51_vm0 = vweird.f32 %v287_v13 }
   0xa   :  { %v48_v15 = vsub.f32 1.0, %v47_v14 }
   0xc   :  { %40 = vadd.xlane.f32.xlu2 %v252_v6  ;;  %36 = vadd.xlane.f32.xlu1 %v248_v7  ;;  %v49_v16 = vmul.f32 %v287_v13, %v48_v15 }
   0xd   :  { %32 = vadd.xlane.f32.xlu0 %v244_v8 }
   0xe   :  { %v50_v17 = vadd.f32 %v287_v13, %v49_v16 }
  0x10   :  { %v337_v18 = vsel %vm51_vm0, %v287_v13, %v50_v17 }
  0x14   :  { %44 = vadd.xlane.f32.xlu1 %v256_v10 }
  0x15   :  { %42 = vadd.xlane.f32.xlu0 %v255_v11 }
  0x77   :  { %v39_v19 = vpop.xlane.xlu2 %38  ;;  %v35_v20 = vpop.xlane.xlu1 %34 }
  0x78   :  { %v55_v21 = vmul.f32 %v337_v18, %v35_v20  ;;  %v31_v22 = vpop.xlane.xlu0 %30  ;;  %v57_v36 = vmul.f32 %v337_v18, %v39_v19 }
  0x79   :  { %v53_v23 = vmul.f32 %v337_v18, %v31_v22 }
  0x7a   :  { %v341_v24 = vsub.f32 %v247_v4, %v55_v21  ;;  %v365_v41 = vsub.f32 %v251_v3, %v57_v36 }
  0x7b   :  { %v343_v25 = vsub.f32 %v243_v5, %v53_v23 }
  0x7c   :  { %v71_v26 = vmul.f32 %v341_v24, %v341_v24  ;;  %v73_v46 = vmul.f32 %v365_v41, %v365_v41 }
  0x7d   :  { %v69_v27 = vmul.f32 %v343_v25, %v343_v25 }
  0x7e   :  { %81 = vadd.xlane.f32.xlu1 %v71_v26 }
  0x7f   :  { %77 = vadd.xlane.f32.xlu2 %v69_v27  ;;  %v41_v28 = vpop.xlane.xlu2 %40  ;;  %v37_v29 = vpop.xlane.xlu1 %36 }
  0x80   :  { %v58_v30 = vmul.f32 %v337_v18, %v41_v28  ;;  %v56_v31 = vmul.f32 %v337_v18, %v37_v29  ;;  %v33_v32 = vpop.xlane.xlu0 %32 }
  0x81   :  { %v54_v33 = vmul.f32 %v337_v18, %v33_v32 }
  0x82   :  { %v352_v34 = vsub.f32 %v252_v6, %v58_v30  ;;  %v354_v35 = vsub.f32 %v248_v7, %v56_v31 }
  0x83   :  { %v357_v37 = vsub.f32 %v244_v8, %v54_v33 }
  0x84   :  { %v74_v38 = vmul.f32 %v352_v34, %v352_v34  ;;  %v72_v39 = vmul.f32 %v354_v35, %v354_v35 }
  0x85   :  { %v70_v40 = vmul.f32 %v357_v37, %v357_v37 }
  0x86   :  { %87 = vadd.xlane.f32.xlu1 %v74_v38 }
  0x87   :  { %83 = vadd.xlane.f32.xlu2 %v72_v39  ;;  %79 = vadd.xlane.f32.xlu0 %v70_v40  ;;  %v45_v43 = vpop.xlane.xlu1 %44 }
  0x88   :  { %v43_v42 = vpop.xlane.xlu0 %42  ;;  %v60_v47 = vmul.f32 %v337_v18, %v45_v43 }
  0x89   :  { %v59_v44 = vmul.f32 %v337_v18, %v43_v42 }
  0x8a   :  { %v375_v49 = vsub.f32 %v256_v10, %v60_v47 }
  0x8b   :  { %v368_v45 = vsub.f32 %v255_v11, %v59_v44 }
  0x8c   :  { %v76_v50 = vmul.f32 %v375_v49, %v375_v49 }
  0x8d   :  { %v75_v48 = vmul.f32 %v368_v45, %v368_v45 }
  0x8f   :  { %85 = vadd.xlane.f32.xlu0 %v73_v46  ;;  %89 = vadd.xlane.f32.xlu2 %v75_v48  ;;  %v420_v46 = vld [vmem:[%s492_s1] ss:$0 sm:$0xff] }
  0x97   :  { %91 = vadd.xlane.f32.xlu0 %v76_v50 }
  0xf1   :  { %v82_v51 = vpop.xlane.xlu1 %81 }
  0xf2   :  { %v95_v52 = vmul.f32 %v82_v51, %v337_v18  ;;  %v78_v53 = vpop.xlane.xlu2 %77 }
  0xf3   :  { %v93_v54 = vmul.f32 %v78_v53, %v337_v18 }
  0xf4   :  { %v103_v55 = vadd.f32 1e-05, %v95_v52 }
  0xf5   :  { %v101_v56 = vadd.f32 1e-05, %v93_v54 }
  0xf6   :  { %288 = vrsqrt.f32 %v103_v55  ;;  %vm135_vm1 = vweird.f32 %v103_v55 }
  0xf7   :  { %290 = vrsqrt.f32 %v101_v56  ;;  %vm115_vm5 = vweird.f32 %v101_v56 }
  0xf9   :  { %v88_v57 = vpop.xlane.xlu1 %87 }
  0xfa   :  { %v98_v58 = vmul.f32 %v88_v57, %v337_v18  ;;  %v84_v59 = vpop.xlane.xlu2 %83  ;;  %v80_v60 = vpop.xlane.xlu0 %79  ;;  %v434_v57 = vld [vmem:[%s493_s2] ss:$0 sm:$0xff] }
  0xfb   :  { %v96_v61 = vmul.f32 %v84_v59, %v337_v18  ;;  %v94_v62 = vmul.f32 %v80_v60, %v337_v18 }
  0xfc   :  { %v289_v63 = vpop.eup %288  ;;  %v384_v0 = vadd.f32 1e-05, %v98_v58 }
  0xfd   :  { %v291_v1 = vpop.eup %290  ;;  %v130_v2 = vmul.f32 %v289_v63, %v103_v55  ;;  %v104_v3 = vadd.f32 1e-05, %v96_v61  ;;  %v386_v4 = vadd.f32 1e-05, %v94_v62  ;;  %vm136_vm2 = vweird.f32 %v289_v63 }
  0xfe   :  { %v110_v5 = vmul.f32 %v291_v1, %v101_v56  ;;  %292 = vrsqrt.f32 %v384_v0  ;;  %vm116_vm3 = vweird.f32 %v291_v1  ;;  %vm402_vm4 = vmor %vm135_vm1, %vm136_vm2  ;;  %vm165_vm10 = vweird.f32 %v384_v0 }
  0xff   :  { %v131_v6 = vmul.f32 %v289_v63, %v130_v2  ;;  %294 = vrsqrt.f32 %v104_v3  ;;  %vm409_vm6 = vmor %vm115_vm5, %vm116_vm3  ;;  %vm145_vm7 = vweird.f32 %v104_v3  ;;  %vm125_vm13 = vweird.f32 %v386_v4 }
 0x100   :  { %v111_v7 = vmul.f32 %v291_v1, %v110_v5  ;;  %296 = vrsqrt.f32 %v386_v4 }
 0x101   :  { %v132_v8 = vmul.f32 0.5, %v131_v6 }
 0x102   :  { %v112_v9 = vmul.f32 0.5, %v111_v7  ;;  %v90_v10 = vpop.xlane.xlu2 %89  ;;  %v86_v11 = vpop.xlane.xlu0 %85 }
 0x103   :  { %v133_v12 = vsub.f32 1.5, %v132_v8  ;;  %v99_v13 = vmul.f32 %v90_v10, %v337_v18  ;;  %v97_v14 = vmul.f32 %v86_v11, %v337_v18 }
 0x104   :  { %v392_v15 = vpop.eup %292  ;;  %v113_v16 = vsub.f32 1.5, %v112_v9 }
 0x105   :  { %v295_v17 = vpop.eup %294  ;;  %v134_v19 = vmul.f32 %v289_v63, %v133_v12  ;;  %v160_v20 = vmul.f32 %v392_v15, %v384_v0  ;;  %v396_v21 = vadd.f32 1e-05, %v99_v13  ;;  %v398_v26 = vadd.f32 1e-05, %v97_v14 }
 0x106   :  { %v297_v22 = vpop.eup %296  ;;  %v140_v23 = vmul.f32 %v295_v17, %v104_v3  ;;  %v114_v27 = vmul.f32 %v291_v1, %v113_v16  ;;  %vm146_vm8 = vweird.f32 %v295_v17  ;;  %vm166_vm11 = vweird.f32 %v392_v15 }
 0x107   :  { %v161_v28 = vmul.f32 %v392_v15, %v160_v20  ;;  %v120_v29 = vmul.f32 %v297_v22, %v386_v4  ;;  %298 = vrsqrt.f32 %v396_v21  ;;  %v138_v32 = vsel %vm402_vm4, %v289_v63, %v134_v19  ;;  %vm147_vm12 = vmor %vm145_vm7, %vm146_vm8 }
 0x108   :  { %v141_v31 = vmul.f32 %v295_v17, %v140_v23  ;;  %300 = vrsqrt.f32 %v398_v26  ;;  %v118_v42 = vsel %vm409_vm6, %v291_v1, %v114_v27  ;;  %v191_v47 = vmul.f32 %v138_v32, %v341_v24  ;;  %vm447_vm15 = vmor %vm165_vm10, %vm166_vm11 }
 0x109   :  { %v162_v33 = vmul.f32 0.5, %v161_v28  ;;  %v121_v36 = vmul.f32 %v297_v22, %v120_v29  ;;  %vm126_vm9 = vweird.f32 %v297_v22  ;;  %v189_v54 = vmul.f32 %v118_v42, %v343_v25 }
 0x10a   :  { %v142_v39 = vmul.f32 0.5, %v141_v31  ;;  %v92_v40 = vpop.xlane.xlu0 %91  ;;  %v203_v25 = vmul.f32 %v420_v46, %v191_v47  ;;  %vm127_vm14 = vmor %vm125_vm13, %vm126_vm9  ;;  %vm175_vm0 = vweird.f32 %v396_v21  ;;  %vm155_vm4 = vweird.f32 %v398_v26 }
 0x10b   :  { %v122_v43 = vmul.f32 0.5, %v121_v36  ;;  %v100_v44 = vmul.f32 %v92_v40, %v337_v18  ;;  %v163_v48 = vsub.f32 1.5, %v162_v33  ;;  %v201_v1 = vmul.f32 %v420_v46, %v189_v54 }
 0x10c   :  { %v143_v50 = vsub.f32 1.5, %v142_v39  ;;  %v215_v6 = vadd.f32 %v434_v57, %v203_v25 }
 0x10d   :  { %v123_v51 = vsub.f32 1.5, %v122_v43  ;;  %v423_v52 = vadd.f32 1e-05, %v100_v44  ;;  %v299_v53 = vpop.eup %298  ;;  %v164_v58 = vmul.f32 %v392_v15, %v163_v48 }
 0x10e   :  { %v144_v18 = vmul.f32 %v295_v17, %v143_v50  ;;  %v170_v24 = vmul.f32 %v299_v53, %v396_v21  ;;  %v301_v56 = vpop.eup %300  ;;  %vm176_vm1 = vweird.f32 %v299_v53 }
 0x10f   :  { %v124_v55 = vmul.f32 %v297_v22, %v123_v51  ;;  %302 = vrsqrt.f32 %v423_v52  ;;  %v150_v63 = vmul.f32 %v301_v56, %v398_v26  ;;  %v168_v0 = vsel %vm447_vm15, %v392_v15, %v164_v58  ;;  %vm177_vm3 = vmor %vm175_vm0, %vm176_vm1 }
 0x110   :  { %v148_v59 = vsel %vm147_vm12, %v295_v17, %v144_v18  ;;  %v171_v62 = vmul.f32 %v299_v53, %v170_v24  ;;  %vm156_vm2 = vweird.f32 %v301_v56  ;;  %v194_v19 = vmul.f32 %v168_v0, %v352_v34 }
 0x111   :  { %v192_v60 = vmul.f32 %v148_v59, %v354_v35  ;;  %v128_v61 = vsel %vm127_vm14, %v297_v22, %v124_v55  ;;  %v151_v35 = vmul.f32 %v301_v56, %v150_v63  ;;  %vm157_vm5 = vmor %vm155_vm4, %vm156_vm2  ;;  %vm185_vm7 = vweird.f32 %v423_v52 }
 0x112   :  { %v190_v3 = vmul.f32 %v128_v61, %v357_v37  ;;  %v172_v5 = vmul.f32 0.5, %v171_v62  ;;  %v213_v37 = vadd.f32 %v434_v57, %v201_v1  ;;  %v206_v28 = vmul.f32 %v420_v46, %v194_v19 }
 0x113   :  { %v204_v4 = vmul.f32 %v420_v46, %v192_v60  ;;  %v152_v10 = vmul.f32 0.5, %v151_v35 }
 0x114   :  { %v202_v7 = vmul.f32 %v420_v46, %v190_v3  ;;  %v173_v9 = vsub.f32 1.5, %v172_v5  ;;  %v218_v32 = vadd.f32 %v434_v57, %v206_v28 }
 0x115   :  { %v216_v8 = vadd.f32 %v434_v57, %v204_v4  ;;  %v303_v11 = vpop.eup %302  ;;  %v153_v16 = vsub.f32 1.5, %v152_v10 }
 0x116   :  { %v214_v12 = vadd.f32 %v434_v57, %v202_v7  ;;  %v174_v14 = vmul.f32 %v299_v53, %v173_v9  ;;  %v180_v17 = vmul.f32 %v303_v11, %v423_v52  ;;  %vm186_vm6 = vweird.f32 %v303_v11 }
 0x117   :  { %v265_v13 = vpack.c.bf16 %v216_v8, %v215_v6  ;;  %v154_v15 = vmul.f32 %v301_v56, %v153_v16  ;;  %vm187_vm8 = vmor %vm185_vm7, %vm186_vm6 }
 0x118   :  { %v260_v20 = vpack.c.bf16 %v214_v12, %v213_v37  ;;  %v181_v22 = vmul.f32 %v303_v11, %v180_v17  ;;  %v178_v23 = vsel %vm177_vm3, %v299_v53, %v174_v14 }
 0x119   :  { %280 = vst [vmem:[%s494_s3 + $0x8] sm:$0xff] %v265_v13   ;;  %v158_v27 = vsel %vm157_vm5, %v301_v56, %v154_v15  ;;  %v195_v21 = vmul.f32 %v178_v23, %v368_v45 }
 0x11a   :  { %261 = vst [vmem:[%s494_s3] sm:$0xff] %v260_v20   ;;  %v182_v34 = vmul.f32 0.5, %v181_v22  ;;  %v193_v29 = vmul.f32 %v158_v27, %v365_v41 }
 0x11b   :  { %v207_v38 = vmul.f32 %v420_v46, %v195_v21 }
 0x11c   :  { %v183_v30 = vsub.f32 1.5, %v182_v34  ;;  %v205_v31 = vmul.f32 %v420_v46, %v193_v29 }
 0x11d   :  { %v219_v40 = vadd.f32 %v434_v57, %v207_v38 }
 0x11e   :  { %v184_v26 = vmul.f32 %v303_v11, %v183_v30  ;;  %v217_v33 = vadd.f32 %v434_v57, %v205_v31 }
 0x120   :  { %v188_v36 = vsel %vm187_vm8, %v303_v11, %v184_v26  ;;  %v270_v39 = vpack.c.bf16 %v218_v32, %v217_v33 }
 0x121   :  { %v196_v41 = vmul.f32 %v188_v36, %v375_v49 }
 0x122   :  { %281 = vst [vmem:[%s494_s3 + $0x10] sm:$0xff] %v270_v39  }
 0x123   :  { %v208_v45 = vmul.f32 %v420_v46, %v196_v41 }
 0x125   :  { %v220_v42 = vadd.f32 %v434_v57, %v208_v45 }
 0x127   :  { %v275_v43 = vpack.c.bf16 %v220_v42, %v219_v40 }
 0x129   :  { %282 = vst [vmem:[%s494_s3 + $0x18] sm:$0xff] %v275_v43  }

// kernel: vision_transformer_forward.24
= control target key start
LH: loop header
LB: loop body
LE: loop exit
PB: predicated region body
PF: predicated region fallthrough
CT: control target
= control target key end

     0   :  { %v785_v11 = vmov 128.0   ;;  %s1161_s0 = inlined_call_operand.vmem [shape: bf16[64,128], index: 0, kind: input, shape index: {}]   ;;  %s1162_s1 = inlined_call_operand.vmem [shape: f32[1,128], index: 1, kind: input, shape index: {}]   ;;  %s1163_s2 = inlined_call_operand.vmem [shape: f32[1,128], index: 2, kind: input, shape index: {}]   ;;  %s1164_s3 = inlined_call_operand.vmem [shape: bf16[128,384], index: 3, kind: input, shape index: {}]   ;;  %s1165_s4 = inlined_call_operand.vmem [shape: bf16[1,384], index: 4, kind: input, shape index: {}]   ;;  %s1166_s5 = inlined_call_operand.vmem [shape: bf16[64,384], index: 5, kind: output, shape index: {}]  }
   0x1   :  { %v751_v0 = vld [vmem:[%s1161_s0 + $0x10] sm:$0xff]   ;;  %v750_v1 = vld [vmem:[%s1161_s0 + $0x8] sm:$0xff]   ;;  %v715_v2 = vld [vmem:[%s1161_s0] sm:$0xff]   ;;  %767 = vrcp.f32 %v785_v11 }
   0x2   :  { %v724_v3 = vunpack.c.l.bf16 %v751_v0  ;;  %v720_v4 = vunpack.c.l.bf16 %v750_v1  ;;  %v716_v5 = vunpack.c.l.bf16 %v715_v2  ;;  %v725_v6 = vunpack.c.h.bf16 %v751_v0  ;;  %v828_v9 = vld [vmem:[%s1161_s0 + $0x18] sm:$0xff]   ;;  %v676_v47 = vld [vmem:[%s1164_s3 + $0xa8] sm:$0xf]  ;;  %v712_v48 = vld [vmem:[%s1164_s3 + $0xb0] sm:$0xf0] }
   0x3   :  { %v721_v7 = vunpack.c.h.bf16 %v750_v1  ;;  %v717_v8 = vunpack.c.h.bf16 %v715_v2  ;;  %v728_v10 = vunpack.c.l.bf16 %v828_v9  ;;  %v729_v33 = vunpack.c.h.bf16 %v828_v9  ;;  %v711_v49 = vld [vmem:[%s1164_s3 + $0xac] sm:$0xf]  ;;  %v678_v51 = vld [vmem:[%s1164_s3 + $0xb4] sm:$0xf0]  ;;  %v684_v52 = vld [vmem:[%s1164_s3 + $0xb0] sm:$0xf] }
   0x4   :  { %48 = vadd.xlane.f32.xlu2 %v724_v3  ;;  %44 = vadd.xlane.f32.xlu1 %v720_v4  ;;  %v677_v50 = vor.u32 %v712_v48, %v676_v47  ;;  %v713_v53 = vld [vmem:[%s1164_s3 + $0xb8] sm:$0xf0]  ;;  %v681_v54 = vor.u32 %v711_v49, %v678_v51  ;;  %v664_v56 = vld [vmem:[%s1164_s3 + $0x90] sm:$0xf]  ;;  %v708_v58 = vld [vmem:[%s1164_s3 + $0x94] sm:$0xf] }
   0x5   :  { %40 = vadd.xlane.f32.xlu0 %v716_v5  ;;  %v685_v55 = vor.u32 %v713_v53, %v684_v52  ;;  %v709_v57 = vld [vmem:[%s1164_s3 + $0x98] sm:$0xf0]  ;;  %v666_v60 = vld [vmem:[%s1164_s3 + $0x9c] sm:$0xf0]  ;;  %v672_v61 = vld [vmem:[%s1164_s3 + $0x98] sm:$0xf] }
   0x6   :  { %451 = vmatpush.bf16.msra.mxu0 %v677_v50  ;;  %756 = vmatpush.bf16.msra.mxu3 %v677_v50  ;;  %v665_v59 = vor.u32 %v709_v57, %v664_v56  ;;  %v710_v62 = vld [vmem:[%s1164_s3 + $0xa0] sm:$0xf0]  ;;  %v669_v63 = vor.u32 %v708_v58, %v666_v60  ;;  %v652_v1 = vld [vmem:[%s1164_s3 + $0x78] sm:$0xf]  ;;  %v640_v11 = vld [vmem:[%s1164_s3 + $0x60] sm:$0xf] }
   0x7   :  { %v768_v12 = vpop.eup %767  ;;  %480 = vmatpush.bf16.msra.mxu1 %v681_v54  ;;  %509 = vmatpush.bf16.msra.mxu2 %v685_v55  ;;  %v673_v0 = vor.u32 %v710_v62, %v672_v61  ;;  %v706_v2 = vld [vmem:[%s1164_s3 + $0x80] sm:$0xf0]  ;;  %v604_v51 = vld [vmem:[%s1164_s3 + $0x18] sm:$0xf]  ;;  %v693_v53 = vld [vmem:[%s1164_s3 + $0x1c] sm:$0xf] }
   0x8   :  { %v57_v13 = vmul.f32 128.0, %v768_v12  ;;  %vm61_vm0 = vweird.f32 %v768_v12  ;;  %v698_v48 = vld [vmem:[%s1164_s3 + $0x40] sm:$0xf0]  ;;  %v606_v58 = vld [vmem:[%s1164_s3 + $0x24] sm:$0xf0] }
   0x9   :  { %v694_v52 = vld [vmem:[%s1164_s3 + $0x20] sm:$0xf0]  ;;  %v695_v60 = vld [vmem:[%s1164_s3 + $0x28] sm:$0xf0] }
   0xa   :  { %v58_v14 = vsub.f32 1.0, %v57_v13  ;;  %452 = vmatpush.bf16.msra.mxu0 %v665_v59  ;;  %757 = vmatpush.bf16.msra.mxu3 %v665_v59  ;;  %v702_v13 = vld [vmem:[%s1164_s3 + $0x64] sm:$0xf]  ;;  %v605_v57 = vor.u32 %v694_v52, %v604_v51  ;;  %v612_v59 = vld [vmem:[%s1164_s3 + $0x20] sm:$0xf] }
   0xb   :  { %481 = vmatpush.bf16.msra.mxu1 %v669_v63  ;;  %510 = vmatpush.bf16.msra.mxu2 %v673_v0  ;;  %v609_v63 = vor.u32 %v693_v53, %v606_v58  ;;  %v613_v0 = vor.u32 %v695_v60, %v612_v59  ;;  %v690_v9 = vld [vmem:[%s1164_s3 + $0x4] sm:$0xf] }
   0xc   :  { %50 = vadd.xlane.f32.xlu2 %v725_v6  ;;  %46 = vadd.xlane.f32.xlu1 %v721_v7  ;;  %v59_v15 = vmul.f32 %v768_v12, %v58_v14 }
   0xd   :  { %42 = vadd.xlane.f32.xlu0 %v717_v8 }
   0xe   :  { %v60_v16 = vadd.f32 %v768_v12, %v59_v15  ;;  %v642_v15 = vld [vmem:[%s1164_s3 + $0x6c] sm:$0xf0] }
  0x10   :  { %v831_v17 = vsel %vm61_vm0, %v768_v12, %v60_v16  ;;  %v703_v12 = vld [vmem:[%s1164_s3 + $0x68] sm:$0xf0]  ;;  %v648_v16 = vld [vmem:[%s1164_s3 + $0x68] sm:$0xf] }
  0x11   :  { %v641_v14 = vor.u32 %v703_v12, %v640_v11  ;;  %v692_v12 = vld [vmem:[%s1164_s3 + $0x10] sm:$0xf0] }
  0x14   :  { %52 = vadd.xlane.f32.xlu2 %v728_v10 }
  0x77   :  { %v49_v18 = vpop.xlane.xlu2 %48  ;;  %v45_v19 = vpop.xlane.xlu1 %44 }
  0x78   :  { %v41_v20 = vpop.xlane.xlu0 %40  ;;  %v67_v30 = vmul.f32 %v831_v17, %v49_v18  ;;  %v65_v31 = vmul.f32 %v831_v17, %v45_v19  ;;  %v704_v18 = vld [vmem:[%s1164_s3 + $0x70] sm:$0xf0]  ;;  %v645_v19 = vor.u32 %v702_v13, %v642_v15 }
  0x79   :  { %v63_v21 = vmul.f32 %v831_v17, %v41_v20  ;;  %v649_v20 = vor.u32 %v704_v18, %v648_v16 }
  0x7a   :  { %v851_v36 = vsub.f32 %v724_v3, %v67_v30  ;;  %v853_v37 = vsub.f32 %v720_v4, %v65_v31  ;;  %v705_v3 = vld [vmem:[%s1164_s3 + $0x7c] sm:$0xf]  ;;  %v653_v4 = vor.u32 %v706_v2, %v652_v1 }
  0x7b   :  { %v834_v22 = vsub.f32 %v716_v5, %v63_v21  ;;  %v654_v5 = vld [vmem:[%s1164_s3 + $0x84] sm:$0xf0]  ;;  %v701_v30 = vld [vmem:[%s1164_s3 + $0x58] sm:$0xf0] }
  0x7c   :  { %v83_v42 = vmul.f32 %v851_v36, %v851_v36  ;;  %v81_v43 = vmul.f32 %v853_v37, %v853_v37  ;;  %453 = vmatpush.bf16.msra.mxu0 %v653_v4  ;;  %758 = vmatpush.bf16.msra.mxu3 %v653_v4  ;;  %v628_v21 = vld [vmem:[%s1164_s3 + $0x48] sm:$0xf] }
  0x7d   :  { %v79_v23 = vmul.f32 %v834_v22, %v834_v22 }
  0x7f   :  { %87 = vadd.xlane.f32.xlu0 %v79_v23  ;;  %v51_v24 = vpop.xlane.xlu2 %50  ;;  %v47_v25 = vpop.xlane.xlu1 %46  ;;  %v700_v23 = vld [vmem:[%s1164_s3 + $0x50] sm:$0xf0] }
  0x80   :  { %v66_v26 = vmul.f32 %v831_v17, %v47_v25  ;;  %v43_v27 = vpop.xlane.xlu0 %42  ;;  %v68_v41 = vmul.f32 %v831_v17, %v51_v24  ;;  %454 = vmatpush.bf16.msra.mxu0 %v641_v14  ;;  %759 = vmatpush.bf16.msra.mxu3 %v641_v14  ;;  %v699_v24 = vld [vmem:[%s1164_s3 + $0x4c] sm:$0xf] }
  0x81   :  { %v64_v28 = vmul.f32 %v831_v17, %v43_v27  ;;  %v630_v27 = vld [vmem:[%s1164_s3 + $0x54] sm:$0xf0] }
  0x82   :  { %v840_v29 = vsub.f32 %v721_v7, %v66_v26  ;;  %v867_v45 = vsub.f32 %v725_v6, %v68_v41  ;;  %v660_v6 = vld [vmem:[%s1164_s3 + $0x80] sm:$0xf]  ;;  %v707_v7 = vld [vmem:[%s1164_s3 + $0x88] sm:$0xf0]  ;;  %v629_v26 = vor.u32 %v700_v23, %v628_v21  ;;  %v697_v41 = vld [vmem:[%s1164_s3 + $0x38] sm:$0xf0] }
  0x83   :  { %v844_v32 = vsub.f32 %v717_v8, %v64_v28  ;;  %v657_v8 = vor.u32 %v705_v3, %v654_v5  ;;  %v636_v28 = vld [vmem:[%s1164_s3 + $0x50] sm:$0xf]  ;;  %v592_v5 = vld [vmem:[%s1164_s3] sm:$0xf] }
  0x84   :  { %v82_v34 = vmul.f32 %v840_v29, %v840_v29  ;;  %v84_v46 = vmul.f32 %v867_v45, %v867_v45  ;;  %455 = vmatpush.bf16.msra.mxu0 %v629_v26  ;;  %760 = vmatpush.bf16.msra.mxu3 %v629_v26 }
  0x85   :  { %v80_v35 = vmul.f32 %v844_v32, %v844_v32  ;;  %482 = vmatpush.bf16.msra.mxu1 %v657_v8  ;;  %v600_v8 = vld [vmem:[%s1164_s3 + $0x8] sm:$0xf] }
  0x86   :  { %93 = vadd.xlane.f32.xlu2 %v82_v34  ;;  %v633_v34 = vor.u32 %v699_v24, %v630_v27  ;;  %v601_v15 = vor.u32 %v692_v12, %v600_v8 }
  0x87   :  { %54 = vadd.xlane.f32.xlu0 %v729_v33  ;;  %89 = vadd.xlane.f32.xlu1 %v80_v35  ;;  %v53_v38 = vpop.xlane.xlu2 %52  ;;  %v637_v35 = vor.u32 %v701_v30, %v636_v28 }
  0x88   :  { %v69_v39 = vmul.f32 %v831_v17, %v53_v38 }
  0x89   :  { %483 = vmatpush.bf16.msra.mxu1 %v645_v19 }
  0x8a   :  { %v858_v40 = vsub.f32 %v728_v10, %v69_v39  ;;  %v661_v10 = vor.u32 %v707_v7, %v660_v6  ;;  %v616_v39 = vld [vmem:[%s1164_s3 + $0x30] sm:$0xf]  ;;  %v691_v6 = vld [vmem:[%s1164_s3 + $0x8] sm:$0xf0] }
  0x8b   :  { %v593_v11 = vor.u32 %v691_v6, %v592_v5 }
  0x8c   :  { %v85_v44 = vmul.f32 %v858_v40, %v858_v40  ;;  %511 = vmatpush.bf16.msra.mxu2 %v661_v10 }
  0x8d   :  { %484 = vmatpush.bf16.msra.mxu1 %v633_v34 }
  0x8e   :  { %99 = vadd.xlane.f32.xlu2 %v85_v44  ;;  %v618_v44 = vld [vmem:[%s1164_s3 + $0x3c] sm:$0xf0] }
  0x8f   :  { %95 = vadd.xlane.f32.xlu0 %v83_v42  ;;  %91 = vadd.xlane.f32.xlu1 %v81_v43  ;;  %v617_v42 = vor.u32 %v697_v41, %v616_v39  ;;  %v696_v43 = vld [vmem:[%s1164_s3 + $0x34] sm:$0xf] }
  0x90   :  { %512 = vmatpush.bf16.msra.mxu2 %v649_v20  ;;  %v621_v47 = vor.u32 %v696_v43, %v618_v44 }
  0x91   :  { %456 = vmatpush.bf16.msra.mxu0 %v617_v42  ;;  %761 = vmatpush.bf16.msra.mxu3 %v617_v42 }
  0x92   :  { %485 = vmatpush.bf16.msra.mxu1 %v621_v47  ;;  %v1040_v47 = vld [vmem:[%s1162_s1] ss:$0 sm:$0xff] }
  0x94   :  { %513 = vmatpush.bf16.msra.mxu2 %v637_v35 }
  0x95   :  { %457 = vmatpush.bf16.msra.mxu0 %v605_v57  ;;  %762 = vmatpush.bf16.msra.mxu3 %v605_v57 }
  0x96   :  { %486 = vmatpush.bf16.msra.mxu1 %v609_v63 }
  0x97   :  { %97 = vadd.xlane.f32.xlu1 %v84_v46  ;;  %v624_v46 = vld [vmem:[%s1164_s3 + $0x38] sm:$0xf] }
  0x98   :  { %v625_v49 = vor.u32 %v698_v48, %v624_v46 }
  0x99   :  { %458 = vmatpush.bf16.msra.mxu0 %v593_v11  ;;  %763 = vmatpush.bf16.msra.mxu3 %v593_v11 }
  0x9a   :  { %514 = vmatpush.bf16.msra.mxu2 %v625_v49 }
  0x9e   :  { %515 = vmatpush.bf16.msra.mxu2 %v613_v0 }
  0xa2   :  { %516 = vmatpush.bf16.msra.mxu2 %v601_v15 }
  0xf2   :  { %v88_v25 = vpop.xlane.xlu0 %87 }
  0xf3   :  { %v103_v31 = vmul.f32 %v88_v25, %v831_v17 }
  0xf5   :  { %v962_v38 = vadd.f32 1e-05, %v103_v31 }
  0xf7   :  { %769 = vrsqrt.f32 %v962_v38  ;;  %vm125_vm2 = vweird.f32 %v962_v38 }
  0xf9   :  { %v94_v50 = vpop.xlane.xlu2 %93 }
  0xfa   :  { %v106_v54 = vmul.f32 %v94_v50, %v831_v17  ;;  %v90_v55 = vpop.xlane.xlu1 %89  ;;  %v55_v56 = vpop.xlane.xlu0 %54 }
  0xfb   :  { %v104_v61 = vmul.f32 %v90_v55, %v831_v17  ;;  %v70_v62 = vmul.f32 %v831_v17, %v55_v56 }
  0xfc   :  { %v1004_v1 = vadd.f32 1e-05, %v106_v54 }
  0xfd   :  { %v770_v2 = vpop.eup %769  ;;  %v112_v3 = vadd.f32 1e-05, %v104_v61  ;;  %v1008_v4 = vsub.f32 %v729_v33, %v70_v62  ;;  %v594_v33 = vld [vmem:[%s1164_s3 + $0xc] sm:$0xf0] }
  0xfe   :  { %v120_v7 = vmul.f32 %v770_v2, %v962_v38  ;;  %771 = vrsqrt.f32 %v1004_v1  ;;  %v597_v14 = vor.u32 %v690_v9, %v594_v33  ;;  %vm126_vm1 = vweird.f32 %v770_v2 }
  0xff   :  { %773 = vrsqrt.f32 %v112_v3  ;;  %v86_v10 = vmul.f32 %v1008_v4, %v1008_v4  ;;  %vm127_vm3 = vmor %vm125_vm2, %vm126_vm1  ;;  %vm135_vm4 = vweird.f32 %v112_v3  ;;  %vm155_vm6 = vweird.f32 %v1004_v1 }
 0x100   :  { %v121_v13 = vmul.f32 %v770_v2, %v120_v7  ;;  %487 = vmatpush.bf16.msra.mxu1 %v597_v14 }
 0x101   :  { %101 = vadd.xlane.f32.xlu0 %v86_v10 }
 0x102   :  { %v122_v16 = vmul.f32 0.5, %v121_v13  ;;  %v92_v18 = vpop.xlane.xlu1 %91  ;;  %v96_v19 = vpop.xlane.xlu0 %95 }
 0x103   :  { %v105_v20 = vmul.f32 %v92_v18, %v831_v17  ;;  %v107_v21 = vmul.f32 %v96_v19, %v831_v17 }
 0x104   :  { %v772_v23 = vpop.eup %771  ;;  %v123_v24 = vsub.f32 1.5, %v122_v16 }
 0x105   :  { %v774_v25 = vpop.eup %773  ;;  %v150_v26 = vmul.f32 %v772_v23, %v1004_v1  ;;  %v113_v27 = vadd.f32 1e-05, %v105_v20  ;;  %v115_v28 = vadd.f32 1e-05, %v107_v21  ;;  %vm156_vm7 = vweird.f32 %v772_v23 }
 0x106   :  { %v124_v30 = vmul.f32 %v770_v2, %v123_v24  ;;  %v130_v31 = vmul.f32 %v774_v25, %v112_v3  ;;  %vm136_vm5 = vweird.f32 %v774_v25  ;;  %vm1044_vm9 = vmor %vm155_vm6, %vm156_vm7 }
 0x107   :  { %v151_v34 = vmul.f32 %v772_v23, %v150_v26  ;;  %775 = vrsqrt.f32 %v113_v27  ;;  %vm137_vm8 = vmor %vm135_vm4, %vm136_vm5  ;;  %vm145_vm10 = vweird.f32 %v113_v27  ;;  %vm165_vm12 = vweird.f32 %v115_v28 }
 0x108   :  { %v131_v35 = vmul.f32 %v774_v25, %v130_v31  ;;  %777 = vrsqrt.f32 %v115_v28  ;;  %v128_v39 = vsel %vm127_vm3, %v770_v2, %v124_v30 }
 0x109   :  { %v152_v41 = vmul.f32 0.5, %v151_v34  ;;  %v199_v38 = vmul.f32 %v128_v39, %v834_v22  ;;  %v1051_v22 = vld [vmem:[%s1163_s2] ss:$0 sm:$0xff] }
 0x10a   :  { %v132_v42 = vmul.f32 0.5, %v131_v35  ;;  %v98_v43 = vpop.xlane.xlu1 %97 }
 0x10b   :  { %v153_v44 = vsub.f32 1.5, %v152_v41  ;;  %v108_v46 = vmul.f32 %v98_v43, %v831_v17  ;;  %v211_v57 = vmul.f32 %v1040_v47, %v199_v38 }
 0x10c   :  { %v133_v48 = vsub.f32 1.5, %v132_v42 }
 0x10d   :  { %v776_v49 = vpop.eup %775  ;;  %v154_v51 = vmul.f32 %v772_v23, %v153_v44  ;;  %v116_v54 = vadd.f32 1e-05, %v108_v46  ;;  %v223_v2 = vadd.f32 %v1051_v22, %v211_v57 }
 0x10e   :  { %v778_v50 = vpop.eup %777  ;;  %v134_v52 = vmul.f32 %v774_v25, %v133_v48  ;;  %v140_v53 = vmul.f32 %v776_v49, %v113_v27  ;;  %vm146_vm11 = vweird.f32 %v776_v49 }
 0x10f   :  { %v160_v56 = vmul.f32 %v778_v50, %v115_v28  ;;  %779 = vrsqrt.f32 %v116_v54  ;;  %v158_v62 = vsel %vm1044_vm9, %v772_v23, %v154_v51  ;;  %vm147_vm13 = vmor %vm145_vm10, %vm146_vm11  ;;  %vm166_vm14 = vweird.f32 %v778_v50 }
 0x110   :  { %v138_v58 = vsel %vm137_vm8, %v774_v25, %v134_v52  ;;  %v141_v59 = vmul.f32 %v776_v49, %v140_v53  ;;  %v202_v5 = vmul.f32 %v158_v62, %v840_v29  ;;  %vm167_vm15 = vmor %vm165_vm12, %vm166_vm14  ;;  %vm175_vm0 = vweird.f32 %v116_v54 }
 0x111   :  { %v200_v60 = vmul.f32 %v138_v58, %v844_v32  ;;  %v161_v61 = vmul.f32 %v778_v50, %v160_v56 }
 0x112   :  { %v142_v63 = vmul.f32 0.5, %v141_v59  ;;  %v214_v12 = vmul.f32 %v1040_v47, %v202_v5 }
 0x113   :  { %v212_v0 = vmul.f32 %v1040_v47, %v200_v60  ;;  %v162_v1 = vmul.f32 0.5, %v161_v61 }
 0x114   :  { %v143_v3 = vsub.f32 1.5, %v142_v63  ;;  %v226_v18 = vadd.f32 %v1051_v22, %v214_v12 }
 0x115   :  { %v224_v6 = vadd.f32 %v1051_v22, %v212_v0  ;;  %v163_v32 = vsub.f32 1.5, %v162_v1  ;;  %v780_v7 = vpop.eup %779 }
 0x116   :  { %v144_v9 = vmul.f32 %v776_v49, %v143_v3  ;;  %v170_v10 = vmul.f32 %v780_v7, %v116_v54  ;;  %vm176_vm1 = vweird.f32 %v780_v7 }
 0x117   :  { %v733_v33 = vpack.c.bf16 %v224_v6, %v223_v2  ;;  %v164_v8 = vmul.f32 %v778_v50, %v163_v32  ;;  %vm177_vm2 = vmor %vm175_vm0, %vm176_vm1  ;;  %v287_v2 = vld [vmem:[%s1165_s4] sm:$0x7] }
 0x118   :  { %v148_v11 = vsel %vm147_vm13, %v776_v49, %v144_v9  ;;  %v171_v14 = vmul.f32 %v780_v7, %v170_v10 }
 0x119   :  { %734 = vst [vmem:[#allocation2 + $0x10] sm:$0xff] %v733_v33   ;;  %v201_v13 = vmul.f32 %v148_v11, %v853_v37  ;;  %v168_v15 = vsel %vm167_vm15, %v778_v50, %v164_v8 }
 0x11a   :  { %v172_v16 = vmul.f32 0.5, %v171_v14  ;;  %v203_v21 = vmul.f32 %v168_v15, %v851_v36 }
 0x11b   :  { %v213_v29 = vmul.f32 %v1040_v47, %v201_v13 }
 0x11c   :  { %v173_v20 = vsub.f32 1.5, %v172_v16  ;;  %v215_v26 = vmul.f32 %v1040_v47, %v203_v21 }
 0x11d   :  { %v225_v19 = vadd.f32 %v1051_v22, %v213_v29 }
 0x11e   :  { %v174_v24 = vmul.f32 %v780_v7, %v173_v20  ;;  %v227_v30 = vadd.f32 %v1051_v22, %v215_v26 }
 0x11f   :  { %v738_v23 = vpack.c.bf16 %v226_v18, %v225_v19 }
 0x120   :  { %v686_v25 = vld [vmem:[#allocation2 + $0x10] sm:$0xff]  ;;  %v178_v37 = vsel %vm177_vm2, %v780_v7, %v174_v24 }
 0x121   :  { %753 = vst [vmem:[#allocation2] sm:$0xff] %v738_v23   ;;  %v204_v27 = vmul.f32 %v178_v37, %v867_v45  ;;  %459 = vmatmul.bf16.vlgmr.msra.gmra.mxu0 %v686_v25  ;;  %488 = vmatmul.bf16.vlgmr.msra.gmra.mxu1 %v686_v25  ;;  %v100_v45 = vpop.xlane.xlu2 %99 }
 0x122   :  { %517 = vmatmul.bf16.vlgmr.msra.gmra.mxu2 %v686_v25  ;;  %v109_v39 = vmul.f32 %v100_v45, %v831_v17 }
 0x123   :  { %v216_v28 = vmul.f32 %v1040_v47, %v204_v27 }
 0x124   :  { %v117_v41 = vadd.f32 1e-05, %v109_v39 }
 0x125   :  { %v228_v31 = vadd.f32 %v1051_v22, %v216_v28 }
 0x126   :  { %781 = vrsqrt.f32 %v117_v41  ;;  %vm185_vm3 = vweird.f32 %v117_v41 }
 0x127   :  { %v743_v36 = vpack.c.bf16 %v228_v31, %v227_v30 }
 0x128   :  { %v687_v34 = vld [vmem:[#allocation2] sm:$0xff] }
 0x129   :  { %754 = vst [vmem:[#allocation2 + $0x18] sm:$0xff] %v743_v36   ;;  %464 = vmatmul.bf16.vlgmr.msra.gmra.mxu3 %v687_v34 }
 0x12c   :  { %v782_v42 = vpop.eup %781 }
 0x12d   :  { %v180_v43 = vmul.f32 %v782_v42, %v117_v41  ;;  %vm186_vm4 = vweird.f32 %v782_v42 }
 0x12e   :  { %vm187_vm5 = vmor %vm185_vm3, %vm186_vm4 }
 0x12f   :  { %v181_v44 = vmul.f32 %v782_v42, %v180_v43 }
 0x130   :  { %v688_v35 = vld [vmem:[#allocation2 + $0x18] sm:$0xff] }
 0x131   :  { %493 = vmatmul.bf16.gmra.mxu1 %v687_v34  ;;  %v182_v49 = vmul.f32 0.5, %v181_v44 }
 0x132   :  { %522 = vmatmul.bf16.gmra.mxu2 %v687_v34 }
 0x133   :  { %v183_v50 = vsub.f32 1.5, %v182_v49 }
 0x135   :  { %v184_v52 = vmul.f32 %v782_v42, %v183_v50 }
 0x137   :  { %v188_v55 = vsel %vm187_vm5, %v782_v42, %v184_v52 }
 0x138   :  { %v205_v58 = vmul.f32 %v188_v55, %v858_v40  ;;  %v288_v40 = vunpack.c.l.bf16 %v287_v2 }
 0x139   :  { %469 = vmatmul.bf16.gmra.mxu3 %v688_v35 }
 0x13a   :  { %v217_v60 = vmul.f32 %v1040_v47, %v205_v58  ;;  %v290_v3 = vperm.slane %v288_v40, 0  ;;  %v291_v5 = vperm.slane %v288_v40, 2 }
 0x13c   :  { %v229_v63 = vadd.f32 %v1051_v22, %v217_v60  ;;  %v1083_v32 = vperm.slane %v290_v3, 0 }
 0x141   :  { %498 = vmatmul.bf16.gmra.mxu1 %v688_v35 }
 0x142   :  { %527 = vmatmul.bf16.gmra.mxu2 %v688_v35 }
 0x174   :  { %v102_v46 = vpop.xlane.xlu0 %101 }
 0x175   :  { %v110_v38 = vmul.f32 %v102_v46, %v831_v17 }
 0x177   :  { %v118_v48 = vadd.f32 1e-05, %v110_v38 }
 0x179   :  { %783 = vrsqrt.f32 %v118_v48  ;;  %vm195_vm7 = vweird.f32 %v118_v48 }
 0x17f   :  { %v784_v51 = vpop.eup %783 }
 0x180   :  { %v190_v53 = vmul.f32 %v784_v51, %v118_v48  ;;  %vm196_vm6 = vweird.f32 %v784_v51 }
 0x181   :  { %vm197_vm8 = vmor %vm195_vm7, %vm196_vm6 }
 0x182   :  { %v191_v54 = vmul.f32 %v784_v51, %v190_v53 }
 0x184   :  { %v192_v56 = vmul.f32 0.5, %v191_v54 }
 0x186   :  { %v193_v57 = vsub.f32 1.5, %v192_v56 }
 0x188   :  { %v194_v59 = vmul.f32 %v784_v51, %v193_v57 }
 0x18a   :  { %v198_v17 = vsel %vm197_vm8, %v784_v51, %v194_v59 }
 0x18b   :  { %v206_v61 = vmul.f32 %v198_v17, %v1008_v4  ;;  %v1085_v4 = vperm.slane %v291_v5, 0 }
 0x18d   :  { %v218_v62 = vmul.f32 %v1040_v47, %v206_v61 }
 0x18f   :  { %v230_v0 = vadd.f32 %v1051_v22, %v218_v62  ;;  %v292_v22 = vperm.slane %v288_v40, 4 }
 0x191   :  { %v748_v1 = vpack.c.bf16 %v230_v0, %v229_v63  ;;  %v1089_v10 = vperm.slane %v292_v22, 0 }
 0x193   :  { %755 = vst [vmem:[#allocation2 + $0x8] sm:$0xff] %v748_v1  }
 0x19a   :  { %v689_v6 = vld [vmem:[#allocation2 + $0x8] sm:$0xff] }
 0x19b   :  { %474 = vmatmul.bf16.gmra.mxu3 %v689_v6  ;;  %503 = vmatmul.bf16.gmra.mxu1 %v689_v6 }
 0x19c   :  { %532 = vmatmul.bf16.gmra.mxu2 %v689_v6 }
 0x19e   :  { %v460_v47 = vpop.f32.mrf.mxu0  ;;  %v489_v7 = vpop.f32.mrf.mxu1 }
 0x19f   :  { %v461_v9 = vadd.f32 %v460_v47, %v1083_v32  ;;  %v490_v33 = vadd.f32 %v489_v7, %v1085_v4 }
 0x1a1   :  { %v538_v8 = vpack.c.bf16 %v490_v33, %v461_v9 }
 0x1a3   :  { %554 = vst [vmem:[%s1166_s5] sm:$0xff] %v538_v8 }
 0x1a5   :  { %v518_v11 = vpop.f32.mrf.mxu2 }
 0x1a6   :  { %v519_v12 = vadd.f32 %v518_v11, %v1089_v10  ;;  %v462_v13 = vpop.f32.mrf.mxu0  ;;  %v491_v14 = vpop.f32.mrf.mxu1 }
 0x1a7   :  { %v463_v29 = vadd.f32 %v462_v13, %v1083_v32  ;;  %v492_v15 = vadd.f32 %v491_v14, %v1085_v4 }
 0x1a8   :  { %v539_v16 = vpack.c.bf16 %v519_v12, %v519_v12 }
 0x1a9   :  { %v540_v18 = vpack.c.bf16 %v492_v15, %v463_v29 }
 0x1aa   :  { %555 = vst [vmem:[%s1166_s5 + $0x8] sm:$0xf] %v539_v16 }
 0x1ab   :  { %556 = vst [vmem:[%s1166_s5 + $0xc] sm:$0xff] %v540_v18 }
 0x1ac   :  { %v465_v19 = vpop.f32.mrf.mxu3 }
 0x1ad   :  { %v520_v20 = vpop.f32.mrf.mxu2  ;;  %v466_v24 = vadd.f32 %v465_v19, %v1083_v32 }
 0x1ae   :  { %v521_v21 = vadd.f32 %v520_v20, %v1089_v10  ;;  %v494_v23 = vpop.f32.mrf.mxu1 }
 0x1af   :  { %v495_v25 = vadd.f32 %v494_v23, %v1085_v4 }
 0x1b0   :  { %v541_v37 = vpack.c.bf16 %v521_v21, %v521_v21 }
 0x1b1   :  { %v542_v26 = vpack.c.bf16 %v495_v25, %v466_v24 }
 0x1b2   :  { %557 = vst [vmem:[%s1166_s5 + $0x14] sm:$0xf] %v541_v37 }
 0x1b3   :  { %558 = vst [vmem:[%s1166_s5 + $0x18] sm:$0xff] %v542_v26 }
 0x1b4   :  { %v467_v27 = vpop.f32.mrf.mxu3 }
 0x1b5   :  { %v523_v28 = vpop.f32.mrf.mxu2  ;;  %v468_v36 = vadd.f32 %v467_v27, %v1083_v32 }
 0x1b6   :  { %v524_v30 = vadd.f32 %v523_v28, %v1089_v10  ;;  %v496_v31 = vpop.f32.mrf.mxu1 }
 0x1b7   :  { %v497_v34 = vadd.f32 %v496_v31, %v1085_v4 }
 0x1b8   :  { %v543_v35 = vpack.c.bf16 %v524_v30, %v524_v30 }
 0x1b9   :  { %v544_v45 = vpack.c.bf16 %v497_v34, %v468_v36 }
 0x1ba   :  { %559 = vst [vmem:[%s1166_s5 + $0x20] sm:$0xf] %v543_v35 }
 0x1bb   :  { %560 = vst [vmem:[%s1166_s5 + $0x24] sm:$0xff] %v544_v45 }
 0x1bc   :  { %v470_v39 = vpop.f32.mrf.mxu3 }
 0x1bd   :  { %v525_v41 = vpop.f32.mrf.mxu2  ;;  %v471_v44 = vadd.f32 %v470_v39, %v1083_v32 }
 0x1be   :  { %v526_v42 = vadd.f32 %v525_v41, %v1089_v10  ;;  %v499_v43 = vpop.f32.mrf.mxu1 }
 0x1bf   :  { %v500_v46 = vadd.f32 %v499_v43, %v1085_v4 }
 0x1c0   :  { %v545_v38 = vpack.c.bf16 %v526_v42, %v526_v42 }
 0x1c1   :  { %v546_v48 = vpack.c.bf16 %v500_v46, %v471_v44 }
 0x1c2   :  { %561 = vst [vmem:[%s1166_s5 + $0x2c] sm:$0xf] %v545_v38 }
 0x1c3   :  { %562 = vst [vmem:[%s1166_s5 + $0x30] sm:$0xff] %v546_v48 }
 0x1c4   :  { %v472_v49 = vpop.f32.mrf.mxu3 }
 0x1c5   :  { %v528_v50 = vpop.f32.mrf.mxu2  ;;  %v473_v53 = vadd.f32 %v472_v49, %v1083_v32 }
 0x1c6   :  { %v529_v51 = vadd.f32 %v528_v50, %v1089_v10  ;;  %v501_v52 = vpop.f32.mrf.mxu1 }
 0x1c7   :  { %v502_v54 = vadd.f32 %v501_v52, %v1085_v4 }
 0x1c8   :  { %v547_v55 = vpack.c.bf16 %v529_v51, %v529_v51 }
 0x1c9   :  { %v548_v56 = vpack.c.bf16 %v502_v54, %v473_v53 }
 0x1ca   :  { %563 = vst [vmem:[%s1166_s5 + $0x38] sm:$0xf] %v547_v55 }
 0x1cb   :  { %564 = vst [vmem:[%s1166_s5 + $0x3c] sm:$0xff] %v548_v56 }
 0x1cd   :  { %v530_v57 = vpop.f32.mrf.mxu2 }
 0x1ce   :  { %v531_v58 = vadd.f32 %v530_v57, %v1089_v10 }
 0x1d0   :  { %v549_v59 = vpack.c.bf16 %v531_v58, %v531_v58 }
 0x1d2   :  { %565 = vst [vmem:[%s1166_s5 + $0x44] sm:$0xf] %v549_v59 }
 0x218   :  { %v504_v17 = vpop.f32.mrf.mxu1 }
 0x219   :  { %v505_v61 = vadd.f32 %v504_v17, %v1085_v4 }
 0x21e   :  { %v475_v60 = vpop.f32.mrf.mxu3 }
 0x21f   :  { %v476_v62 = vadd.f32 %v475_v60, %v1083_v32  ;;  %v533_v63 = vpop.f32.mrf.mxu2 }
 0x220   :  { %v534_v0 = vadd.f32 %v533_v63, %v1089_v10  ;;  %v506_v40 = vpop.f32.mrf.mxu1 }
 0x221   :  { %v550_v1 = vpack.c.bf16 %v505_v61, %v476_v62  ;;  %v507_v5 = vadd.f32 %v506_v40, %v1085_v4 }
 0x222   :  { %v551_v2 = vpack.c.bf16 %v534_v0, %v534_v0 }
 0x223   :  { %566 = vst [vmem:[%s1166_s5 + $0x48] sm:$0xff] %v550_v1 }
 0x224   :  { %567 = vst [vmem:[%s1166_s5 + $0x50] sm:$0xf] %v551_v2 }
 0x226   :  { %v477_v3 = vpop.f32.mrf.mxu3 }
 0x227   :  { %v478_v6 = vadd.f32 %v477_v3, %v1083_v32  ;;  %v535_v47 = vpop.f32.mrf.mxu2 }
 0x228   :  { %v536_v7 = vadd.f32 %v535_v47, %v1089_v10 }
 0x229   :  { %v552_v22 = vpack.c.bf16 %v507_v5, %v478_v6 }
 0x22a   :  { %v553_v9 = vpack.c.bf16 %v536_v7, %v536_v7 }
 0x22b   :  { %568 = vst [vmem:[%s1166_s5 + $0x54] sm:$0xff] %v552_v22 }
 0x22c   :  { %569 = vst [vmem:[%s1166_s5 + $0x5c] sm:$0xf] %v553_v9 }

// kernel: vision_transformer_forward.25
= control target key start
LH: loop header
LB: loop body
LE: loop exit
PB: predicated region body
PF: predicated region fallthrough
CT: control target
= control target key end

     0   :  { %s1414_s12 = smov 0   ;;  %s1416_s13 = smov 0   ;;  %s1730_s0 = inlined_call_operand.vmem [shape: bf16[2,32,384], index: 0, kind: input, shape index: {}, may-alias: {0,1,2}]   ;;  %s1731_s1 = inlined_call_operand.vmem [shape: bf16[2,32,384], index: 1, kind: input, shape index: {}, may-alias: {0,1,2}]   ;;  %s1732_s2 = inlined_call_operand.vmem [shape: bf16[2,32,384], index: 2, kind: input, shape index: {}, may-alias: {0,1,2}]   ;;  %s1733_s3 = inlined_call_operand.vmem [shape: bf16[2,32,128], index: 3, kind: output, shape index: {}]  }
   0x1   :  { %s1418_s14 = smov 0   ;;  %s1420_s15 = smov 0  }
   0x2   :  { %s1422_s16 = smov 0  }
   0x3 LB: > { %s25_s17 = sadd.s32 1, %s1385_s15  ;;  %p41_p1 = scmp.ne.s32.totalorder %s1377_s13, %s1373_s12  ;;  %s1389_s16 = sphi %s1422_s16, %s13_s16   ;;  %s1385_s15 = sphi %s1420_s15, %s1738_s15   ;;  %s1381_s14 = sphi %s1418_s14, %s1737_s14   ;;  %s1377_s13 = sphi %s1416_s13, %s1736_s13   ;;  %s1373_s12 = sphi %s1414_s12, %s1735_s12  }
   0x4   : > { %p27_p0 = scmp.ge.s32.totalorder %s25_s17, 2  ;;  %p42_p2 = scmp.eq.s32.totalorder %s1389_s16, 0 }
   0x5   : > { %s34_s20 = sadd.s32 1, %s1377_s13  ;;  %p1133_p5 = scmp.ge.s32.totalorder %s1389_s16, 2 }
   0x6   : > { %s1740_s17 = smov (%p27_p0, %s25_s17), 0  ;;  %p1445_p3 = por %p42_p2, %p41_p1 }
   0x7   : > { %s29_s19 = ssub.s32 %s1385_s15, %s1740_s17  ;;  %155 = sbr.rel (%p1133_p5) target bundleno = 39 (0x27), region = 16 }
   0x8   : > { %p32_p4 = scmp.eq.s32.totalorder %s29_s19, 0 }
   0xa   : > { %s1453_s21 = scalar_select %p32_p4, %s1377_s13, %s34_s20  }
   0xc   : > { %158 = sbr.rel (!%p1445_p3) target bundleno = 21 (0x15), region = 20  ;;  %s160_s22 = sand.u32 (%p1445_p3), 1, %s1377_s13  }
   0xd   : > { %s1213_s23 = smul.u32 (%p1445_p3), 48, %s1385_s15  ;;  %s1134_s24 = sshll.u32 (%p1445_p3), %s160_s22, 4 }
   0xe   : > { %s162_s28 = scalar_lea.vmem (%p1445_p3), [#allocation2], %s1134_s24 }
   0xf   : > { %s166_s27 = scalar_lea.vmem (%p1445_p3), %s1730_s0, %s1213_s23 }
  0x10   : > { %v183_v0 = vld [vmem:[%s166_s27] sm:$0xf] (%p1445_p3)  ;;  %v185_v1 = vld [vmem:[%s166_s27 + $0xc] sm:$0xf] (%p1445_p3)  ;;  %v187_v2 = vld [vmem:[%s166_s27 + $0x18] sm:$0xf] (%p1445_p3) }
  0x11   : > { %184 = vst [vmem:[%s162_s28] sm:$0xf] %v183_v0  ;;  %v189_v3 = vld [vmem:[%s166_s27 + $0x24] sm:$0xf] }
  0x12   : > { %186 = vst [vmem:[%s162_s28 + $0x4] sm:$0xf] %v185_v1 }
  0x13   : > { %188 = vst [vmem:[%s162_s28 + $0x8] sm:$0xf] %v187_v2 }
  0x14   : > { %190 = vst [vmem:[%s162_s28 + $0xc] sm:$0xf] %v189_v3 }
  0x15 PF: > { %222 = sbr.rel (!%p1445_p3) target bundleno = 30 (0x1e), region = 61  ;;  %s224_s29 = sand.u32 (%p1445_p3), 1, %s1377_s13  }
  0x16   : > { %s1137_s30 = smul.u32 (%p1445_p3), 48, %s1385_s15  ;;  %s1136_s4 = sshll.u32 (%p1445_p3), %s224_s29, 4 }
  0x17   : > { %s226_s8 = scalar_lea.vmem (%p1445_p3), [#allocation3], %s1136_s4 }
  0x18   : > { %s1041_s7 = scalar_lea.vmem (%p1445_p3), %s1731_s1, %s1137_s30 }
  0x19   : > { %v1138_v4 = vld [vmem:[%s1041_s7 + $0x4] sm:$0xf] (%p1445_p3)  ;;  %v1139_v5 = vld [vmem:[%s1041_s7 + $0x10] sm:$0xf] (%p1445_p3)  ;;  %v1140_v6 = vld [vmem:[%s1041_s7 + $0x1c] sm:$0xf] (%p1445_p3) }
  0x1a   : > { %249 = vst [vmem:[%s226_s8] sm:$0xf] %v1138_v4  ;;  %v1141_v7 = vld [vmem:[%s1041_s7 + $0x28] sm:$0xf] }
  0x1b   : > { %251 = vst [vmem:[%s226_s8 + $0x4] sm:$0xf] %v1139_v5 }
  0x1c   : > { %253 = vst [vmem:[%s226_s8 + $0x8] sm:$0xf] %v1140_v6 }
  0x1d   : > { %255 = vst [vmem:[%s226_s8 + $0xc] sm:$0xf] %v1141_v7 }
  0x1e PF: > { %287 = sbr.rel (!%p1445_p3) target bundleno = 39 (0x27), region = 102  ;;  %s289_s9 = sand.u32 (%p1445_p3), 1, %s1377_s13  }
  0x1f   : > { %s1143_s10 = smul.u32 (%p1445_p3), 48, %s1385_s15  ;;  %s1142_s11 = sshll.u32 (%p1445_p3), %s289_s9, 4 }
  0x20   : > { %s291_s23 = scalar_lea.vmem (%p1445_p3), [#allocation4], %s1142_s11 }
  0x21   : > { %s1048_s22 = scalar_lea.vmem (%p1445_p3), %s1732_s2, %s1143_s10 }
  0x22   : > { %v1144_v8 = vld [vmem:[%s1048_s22 + $0x8] sm:$0xf] (%p1445_p3)  ;;  %v1145_v9 = vld [vmem:[%s1048_s22 + $0x14] sm:$0xf] (%p1445_p3)  ;;  %v1146_v10 = vld [vmem:[%s1048_s22 + $0x20] sm:$0xf] (%p1445_p3) }
  0x23   : > { %314 = vst [vmem:[%s291_s23] sm:$0xf] %v1144_v8  ;;  %v1147_v11 = vld [vmem:[%s1048_s22 + $0x2c] sm:$0xf] }
  0x24   : > { %316 = vst [vmem:[%s291_s23 + $0x4] sm:$0xf] %v1145_v9 }
  0x25   : > { %318 = vst [vmem:[%s291_s23 + $0x8] sm:$0xf] %v1146_v10 }
  0x26   : > { %320 = vst [vmem:[%s291_s23 + $0xc] sm:$0xf] %v1147_v11 }
  0x27 PF: > { %p1148_p6 = scmp.ge.s32.totalorder %s1389_s16, 1  ;;  %p351_p7 = scmp.lt.s32.totalorder %s1389_s16, 3 }
  0x29   : > { %p352_p8 = pnand %p1148_p6, %p351_p7 }
  0x2a   : > { %s358_s18 = sand.u32 (!%p352_p8), 1, %s1373_s12   ;;  %s1391_s12 = smov (!%p352_p8), 96  }
  0x2b   : > { %355 = sbr.rel (%p352_p8) target bundleno = 1364 (0x554), region = 143  ;;  %s1480_s24 = sshll.u32 (!%p352_p8), %s358_s18, 4 }
  0x2c   : > { %s367_s25 = scalar_lea.vmem (!%p352_p8), [#allocation3], %s1480_s24  ;;  %s360_s26 = scalar_lea.vmem (!%p352_p8), [#allocation2], %s1480_s24 }
  0x2d   : > { %s1392_s27 = smov (!%p352_p8), 64   ;;  %s1393_s28 = smov (!%p352_p8), 32  }
  0x2e   : > { %s374_s29 = scalar_lea.vmem (!%p352_p8), [#allocation4], %s1480_s24  ;;  %p408_p9 = scmp.lt.s32.totalorder (!%p352_p8), %s1381_s14, 1 }
  0x30   : > { %vm449_vm0 = vcmask 261120   ;;  %v1483_v12 = vld [vmem:[%s367_s25 + $0x8] sm:$0xff]  ;;  %v1194_v14 = vld [vmem:[%s360_s26] sm:$0xff]   ;;  %v481_v28 = vlaneseq  ;;  %s1742_s14 = smov (!%p408_p9, %s1381_s14), 1  ;;  %vm985_vm2 = vcmask 523264   ;;  %vm990_vm3 = vcmask 785408  }
  0x31   : > { %v460_v13 = vsel %vm449_vm0, %v1483_v12, 0  ;;  %v1189_v15 = vld [vmem:[%s367_s25] sm:$0xff]  ;;  %v1195_v16 = vunpack.c.l.bf16 %v1194_v14  ;;  %v1196_v17 = vunpack.c.h.bf16 %v1194_v14  ;;  %v1211_v22 = vld [vmem:[%s360_s26 + $0x8] sm:$0xff]   ;;  %579 = vrot.lane.b32.xlu2 %v1483_v12, %s1391_s12  ;;  %s1188_s30 = sshll.u32 %s1742_s14, 4 }
  0x32   : > { %468 = vmatpush.bf16.xpose.msra.mxu0 %v460_v13  ;;  %v457_v18 = vsel %vm449_vm0, %v1189_v15, 0  ;;  %v1199_v23 = vunpack.c.l.bf16 %v1211_v22  ;;  %v1200_v24 = vunpack.c.h.bf16 %v1211_v22  ;;  %v1505_v29 = vand.u32 127, %v481_v28  ;;  %v1542_v4 = vld [vmem:[%s374_s29 + $0x8] sm:$0xff]  ;;  %v1545_v5 = vld [vmem:[%s374_s29] sm:$0xff]  ;;  %s415_s6 = scalar_lea.vmem %s1733_s3, %s1188_s30 }
  0x33   : > { %v433_v19 = vmul.f32 0.17675781, %v1195_v16  ;;  %v434_v20 = vmul.f32 0.17675781, %v1196_v17  ;;  %558 = vmatpush.bf16.msra.mxu1 %v1542_v4 }
  0x34   : > { %v435_v25 = vmul.f32 0.17675781, %v1199_v23  ;;  %v436_v26 = vmul.f32 0.17675781, %v1200_v24  ;;  %vm483_vm1 = vcmp.lt.s32.totalorder %v1505_v29, 17 }
  0x35   : > { %v1489_v21 = vpack.c.bf16 %v434_v20, %v433_v19 }
  0x36   : > { %v1493_v27 = vpack.c.bf16 %v436_v26, %v435_v25 }
  0x37   : > { %559 = vmatpush.bf16.msra.mxu1 %v1545_v5 }
  0x39   : > { %577 = vrot.lane.b32.xlu2 %v1189_v15, %s1391_s12 }
  0x3a   : > { %469 = vmatpush.bf16.xpose.msra.mxu0 %v457_v18 }
  0x41   : > { %1162 = vmatmul.msk.bf16.vlgmr.msra.gmra.mxu0 %vm449_vm0, %v1489_v21  ;;  %573 = vrot.lane.b32.xlu2 %v1489_v21, %s1391_s12 }
  0x49   : > { %575 = vrot.lane.b32.xlu2 %v1493_v27, %s1391_s12 }
  0x51   : > { %1163 = vmatmul.msk.bf16.gmra.mxu0 %vm449_vm0, %v1493_v27  ;;  %697 = vrot.lane.b32.xlu2 %v1189_v15, %s1392_s27 }
  0x59   : > { %817 = vrot.lane.b32.xlu2 %v1189_v15, %s1393_s28 }
  0x61   : > { %693 = vrot.lane.b32.xlu2 %v1489_v21, %s1392_s27 }
  0x69   : > { %695 = vrot.lane.b32.xlu2 %v1493_v27, %s1392_s27 }
  0x8b   : > { %v580_v42 = vpop.permute.xlu2 %579 }
  0x8c   : > { %v591_v43 = vsel %vm449_vm0, %v580_v42, 0 }
  0x8d   : > { %599 = vmatpush.bf16.xpose.msra.mxu2 %v591_v43 }
  0x93   : > { %v578_v44 = vpop.permute.xlu2 %577 }
  0x94   : > { %v588_v45 = vsel %vm449_vm0, %v578_v44, 0 }
  0x95   : > { %600 = vmatpush.bf16.xpose.msra.mxu2 %v588_v45 }
  0x9b   : > { %v574_v46 = vpop.permute.xlu2 %573 }
  0x9c   : > { %1174 = vmatmul.msk.bf16.vlgmr.msra.gmra.mxu2 %vm449_vm0, %v574_v46 }
  0xa3   : > { %v576_v52 = vpop.permute.xlu2 %575 }
  0xab   : > { %v698_v15 = vpop.permute.xlu2 %697 }
  0xac   : > { %1175 = vmatmul.msk.bf16.gmra.mxu2 %vm449_vm0, %v576_v52 }
  0xbe   : > { %v471_v30 = vpop.f32.mrf.mxu0 }
  0xbf   : > { %v484_v31 = vsel %vm483_vm1, %v471_v30, -1e+30 }
  0xc0   : > { %v488_v32 = vsel %vm449_vm0, %v484_v31, -inf }
  0xc1   : > { %489 = vmax.xlane.f32.xlu0 %v488_v32 }
  0xc6   : > { %v473_v33 = vpop.f32.mrf.mxu0 }
  0xc7   : > { %v485_v34 = vsel %vm483_vm1, %v473_v33, -1e+30 }
  0xc8   : > { %v491_v35 = vsel %vm449_vm0, %v485_v34, -inf }
  0xc9   : > { %492 = vmax.xlane.f32.xlu0 %v491_v35 }
  0xce   : > { %v476_v36 = vpop.f32.mrf.mxu0 }
  0xcf   : > { %v486_v37 = vsel %vm483_vm1, %v476_v36, -1e+30 }
  0xd0   : > { %v494_v38 = vsel %vm449_vm0, %v486_v37, -inf }
  0xd1   : > { %495 = vmax.xlane.f32.xlu1 %v494_v38 }
  0xd6   : > { %v478_v39 = vpop.f32.mrf.mxu0 }
  0xd7   : > { %v487_v40 = vsel %vm483_vm1, %v478_v39, -1e+30 }
  0xd8   : > { %v497_v41 = vsel %vm449_vm0, %v487_v40, -inf }
  0xd9   : > { %498 = vmax.xlane.f32.xlu1 %v497_v41 }
  0xdd   : > { %699 = vrot.lane.b32.xlu0 %v1483_v12, %s1392_s27 }
 0x11f   : > { %v602_v8 = vpop.f32.mrf.mxu2 }
 0x120   : > { %v1551_v13 = vsel %vm483_vm1, %v602_v8, -1e+30 }
 0x121   : > { %v616_v22 = vsel %vm449_vm0, %v1551_v13, -inf }
 0x127   : > { %v604_v10 = vpop.f32.mrf.mxu2 }
 0x128   : > { %v1555_v14 = vsel %vm483_vm1, %v604_v10, -1e+30 }
 0x129   : > { %v619_v20 = vsel %vm449_vm0, %v1555_v14, -inf }
 0x12a   : > { %620 = vmax.xlane.f32.xlu2 %v619_v20 }
 0x12f   : > { %v607_v17 = vpop.f32.mrf.mxu2 }
 0x130   : > { %v1565_v25 = vsel %vm483_vm1, %v607_v17, -1e+30 }
 0x134   : > { %v490_v47 = vpop.xlane.xlu0 %489 }
 0x135   : > { %v500_v48 = vsub.f32 %v484_v31, %v490_v47  ;;  %v622_v31 = vsel %vm449_vm0, %v1565_v25, -inf }
 0x137   : > { %v504_v49 = vmul.f32 1.442695, %v500_v48  ;;  %v609_v26 = vpop.f32.mrf.mxu2 }
 0x138   : > { %v1569_v28 = vsel %vm483_vm1, %v609_v26, -1e+30 }
 0x139   : > { %1287 = vpow2.f32 %v504_v49  ;;  %v625_v30 = vsel %vm449_vm0, %v1569_v28, -inf }
 0x13c   : > { %v493_v50 = vpop.xlane.xlu0 %492 }
 0x13d   : > { %v501_v51 = vsub.f32 %v485_v34, %v493_v50 }
 0x13f   : > { %v1288_v53 = vpop.eup %1287  ;;  %v506_v54 = vmul.f32 1.442695, %v501_v51 }
 0x140   : > { %v512_v55 = vsel %vm449_vm0, %v1288_v53, 0.0 }
 0x141   : > { %1289 = vpow2.f32 %v506_v54  ;;  %513 = vadd.xlane.f32.xlu0 %v512_v55 }
 0x144   : > { %v496_v56 = vpop.xlane.xlu1 %495 }
 0x145   : > { %v502_v57 = vsub.f32 %v486_v37, %v496_v56  ;;  %v818_v37 = vpop.permute.xlu2 %817 }
 0x146   : > { %v828_v41 = vsel %vm449_vm0, %v818_v37, 0 }
 0x147   : > { %v1290_v58 = vpop.eup %1289  ;;  %v508_v59 = vmul.f32 1.442695, %v502_v57 }
 0x148   : > { %v515_v60 = vsel %vm449_vm0, %v1290_v58, 0.0 }
 0x149   : > { %1291 = vpow2.f32 %v508_v59  ;;  %516 = vadd.xlane.f32.xlu1 %v515_v60 }
 0x14c   : > { %v499_v61 = vpop.xlane.xlu1 %498 }
 0x14d   : > { %v503_v62 = vsub.f32 %v487_v40, %v499_v61  ;;  %v694_v40 = vpop.permute.xlu2 %693 }
 0x14f   : > { %v1292_v63 = vpop.eup %1291  ;;  %v510_v0 = vmul.f32 1.442695, %v503_v62  ;;  %v700_v6 = vpop.permute.xlu0 %699 }
 0x150   : > { %v518_v1 = vsel %vm449_vm0, %v1292_v63, 0.0  ;;  %v711_v7 = vsel %vm449_vm0, %v700_v6, 0 }
 0x151   : > { %1293 = vpow2.f32 %v510_v0  ;;  %519 = vadd.xlane.f32.xlu0 %v518_v1  ;;  %719 = vmatpush.bf16.xpose.msrb.mxu1 %v711_v7 }
 0x155   : > { %v696_v43 = vpop.permute.xlu2 %695 }
 0x157   : > { %v1294_v2 = vpop.eup %1293 }
 0x158   : > { %v521_v3 = vsel %vm449_vm0, %v1294_v2, 0.0 }
 0x159   : > { %522 = vadd.xlane.f32.xlu1 %v521_v3 }
 0x165   : > { %813 = vrot.lane.b32.xlu0 %v1489_v21, %s1393_s28  ;;  %v708_v21 = vsel %vm449_vm0, %v698_v15, 0 }
 0x166   : > { %720 = vmatpush.bf16.xpose.msrb.mxu1 %v708_v21 }
 0x172   : > { %819 = vrot.lane.b32.xlu1 %v1483_v12, %s1393_s28 }
 0x17a   : > { %815 = vrot.lane.b32.xlu1 %v1493_v27, %s1393_s28 }
 0x18f   : > { %617 = vmax.xlane.f32.xlu0 %v616_v22 }
 0x197   : > { %626 = vmax.xlane.f32.xlu0 %v625_v30 }
 0x1a4   : > { %623 = vmax.xlane.f32.xlu1 %v622_v31 }
 0x1b4   : > { %v514_v9 = vpop.xlane.xlu0 %513 }
 0x1b5   : > { %1295 = vrcp.f32 %v514_v9 }
 0x1bb   : > { %v1296_v12 = vpop.eup %1295 }
 0x1bc   : > { %v517_v11 = vpop.xlane.xlu1 %516  ;;  %v528_v18 = vmul.f32 %v1296_v12, %v1288_v53 }
 0x1bd   : > { %1297 = vrcp.f32 %v517_v11  ;;  %v621_v11 = vpop.xlane.xlu2 %620 }
 0x1c3   : > { %v1298_v16 = vpop.eup %1297 }
 0x1c4   : > { %v529_v19 = vmul.f32 %v1298_v16, %v1290_v58  ;;  %v520_v24 = vpop.xlane.xlu0 %519 }
 0x1c5   : > { %1299 = vrcp.f32 %v520_v24 }
 0x1c6   : > { %v532_v23 = vpack.c.bf16 %v529_v19, %v528_v18  ;;  %v629_v19 = vsub.f32 %v1555_v14, %v621_v11 }
 0x1c8   : > { %1172 = vmatmul.msk.bf16.vlgmr.msra.gmra.mxu1 %vm449_vm0, %v532_v23  ;;  %v634_v22 = vmul.f32 1.442695, %v629_v19 }
 0x1cb   : > { %v1300_v32 = vpop.eup %1299 }
 0x1cc   : > { %v523_v27 = vpop.xlane.xlu1 %522  ;;  %v530_v34 = vmul.f32 %v1300_v32, %v1292_v63 }
 0x1cd   : > { %1301 = vrcp.f32 %v523_v27 }
 0x1d3   : > { %v1302_v33 = vpop.eup %1301 }
 0x1d4   : > { %v531_v35 = vmul.f32 %v1302_v33, %v1294_v2 }
 0x1d6   : > { %v533_v36 = vpack.c.bf16 %v531_v35, %v530_v34 }
 0x1d7   : > { %v814_v42 = vpop.permute.xlu0 %813 }
 0x1d8   : > { %1173 = vmatmul.msk.bf16.gmra.mxu1 %vm449_vm0, %v533_v36 }
 0x1e4   : > { %v820_v38 = vpop.permute.xlu1 %819 }
 0x1e5   : > { %v831_v39 = vsel %vm449_vm0, %v820_v38, 0 }
 0x1e6   : > { %839 = vmatpush.bf16.xpose.msrb.mxu0 %v831_v39 }
 0x1e8   : > { %1178 = vmatmul.msk.bf16.vlgmr.msrb.gmra.mxu1 %vm449_vm0, %v694_v40 }
 0x1ec   : > { %v816_v44 = vpop.permute.xlu1 %815 }
 0x1ee   : > { %840 = vmatpush.bf16.xpose.msrb.mxu0 %v828_v41 }
 0x1f5   : > { %1182 = vmatmul.msk.bf16.vlgmr.msrb.gmra.mxu0 %vm449_vm0, %v814_v42 }
 0x1f8   : > { %1179 = vmatmul.msk.bf16.gmra.mxu1 %vm449_vm0, %v696_v43 }
 0x202   : > { %v618_v62 = vpop.xlane.xlu0 %617 }
 0x203   : > { %v628_v0 = vsub.f32 %v1551_v13, %v618_v62 }
 0x205   : > { %1183 = vmatmul.msk.bf16.gmra.mxu0 %vm449_vm0, %v816_v44  ;;  %v632_v1 = vmul.f32 1.442695, %v628_v0 }
 0x207   : > { %1303 = vpow2.f32 %v632_v1 }
 0x20a   : > { %v627_v10 = vpop.xlane.xlu0 %626 }
 0x20b   : > { %v631_v35 = vsub.f32 %v1569_v28, %v627_v10 }
 0x20d   : > { %v1615_v3 = vpop.eup %1303 }
 0x20e   : > { %v640_v6 = vsel %vm449_vm0, %v1615_v3, 0.0 }
 0x217   : > { %v624_v24 = vpop.xlane.xlu1 %623 }
 0x218   : > { %v630_v30 = vsub.f32 %v1565_v25, %v624_v24  ;;  %v638_v25 = vmul.f32 1.442695, %v631_v35 }
 0x21a   : > { %v636_v14 = vmul.f32 1.442695, %v630_v30 }
 0x245   : > { %v1582_v45 = vpop.f32.mrf.mxu1 }
 0x24d   : > { %v1587_v49 = vpop.f32.mrf.mxu1 }
 0x255   : > { %v1592_v53 = vpop.f32.mrf.mxu1 }
 0x25d   : > { %v1606_v59 = vpop.f32.mrf.mxu1 }
 0x265   : > { %v722_v61 = vpop.f32.mrf.mxu1 }
 0x266   : > { %v732_v28 = vsel %vm483_vm1, %v722_v61, -1e+30 }
 0x26d   : > { %v724_v63 = vpop.f32.mrf.mxu1 }
 0x26e   : > { %v733_v23 = vsel %vm483_vm1, %v724_v63, -1e+30 }
 0x26f   : > { %v739_v26 = vsel %vm449_vm0, %v733_v23, -inf }
 0x272   : > { %v842_v46 = vpop.f32.mrf.mxu0 }
 0x273   : > { %v852_v47 = vsel %vm483_vm1, %v842_v46, -1e+30  ;;  %v736_v46 = vsel %vm449_vm0, %v732_v28, -inf }
 0x274   : > { %v856_v48 = vsel %vm449_vm0, %v852_v47, -inf }
 0x275   : > { %857 = vmax.xlane.f32.xlu0 %v856_v48  ;;  %v727_v2 = vpop.f32.mrf.mxu1 }
 0x276   : > { %v1637_v32 = vsel %vm483_vm1, %v727_v2, -1e+30 }
 0x277   : > { %v742_v34 = vsel %vm449_vm0, %v1637_v32, -inf }
 0x27a   : > { %v844_v50 = vpop.f32.mrf.mxu0 }
 0x27b   : > { %v853_v51 = vsel %vm483_vm1, %v844_v50, -1e+30 }
 0x27c   : > { %v859_v52 = vsel %vm449_vm0, %v853_v51, -inf }
 0x27d   : > { %860 = vmax.xlane.f32.xlu2 %v859_v52  ;;  %v729_v7 = vpop.f32.mrf.mxu1 }
 0x27e   : > { %v1621_v8 = vsel %vm483_vm1, %v729_v7, -1e+30 }
 0x27f   : > { %v745_v9 = vsel %vm449_vm0, %v1621_v8, -inf }
 0x282   : > { %v847_v54 = vpop.f32.mrf.mxu0 }
 0x283   : > { %v1596_v55 = vsel %vm483_vm1, %v847_v54, -1e+30 }
 0x284   : > { %v862_v56 = vsel %vm449_vm0, %v1596_v55, -inf }
 0x285   : > { %863 = vmax.xlane.f32.xlu2 %v862_v56 }
 0x289   : > { %662 = vrot.lane.b32.xlu0 %v1545_v5, %s1391_s12 }
 0x28a   : > { %v849_v57 = vpop.f32.mrf.mxu0 }
 0x28b   : > { %v1604_v58 = vsel %vm483_vm1, %v849_v57, -1e+30 }
 0x28c   : > { %v865_v60 = vsel %vm449_vm0, %v1604_v58, -inf }
 0x28d   : > { %866 = vmax.xlane.f32.xlu1 %v865_v60 }
 0x29d   : > { %784 = vrot.lane.b32.xlu2 %v1542_v4, %s1392_s27 }
 0x2a6   : > { %664 = vrot.lane.b32.xlu1 %v1542_v4, %s1391_s12 }
 0x2b3   : > { %641 = vadd.xlane.f32.xlu0 %v640_v6 }
 0x2bb   : > { %746 = vmax.xlane.f32.xlu0 %v745_v9 }
 0x2e8   : > { %v858_v12 = vpop.xlane.xlu0 %857 }
 0x2e9   : > { %v868_v13 = vsub.f32 %v852_v47, %v858_v12 }
 0x2eb   : > { %v872_v15 = vmul.f32 1.442695, %v868_v13 }
 0x2ed   : > { %1305 = vpow2.f32 %v872_v15 }
 0x2f0   : > { %v861_v16 = vpop.xlane.xlu2 %860 }
 0x2f1   : > { %v869_v17 = vsub.f32 %v853_v51, %v861_v16 }
 0x2f3   : > { %v1625_v18 = vpop.eup %1305  ;;  %v874_v20 = vmul.f32 1.442695, %v869_v17 }
 0x2f4   : > { %v880_v21 = vsel %vm449_vm0, %v1625_v18, 0.0 }
 0x2f5   : > { %1307 = vpow2.f32 %v874_v20  ;;  %881 = vadd.xlane.f32.xlu1 %v880_v21 }
 0x2f6   : > { %1309 = vpow2.f32 %v634_v22 }
 0x2f7   : > { %1311 = vpow2.f32 %v636_v14 }
 0x2f8   : > { %1313 = vpow2.f32 %v638_v25  ;;  %v864_v41 = vpop.xlane.xlu2 %863 }
 0x2f9   : > { %v870_v48 = vsub.f32 %v1596_v55, %v864_v41 }
 0x2fb   : > { %v1308_v27 = vpop.eup %1307  ;;  %v663_v47 = vpop.permute.xlu0 %662  ;;  %v876_v50 = vmul.f32 1.442695, %v870_v48 }
 0x2fc   : > { %v883_v31 = vsel %vm449_vm0, %v1308_v27, 0.0  ;;  %v1310_v33 = vpop.eup %1309 }
 0x2fd   : > { %884 = vadd.xlane.f32.xlu2 %v883_v31  ;;  %740 = vmax.xlane.f32.xlu1 %v739_v26  ;;  %v643_v36 = vsel %vm449_vm0, %v1310_v33, 0.0  ;;  %v1312_v37 = vpop.eup %1311  ;;  %1315 = vpow2.f32 %v876_v50 }
 0x2fe   : > { %v646_v38 = vsel %vm449_vm0, %v1312_v37, 0.0  ;;  %v1314_v40 = vpop.eup %1313 }
 0x2ff   : > { %v649_v42 = vsel %vm449_vm0, %v1314_v40, 0.0 }
 0x300   : > { %v1644_v39 = vpop.xlane.xlu1 %866  ;;  %v785_v44 = vpop.permute.xlu2 %784 }
 0x303   : > { %v1653_v51 = vpop.eup %1315 }
 0x304   : > { %v886_v29 = vsel %vm449_vm0, %v1653_v51, 0.0 }
 0x305   : > { %644 = vadd.xlane.f32.xlu2 %v643_v36  ;;  %743 = vmax.xlane.f32.xlu1 %v742_v34  ;;  %v871_v36 = vsub.f32 %v1604_v58, %v1644_v39 }
 0x307   : > { %v878_v25 = vmul.f32 1.442695, %v871_v36 }
 0x30d   : > { %647 = vadd.xlane.f32.xlu2 %v646_v38 }
 0x315   : > { %650 = vadd.xlane.f32.xlu2 %v649_v42 }
 0x318   : > { %v665_v43 = vpop.permute.xlu1 %664 }
 0x319   : > { %680 = vmatpush.bf16.msra.mxu3 %v665_v43 }
 0x31d   : > { %737 = vmax.xlane.f32.xlu2 %v736_v46  ;;  %681 = vmatpush.bf16.msra.mxu3 %v663_v47 }
 0x31e   : > { %902 = vrot.lane.b32.xlu1 %v1545_v5, %s1393_s28 }
 0x321   : > { %800 = vmatpush.bf16.msrb.mxu3 %v785_v44 }
 0x326   : > { %v642_v61 = vpop.xlane.xlu0 %641 }
 0x348   : > { %887 = vadd.xlane.f32.xlu1 %v886_v29 }
 0x368   : > { %v882_v52 = vpop.xlane.xlu1 %881 }
 0x369   : > { %1317 = vrcp.f32 %v882_v52 }
 0x36f   : > { %v1318_v62 = vpop.eup %1317 }
 0x370   : > { %v885_v54 = vpop.xlane.xlu2 %884  ;;  %v741_v56 = vpop.xlane.xlu1 %740  ;;  %v1658_v55 = vmul.f32 %v1318_v62, %v1625_v18 }
 0x371   : > { %1319 = vrcp.f32 %v885_v54  ;;  %v749_v57 = vsub.f32 %v733_v23, %v741_v56 }
 0x373   : > { %v754_v60 = vmul.f32 1.442695, %v749_v57 }
 0x375   : > { %1321 = vpow2.f32 %v754_v60 }
 0x376   : > { %1323 = vrcp.f32 %v642_v61 }
 0x377   : > { %v1320_v63 = vpop.eup %1319 }
 0x378   : > { %v1660_v0 = vmul.f32 %v1320_v63, %v1308_v27  ;;  %v645_v1 = vpop.xlane.xlu2 %644  ;;  %v747_v27 = vpop.xlane.xlu0 %746 }
 0x379   : > { %1325 = vrcp.f32 %v645_v1  ;;  %v751_v30 = vsub.f32 %v1621_v8, %v747_v27 }
 0x37a   : > { %v900_v2 = vpack.c.bf16 %v1660_v0, %v1658_v55 }
 0x37b   : > { %v1322_v6 = vpop.eup %1321  ;;  %v758_v31 = vmul.f32 1.442695, %v751_v30 }
 0x37c   : > { %v763_v7 = vsel %vm449_vm0, %v1322_v6, 0.0  ;;  %v1324_v9 = vpop.eup %1323 }
 0x37d   : > { %764 = vadd.xlane.f32.xlu0 %v763_v7  ;;  %v656_v12 = vmul.f32 %v1324_v9, %v1615_v3 }
 0x37f   : > { %v1326_v10 = vpop.eup %1325 }
 0x380   : > { %v648_v11 = vpop.xlane.xlu2 %647  ;;  %v657_v13 = vmul.f32 %v1326_v10, %v1310_v33  ;;  %v744_v33 = vpop.xlane.xlu1 %743 }
 0x381   : > { %1327 = vrcp.f32 %v648_v11  ;;  %v750_v34 = vsub.f32 %v1637_v32, %v744_v33 }
 0x382   : > { %v660_v15 = vpack.c.bf16 %v657_v13, %v656_v12 }
 0x383   : > { %v756_v35 = vmul.f32 1.442695, %v750_v34 }
 0x384   : > { %1176 = vmatmul.msk.bf16.vlgmr.msra.gmra.mxu3 %vm449_vm0, %v660_v15 }
 0x387   : > { %v1328_v17 = vpop.eup %1327 }
 0x388   : > { %v651_v16 = vpop.xlane.xlu2 %650  ;;  %v658_v20 = vmul.f32 %v1328_v17, %v1312_v37 }
 0x389   : > { %1329 = vrcp.f32 %v651_v16 }
 0x38f   : > { %v1330_v18 = vpop.eup %1329 }
 0x390   : > { %v738_v19 = vpop.xlane.xlu2 %737  ;;  %v659_v21 = vmul.f32 %v1330_v18, %v1314_v40  ;;  %v903_v29 = vpop.permute.xlu1 %902 }
 0x391   : > { %v748_v22 = vsub.f32 %v732_v28, %v738_v19  ;;  %782 = vrot.lane.b32.xlu0 %v1545_v5, %s1392_s27 }
 0x392   : > { %v661_v23 = vpack.c.bf16 %v659_v21, %v658_v20 }
 0x393   : > { %v752_v24 = vmul.f32 1.442695, %v748_v22 }
 0x394   : > { %1177 = vmatmul.msk.bf16.gmra.mxu3 %vm449_vm0, %v661_v23 }
 0x395   : > { %1331 = vpow2.f32 %v752_v24 }
 0x396   : > { %1333 = vpow2.f32 %v758_v31 }
 0x397   : > { %1335 = vpow2.f32 %v756_v35 }
 0x398   : > { %1337 = vpow2.f32 %v878_v25 }
 0x39b   : > { %v1332_v3 = vpop.eup %1331 }
 0x39c   : > { %v760_v26 = vsel %vm449_vm0, %v1332_v3, 0.0  ;;  %v1334_v14 = vpop.eup %1333 }
 0x39d   : > { %761 = vadd.xlane.f32.xlu2 %v760_v26  ;;  %v769_v5 = vsel %vm449_vm0, %v1334_v14, 0.0  ;;  %v1336_v37 = vpop.eup %1335 }
 0x39e   : > { %v766_v8 = vsel %vm449_vm0, %v1336_v37, 0.0  ;;  %v1338_v38 = vpop.eup %1337 }
 0x3b5   : > { %904 = vrot.lane.b32.xlu2 %v1542_v4, %s1393_s28  ;;  %v889_v4 = vsel %vm449_vm0, %v1338_v38, 0.0 }
 0x3bb   : > { %770 = vadd.xlane.f32.xlu0 %v769_v5  ;;  %v888_v60 = vpop.xlane.xlu1 %887 }
 0x3de   : > { %767 = vadd.xlane.f32.xlu2 %v766_v8 }
 0x3e6   : > { %890 = vadd.xlane.f32.xlu2 %v889_v4 }
 0x3f0   : > { %v765_v40 = vpop.xlane.xlu0 %764 }
 0x3f1   : > { %1339 = vrcp.f32 %v765_v40 }
 0x3f7   : > { %v1340_v58 = vpop.eup %1339 }
 0x3f8   : > { %v777_v46 = vmul.f32 %v1340_v58, %v1322_v6 }
 0x403   : > { %v783_v41 = vpop.permute.xlu0 %782 }
 0x404   : > { %801 = vmatpush.bf16.msrb.mxu3 %v783_v41 }
 0x407   : > { %v683_v42 = vpop.f32.mrf.mxu3 }
 0x40f   : > { %v685_v32 = vpop.f32.mrf.mxu3 }
 0x410   : > { %v1257_v43 = vpack.i.bf16 %v685_v32, %v683_v42  ;;  %v762_v28 = vpop.xlane.xlu2 %761 }
 0x411   : > { %1341 = vrcp.f32 %v762_v28 }
 0x412   : > { %1258 = vrot.lane.b32.xlu2 %v1257_v43, %s1393_s28 }
 0x417   : > { %v1342_v39 = vpop.eup %1341  ;;  %v688_v44 = vpop.f32.mrf.mxu3 }
 0x418   : > { %v776_v47 = vmul.f32 %v1342_v39, %v1332_v3  ;;  %v905_v48 = vpop.permute.xlu2 %904 }
 0x419   : > { %920 = vmatpush.bf16.msrb.mxu2 %v905_v48 }
 0x41a   : > { %v780_v50 = vpack.c.bf16 %v777_v46, %v776_v47 }
 0x41c   : > { %1180 = vmatmul.msk.bf16.vlgmr.msrb.gmra.mxu3 %vm449_vm0, %v780_v50 }
 0x41d   : > { %921 = vmatpush.bf16.msrb.mxu2 %v903_v29 }
 0x41f   : > { %v690_v52 = vpop.f32.mrf.mxu3 }
 0x420   : > { %v1262_v54 = vpack.i.bf16 %v690_v52, %v688_v44  ;;  %1184 = vmatmul.msk.bf16.vlgmr.msrb.gmra.mxu2 %vm449_vm0, %v900_v2 }
 0x422   : > { %1263 = vrot.lane.b32.xlu0 %v1262_v54, %s1393_s28 }
 0x42e   : > { %v771_v56 = vpop.xlane.xlu0 %770 }
 0x42f   : > { %1343 = vrcp.f32 %v771_v56 }
 0x435   : > { %v1344_v61 = vpop.eup %1343 }
 0x436   : > { %v779_v6 = vmul.f32 %v1344_v61, %v1334_v14 }
 0x451   : > { %v768_v57 = vpop.xlane.xlu2 %767 }
 0x452   : > { %1345 = vrcp.f32 %v768_v57 }
 0x453   : > { %1347 = vrcp.f32 %v888_v60 }
 0x458   : > { %v1346_v62 = vpop.eup %1345 }
 0x459   : > { %v891_v63 = vpop.xlane.xlu2 %890  ;;  %v778_v1 = vmul.f32 %v1346_v62, %v1336_v37  ;;  %v1348_v55 = vpop.eup %1347 }
 0x45a   : > { %1349 = vrcp.f32 %v891_v63  ;;  %v898_v2 = vmul.f32 %v1348_v55, %v1653_v51 }
 0x45b   : > { %v781_v7 = vpack.c.bf16 %v779_v6, %v778_v1 }
 0x45d   : > { %1181 = vmatmul.msk.bf16.gmra.mxu3 %vm449_vm0, %v781_v7 }
 0x460   : > { %v1350_v0 = vpop.eup %1349 }
 0x461   : > { %v899_v9 = vmul.f32 %v1350_v0, %v1338_v38 }
 0x463   : > { %v901_v10 = vpack.c.bf16 %v899_v9, %v898_v2 }
 0x465   : > { %1185 = vmatmul.msk.bf16.gmra.mxu2 %vm449_vm0, %v901_v10 }
 0x46c   : > { %v1259_v24 = vpop.permute.xlu2 %1258 }
 0x46d   : > { %v1261_v26 = vunpack.i.h.bf16 %v1259_v24  ;;  %v1260_v27 = vunpack.i.l.bf16 %v1259_v24 }
 0x46f   : > { %v982_v5 = vsel %vm449_vm0, %v1587_v49, %v1261_v26  ;;  %v981_v33 = vsel %vm449_vm0, %v1582_v45, %v1260_v27 }
 0x494   : > { %v1264_v23 = vpop.permute.xlu0 %1263 }
 0x495   : > { %v1266_v4 = vunpack.i.h.bf16 %v1264_v23  ;;  %v1265_v40 = vunpack.i.l.bf16 %v1264_v23 }
 0x497   : > { %v984_v32 = vsel %vm449_vm0, %v1606_v59, %v1266_v4  ;;  %v983_v43 = vsel %vm449_vm0, %v1592_v53, %v1265_v40 }
 0x49f   : > { %v803_v11 = vpop.f32.mrf.mxu3 }
 0x4a3   : > { %v923_v12 = vpop.f32.mrf.mxu2 }
 0x4a7   : > { %v805_v13 = vpop.f32.mrf.mxu3 }
 0x4a8   : > { %v1267_v15 = vpack.i.bf16 %v805_v13, %v803_v11 }
 0x4aa   : > { %1268 = vrot.lane.b32.xlu1 %v1267_v15, %s1392_s27 }
 0x4ab   : > { %v925_v16 = vpop.f32.mrf.mxu2 }
 0x4ac   : > { %v1277_v17 = vpack.i.bf16 %v925_v16, %v923_v12 }
 0x4ae   : > { %1278 = vrot.lane.b32.xlu0 %v1277_v17, %s1391_s12 }
 0x4e0   : > { %v808_v18 = vpop.f32.mrf.mxu3 }
 0x4e8   : > { %v810_v19 = vpop.f32.mrf.mxu3  ;;  %v928_v20 = vpop.f32.mrf.mxu2 }
 0x4e9   : > { %v1272_v51 = vpack.i.bf16 %v810_v19, %v808_v18 }
 0x4eb   : > { %1273 = vrot.lane.b32.xlu2 %v1272_v51, %s1392_s27 }
 0x4f0   : > { %v930_v21 = vpop.f32.mrf.mxu2 }
 0x4f1   : > { %v1282_v22 = vpack.i.bf16 %v930_v21, %v928_v20 }
 0x4f3   : > { %1283 = vrot.lane.b32.xlu2 %v1282_v22, %s1391_s12 }
 0x51c   : > { %v1269_v3 = vpop.permute.xlu1 %1268 }
 0x51d   : > { %v1271_v30 = vunpack.i.h.bf16 %v1269_v3  ;;  %v1270_v31 = vunpack.i.l.bf16 %v1269_v3 }
 0x51f   : > { %v987_v36 = vsel %vm985_vm2, %v982_v5, %v1271_v30  ;;  %v986_v25 = vsel %vm985_vm2, %v981_v33, %v1270_v31 }
 0x520   : > { %v1279_v14 = vpop.permute.xlu0 %1278 }
 0x521   : > { %v1281_v34 = vunpack.i.h.bf16 %v1279_v14  ;;  %v1280_v35 = vunpack.i.l.bf16 %v1279_v14 }
 0x523   : > { %v991_v37 = vsel %vm990_vm3, %v986_v25, %v1280_v35  ;;  %v992_v8 = vsel %vm990_vm3, %v987_v36, %v1281_v34 }
 0x524   : > { %v1204_v38 = vpack.c.bf16 %v992_v8, %v991_v37 }
 0x526   : > { %1205 = vst [vmem:[%s415_s6] sm:$0xff] %v1204_v38  }
 0x545   : > { %v1274_v49 = vpop.permute.xlu2 %1273 }
 0x546   : > { %v1276_v45 = vunpack.i.h.bf16 %v1274_v49  ;;  %v1275_v41 = vunpack.i.l.bf16 %v1274_v49 }
 0x548   : > { %v989_v39 = vsel %vm985_vm2, %v984_v32, %v1276_v45  ;;  %v988_v44 = vsel %vm985_vm2, %v983_v43, %v1275_v41 }
 0x54d   : > { %v1284_v42 = vpop.permute.xlu2 %1283 }
 0x54e   : > { %v1286_v28 = vunpack.i.h.bf16 %v1284_v42  ;;  %v1285_v58 = vunpack.i.l.bf16 %v1284_v42 }
 0x550   : > { %v994_v46 = vsel %vm990_vm3, %v989_v39, %v1286_v28  ;;  %v993_v47 = vsel %vm990_vm3, %v988_v44, %v1285_v58 }
 0x551   : > { %v1209_v48 = vpack.c.bf16 %v994_v46, %v993_v47 }
 0x553   : > { %1212 = vst [vmem:[%s415_s6 + $0x8] sm:$0xff] %v1209_v48  }
 0x554 PF: > { %s13_s16 = sadd.s32 1, %s1389_s16   ;;  %s1735_s12 = smov %s1377_s13 }
 0x555   : > { %p10_p10 = scmp.ge.s32.totalorder %s13_s16, 4   ;;  %s1736_s13 = smov %s1453_s21 }
 0x556   : > { %s1737_s14 = smov %s1385_s15  ;;  %s1738_s15 = smov %s1740_s17 }
 0x557   :  { %12 = sbr.rel (!%p10_p10) target bundleno = 3 (0x3), region = 206 }

// kernel: vision_transformer_forward.26
= control target key start
LH: loop header
LB: loop body
LE: loop exit
PB: predicated region body
PF: predicated region fallthrough
CT: control target
= control target key end

     0   :  { %s395_s1 = inlined_call_operand.vmem [shape: bf16[128,128], index: 1, kind: input, shape index: {}]   ;;  %s396_s0 = inlined_call_operand.vmem [shape: bf16[64,128], index: 0, kind: input, shape index: {}]   ;;  %s397_s2 = inlined_call_operand.vmem [shape: bf16[1,128], index: 2, kind: input, shape index: {}]   ;;  %s398_s3 = inlined_call_operand.vmem [shape: bf16[64,128], index: 3, kind: output, shape index: {}]  }
   0x1   :  { %v276_v0 = vld [vmem:[%s395_s1 + $0x38] sm:$0xff]  ;;  %v275_v1 = vld [vmem:[%s395_s1 + $0x30] sm:$0xff]  ;;  %v274_v2 = vld [vmem:[%s395_s1 + $0x28] sm:$0xff] }
   0x2   :  { %130 = vmatpush.bf16.msra.mxu0 %v276_v0  ;;  %300 = vmatpush.bf16.msra.mxu1 %v276_v0  ;;  %v273_v3 = vld [vmem:[%s395_s1 + $0x20] sm:$0xff]  ;;  %v272_v4 = vld [vmem:[%s395_s1 + $0x18] sm:$0xff]  ;;  %v271_v5 = vld [vmem:[%s395_s1 + $0x10] sm:$0xff] }
   0x3   :  { %301 = vmatpush.bf16.msra.mxu2 %v276_v0  ;;  %302 = vmatpush.bf16.msra.mxu3 %v276_v0  ;;  %v270_v6 = vld [vmem:[%s395_s1 + $0x8] sm:$0xff]  ;;  %v269_v7 = vld [vmem:[%s395_s1] sm:$0xff]  ;;  %v267_v10 = vld [vmem:[%s396_s0 + $0x10] sm:$0xff] }
   0x4   :  { %v265_v8 = vld [vmem:[%s396_s0] sm:$0xff]  ;;  %v266_v9 = vld [vmem:[%s396_s0 + $0x8] sm:$0xff]  ;;  %v268_v11 = vld [vmem:[%s396_s0 + $0x18] sm:$0xff] }
   0x5   :  { %v186_v12 = vld [vmem:[%s397_s2] sm:$0x1] }
   0x6   :  { %131 = vmatpush.bf16.msra.mxu0 %v275_v1  ;;  %303 = vmatpush.bf16.msra.mxu1 %v275_v1  ;;  %v187_v15 = vunpack.c.l.bf16 %v186_v12 }
   0x7   :  { %304 = vmatpush.bf16.msra.mxu2 %v275_v1  ;;  %305 = vmatpush.bf16.msra.mxu3 %v275_v1 }
   0x8   :  { %v188_v16 = vperm.slane %v187_v15, 0 }
   0xa   :  { %132 = vmatpush.bf16.msra.mxu0 %v274_v2  ;;  %306 = vmatpush.bf16.msra.mxu1 %v274_v2 }
   0xb   :  { %307 = vmatpush.bf16.msra.mxu2 %v274_v2  ;;  %308 = vmatpush.bf16.msra.mxu3 %v274_v2 }
   0xe   :  { %133 = vmatpush.bf16.msra.mxu0 %v273_v3  ;;  %309 = vmatpush.bf16.msra.mxu1 %v273_v3 }
   0xf   :  { %310 = vmatpush.bf16.msra.mxu2 %v273_v3  ;;  %311 = vmatpush.bf16.msra.mxu3 %v273_v3 }
  0x12   :  { %134 = vmatpush.bf16.msra.mxu0 %v272_v4  ;;  %312 = vmatpush.bf16.msra.mxu1 %v272_v4 }
  0x13   :  { %313 = vmatpush.bf16.msra.mxu2 %v272_v4  ;;  %314 = vmatpush.bf16.msra.mxu3 %v272_v4 }
  0x16   :  { %135 = vmatpush.bf16.msra.mxu0 %v271_v5  ;;  %315 = vmatpush.bf16.msra.mxu1 %v271_v5 }
  0x17   :  { %316 = vmatpush.bf16.msra.mxu2 %v271_v5  ;;  %317 = vmatpush.bf16.msra.mxu3 %v271_v5 }
  0x1a   :  { %136 = vmatpush.bf16.msra.mxu0 %v270_v6  ;;  %318 = vmatpush.bf16.msra.mxu1 %v270_v6 }
  0x1b   :  { %319 = vmatpush.bf16.msra.mxu2 %v270_v6  ;;  %320 = vmatpush.bf16.msra.mxu3 %v270_v6 }
  0x1e   :  { %137 = vmatpush.bf16.msra.mxu0 %v269_v7  ;;  %321 = vmatpush.bf16.msra.mxu1 %v269_v7 }
  0x1f   :  { %322 = vmatpush.bf16.msra.mxu2 %v269_v7  ;;  %323 = vmatpush.bf16.msra.mxu3 %v269_v7 }
  0x21   :  { %138 = vmatmul.bf16.vlgmr.msra.gmra.mxu0 %v265_v8  ;;  %143 = vmatmul.bf16.vlgmr.msra.gmra.mxu1 %v266_v9 }
  0x22   :  { %148 = vmatmul.bf16.vlgmr.msra.gmra.mxu2 %v267_v10  ;;  %153 = vmatmul.bf16.vlgmr.msra.gmra.mxu3 %v268_v11 }
  0x9e   :  { %v139_v13 = vpop.f32.mrf.mxu0  ;;  %v144_v14 = vpop.f32.mrf.mxu1 }
  0x9f   :  { %v189_v21 = vadd.f32 %v188_v16, %v139_v13  ;;  %v191_v22 = vadd.f32 %v188_v16, %v144_v14 }
  0xa5   :  { %v149_v17 = vpop.f32.mrf.mxu2  ;;  %v154_v18 = vpop.f32.mrf.mxu3 }
  0xa6   :  { %v141_v19 = vpop.f32.mrf.mxu0  ;;  %v146_v20 = vpop.f32.mrf.mxu1  ;;  %v193_v29 = vadd.f32 %v188_v16, %v149_v17  ;;  %v195_v30 = vadd.f32 %v188_v16, %v154_v18 }
  0xa7   :  { %v190_v23 = vadd.f32 %v188_v16, %v141_v19  ;;  %v192_v24 = vadd.f32 %v188_v16, %v146_v20 }
  0xa9   :  { %v280_v25 = vpack.c.bf16 %v190_v23, %v189_v21  ;;  %v285_v26 = vpack.c.bf16 %v192_v24, %v191_v22 }
  0xab   :  { %281 = vst [vmem:[%s398_s3] sm:$0xff] %v280_v25  }
  0xac   :  { %297 = vst [vmem:[%s398_s3 + $0x8] sm:$0xff] %v285_v26  }
  0xad   :  { %v151_v27 = vpop.f32.mrf.mxu2  ;;  %v156_v28 = vpop.f32.mrf.mxu3 }
  0xae   :  { %v194_v31 = vadd.f32 %v188_v16, %v151_v27  ;;  %v196_v32 = vadd.f32 %v188_v16, %v156_v28 }
  0xb0   :  { %v290_v33 = vpack.c.bf16 %v194_v31, %v193_v29  ;;  %v295_v34 = vpack.c.bf16 %v196_v32, %v195_v30 }
  0xb2   :  { %298 = vst [vmem:[%s398_s3 + $0x10] sm:$0xff] %v290_v33  }
  0xb3   :  { %299 = vst [vmem:[%s398_s3 + $0x18] sm:$0xff] %v295_v34  }

// kernel: vision_transformer_forward.27
= control target key start
LH: loop header
LB: loop body
LE: loop exit
PB: predicated region body
PF: predicated region fallthrough
CT: control target
= control target key end

     0   :  { %vm18_vm0 = vcmask 523264   ;;  %v313_v2 = vmov 0.0   ;;  %vm215_vm1 = vcmask 519168   ;;  %s421_s1 = inlined_call_operand.vmem [shape: bf16[128,64], index: 1, kind: input, shape index: {}]   ;;  %s422_s0 = inlined_call_operand.vmem [shape: bf16[64,128], index: 0, kind: input, shape index: {}]   ;;  %s423_s2 = inlined_call_operand.vmem [shape: bf16[1,64], index: 2, kind: input, shape index: {}]   ;;  %s424_s3 = inlined_call_operand.vmem [shape: bf16[64,64], index: 3, kind: output, shape index: {}]  }
   0x1   :  { %v287_v0 = vld [vmem:[%s421_s1 + $0x38] sm:$0xff]  ;;  %v286_v1 = vld [vmem:[%s421_s1 + $0x30] sm:$0xff]  ;;  %19 = vst.msk [vmem:[#allocation2] sm:$0xff] %vm18_vm0, %v313_v2  ;;  %v285_v3 = vld [vmem:[%s421_s1 + $0x28] sm:$0xff] }
   0x2   :  { %131 = vmatpush.bf16.msra.mxu0 %v287_v0  ;;  %288 = vmatpush.bf16.msra.mxu1 %v287_v0  ;;  %20 = vst.msk [vmem:[#allocation2 + $0x8] sm:$0xff] %vm18_vm0, %v313_v2  ;;  %v284_v4 = vld [vmem:[%s421_s1 + $0x20] sm:$0xff]  ;;  %v283_v5 = vld [vmem:[%s421_s1 + $0x18] sm:$0xff]  ;;  %v282_v6 = vld [vmem:[%s421_s1 + $0x10] sm:$0xff] }
   0x3   :  { %289 = vmatpush.bf16.msra.mxu2 %v287_v0  ;;  %290 = vmatpush.bf16.msra.mxu3 %v287_v0  ;;  %21 = vst.msk [vmem:[#allocation2 + $0x10] sm:$0xff] %vm18_vm0, %v313_v2  ;;  %v281_v7 = vld [vmem:[%s421_s1 + $0x8] sm:$0xff]  ;;  %v280_v8 = vld [vmem:[%s421_s1] sm:$0xff]  ;;  %v278_v11 = vld [vmem:[%s422_s0 + $0x10] sm:$0xff] }
   0x4   :  { %22 = vst.msk [vmem:[#allocation2 + $0x18] sm:$0xff] %vm18_vm0, %v313_v2  ;;  %v276_v9 = vld [vmem:[%s422_s0] sm:$0xff]  ;;  %v277_v10 = vld [vmem:[%s422_s0 + $0x8] sm:$0xff]  ;;  %v279_v12 = vld [vmem:[%s422_s0 + $0x18] sm:$0xff] }
   0x5   :  { %23 = vst.msk [vmem:[#allocation2 + $0x20] sm:$0xff] %vm18_vm0, %v313_v2  ;;  %v188_v16 = vld [vmem:[%s423_s2] sm:$0x1] }
   0x6   :  { %132 = vmatpush.bf16.msra.mxu0 %v286_v1  ;;  %291 = vmatpush.bf16.msra.mxu1 %v286_v1  ;;  %24 = vst.msk [vmem:[#allocation2 + $0x28] sm:$0xff] %vm18_vm0, %v313_v2  ;;  %v189_v20 = vunpack.c.l.bf16 %v188_v16 }
   0x7   :  { %292 = vmatpush.bf16.msra.mxu2 %v286_v1  ;;  %293 = vmatpush.bf16.msra.mxu3 %v286_v1  ;;  %25 = vst.msk [vmem:[#allocation2 + $0x30] sm:$0xff] %vm18_vm0, %v313_v2 }
   0x8   :  { %26 = vst.msk [vmem:[#allocation2 + $0x38] sm:$0xff] %vm18_vm0, %v313_v2  ;;  %v27_v13 = vld [vmem:[#allocation2] sm:$0xff]  ;;  %v190_v25 = vperm.slane %v189_v20, 0 }
   0x9   :  { %v28_v23 = vld [vmem:[#allocation2 + $0x8] sm:$0xff] }
   0xa   :  { %133 = vmatpush.bf16.msra.mxu0 %v285_v3  ;;  %294 = vmatpush.bf16.msra.mxu1 %v285_v3  ;;  %v29_v14 = vld [vmem:[#allocation2 + $0x10] sm:$0xff] }
   0xb   :  { %295 = vmatpush.bf16.msra.mxu2 %v285_v3  ;;  %296 = vmatpush.bf16.msra.mxu3 %v285_v3  ;;  %v30_v24 = vld [vmem:[#allocation2 + $0x18] sm:$0xff] }
   0xc   :  { %v31_v21 = vld [vmem:[#allocation2 + $0x20] sm:$0xff] }
   0xd   :  { %v32_v39 = vld [vmem:[#allocation2 + $0x28] sm:$0xff] }
   0xe   :  { %134 = vmatpush.bf16.msra.mxu0 %v284_v4  ;;  %297 = vmatpush.bf16.msra.mxu1 %v284_v4  ;;  %v33_v22 = vld [vmem:[#allocation2 + $0x30] sm:$0xff] }
   0xf   :  { %298 = vmatpush.bf16.msra.mxu2 %v284_v4  ;;  %299 = vmatpush.bf16.msra.mxu3 %v284_v4  ;;  %v34_v40 = vld [vmem:[#allocation2 + $0x38] sm:$0xff] }
  0x12   :  { %135 = vmatpush.bf16.msra.mxu0 %v283_v5  ;;  %300 = vmatpush.bf16.msra.mxu1 %v283_v5 }
  0x13   :  { %301 = vmatpush.bf16.msra.mxu2 %v283_v5  ;;  %302 = vmatpush.bf16.msra.mxu3 %v283_v5 }
  0x16   :  { %136 = vmatpush.bf16.msra.mxu0 %v282_v6  ;;  %303 = vmatpush.bf16.msra.mxu1 %v282_v6 }
  0x17   :  { %304 = vmatpush.bf16.msra.mxu2 %v282_v6  ;;  %305 = vmatpush.bf16.msra.mxu3 %v282_v6 }
  0x1a   :  { %137 = vmatpush.bf16.msra.mxu0 %v281_v7  ;;  %306 = vmatpush.bf16.msra.mxu1 %v281_v7 }
  0x1b   :  { %307 = vmatpush.bf16.msra.mxu2 %v281_v7  ;;  %308 = vmatpush.bf16.msra.mxu3 %v281_v7 }
  0x1e   :  { %138 = vmatpush.bf16.msra.mxu0 %v280_v8  ;;  %309 = vmatpush.bf16.msra.mxu1 %v280_v8 }
  0x1f   :  { %310 = vmatpush.bf16.msra.mxu2 %v280_v8  ;;  %311 = vmatpush.bf16.msra.mxu3 %v280_v8 }
  0x21   :  { %139 = vmatmul.bf16.vlgmr.msra.gmra.mxu0 %v276_v9  ;;  %144 = vmatmul.bf16.vlgmr.msra.gmra.mxu1 %v277_v10 }
  0x22   :  { %149 = vmatmul.bf16.vlgmr.msra.gmra.mxu2 %v278_v11  ;;  %154 = vmatmul.bf16.vlgmr.msra.gmra.mxu3 %v279_v12 }
  0x9e   :  { %v140_v15 = vpop.f32.mrf.mxu0  ;;  %v145_v17 = vpop.f32.mrf.mxu1 }
  0x9f   :  { %v160_v18 = vadd.f32 %v140_v15, %v27_v13  ;;  %v162_v19 = vadd.f32 %v145_v17, %v29_v14 }
  0xa1   :  { %169 = vst.msk [vmem:[#allocation2] sm:$0xff] %vm18_vm0, %v160_v18 }
  0xa2   :  { %171 = vst.msk [vmem:[#allocation2 + $0x10] sm:$0xff] %vm18_vm0, %v162_v19 }
  0xa5   :  { %v150_v26 = vpop.f32.mrf.mxu2  ;;  %v155_v27 = vpop.f32.mrf.mxu3 }
  0xa6   :  { %v164_v28 = vadd.f32 %v150_v26, %v31_v21  ;;  %v166_v29 = vadd.f32 %v155_v27, %v33_v22  ;;  %v142_v30 = vpop.f32.mrf.mxu0  ;;  %v147_v31 = vpop.f32.mrf.mxu1 }
  0xa7   :  { %v161_v32 = vadd.f32 %v142_v30, %v28_v23  ;;  %v163_v33 = vadd.f32 %v147_v31, %v30_v24 }
  0xa8   :  { %v180_v34 = vld [vmem:[#allocation2] sm:$0xff]  ;;  %173 = vst.msk [vmem:[#allocation2 + $0x20] sm:$0xff] %vm18_vm0, %v164_v28 }
  0xa9   :  { %v191_v35 = vadd.f32 %v190_v25, %v180_v34  ;;  %v182_v36 = vld [vmem:[#allocation2 + $0x10] sm:$0xff]  ;;  %175 = vst.msk [vmem:[#allocation2 + $0x30] sm:$0xff] %vm18_vm0, %v166_v29 }
  0xaa   :  { %v193_v37 = vadd.f32 %v190_v25, %v182_v36  ;;  %170 = vst.msk [vmem:[#allocation2 + $0x8] sm:$0xff] %vm18_vm0, %v161_v32 }
  0xab   :  { %v199_v38 = vmax.f32 %v191_v35, 0.0  ;;  %172 = vst.msk [vmem:[#allocation2 + $0x18] sm:$0xff] %vm18_vm0, %v163_v33 }
  0xac   :  { %v201_v41 = vmax.f32 %v193_v37, 0.0 }
  0xad   :  { %v207_v42 = vpack.c.bf16 %v199_v38, %v199_v38  ;;  %v152_v43 = vpop.f32.mrf.mxu2  ;;  %v157_v44 = vpop.f32.mrf.mxu3 }
  0xae   :  { %v209_v45 = vpack.c.bf16 %v201_v41, %v201_v41  ;;  %v165_v46 = vadd.f32 %v152_v43, %v32_v39  ;;  %v167_v47 = vadd.f32 %v157_v44, %v34_v40 }
  0xaf   :  { %216 = vst.msk [vmem:[%s424_s3] sm:$0xf] %vm215_vm1, %v207_v42  ;;  %v184_v48 = vld [vmem:[#allocation2 + $0x20] sm:$0xff] }
  0xb0   :  { %218 = vst.msk [vmem:[%s424_s3 + $0x8] sm:$0xf] %vm215_vm1, %v209_v45  ;;  %v195_v49 = vadd.f32 %v190_v25, %v184_v48  ;;  %v186_v50 = vld [vmem:[#allocation2 + $0x30] sm:$0xff] }
  0xb1   :  { %v197_v51 = vadd.f32 %v190_v25, %v186_v50  ;;  %v181_v52 = vld [vmem:[#allocation2 + $0x8] sm:$0xff]  ;;  %174 = vst.msk [vmem:[#allocation2 + $0x28] sm:$0xff] %vm18_vm0, %v165_v46 }
  0xb2   :  { %v203_v53 = vmax.f32 %v195_v49, 0.0  ;;  %v192_v54 = vadd.f32 %v190_v25, %v181_v52  ;;  %v183_v55 = vld [vmem:[#allocation2 + $0x18] sm:$0xff]  ;;  %176 = vst.msk [vmem:[#allocation2 + $0x38] sm:$0xff] %vm18_vm0, %v167_v47 }
  0xb3   :  { %v205_v56 = vmax.f32 %v197_v51, 0.0  ;;  %v194_v57 = vadd.f32 %v190_v25, %v183_v55 }
  0xb4   :  { %v211_v58 = vpack.c.bf16 %v203_v53, %v203_v53  ;;  %v200_v59 = vmax.f32 %v192_v54, 0.0 }
  0xb5   :  { %v213_v60 = vpack.c.bf16 %v205_v56, %v205_v56  ;;  %v202_v61 = vmax.f32 %v194_v57, 0.0 }
  0xb6   :  { %220 = vst.msk [vmem:[%s424_s3 + $0x10] sm:$0xf] %vm215_vm1, %v211_v58  ;;  %v208_v62 = vpack.c.bf16 %v200_v59, %v200_v59 }
  0xb7   :  { %222 = vst.msk [vmem:[%s424_s3 + $0x18] sm:$0xf] %vm215_vm1, %v213_v60  ;;  %v210_v63 = vpack.c.bf16 %v202_v61, %v202_v61 }
  0xb8   :  { %217 = vst.msk [vmem:[%s424_s3 + $0x4] sm:$0xf] %vm215_vm1, %v208_v62  ;;  %v185_v0 = vld [vmem:[#allocation2 + $0x28] sm:$0xff] }
  0xb9   :  { %219 = vst.msk [vmem:[%s424_s3 + $0xc] sm:$0xf] %vm215_vm1, %v210_v63  ;;  %v196_v1 = vadd.f32 %v190_v25, %v185_v0  ;;  %v187_v2 = vld [vmem:[#allocation2 + $0x38] sm:$0xff] }
  0xba   :  { %v198_v3 = vadd.f32 %v190_v25, %v187_v2 }
  0xbb   :  { %v204_v4 = vmax.f32 %v196_v1, 0.0 }
  0xbc   :  { %v206_v5 = vmax.f32 %v198_v3, 0.0 }
  0xbd   :  { %v212_v6 = vpack.c.bf16 %v204_v4, %v204_v4 }
  0xbe   :  { %v214_v7 = vpack.c.bf16 %v206_v5, %v206_v5 }
  0xbf   :  { %221 = vst.msk [vmem:[%s424_s3 + $0x14] sm:$0xf] %vm215_vm1, %v212_v6 }
  0xc0   :  { %223 = vst.msk [vmem:[%s424_s3 + $0x1c] sm:$0xf] %vm215_vm1, %v214_v7 }

// kernel: vision_transformer_forward.28
= control target key start
LH: loop header
LB: loop body
LE: loop exit
PB: predicated region body
PF: predicated region fallthrough
CT: control target
= control target key end

     0   :  { %vm101_vm0 = vcmask 523264   ;;  %s459_s1 = inlined_call_operand.vmem [shape: bf16[64,128], index: 1, kind: input, shape index: {}]   ;;  %s460_s0 = inlined_call_operand.vmem [shape: bf16[64,64], index: 0, kind: input, shape index: {}]   ;;  %s461_s2 = inlined_call_operand.vmem [shape: bf16[1,128], index: 2, kind: input, shape index: {}]   ;;  %s462_s3 = inlined_call_operand.vmem [shape: bf16[64,128], index: 3, kind: input, shape index: {}]   ;;  %s463_s4 = inlined_call_operand.vmem [shape: bf16[64,128], index: 4, kind: input, shape index: {}]   ;;  %s464_s5 = inlined_call_operand.vmem [shape: bf16[64,128], index: 5, kind: output, shape index: {}]  }
   0x1   :  { %v292_v0 = vld [vmem:[%s459_s1 + $0x18] sm:$0xff]  ;;  %v291_v1 = vld [vmem:[%s459_s1 + $0x10] sm:$0xff]  ;;  %v290_v2 = vld [vmem:[%s459_s1 + $0x8] sm:$0xff] }
   0x2   :  { %118 = vmatpush.bf16.msra.mxu0 %v292_v0  ;;  %354 = vmatpush.bf16.msra.mxu1 %v292_v0  ;;  %v289_v3 = vld [vmem:[%s459_s1] sm:$0xff]  ;;  %v286_v5 = vld [vmem:[%s460_s0 + $0x8] sm:$0xff]  ;;  %v287_v6 = vld [vmem:[%s460_s0 + $0x10] sm:$0xff] }
   0x3   :  { %355 = vmatpush.bf16.msra.mxu2 %v292_v0  ;;  %356 = vmatpush.bf16.msra.mxu3 %v292_v0  ;;  %v285_v4 = vld [vmem:[%s460_s0] sm:$0xff]  ;;  %v288_v7 = vld [vmem:[%s460_s0 + $0x18] sm:$0xff]  ;;  %v345_v14 = vld [vmem:[%s462_s3 + $0x8] sm:$0xff]  }
   0x4   :  { %v170_v8 = vld [vmem:[%s461_s2] sm:$0x1]  ;;  %v299_v19 = vunpack.c.l.bf16 %v345_v14  ;;  %v348_v20 = vld [vmem:[%s463_s4 + $0x8] sm:$0xff]   ;;  %v300_v24 = vunpack.c.h.bf16 %v345_v14  ;;  %v346_v33 = vld [vmem:[%s462_s3 + $0x10] sm:$0xff]  }
   0x5   :  { %v171_v9 = vunpack.c.l.bf16 %v170_v8  ;;  %v294_v13 = vld [vmem:[%s462_s3] sm:$0xff]   ;;  %v315_v26 = vunpack.c.l.bf16 %v348_v20  ;;  %v316_v30 = vunpack.c.h.bf16 %v348_v20  ;;  %v347_v34 = vld [vmem:[%s462_s3 + $0x18] sm:$0xff]   ;;  %v349_v37 = vld [vmem:[%s463_s4 + $0x10] sm:$0xff]   ;;  %v303_v42 = vunpack.c.l.bf16 %v346_v33 }
   0x6   :  { %119 = vmatpush.bf16.msra.mxu0 %v291_v1  ;;  %357 = vmatpush.bf16.msra.mxu1 %v291_v1  ;;  %v295_v16 = vunpack.c.l.bf16 %v294_v13  ;;  %v310_v17 = vld [vmem:[%s463_s4] sm:$0xff]   ;;  %v296_v23 = vunpack.c.h.bf16 %v294_v13  ;;  %v350_v38 = vld [vmem:[%s463_s4 + $0x18] sm:$0xff]   ;;  %v307_v44 = vunpack.c.l.bf16 %v347_v34  ;;  %v319_v49 = vunpack.c.l.bf16 %v349_v37 }
   0x7   :  { %358 = vmatpush.bf16.msra.mxu2 %v291_v1  ;;  %359 = vmatpush.bf16.msra.mxu3 %v291_v1  ;;  %v172_v12 = vperm.slane %v171_v9, 0  ;;  %v311_v25 = vunpack.c.l.bf16 %v310_v17  ;;  %v312_v28 = vunpack.c.h.bf16 %v310_v17  ;;  %v323_v50 = vunpack.c.l.bf16 %v350_v38 }
   0x8   :  { %v304_v51 = vunpack.c.h.bf16 %v346_v33  ;;  %v308_v52 = vunpack.c.h.bf16 %v347_v34  ;;  %v320_v56 = vunpack.c.h.bf16 %v349_v37  ;;  %v324_v58 = vunpack.c.h.bf16 %v350_v38 }
   0xa   :  { %120 = vmatpush.bf16.msra.mxu0 %v290_v2  ;;  %360 = vmatpush.bf16.msra.mxu1 %v290_v2 }
   0xb   :  { %361 = vmatpush.bf16.msra.mxu2 %v290_v2  ;;  %362 = vmatpush.bf16.msra.mxu3 %v290_v2 }
   0xe   :  { %121 = vmatpush.bf16.msra.mxu0 %v289_v3  ;;  %363 = vmatpush.bf16.msra.mxu1 %v289_v3 }
   0xf   :  { %364 = vmatpush.bf16.msra.mxu2 %v289_v3  ;;  %365 = vmatpush.bf16.msra.mxu3 %v289_v3 }
  0x11   :  { %281 = vmatmul.msk.bf16.vlgmr.msra.gmra.mxu0 %vm101_vm0, %v285_v4  ;;  %282 = vmatmul.msk.bf16.vlgmr.msra.gmra.mxu1 %vm101_vm0, %v286_v5 }
  0x12   :  { %283 = vmatmul.msk.bf16.vlgmr.msra.gmra.mxu2 %vm101_vm0, %v287_v6  ;;  %284 = vmatmul.msk.bf16.vlgmr.msra.gmra.mxu3 %vm101_vm0, %v288_v7 }
  0x8e   :  { %v123_v10 = vpop.f32.mrf.mxu0  ;;  %v128_v11 = vpop.f32.mrf.mxu1 }
  0x8f   :  { %v173_v15 = vadd.f32 %v172_v12, %v123_v10  ;;  %v175_v18 = vadd.f32 %v172_v12, %v128_v11 }
  0x91   :  { %v197_v31 = vadd.f32 %v295_v16, %v173_v15  ;;  %v199_v32 = vadd.f32 %v299_v19, %v175_v18 }
  0x93   :  { %v221_v45 = vadd.f32 %v311_v25, %v197_v31  ;;  %v223_v46 = vadd.f32 %v315_v26, %v199_v32 }
  0x95   :  { %v133_v21 = vpop.f32.mrf.mxu2  ;;  %v138_v22 = vpop.f32.mrf.mxu3 }
  0x96   :  { %v125_v27 = vpop.f32.mrf.mxu0  ;;  %v130_v29 = vpop.f32.mrf.mxu1  ;;  %v177_v41 = vadd.f32 %v172_v12, %v133_v21  ;;  %v179_v43 = vadd.f32 %v172_v12, %v138_v22 }
  0x97   :  { %v174_v35 = vadd.f32 %v172_v12, %v125_v27  ;;  %v176_v36 = vadd.f32 %v172_v12, %v130_v29 }
  0x98   :  { %v201_v59 = vadd.f32 %v303_v42, %v177_v41  ;;  %v203_v60 = vadd.f32 %v307_v44, %v179_v43 }
  0x99   :  { %v198_v39 = vadd.f32 %v296_v23, %v174_v35  ;;  %v200_v40 = vadd.f32 %v300_v24, %v176_v36 }
  0x9a   :  { %v225_v1 = vadd.f32 %v319_v49, %v201_v59  ;;  %v227_v2 = vadd.f32 %v323_v50, %v203_v60 }
  0x9b   :  { %v222_v47 = vadd.f32 %v312_v28, %v198_v39  ;;  %v224_v48 = vadd.f32 %v316_v30, %v200_v40 }
  0x9d   :  { %v328_v53 = vpack.c.bf16 %v222_v47, %v221_v45  ;;  %v333_v54 = vpack.c.bf16 %v224_v48, %v223_v46  ;;  %v135_v55 = vpop.f32.mrf.mxu2  ;;  %v140_v57 = vpop.f32.mrf.mxu3 }
  0x9e   :  { %v178_v61 = vadd.f32 %v172_v12, %v135_v55  ;;  %v180_v62 = vadd.f32 %v172_v12, %v140_v57 }
  0x9f   :  { %329 = vst [vmem:[%s464_s5] sm:$0xff] %v328_v53  }
  0xa0   :  { %351 = vst [vmem:[%s464_s5 + $0x8] sm:$0xff] %v333_v54   ;;  %v202_v63 = vadd.f32 %v304_v51, %v178_v61  ;;  %v204_v0 = vadd.f32 %v308_v52, %v180_v62 }
  0xa2   :  { %v226_v3 = vadd.f32 %v320_v56, %v202_v63  ;;  %v228_v4 = vadd.f32 %v324_v58, %v204_v0 }
  0xa4   :  { %v338_v5 = vpack.c.bf16 %v226_v3, %v225_v1  ;;  %v343_v6 = vpack.c.bf16 %v228_v4, %v227_v2 }
  0xa6   :  { %352 = vst [vmem:[%s464_s5 + $0x10] sm:$0xff] %v338_v5  }
  0xa7   :  { %353 = vst [vmem:[%s464_s5 + $0x18] sm:$0xff] %v343_v6  }

// kernel: vision_transformer_forward.30
= control target key start
LH: loop header
LB: loop body
LE: loop exit
PB: predicated region body
PF: predicated region fallthrough
CT: control target
= control target key end

     0   :  { %s1050_s1 = inlined_call_operand.vmem [shape: bf16[512,128], index: 1, kind: input, shape index: {}]   ;;  %s1051_s0 = inlined_call_operand.vmem [shape: bf16[64,512], index: 0, kind: input, shape index: {}]   ;;  %s1052_s2 = inlined_call_operand.vmem [shape: bf16[1,128], index: 2, kind: input, shape index: {}]   ;;  %s1053_s3 = inlined_call_operand.vmem [shape: bf16[64,128], index: 3, kind: output, shape index: {}]  }
   0x1   :  { %v775_v0 = vld [vmem:[%s1050_s1 + $0x38] sm:$0xff]  ;;  %v774_v4 = vld [vmem:[%s1050_s1 + $0x30] sm:$0xff]  ;;  %v773_v8 = vld [vmem:[%s1050_s1 + $0x28] sm:$0xff] }
   0x2   :  { %v783_v1 = vld [vmem:[%s1050_s1 + $0x78] sm:$0xff]  ;;  %386 = vmatpush.bf16.msra.mxu0 %v775_v0  ;;  %v782_v5 = vld [vmem:[%s1050_s1 + $0x70] sm:$0xff]  ;;  %v781_v9 = vld [vmem:[%s1050_s1 + $0x68] sm:$0xff] }
   0x3   :  { %v791_v2 = vld [vmem:[%s1050_s1 + $0xb8] sm:$0xff]  ;;  %415 = vmatpush.bf16.msra.mxu1 %v783_v1  ;;  %v790_v6 = vld [vmem:[%s1050_s1 + $0xb0] sm:$0xff]  ;;  %v789_v10 = vld [vmem:[%s1050_s1 + $0xa8] sm:$0xff] }
   0x4   :  { %v799_v3 = vld [vmem:[%s1050_s1 + $0xf8] sm:$0xff]  ;;  %444 = vmatpush.bf16.msra.mxu2 %v791_v2  ;;  %v798_v7 = vld [vmem:[%s1050_s1 + $0xf0] sm:$0xff]  ;;  %v797_v11 = vld [vmem:[%s1050_s1 + $0xe8] sm:$0xff] }
   0x5   :  { %473 = vmatpush.bf16.msra.mxu3 %v799_v3  ;;  %v772_v12 = vld [vmem:[%s1050_s1 + $0x20] sm:$0xff]  ;;  %v771_v16 = vld [vmem:[%s1050_s1 + $0x18] sm:$0xff]  ;;  %v770_v20 = vld [vmem:[%s1050_s1 + $0x10] sm:$0xff] }
   0x6   :  { %387 = vmatpush.bf16.msra.mxu0 %v774_v4  ;;  %v780_v13 = vld [vmem:[%s1050_s1 + $0x60] sm:$0xff]  ;;  %v779_v17 = vld [vmem:[%s1050_s1 + $0x58] sm:$0xff]  ;;  %v778_v21 = vld [vmem:[%s1050_s1 + $0x50] sm:$0xff] }
   0x7   :  { %416 = vmatpush.bf16.msra.mxu1 %v782_v5  ;;  %v788_v14 = vld [vmem:[%s1050_s1 + $0xa0] sm:$0xff]  ;;  %v787_v18 = vld [vmem:[%s1050_s1 + $0x98] sm:$0xff]  ;;  %v786_v22 = vld [vmem:[%s1050_s1 + $0x90] sm:$0xff] }
   0x8   :  { %445 = vmatpush.bf16.msra.mxu2 %v790_v6  ;;  %v796_v15 = vld [vmem:[%s1050_s1 + $0xe0] sm:$0xff]  ;;  %v795_v19 = vld [vmem:[%s1050_s1 + $0xd8] sm:$0xff]  ;;  %v794_v23 = vld [vmem:[%s1050_s1 + $0xd0] sm:$0xff] }
   0x9   :  { %474 = vmatpush.bf16.msra.mxu3 %v798_v7  ;;  %v769_v24 = vld [vmem:[%s1050_s1 + $0x8] sm:$0xff]  ;;  %v768_v28 = vld [vmem:[%s1050_s1] sm:$0xff]  ;;  %v754_v33 = vld [vmem:[%s1051_s0 + $0xc] sm:$0xf0] }
   0xa   :  { %388 = vmatpush.bf16.msra.mxu0 %v773_v8  ;;  %v777_v25 = vld [vmem:[%s1050_s1 + $0x48] sm:$0xff]  ;;  %v776_v29 = vld [vmem:[%s1050_s1 + $0x40] sm:$0xff]  ;;  %v564_v35 = vld [vmem:[%s1051_s0 + $0x10] sm:$0xf0] }
   0xb   :  { %417 = vmatpush.bf16.msra.mxu1 %v781_v9  ;;  %v785_v26 = vld [vmem:[%s1050_s1 + $0x88] sm:$0xff]  ;;  %v784_v30 = vld [vmem:[%s1050_s1 + $0x80] sm:$0xff]  ;;  %v755_v37 = vld [vmem:[%s1051_s0 + $0x14] sm:$0xf0] }
   0xc   :  { %446 = vmatpush.bf16.msra.mxu2 %v789_v10  ;;  %v793_v27 = vld [vmem:[%s1050_s1 + $0xc8] sm:$0xff]  ;;  %v792_v31 = vld [vmem:[%s1050_s1 + $0xc0] sm:$0xff]  ;;  %v572_v39 = vld [vmem:[%s1051_s0 + $0x18] sm:$0xf0] }
   0xd   :  { %475 = vmatpush.bf16.msra.mxu3 %v797_v11  ;;  %v562_v32 = vld [vmem:[%s1051_s0] sm:$0xf]  ;;  %v752_v34 = vld [vmem:[%s1051_s0 + $0x4] sm:$0xf]  ;;  %v570_v36 = vld [vmem:[%s1051_s0 + $0x8] sm:$0xf] }
   0xe   :  { %389 = vmatpush.bf16.msra.mxu0 %v772_v12  ;;  %v753_v38 = vld [vmem:[%s1051_s0 + $0xc] sm:$0xf]  ;;  %v563_v40 = vor.u32 %v754_v33, %v562_v32  ;;  %v567_v41 = vor.u32 %v752_v34, %v564_v35  ;;  %v571_v42 = vor.u32 %v755_v37, %v570_v36  ;;  %v578_v44 = vld [vmem:[%s1051_s0 + $0x20] sm:$0xf]  ;;  %v758_v45 = vld [vmem:[%s1051_s0 + $0x2c] sm:$0xf0] }
   0xf   :  { %418 = vmatpush.bf16.msra.mxu1 %v780_v13  ;;  %v575_v43 = vor.u32 %v753_v38, %v572_v39  ;;  %v756_v46 = vld [vmem:[%s1051_s0 + $0x24] sm:$0xf]  ;;  %v580_v47 = vld [vmem:[%s1051_s0 + $0x30] sm:$0xf0]  ;;  %v586_v48 = vld [vmem:[%s1051_s0 + $0x28] sm:$0xf]  ;;  %v579_v52 = vor.u32 %v758_v45, %v578_v44 }
  0x10   :  { %447 = vmatpush.bf16.msra.mxu2 %v788_v14  ;;  %v759_v49 = vld [vmem:[%s1051_s0 + $0x34] sm:$0xf0]  ;;  %v757_v50 = vld [vmem:[%s1051_s0 + $0x2c] sm:$0xf]  ;;  %v588_v51 = vld [vmem:[%s1051_s0 + $0x38] sm:$0xf0]  ;;  %v583_v53 = vor.u32 %v756_v46, %v580_v47 }
  0x11   :  { %476 = vmatpush.bf16.msra.mxu3 %v796_v15  ;;  %v587_v54 = vor.u32 %v759_v49, %v586_v48  ;;  %v591_v55 = vor.u32 %v757_v50, %v588_v51  ;;  %v594_v56 = vld [vmem:[%s1051_s0 + $0x40] sm:$0xf]  ;;  %v762_v57 = vld [vmem:[%s1051_s0 + $0x4c] sm:$0xf0]  ;;  %v760_v58 = vld [vmem:[%s1051_s0 + $0x44] sm:$0xf] }
  0x12   :  { %390 = vmatpush.bf16.msra.mxu0 %v771_v16  ;;  %v596_v59 = vld [vmem:[%s1051_s0 + $0x50] sm:$0xf0]  ;;  %v602_v60 = vld [vmem:[%s1051_s0 + $0x48] sm:$0xf]  ;;  %v763_v61 = vld [vmem:[%s1051_s0 + $0x54] sm:$0xf0]  ;;  %v595_v0 = vor.u32 %v762_v57, %v594_v56 }
  0x13   :  { %419 = vmatpush.bf16.msra.mxu1 %v779_v17  ;;  %v761_v62 = vld [vmem:[%s1051_s0 + $0x4c] sm:$0xf]  ;;  %v604_v63 = vld [vmem:[%s1051_s0 + $0x58] sm:$0xf0]  ;;  %v599_v1 = vor.u32 %v760_v58, %v596_v59  ;;  %v603_v2 = vor.u32 %v763_v61, %v602_v60  ;;  %v610_v4 = vld [vmem:[%s1051_s0 + $0x60] sm:$0xf] }
  0x14   :  { %448 = vmatpush.bf16.msra.mxu2 %v787_v18  ;;  %v607_v3 = vor.u32 %v761_v62, %v604_v63  ;;  %v766_v5 = vld [vmem:[%s1051_s0 + $0x6c] sm:$0xf0]  ;;  %v764_v6 = vld [vmem:[%s1051_s0 + $0x64] sm:$0xf]  ;;  %v612_v7 = vld [vmem:[%s1051_s0 + $0x70] sm:$0xf0] }
  0x15   :  { %477 = vmatpush.bf16.msra.mxu3 %v795_v19  ;;  %v618_v8 = vld [vmem:[%s1051_s0 + $0x68] sm:$0xf]  ;;  %v767_v9 = vld [vmem:[%s1051_s0 + $0x74] sm:$0xf0]  ;;  %v765_v10 = vld [vmem:[%s1051_s0 + $0x6c] sm:$0xf]  ;;  %v611_v12 = vor.u32 %v766_v5, %v610_v4  ;;  %v615_v13 = vor.u32 %v764_v6, %v612_v7 }
  0x16   :  { %391 = vmatpush.bf16.msra.mxu0 %v770_v20  ;;  %v620_v11 = vld [vmem:[%s1051_s0 + $0x78] sm:$0xf0]  ;;  %v619_v14 = vor.u32 %v767_v9, %v618_v8 }
  0x17   :  { %420 = vmatpush.bf16.msra.mxu1 %v778_v21  ;;  %v623_v15 = vor.u32 %v765_v10, %v620_v11 }
  0x18   :  { %449 = vmatpush.bf16.msra.mxu2 %v786_v22 }
  0x19   :  { %478 = vmatpush.bf16.msra.mxu3 %v794_v23  ;;  %v529_v23 = vld [vmem:[%s1052_s2] sm:$0x1] }
  0x1a   :  { %392 = vmatpush.bf16.msra.mxu0 %v769_v24 }
  0x1b   :  { %421 = vmatpush.bf16.msra.mxu1 %v777_v25  ;;  %v530_v25 = vunpack.c.l.bf16 %v529_v23 }
  0x1c   :  { %450 = vmatpush.bf16.msra.mxu2 %v785_v26 }
  0x1d   :  { %479 = vmatpush.bf16.msra.mxu3 %v793_v27 }
  0x1e   :  { %393 = vmatpush.bf16.msra.mxu0 %v768_v28 }
  0x1f   :  { %422 = vmatpush.bf16.msra.mxu1 %v776_v29 }
  0x20   :  { %451 = vmatpush.bf16.msra.mxu2 %v784_v30  ;;  %v531_v30 = vperm.slane %v530_v25, 0 }
  0x21   :  { %480 = vmatpush.bf16.msra.mxu3 %v792_v31  ;;  %394 = vmatmul.bf16.vlgmr.msra.gmra.mxu0 %v563_v40 }
  0x22   :  { %423 = vmatmul.bf16.vlgmr.msra.gmra.mxu1 %v567_v41 }
  0x23   :  { %452 = vmatmul.bf16.vlgmr.msra.gmra.mxu2 %v571_v42 }
  0x24   :  { %481 = vmatmul.bf16.vlgmr.msra.gmra.mxu3 %v575_v43 }
  0x31   :  { %399 = vmatmul.bf16.gmra.mxu0 %v579_v52 }
  0x32   :  { %428 = vmatmul.bf16.gmra.mxu1 %v583_v53 }
  0x33   :  { %457 = vmatmul.bf16.gmra.mxu2 %v587_v54 }
  0x34   :  { %486 = vmatmul.bf16.gmra.mxu3 %v591_v55 }
  0x41   :  { %404 = vmatmul.bf16.gmra.mxu0 %v595_v0 }
  0x42   :  { %433 = vmatmul.bf16.gmra.mxu1 %v599_v1 }
  0x43   :  { %462 = vmatmul.bf16.gmra.mxu2 %v603_v2 }
  0x44   :  { %491 = vmatmul.bf16.gmra.mxu3 %v607_v3 }
  0x51   :  { %409 = vmatmul.bf16.gmra.mxu0 %v611_v12 }
  0x52   :  { %438 = vmatmul.bf16.gmra.mxu1 %v615_v13 }
  0x53   :  { %467 = vmatmul.bf16.gmra.mxu2 %v619_v14 }
  0x54   :  { %496 = vmatmul.bf16.gmra.mxu3 %v623_v15 }
  0x9e   :  { %v395_v16 = vpop.f32.mrf.mxu0 }
  0x9f   :  { %v424_v17 = vpop.f32.mrf.mxu1 }
  0xa0   :  { %v425_v20 = vadd.f32 %v424_v17, %v395_v16 }
  0xa6   :  { %v453_v18 = vpop.f32.mrf.mxu2  ;;  %v397_v21 = vpop.f32.mrf.mxu0 }
  0xa7   :  { %v482_v19 = vpop.f32.mrf.mxu3  ;;  %v426_v22 = vpop.f32.mrf.mxu1  ;;  %v454_v24 = vadd.f32 %v453_v18, %v425_v20 }
  0xa8   :  { %v427_v26 = vadd.f32 %v426_v22, %v397_v21 }
  0xa9   :  { %v483_v29 = vadd.f32 %v482_v19, %v454_v24 }
  0xab   :  { %v532_v35 = vadd.f32 %v531_v30, %v483_v29 }
  0xae   :  { %v455_v27 = vpop.f32.mrf.mxu2  ;;  %v400_v32 = vpop.f32.mrf.mxu0 }
  0xaf   :  { %v484_v28 = vpop.f32.mrf.mxu3  ;;  %v456_v31 = vadd.f32 %v455_v27, %v427_v26  ;;  %v429_v33 = vpop.f32.mrf.mxu1 }
  0xb0   :  { %v430_v40 = vadd.f32 %v429_v33, %v400_v32 }
  0xb1   :  { %v485_v34 = vadd.f32 %v484_v28, %v456_v31 }
  0xb3   :  { %v533_v36 = vadd.f32 %v531_v30, %v485_v34 }
  0xb5   :  { %v803_v37 = vpack.c.bf16 %v533_v36, %v532_v35 }
  0xb6   :  { %v458_v38 = vpop.f32.mrf.mxu2  ;;  %v402_v41 = vpop.f32.mrf.mxu0 }
  0xb7   :  { %v487_v39 = vpop.f32.mrf.mxu3  ;;  %804 = vst [vmem:[%s1053_s3] sm:$0xff] %v803_v37   ;;  %v431_v42 = vpop.f32.mrf.mxu1  ;;  %v459_v43 = vadd.f32 %v458_v38, %v430_v40 }
  0xb8   :  { %v432_v44 = vadd.f32 %v431_v42, %v402_v41 }
  0xb9   :  { %v488_v47 = vadd.f32 %v487_v39, %v459_v43 }
  0xbb   :  { %v534_v52 = vadd.f32 %v531_v30, %v488_v47 }
  0xbe   :  { %v460_v45 = vpop.f32.mrf.mxu2  ;;  %v405_v49 = vpop.f32.mrf.mxu0 }
  0xbf   :  { %v489_v46 = vpop.f32.mrf.mxu3  ;;  %v461_v48 = vadd.f32 %v460_v45, %v432_v44  ;;  %v434_v50 = vpop.f32.mrf.mxu1 }
  0xc0   :  { %v435_v57 = vadd.f32 %v434_v50, %v405_v49 }
  0xc1   :  { %v490_v51 = vadd.f32 %v489_v46, %v461_v48 }
  0xc3   :  { %v535_v53 = vadd.f32 %v531_v30, %v490_v51 }
  0xc5   :  { %v808_v54 = vpack.c.bf16 %v535_v53, %v534_v52 }
  0xc6   :  { %v463_v55 = vpop.f32.mrf.mxu2  ;;  %v407_v58 = vpop.f32.mrf.mxu0 }
  0xc7   :  { %v492_v56 = vpop.f32.mrf.mxu3  ;;  %820 = vst [vmem:[%s1053_s3 + $0x8] sm:$0xff] %v808_v54   ;;  %v436_v59 = vpop.f32.mrf.mxu1  ;;  %v464_v60 = vadd.f32 %v463_v55, %v435_v57 }
  0xc8   :  { %v437_v61 = vadd.f32 %v436_v59, %v407_v58 }
  0xc9   :  { %v493_v0 = vadd.f32 %v492_v56, %v464_v60 }
  0xcb   :  { %v536_v5 = vadd.f32 %v531_v30, %v493_v0 }
  0xce   :  { %v465_v62 = vpop.f32.mrf.mxu2  ;;  %v410_v2 = vpop.f32.mrf.mxu0 }
  0xcf   :  { %v494_v63 = vpop.f32.mrf.mxu3  ;;  %v466_v1 = vadd.f32 %v465_v62, %v437_v61  ;;  %v439_v3 = vpop.f32.mrf.mxu1 }
  0xd0   :  { %v440_v10 = vadd.f32 %v439_v3, %v410_v2 }
  0xd1   :  { %v495_v4 = vadd.f32 %v494_v63, %v466_v1 }
  0xd3   :  { %v537_v6 = vadd.f32 %v531_v30, %v495_v4 }
  0xd5   :  { %v813_v7 = vpack.c.bf16 %v537_v6, %v536_v5 }
  0xd6   :  { %v468_v8 = vpop.f32.mrf.mxu2  ;;  %v412_v11 = vpop.f32.mrf.mxu0 }
  0xd7   :  { %v497_v9 = vpop.f32.mrf.mxu3  ;;  %821 = vst [vmem:[%s1053_s3 + $0x10] sm:$0xff] %v813_v7   ;;  %v441_v12 = vpop.f32.mrf.mxu1  ;;  %v469_v13 = vadd.f32 %v468_v8, %v440_v10 }
  0xd8   :  { %v442_v14 = vadd.f32 %v441_v12, %v412_v11 }
  0xd9   :  { %v498_v16 = vadd.f32 %v497_v9, %v469_v13 }
  0xdb   :  { %v538_v20 = vadd.f32 %v531_v30, %v498_v16 }
  0xde   :  { %v470_v15 = vpop.f32.mrf.mxu2 }
  0xdf   :  { %v471_v17 = vadd.f32 %v470_v15, %v442_v14  ;;  %v499_v18 = vpop.f32.mrf.mxu3 }
  0xe1   :  { %v500_v19 = vadd.f32 %v499_v18, %v471_v17 }
  0xe3   :  { %v539_v21 = vadd.f32 %v531_v30, %v500_v19 }
  0xe5   :  { %v818_v22 = vpack.c.bf16 %v539_v21, %v538_v20 }
  0xe7   :  { %822 = vst [vmem:[%s1053_s3 + $0x18] sm:$0xff] %v818_v22  }

// kernel: vision_transformer_forward.29
= control target key start
LH: loop header
LB: loop body
LE: loop exit
PB: predicated region body
PF: predicated region fallthrough
CT: control target
= control target key end

     0   :  { %v1713_v11 = vmov 128.0   ;;  %s2647_s0 = inlined_call_operand.vmem [shape: bf16[64,128], index: 0, kind: input, shape index: {}]   ;;  %s2648_s1 = inlined_call_operand.vmem [shape: f32[1,128], index: 1, kind: input, shape index: {}]   ;;  %s2649_s2 = inlined_call_operand.vmem [shape: f32[1,128], index: 2, kind: input, shape index: {}]   ;;  %s2650_s3 = inlined_call_operand.vmem [shape: bf16[128,512], index: 3, kind: input, shape index: {}]   ;;  %s2651_s4 = inlined_call_operand.vmem [shape: bf16[1,512], index: 4, kind: input, shape index: {}]   ;;  %s2652_s5 = inlined_call_operand.vmem [shape: bf16[64,512], index: 5, kind: output, shape index: {}]  }
   0x1   :  { %v1559_v0 = vld [vmem:[%s2647_s0 + $0x10] sm:$0xff]   ;;  %v1558_v1 = vld [vmem:[%s2647_s0 + $0x8] sm:$0xff]   ;;  %v1523_v2 = vld [vmem:[%s2647_s0] sm:$0xff]   ;;  %1567 = vrcp.f32 %v1713_v11 }
   0x2   :  { %v1532_v3 = vunpack.c.l.bf16 %v1559_v0  ;;  %v1528_v4 = vunpack.c.l.bf16 %v1558_v1  ;;  %v1524_v5 = vunpack.c.l.bf16 %v1523_v2  ;;  %v1533_v6 = vunpack.c.h.bf16 %v1559_v0  ;;  %v1756_v9 = vld [vmem:[%s2647_s0 + $0x18] sm:$0xff]   ;;  %v1440_v47 = vld [vmem:[%s2650_s3 + $0xe0] sm:$0xf]  ;;  %v1520_v48 = vld [vmem:[%s2650_s3 + $0xec] sm:$0xf0] }
   0x3   :  { %v1529_v7 = vunpack.c.h.bf16 %v1558_v1  ;;  %v1525_v8 = vunpack.c.h.bf16 %v1523_v2  ;;  %v1536_v10 = vunpack.c.l.bf16 %v1756_v9  ;;  %v1537_v33 = vunpack.c.h.bf16 %v1756_v9  ;;  %v1518_v49 = vld [vmem:[%s2650_s3 + $0xe4] sm:$0xf]  ;;  %v1442_v51 = vld [vmem:[%s2650_s3 + $0xf0] sm:$0xf0]  ;;  %v1448_v52 = vld [vmem:[%s2650_s3 + $0xe8] sm:$0xf] }
   0x4   :  { %48 = vadd.xlane.f32.xlu2 %v1532_v3  ;;  %44 = vadd.xlane.f32.xlu1 %v1528_v4  ;;  %v1441_v50 = vor.u32 %v1520_v48, %v1440_v47  ;;  %v1521_v53 = vld [vmem:[%s2650_s3 + $0xf4] sm:$0xf0]  ;;  %v1445_v54 = vor.u32 %v1518_v49, %v1442_v51  ;;  %v1519_v56 = vld [vmem:[%s2650_s3 + $0xec] sm:$0xf]  ;;  %v1450_v57 = vld [vmem:[%s2650_s3 + $0xf8] sm:$0xf0] }
   0x5   :  { %40 = vadd.xlane.f32.xlu0 %v1524_v5  ;;  %v1449_v55 = vor.u32 %v1521_v53, %v1448_v52  ;;  %v1453_v58 = vor.u32 %v1519_v56, %v1450_v57  ;;  %v1424_v59 = vld [vmem:[%s2650_s3 + $0xc0] sm:$0xf]  ;;  %v1516_v60 = vld [vmem:[%s2650_s3 + $0xcc] sm:$0xf0]  ;;  %v1514_v61 = vld [vmem:[%s2650_s3 + $0xc4] sm:$0xf] }
   0x6   :  { %486 = vmatpush.bf16.msra.mxu0 %v1441_v50  ;;  %515 = vmatpush.bf16.msra.mxu1 %v1445_v54  ;;  %v1425_v62 = vor.u32 %v1516_v60, %v1424_v59  ;;  %v1426_v63 = vld [vmem:[%s2650_s3 + $0xd0] sm:$0xf0]  ;;  %v1432_v0 = vld [vmem:[%s2650_s3 + $0xc8] sm:$0xf]  ;;  %v1517_v1 = vld [vmem:[%s2650_s3 + $0xd4] sm:$0xf0] }
   0x7   :  { %v1568_v12 = vpop.eup %1567  ;;  %544 = vmatpush.bf16.msra.mxu2 %v1449_v55  ;;  %573 = vmatpush.bf16.msra.mxu3 %v1453_v58  ;;  %v1429_v2 = vor.u32 %v1514_v61, %v1426_v63  ;;  %v1384_v47 = vld [vmem:[%s2650_s3 + $0x68] sm:$0xf]  ;;  %v1505_v48 = vld [vmem:[%s2650_s3 + $0x74] sm:$0xf0]  ;;  %v1503_v52 = vld [vmem:[%s2650_s3 + $0x6c] sm:$0xf] }
   0x8   :  { %v57_v13 = vmul.f32 128.0, %v1568_v12  ;;  %vm61_vm0 = vweird.f32 %v1568_v12  ;;  %v1385_v51 = vor.u32 %v1505_v48, %v1384_v47  ;;  %v1386_v53 = vld [vmem:[%s2650_s3 + $0x78] sm:$0xf0]  ;;  %v1360_v56 = vld [vmem:[%s2650_s3 + $0x40] sm:$0xf] }
   0x9   :  { %v1389_v54 = vor.u32 %v1503_v52, %v1386_v53  ;;  %v1500_v57 = vld [vmem:[%s2650_s3 + $0x4c] sm:$0xf0]  ;;  %v1498_v59 = vld [vmem:[%s2650_s3 + $0x44] sm:$0xf]  ;;  %v1362_v60 = vld [vmem:[%s2650_s3 + $0x50] sm:$0xf0] }
   0xa   :  { %v58_v14 = vsub.f32 1.0, %v57_v13  ;;  %487 = vmatpush.bf16.msra.mxu0 %v1425_v62  ;;  %516 = vmatpush.bf16.msra.mxu1 %v1429_v2  ;;  %v1416_v13 = vld [vmem:[%s2650_s3 + $0xa8] sm:$0xf]  ;;  %v1361_v58 = vor.u32 %v1500_v57, %v1360_v56  ;;  %v1365_v62 = vor.u32 %v1498_v59, %v1362_v60  ;;  %v1501_v63 = vld [vmem:[%s2650_s3 + $0x54] sm:$0xf0] }
   0xb   :  { %v1368_v61 = vld [vmem:[%s2650_s3 + $0x48] sm:$0xf]  ;;  %v1490_v9 = vld [vmem:[%s2650_s3 + $0x4] sm:$0xf]  ;;  %v1338_v47 = vld [vmem:[%s2650_s3 + $0x18] sm:$0xf0] }
   0xc   :  { %50 = vadd.xlane.f32.xlu2 %v1533_v6  ;;  %46 = vadd.xlane.f32.xlu1 %v1529_v7  ;;  %v59_v15 = vmul.f32 %v1568_v12, %v58_v14  ;;  %v1513_v14 = vld [vmem:[%s2650_s3 + $0xb4] sm:$0xf0]  ;;  %v1369_v2 = vor.u32 %v1501_v63, %v1368_v61 }
   0xd   :  { %42 = vadd.xlane.f32.xlu0 %v1525_v8 }
   0xe   :  { %v60_v16 = vadd.f32 %v1568_v12, %v59_v15 }
  0x10   :  { %v1759_v17 = vsel %vm61_vm0, %v1568_v12, %v60_v16  ;;  %v1410_v12 = vld [vmem:[%s2650_s3 + $0xb0] sm:$0xf0]  ;;  %v1417_v16 = vor.u32 %v1513_v14, %v1416_v13  ;;  %v1352_v14 = vld [vmem:[%s2650_s3 + $0x28] sm:$0xf] }
  0x11   :  { %v1346_v13 = vld [vmem:[%s2650_s3 + $0x30] sm:$0xf0] }
  0x14   :  { %52 = vadd.xlane.f32.xlu2 %v1536_v10 }
  0x77   :  { %v49_v18 = vpop.xlane.xlu2 %48  ;;  %v45_v19 = vpop.xlane.xlu1 %44 }
  0x78   :  { %v41_v20 = vpop.xlane.xlu0 %40  ;;  %v67_v30 = vmul.f32 %v1759_v17, %v49_v18  ;;  %v65_v31 = vmul.f32 %v1759_v17, %v45_v19  ;;  %v1511_v18 = vld [vmem:[%s2650_s3 + $0xac] sm:$0xf]  ;;  %v1418_v19 = vld [vmem:[%s2650_s3 + $0xb8] sm:$0xf0] }
  0x79   :  { %v63_v21 = vmul.f32 %v1759_v17, %v41_v20  ;;  %v1421_v20 = vor.u32 %v1511_v18, %v1418_v19 }
  0x7a   :  { %v1779_v36 = vsub.f32 %v1532_v3, %v67_v30  ;;  %v1781_v37 = vsub.f32 %v1528_v4, %v65_v31  ;;  %v1433_v3 = vor.u32 %v1517_v1, %v1432_v0  ;;  %v1515_v4 = vld [vmem:[%s2650_s3 + $0xcc] sm:$0xf]  ;;  %v1370_v1 = vld [vmem:[%s2650_s3 + $0x58] sm:$0xf0] }
  0x7b   :  { %v1762_v22 = vsub.f32 %v1524_v5, %v63_v21  ;;  %v1434_v5 = vld [vmem:[%s2650_s3 + $0xd8] sm:$0xf0]  ;;  %v1392_v21 = vld [vmem:[%s2650_s3 + $0x80] sm:$0xf]  ;;  %v1499_v0 = vld [vmem:[%s2650_s3 + $0x4c] sm:$0xf] }
  0x7c   :  { %v83_v42 = vmul.f32 %v1779_v36, %v1779_v36  ;;  %v81_v43 = vmul.f32 %v1781_v37, %v1781_v37  ;;  %545 = vmatpush.bf16.msra.mxu2 %v1433_v3  ;;  %v1373_v3 = vor.u32 %v1499_v0, %v1370_v1 }
  0x7d   :  { %v79_v23 = vmul.f32 %v1762_v22, %v1762_v22 }
  0x7f   :  { %87 = vadd.xlane.f32.xlu0 %v79_v23  ;;  %v51_v24 = vpop.xlane.xlu2 %50  ;;  %v47_v25 = vpop.xlane.xlu1 %46  ;;  %v1508_v23 = vld [vmem:[%s2650_s3 + $0x8c] sm:$0xf0] }
  0x80   :  { %v66_v26 = vmul.f32 %v1759_v17, %v47_v25  ;;  %v43_v27 = vpop.xlane.xlu0 %42  ;;  %v68_v41 = vmul.f32 %v1759_v17, %v51_v24  ;;  %546 = vmatpush.bf16.msra.mxu2 %v1417_v16  ;;  %v1506_v24 = vld [vmem:[%s2650_s3 + $0x84] sm:$0xf]  ;;  %v1393_v25 = vor.u32 %v1508_v23, %v1392_v21  ;;  %v1495_v21 = vld [vmem:[%s2650_s3 + $0x2c] sm:$0xf]  ;;  %v1354_v23 = vld [vmem:[%s2650_s3 + $0x38] sm:$0xf0] }
  0x81   :  { %v64_v28 = vmul.f32 %v1759_v17, %v43_v27  ;;  %v1400_v27 = vld [vmem:[%s2650_s3 + $0x88] sm:$0xf] }
  0x82   :  { %v1768_v29 = vsub.f32 %v1529_v7, %v66_v26  ;;  %v1795_v45 = vsub.f32 %v1533_v6, %v68_v41  ;;  %v1437_v6 = vor.u32 %v1515_v4, %v1434_v5  ;;  %v1408_v7 = vld [vmem:[%s2650_s3 + $0xa0] sm:$0xf]  ;;  %v1394_v26 = vld [vmem:[%s2650_s3 + $0x90] sm:$0xf0]  ;;  %v1504_v41 = vld [vmem:[%s2650_s3 + $0x6c] sm:$0xf0] }
  0x83   :  { %v1772_v32 = vsub.f32 %v1525_v8, %v64_v28  ;;  %v1512_v8 = vld [vmem:[%s2650_s3 + $0xac] sm:$0xf0]  ;;  %v1509_v28 = vld [vmem:[%s2650_s3 + $0x94] sm:$0xf0]  ;;  %v1397_v30 = vor.u32 %v1506_v24, %v1394_v26  ;;  %v1344_v5 = vld [vmem:[%s2650_s3 + $0x20] sm:$0xf] }
  0x84   :  { %v82_v34 = vmul.f32 %v1768_v29, %v1768_v29  ;;  %v84_v46 = vmul.f32 %v1795_v45, %v1795_v45  ;;  %574 = vmatpush.bf16.msra.mxu3 %v1437_v6  ;;  %v1409_v11 = vor.u32 %v1512_v8, %v1408_v7  ;;  %v1401_v31 = vor.u32 %v1509_v28, %v1400_v27  ;;  %v1496_v6 = vld [vmem:[%s2650_s3 + $0x2c] sm:$0xf0]  ;;  %v1494_v7 = vld [vmem:[%s2650_s3 + $0x24] sm:$0xf] }
  0x85   :  { %v80_v35 = vmul.f32 %v1772_v32, %v1772_v32  ;;  %v1349_v19 = vor.u32 %v1494_v7, %v1346_v13  ;;  %v2016_v7 = vld [vmem:[%s2648_s1] ss:$0 sm:$0xff] }
  0x86   :  { %93 = vadd.xlane.f32.xlu2 %v82_v34  ;;  %488 = vmatpush.bf16.msra.mxu0 %v1409_v11  ;;  %v1507_v34 = vld [vmem:[%s2650_s3 + $0x8c] sm:$0xf] }
  0x87   :  { %54 = vadd.xlane.f32.xlu0 %v1537_v33  ;;  %89 = vadd.xlane.f32.xlu1 %v80_v35  ;;  %v53_v38 = vpop.xlane.xlu2 %52  ;;  %v1402_v35 = vld [vmem:[%s2650_s3 + $0x98] sm:$0xf0] }
  0x88   :  { %v69_v39 = vmul.f32 %v1759_v17, %v53_v38  ;;  %575 = vmatpush.bf16.msra.mxu3 %v1421_v20  ;;  %v1405_v38 = vor.u32 %v1507_v34, %v1402_v35  ;;  %547 = vmatpush.bf16.msra.mxu2 %v1401_v31  ;;  %v1492_v31 = vld [vmem:[%s2650_s3 + $0xc] sm:$0xf0]  ;;  %v1336_v35 = vld [vmem:[%s2650_s3 + $0x8] sm:$0xf] }
  0x8a   :  { %v1786_v40 = vsub.f32 %v1536_v10, %v69_v39  ;;  %v1510_v10 = vld [vmem:[%s2650_s3 + $0xa4] sm:$0xf]  ;;  %489 = vmatpush.bf16.msra.mxu0 %v1393_v25  ;;  %v1376_v39 = vld [vmem:[%s2650_s3 + $0x60] sm:$0xf]  ;;  %v1357_v25 = vor.u32 %v1495_v21, %v1354_v23 }
  0x8b   :  { %v1413_v15 = vor.u32 %v1510_v10, %v1410_v12  ;;  %v1345_v12 = vor.u32 %v1496_v6, %v1344_v5 }
  0x8c   :  { %v85_v44 = vmul.f32 %v1786_v40, %v1786_v40  ;;  %576 = vmatpush.bf16.msra.mxu3 %v1405_v38  ;;  %548 = vmatpush.bf16.msra.mxu2 %v1385_v51 }
  0x8d   :  { %517 = vmatpush.bf16.msra.mxu1 %v1413_v15  ;;  %v1497_v15 = vld [vmem:[%s2650_s3 + $0x34] sm:$0xf0] }
  0x8e   :  { %99 = vadd.xlane.f32.xlu2 %v85_v44  ;;  %v1377_v44 = vor.u32 %v1504_v41, %v1376_v39  ;;  %v1353_v20 = vor.u32 %v1497_v15, %v1352_v14  ;;  %v1493_v41 = vld [vmem:[%s2650_s3 + $0x14] sm:$0xf0] }
  0x8f   :  { %95 = vadd.xlane.f32.xlu0 %v83_v42  ;;  %91 = vadd.xlane.f32.xlu1 %v81_v43  ;;  %v1502_v42 = vld [vmem:[%s2650_s3 + $0x64] sm:$0xf] }
  0x90   :  { %490 = vmatpush.bf16.msra.mxu0 %v1377_v44  ;;  %577 = vmatpush.bf16.msra.mxu3 %v1389_v54 }
  0x91   :  { %518 = vmatpush.bf16.msra.mxu1 %v1397_v30  ;;  %549 = vmatpush.bf16.msra.mxu2 %v1369_v2  ;;  %v1328_v30 = vld [vmem:[%s2650_s3] sm:$0xf] }
  0x92   :  { %v1329_v39 = vor.u32 %v1492_v31, %v1328_v30 }
  0x94   :  { %491 = vmatpush.bf16.msra.mxu0 %v1361_v58  ;;  %578 = vmatpush.bf16.msra.mxu3 %v1373_v3 }
  0x95   :  { %550 = vmatpush.bf16.msra.mxu2 %v1353_v20 }
  0x97   :  { %97 = vadd.xlane.f32.xlu1 %v84_v46  ;;  %v1378_v46 = vld [vmem:[%s2650_s3 + $0x70] sm:$0xf0] }
  0x98   :  { %v1381_v50 = vor.u32 %v1502_v42, %v1378_v46  ;;  %492 = vmatpush.bf16.msra.mxu0 %v1345_v12  ;;  %579 = vmatpush.bf16.msra.mxu3 %v1357_v25  ;;  %v1491_v42 = vld [vmem:[%s2650_s3 + $0xc] sm:$0xf]  ;;  %v1337_v46 = vor.u32 %v1493_v41, %v1336_v35 }
  0x99   :  { %v1341_v48 = vor.u32 %v1491_v42, %v1338_v47 }
  0x9a   :  { %519 = vmatpush.bf16.msra.mxu1 %v1381_v50  ;;  %551 = vmatpush.bf16.msra.mxu2 %v1337_v46 }
  0x9c   :  { %493 = vmatpush.bf16.msra.mxu0 %v1329_v39  ;;  %580 = vmatpush.bf16.msra.mxu3 %v1341_v48 }
  0x9e   :  { %520 = vmatpush.bf16.msra.mxu1 %v1365_v62 }
  0xa2   :  { %521 = vmatpush.bf16.msra.mxu1 %v1349_v19 }
  0xf2   :  { %v88_v43 = vpop.xlane.xlu0 %87 }
  0xf3   :  { %v103_v49 = vmul.f32 %v88_v43, %v1759_v17 }
  0xf5   :  { %v1920_v55 = vadd.f32 1e-05, %v103_v49 }
  0xf7   :  { %1569 = vrsqrt.f32 %v1920_v55  ;;  %vm125_vm2 = vweird.f32 %v1920_v55 }
  0xf9   :  { %v94_v4 = vpop.xlane.xlu2 %93 }
  0xfa   :  { %v106_v8 = vmul.f32 %v94_v4, %v1759_v17  ;;  %v90_v10 = vpop.xlane.xlu1 %89  ;;  %v55_v11 = vpop.xlane.xlu0 %54 }
  0xfb   :  { %v104_v16 = vmul.f32 %v90_v10, %v1759_v17  ;;  %v70_v18 = vmul.f32 %v1759_v17, %v55_v11 }
  0xfc   :  { %v1974_v24 = vadd.f32 1e-05, %v106_v8 }
  0xfd   :  { %v1570_v26 = vpop.eup %1569  ;;  %v112_v27 = vadd.f32 1e-05, %v104_v16  ;;  %v1978_v28 = vsub.f32 %v1537_v33, %v70_v18  ;;  %v1330_v33 = vld [vmem:[%s2650_s3 + $0x10] sm:$0xf0] }
  0xfe   :  { %v120_v34 = vmul.f32 %v1570_v26, %v1920_v55  ;;  %1571 = vrsqrt.f32 %v1974_v24  ;;  %v1333_v44 = vor.u32 %v1490_v9, %v1330_v33  ;;  %vm126_vm1 = vweird.f32 %v1570_v26 }
  0xff   :  { %1573 = vrsqrt.f32 %v112_v27  ;;  %v86_v38 = vmul.f32 %v1978_v28, %v1978_v28  ;;  %vm127_vm3 = vmor %vm125_vm2, %vm126_vm1  ;;  %vm135_vm4 = vweird.f32 %v112_v27  ;;  %vm155_vm6 = vweird.f32 %v1974_v24 }
 0x100   :  { %v121_v43 = vmul.f32 %v1570_v26, %v120_v34  ;;  %522 = vmatpush.bf16.msra.mxu1 %v1333_v44 }
 0x101   :  { %101 = vadd.xlane.f32.xlu0 %v86_v38 }
 0x102   :  { %v122_v49 = vmul.f32 0.5, %v121_v43  ;;  %v92_v50 = vpop.xlane.xlu1 %91  ;;  %v96_v51 = vpop.xlane.xlu0 %95 }
 0x103   :  { %v105_v52 = vmul.f32 %v92_v50, %v1759_v17  ;;  %v107_v53 = vmul.f32 %v96_v51, %v1759_v17 }
 0x104   :  { %v1572_v54 = vpop.eup %1571  ;;  %v123_v56 = vsub.f32 1.5, %v122_v49 }
 0x105   :  { %v1574_v57 = vpop.eup %1573  ;;  %v150_v58 = vmul.f32 %v1572_v54, %v1974_v24  ;;  %v113_v59 = vadd.f32 1e-05, %v105_v52  ;;  %v115_v60 = vadd.f32 1e-05, %v107_v53  ;;  %vm156_vm7 = vweird.f32 %v1572_v54 }
 0x106   :  { %v124_v61 = vmul.f32 %v1570_v26, %v123_v56  ;;  %v130_v62 = vmul.f32 %v1574_v57, %v112_v27  ;;  %vm136_vm5 = vweird.f32 %v1574_v57  ;;  %vm2020_vm9 = vmor %vm155_vm6, %vm156_vm7 }
 0x107   :  { %v151_v63 = vmul.f32 %v1572_v54, %v150_v58  ;;  %1575 = vrsqrt.f32 %v113_v59  ;;  %vm137_vm8 = vmor %vm135_vm4, %vm136_vm5  ;;  %vm145_vm10 = vweird.f32 %v113_v59  ;;  %vm165_vm12 = vweird.f32 %v115_v60 }
 0x108   :  { %v131_v0 = vmul.f32 %v1574_v57, %v130_v62  ;;  %1577 = vrsqrt.f32 %v115_v60  ;;  %v128_v1 = vsel %vm127_vm3, %v1570_v26, %v124_v61 }
 0x109   :  { %v152_v2 = vmul.f32 0.5, %v151_v63  ;;  %v199_v55 = vmul.f32 %v128_v1, %v1762_v22  ;;  %v2027_v22 = vld [vmem:[%s2649_s2] ss:$0 sm:$0xff] }
 0x10a   :  { %v132_v3 = vmul.f32 0.5, %v131_v0  ;;  %v98_v4 = vpop.xlane.xlu1 %97 }
 0x10b   :  { %v153_v5 = vsub.f32 1.5, %v152_v2  ;;  %v108_v6 = vmul.f32 %v98_v4, %v1759_v17  ;;  %v211_v19 = vmul.f32 %v2016_v7, %v199_v55 }
 0x10c   :  { %v133_v8 = vsub.f32 1.5, %v132_v3 }
 0x10d   :  { %v1576_v10 = vpop.eup %1575  ;;  %v154_v12 = vmul.f32 %v1572_v54, %v153_v5  ;;  %v116_v15 = vadd.f32 1e-05, %v108_v6  ;;  %v223_v31 = vadd.f32 %v2027_v22, %v211_v19 }
 0x10e   :  { %v1578_v11 = vpop.eup %1577  ;;  %v134_v13 = vmul.f32 %v1574_v57, %v133_v8  ;;  %v140_v14 = vmul.f32 %v1576_v10, %v113_v59  ;;  %vm146_vm11 = vweird.f32 %v1576_v10 }
 0x10f   :  { %v160_v18 = vmul.f32 %v1578_v11, %v115_v60  ;;  %1579 = vrsqrt.f32 %v116_v15  ;;  %v158_v25 = vsel %vm2020_vm9, %v1572_v54, %v154_v12  ;;  %vm147_vm13 = vmor %vm145_vm10, %vm146_vm11  ;;  %vm166_vm14 = vweird.f32 %v1578_v11 }
 0x110   :  { %v138_v20 = vsel %vm137_vm8, %v1574_v57, %v134_v13  ;;  %v141_v21 = vmul.f32 %v1576_v10, %v140_v14  ;;  %v202_v9 = vmul.f32 %v158_v25, %v1768_v29  ;;  %vm167_vm15 = vmor %vm165_vm12, %vm166_vm14  ;;  %vm175_vm0 = vweird.f32 %v116_v15 }
 0x111   :  { %v200_v23 = vmul.f32 %v138_v20, %v1772_v32  ;;  %v161_v24 = vmul.f32 %v1578_v11, %v160_v18 }
 0x112   :  { %v142_v26 = vmul.f32 0.5, %v141_v21  ;;  %v214_v44 = vmul.f32 %v2016_v7, %v202_v9 }
 0x113   :  { %v212_v27 = vmul.f32 %v2016_v7, %v200_v23  ;;  %v162_v30 = vmul.f32 0.5, %v161_v24 }
 0x114   :  { %v143_v34 = vsub.f32 1.5, %v142_v26  ;;  %v226_v50 = vadd.f32 %v2027_v22, %v214_v44 }
 0x115   :  { %v224_v33 = vadd.f32 %v2027_v22, %v212_v27  ;;  %v163_v32 = vsub.f32 1.5, %v162_v30  ;;  %v1580_v35 = vpop.eup %1579 }
 0x116   :  { %v144_v38 = vmul.f32 %v1576_v10, %v143_v34  ;;  %v170_v42 = vmul.f32 %v1580_v35, %v116_v15  ;;  %vm176_vm1 = vweird.f32 %v1580_v35 }
 0x117   :  { %v1541_v39 = vpack.c.bf16 %v224_v33, %v223_v31  ;;  %v164_v41 = vmul.f32 %v1578_v11, %v163_v32  ;;  %vm177_vm2 = vmor %vm175_vm0, %vm176_vm1  ;;  %v287_v31 = vld [vmem:[%s2651_s4] sm:$0xf] }
 0x118   :  { %v148_v43 = vsel %vm147_vm13, %v1576_v10, %v144_v38  ;;  %v171_v47 = vmul.f32 %v1580_v35, %v170_v42 }
 0x119   :  { %1542 = vst [vmem:[#allocation2 + $0x10] sm:$0xff] %v1541_v39   ;;  %v201_v46 = vmul.f32 %v148_v43, %v1781_v37  ;;  %v168_v48 = vsel %vm167_vm15, %v1578_v11, %v164_v41 }
 0x11a   :  { %v172_v49 = vmul.f32 0.5, %v171_v47  ;;  %v203_v53 = vmul.f32 %v168_v48, %v1779_v36 }
 0x11b   :  { %v213_v29 = vmul.f32 %v2016_v7, %v201_v46 }
 0x11c   :  { %v173_v52 = vsub.f32 1.5, %v172_v49  ;;  %v215_v58 = vmul.f32 %v2016_v7, %v203_v53 }
 0x11d   :  { %v225_v51 = vadd.f32 %v2027_v22, %v213_v29 }
 0x11e   :  { %v174_v56 = vmul.f32 %v1580_v35, %v173_v52  ;;  %v227_v61 = vadd.f32 %v2027_v22, %v215_v58 }
 0x11f   :  { %v1546_v54 = vpack.c.bf16 %v226_v50, %v225_v51 }
 0x120   :  { %v1486_v57 = vld [vmem:[#allocation2 + $0x10] sm:$0xff]  ;;  %v178_v37 = vsel %vm177_vm2, %v1580_v35, %v174_v56 }
 0x121   :  { %1561 = vst [vmem:[#allocation2] sm:$0xff] %v1546_v54   ;;  %v204_v59 = vmul.f32 %v178_v37, %v1795_v45  ;;  %494 = vmatmul.bf16.vlgmr.msra.gmra.mxu0 %v1486_v57  ;;  %523 = vmatmul.bf16.vlgmr.msra.gmra.mxu1 %v1486_v57  ;;  %v100_v45 = vpop.xlane.xlu2 %99 }
 0x122   :  { %552 = vmatmul.bf16.vlgmr.msra.gmra.mxu2 %v1486_v57  ;;  %581 = vmatmul.bf16.vlgmr.msra.gmra.mxu3 %v1486_v57  ;;  %v109_v1 = vmul.f32 %v100_v45, %v1759_v17 }
 0x123   :  { %v216_v60 = vmul.f32 %v2016_v7, %v204_v59 }
 0x124   :  { %v117_v2 = vadd.f32 1e-05, %v109_v1 }
 0x125   :  { %v228_v36 = vadd.f32 %v2027_v22, %v216_v60 }
 0x126   :  { %1581 = vrsqrt.f32 %v117_v2  ;;  %vm185_vm3 = vweird.f32 %v117_v2 }
 0x127   :  { %v1551_v62 = vpack.c.bf16 %v228_v36, %v227_v61 }
 0x128   :  { %v1487_v63 = vld [vmem:[#allocation2] sm:$0xff] }
 0x129   :  { %1562 = vst [vmem:[#allocation2 + $0x18] sm:$0xff] %v1551_v62  }
 0x12c   :  { %v1582_v3 = vpop.eup %1581 }
 0x12d   :  { %v180_v4 = vmul.f32 %v1582_v3, %v117_v2  ;;  %vm186_vm4 = vweird.f32 %v1582_v3 }
 0x12e   :  { %vm187_vm5 = vmor %vm185_vm3, %vm186_vm4 }
 0x12f   :  { %v181_v5 = vmul.f32 %v1582_v3, %v180_v4 }
 0x130   :  { %v1488_v0 = vld [vmem:[#allocation2 + $0x18] sm:$0xff] }
 0x131   :  { %499 = vmatmul.bf16.gmra.mxu0 %v1487_v63  ;;  %528 = vmatmul.bf16.gmra.mxu1 %v1487_v63  ;;  %v182_v10 = vmul.f32 0.5, %v181_v5 }
 0x132   :  { %557 = vmatmul.bf16.gmra.mxu2 %v1487_v63  ;;  %586 = vmatmul.bf16.gmra.mxu3 %v1487_v63 }
 0x133   :  { %v183_v11 = vsub.f32 1.5, %v182_v10 }
 0x135   :  { %v184_v13 = vmul.f32 %v1582_v3, %v183_v11 }
 0x137   :  { %v188_v16 = vsel %vm187_vm5, %v1582_v3, %v184_v13 }
 0x138   :  { %v205_v20 = vmul.f32 %v188_v16, %v1786_v40  ;;  %v288_v40 = vunpack.c.l.bf16 %v287_v31 }
 0x13a   :  { %v217_v23 = vmul.f32 %v2016_v7, %v205_v20  ;;  %v290_v34 = vperm.slane %v288_v40, 0  ;;  %v291_v9 = vperm.slane %v288_v40, 2  ;;  %v292_v35 = vperm.slane %v288_v40, 4 }
 0x13b   :  { %v293_v38 = vperm.slane %v288_v40, 6 }
 0x13c   :  { %v229_v26 = vadd.f32 %v2027_v22, %v217_v23  ;;  %v2059_v32 = vperm.slane %v290_v34, 0  ;;  %v2071_v44 = vperm.slane %v292_v35, 0 }
 0x13d   :  { %v2073_v46 = vperm.slane %v293_v38, 0 }
 0x141   :  { %504 = vmatmul.bf16.gmra.mxu0 %v1488_v0  ;;  %533 = vmatmul.bf16.gmra.mxu1 %v1488_v0 }
 0x142   :  { %562 = vmatmul.bf16.gmra.mxu2 %v1488_v0  ;;  %591 = vmatmul.bf16.gmra.mxu3 %v1488_v0 }
 0x174   :  { %v102_v6 = vpop.xlane.xlu0 %101 }
 0x175   :  { %v110_v55 = vmul.f32 %v102_v6, %v1759_v17 }
 0x177   :  { %v118_v8 = vadd.f32 1e-05, %v110_v55 }
 0x179   :  { %1583 = vrsqrt.f32 %v118_v8  ;;  %vm195_vm7 = vweird.f32 %v118_v8 }
 0x17f   :  { %v1584_v12 = vpop.eup %1583 }
 0x180   :  { %v190_v14 = vmul.f32 %v1584_v12, %v118_v8  ;;  %vm196_vm6 = vweird.f32 %v1584_v12 }
 0x181   :  { %vm197_vm8 = vmor %vm195_vm7, %vm196_vm6 }
 0x182   :  { %v191_v15 = vmul.f32 %v1584_v12, %v190_v14 }
 0x184   :  { %v192_v18 = vmul.f32 0.5, %v191_v15 }
 0x186   :  { %v193_v19 = vsub.f32 1.5, %v192_v18 }
 0x188   :  { %v194_v21 = vmul.f32 %v1584_v12, %v193_v19 }
 0x18a   :  { %v198_v17 = vsel %vm197_vm8, %v1584_v12, %v194_v21 }
 0x18b   :  { %v206_v24 = vmul.f32 %v198_v17, %v1978_v28  ;;  %v2061_v28 = vperm.slane %v291_v9, 0 }
 0x18d   :  { %v218_v25 = vmul.f32 %v2016_v7, %v206_v24 }
 0x18f   :  { %v230_v27 = vadd.f32 %v2027_v22, %v218_v25 }
 0x191   :  { %v1556_v30 = vpack.c.bf16 %v230_v27, %v229_v26 }
 0x193   :  { %1563 = vst [vmem:[#allocation2 + $0x8] sm:$0xff] %v1556_v30  }
 0x19a   :  { %v1489_v33 = vld [vmem:[#allocation2 + $0x8] sm:$0xff] }
 0x19b   :  { %509 = vmatmul.bf16.gmra.mxu0 %v1489_v33  ;;  %538 = vmatmul.bf16.gmra.mxu1 %v1489_v33 }
 0x19c   :  { %567 = vmatmul.bf16.gmra.mxu2 %v1489_v33  ;;  %596 = vmatmul.bf16.gmra.mxu3 %v1489_v33 }
 0x19e   :  { %v495_v7 = vpop.f32.mrf.mxu0  ;;  %v524_v22 = vpop.f32.mrf.mxu1 }
 0x19f   :  { %v2064_v39 = vadd.f32 %v495_v7, %v2059_v32  ;;  %v2067_v41 = vadd.f32 %v524_v22, %v2061_v28 }
 0x1a1   :  { %v1454_v42 = vmul.f32 -1.702, %v2064_v39  ;;  %v1455_v43 = vmul.f32 -1.702, %v2067_v41 }
 0x1a3   :  { %v666_v47 = vmul.f32 1.442695, %v1454_v42  ;;  %v668_v29 = vmul.f32 1.442695, %v1455_v43 }
 0x1a5   :  { %1585 = vpow2.f32 %v666_v47  ;;  %v553_v48 = vpop.f32.mrf.mxu2  ;;  %v582_v49 = vpop.f32.mrf.mxu3 }
 0x1a6   :  { %1587 = vpow2.f32 %v668_v29  ;;  %v2076_v50 = vadd.f32 %v553_v48, %v2071_v44  ;;  %v2079_v51 = vadd.f32 %v582_v49, %v2073_v46  ;;  %v497_v52 = vpop.f32.mrf.mxu0  ;;  %v526_v53 = vpop.f32.mrf.mxu1 }
 0x1a7   :  { %v2082_v54 = vadd.f32 %v497_v52, %v2059_v32  ;;  %v2085_v56 = vadd.f32 %v526_v53, %v2061_v28 }
 0x1a8   :  { %v1456_v57 = vmul.f32 -1.702, %v2076_v50  ;;  %v1457_v37 = vmul.f32 -1.702, %v2079_v51 }
 0x1a9   :  { %v1458_v58 = vmul.f32 -1.702, %v2082_v54  ;;  %v1459_v59 = vmul.f32 -1.702, %v2085_v56 }
 0x1aa   :  { %v670_v60 = vmul.f32 1.442695, %v1456_v57  ;;  %v672_v61 = vmul.f32 1.442695, %v1457_v37 }
 0x1ab   :  { %v1586_v36 = vpop.eup %1585  ;;  %v674_v0 = vmul.f32 1.442695, %v1458_v58  ;;  %v676_v1 = vmul.f32 1.442695, %v1459_v59 }
 0x1ac   :  { %v1588_v62 = vpop.eup %1587  ;;  %v730_v63 = vadd.f32 1.0, %v1586_v36  ;;  %1589 = vpow2.f32 %v670_v60 }
 0x1ad   :  { %v2091_v45 = vadd.f32 1.0, %v1588_v62  ;;  %1591 = vpow2.f32 %v672_v61  ;;  %v555_v2 = vpop.f32.mrf.mxu2  ;;  %v584_v4 = vpop.f32.mrf.mxu3 }
 0x1ae   :  { %1593 = vrcp.f32 %v730_v63  ;;  %v2095_v3 = vadd.f32 %v555_v2, %v2071_v44  ;;  %v771_v5 = vand.u32 2147483647, %v730_v63  ;;  %v773_v6 = vand.u32 2147483648, %v730_v63  ;;  %v500_v55 = vpop.f32.mrf.mxu0  ;;  %v529_v20 = vpop.f32.mrf.mxu1 }
 0x1af   :  { %1595 = vrcp.f32 %v2091_v45  ;;  %v786_v10 = vand.u32 2147483647, %v2091_v45  ;;  %v788_v11 = vand.u32 2147483648, %v2091_v45  ;;  %v2103_v15 = vadd.f32 %v584_v4, %v2073_v46 }
 0x1b0   :  { %1597 = vpow2.f32 %v674_v0  ;;  %v1460_v12 = vmul.f32 -1.702, %v2095_v3  ;;  %vm767_vm9 = vweird.f32 %v730_v63  ;;  %vm782_vm10 = vweird.f32 %v2091_v45 }
 0x1b1   :  { %1599 = vpow2.f32 %v676_v1  ;;  %v2109_v19 = vadd.f32 %v500_v55, %v2059_v32  ;;  %vm2111_vm11 = vcmp.eq.f32.partialorder %v771_v5, 8.507059e+37  ;;  %v774_v24 = vor.u32 1.1754944e-38, %v773_v6 }
 0x1b2   :  { %v1590_v8 = vpop.eup %1589  ;;  %vm2117_vm12 = vcmp.eq.f32.partialorder %v786_v10, 8.507059e+37  ;;  %v789_v30 = vor.u32 1.1754944e-38, %v788_v11  ;;  %v678_v31 = vmul.f32 1.442695, %v1460_v12  ;;  %v1461_v9 = vmul.f32 -1.702, %v2103_v15 }
 0x1b3   :  { %v1592_v13 = vpop.eup %1591  ;;  %v2100_v14 = vadd.f32 1.0, %v1590_v8  ;;  %v2124_v33 = vadd.f32 %v529_v20, %v2061_v28  ;;  %v1462_v35 = vmul.f32 -1.702, %v2109_v19 }
 0x1b4   :  { %v1594_v16 = vpop.eup %1593  ;;  %v2106_v18 = vadd.f32 1.0, %v1592_v13  ;;  %v680_v36 = vmul.f32 1.442695, %v1461_v9 }
 0x1b5   :  { %v1596_v21 = vpop.eup %1595  ;;  %v763_v17 = vmul.f32 %v1594_v16, %v730_v63  ;;  %1601 = vrcp.f32 %v2100_v14  ;;  %vm768_vm13 = vweird.f32 %v1594_v16  ;;  %v801_v22 = vand.u32 2147483647, %v2100_v14 }
 0x1b6   :  { %v1598_v25 = vpop.eup %1597  ;;  %v778_v26 = vmul.f32 %v1596_v21, %v2091_v45  ;;  %1603 = vrcp.f32 %v2106_v18  ;;  %v803_v42 = vand.u32 2147483648, %v2100_v14  ;;  %vm783_vm14 = vweird.f32 %v1596_v21  ;;  %vm769_vm0 = vmor %vm767_vm9, %vm768_vm13 }
 0x1b7   :  { %v1600_v40 = vpop.eup %1599  ;;  %v764_v34 = vsub.f32 1.0, %v763_v17  ;;  %v2129_v43 = vadd.f32 1.0, %v1598_v25  ;;  %vm797_vm15 = vweird.f32 %v2100_v14  ;;  %1605 = vpow2.f32 %v678_v31  ;;  %vm784_vm3 = vmor %vm782_vm10, %vm783_vm14 }
 0x1b8   :  { %v779_v7 = vsub.f32 1.0, %v778_v26  ;;  %v2131_v47 = vadd.f32 1.0, %v1600_v40  ;;  %v816_v52 = vand.u32 2147483647, %v2106_v18  ;;  %v818_v53 = vand.u32 2147483648, %v2106_v18 }
 0x1b9   :  { %v765_v38 = vmul.f32 %v1594_v16, %v764_v34  ;;  %1607 = vrcp.f32 %v2129_v43  ;;  %vm2140_vm1 = vcmp.eq.f32.partialorder %v801_v22, 8.507059e+37  ;;  %vm812_vm2 = vweird.f32 %v2106_v18  ;;  %v558_v22 = vpop.f32.mrf.mxu2 }
 0x1ba   :  { %v780_v29 = vmul.f32 %v1596_v21, %v779_v7  ;;  %v804_v61 = vor.u32 1.1754944e-38, %v803_v42  ;;  %1609 = vrcp.f32 %v2131_v47  ;;  %vm2155_vm4 = vcmp.eq.f32.partialorder %v816_v52, 8.507059e+37  ;;  %v587_v52 = vpop.f32.mrf.mxu3 }
 0x1bb   :  { %v1602_v48 = vpop.eup %1601  ;;  %v766_v49 = vadd.f32 %v1594_v16, %v765_v38  ;;  %v819_v45 = vor.u32 1.1754944e-38, %v818_v53  ;;  %v831_v12 = vand.u32 2147483647, %v2129_v43  ;;  %1611 = vpow2.f32 %v680_v36 }
 0x1bc   :  { %v781_v57 = vadd.f32 %v1596_v21, %v780_v29  ;;  %v793_v37 = vmul.f32 %v1602_v48, %v2100_v14  ;;  %v1604_v59 = vpop.eup %1603  ;;  %vm798_vm5 = vweird.f32 %v1602_v48  ;;  %vm827_vm8 = vweird.f32 %v2129_v43 }
 0x1bd   :  { %v770_v60 = vsel %vm769_vm0, %v1594_v16, %v766_v49  ;;  %v808_v1 = vmul.f32 %v1604_v59, %v2106_v18  ;;  %v1606_v6 = vpop.eup %1605  ;;  %vm813_vm6 = vweird.f32 %v1604_v59  ;;  %vm799_vm7 = vmor %vm797_vm15, %vm798_vm5  ;;  %v682_v23 = vmul.f32 1.442695, %v1462_v35 }
 0x1be   :  { %v775_v62 = vsel %vm2111_vm11, %v774_v24, %v770_v60  ;;  %v785_v63 = vsel %vm784_vm3, %v1596_v21, %v781_v57  ;;  %v794_v0 = vsub.f32 1.0, %v793_v37  ;;  %v2161_v13 = vadd.f32 1.0, %v1606_v6  ;;  %vm814_vm9 = vmor %vm812_vm2, %vm813_vm6 }
 0x1bf   :  { %v1242_v2 = vmul.f32 %v775_v62, %v2064_v39  ;;  %v790_v4 = vsel %vm2117_vm12, %v789_v30, %v785_v63  ;;  %v809_v10 = vsub.f32 1.0, %v808_v1  ;;  %v1608_v11 = vpop.eup %1607  ;;  %vm2178_vm11 = vcmp.eq.f32.partialorder %v831_v12, 8.507059e+37 }
 0x1c0   :  { %v1243_v55 = vmul.f32 %v790_v4, %v2067_v41  ;;  %v795_v8 = vmul.f32 %v1602_v48, %v794_v0  ;;  %v823_v21 = vmul.f32 %v1608_v11, %v2129_v43  ;;  %v1610_v17 = vpop.eup %1609  ;;  %v833_v41 = vand.u32 2147483648, %v2129_v43 }
 0x1c1   :  { %v810_v20 = vmul.f32 %v1604_v59, %v809_v10  ;;  %1613 = vrcp.f32 %v2161_v13  ;;  %v838_v27 = vmul.f32 %v1610_v17, %v2131_v47  ;;  %vm828_vm10 = vweird.f32 %v1608_v11  ;;  %v1612_v35 = vpop.eup %1611 }
 0x1c2   :  { %v1274_v39 = vpack.c.bf16 %v1243_v55, %v1242_v2  ;;  %v796_v16 = vadd.f32 %v1602_v48, %v795_v8  ;;  %v824_v26 = vsub.f32 1.0, %v823_v21  ;;  %v846_v31 = vand.u32 2147483647, %v2131_v47  ;;  %vm829_vm13 = vmor %vm827_vm8, %vm828_vm10 }
 0x1c3   :  { %v811_v25 = vadd.f32 %v1604_v59, %v810_v20  ;;  %v839_v7 = vsub.f32 1.0, %v838_v27  ;;  %vm843_vm12 = vweird.f32 %v1610_v17  ;;  %v848_v18 = vand.u32 2147483648, %v2131_v47 }
 0x1c4   :  { %1290 = vst [vmem:[%s2652_s5] sm:$0xff] %v1274_v39  ;;  %v800_v24 = vsel %vm799_vm7, %v1602_v48, %v796_v16  ;;  %v825_v9 = vmul.f32 %v1608_v11, %v824_v26  ;;  %1615 = vpow2.f32 %v682_v23  ;;  %v2188_v49 = vadd.f32 1.0, %v1612_v35 }
 0x1c5   :  { %v805_v14 = vsel %vm2140_vm1, %v804_v61, %v800_v24  ;;  %v815_v34 = vsel %vm814_vm9, %v1604_v59, %v811_v25  ;;  %v840_v48 = vmul.f32 %v1610_v17, %v839_v7  ;;  %v834_v53 = vor.u32 1.1754944e-38, %v833_v41 }
 0x1c6   :  { %v1244_v40 = vmul.f32 %v805_v14, %v2076_v50  ;;  %v820_v38 = vsel %vm2155_vm4, %v819_v45, %v815_v34  ;;  %v826_v29 = vadd.f32 %v1608_v11, %v825_v9  ;;  %vm842_vm14 = vweird.f32 %v2131_v47  ;;  %v560_v9 = vpop.f32.mrf.mxu2 }
 0x1c7   :  { %v1245_v42 = vmul.f32 %v820_v38, %v2079_v51  ;;  %v2190_v50 = vpop.eup %1613  ;;  %v1463_v57 = vmul.f32 -1.702, %v2124_v33  ;;  %v2198_v37 = vadd.f32 %v558_v22, %v2071_v44  ;;  %v841_v59 = vadd.f32 %v1610_v17, %v840_v48  ;;  %vm844_vm15 = vmor %vm842_vm14, %vm843_vm12 }
 0x1c8   :  { %v830_v58 = vsel %vm829_vm13, %v1608_v11, %v826_v29  ;;  %v853_v60 = vmul.f32 %v2190_v50, %v2161_v13  ;;  %v849_v43 = vor.u32 1.1754944e-38, %v848_v18  ;;  %1617 = vrcp.f32 %v2188_v49  ;;  %v502_v11 = vpop.f32.mrf.mxu0  ;;  %v589_v18 = vpop.f32.mrf.mxu3 }
 0x1c9   :  { %v1275_v51 = vpack.c.bf16 %v1245_v42, %v1244_v40  ;;  %v835_v61 = vsel %vm2178_vm11, %v834_v53, %v830_v58  ;;  %v2207_v47 = vadd.f32 %v587_v52, %v2073_v46  ;;  %v845_v62 = vsel %vm844_vm15, %v1610_v17, %v841_v59  ;;  %v531_v17 = vpop.f32.mrf.mxu1 }
 0x1ca   :  { %v1246_v36 = vmul.f32 %v835_v61, %v2082_v54  ;;  %vm847_vm0 = vcmp.eq.f32.partialorder %v846_v31, 8.507059e+37  ;;  %v854_v63 = vsub.f32 1.0, %v853_v60  ;;  %v1616_v0 = vpop.eup %1615  ;;  %v684_v2 = vmul.f32 1.442695, %v1463_v57 }
 0x1cb   :  { %1291 = vst [vmem:[%s2652_s5 + $0x8] sm:$0xff] %v1275_v51  ;;  %v850_v1 = vsel %vm847_vm0, %v849_v43, %v845_v62  ;;  %v1464_v4 = vmul.f32 -1.702, %v2198_v37  ;;  %v861_v6 = vand.u32 2147483647, %v2161_v13  ;;  %v2217_v55 = vadd.f32 1.0, %v1616_v0 }
 0x1cc   :  { %v1247_v5 = vmul.f32 %v850_v1, %v2085_v56  ;;  %v855_v45 = vmul.f32 %v2190_v50, %v854_v63  ;;  %v863_v8 = vand.u32 2147483648, %v2161_v13  ;;  %1619 = vpow2.f32 %v684_v2 }
 0x1cd   :  { %v686_v54 = vmul.f32 1.442695, %v1464_v4  ;;  %v1465_v10 = vmul.f32 -1.702, %v2207_v47  ;;  %vm858_vm1 = vweird.f32 %v2190_v50  ;;  %1621 = vrcp.f32 %v2217_v55 }
 0x1ce   :  { %v1276_v12 = vpack.c.bf16 %v1247_v5, %v1246_v36  ;;  %v856_v39 = vadd.f32 %v2190_v50, %v855_v45  ;;  %v1618_v56 = vpop.eup %1617  ;;  %v876_v16 = vand.u32 2147483647, %v2188_v49  ;;  %v878_v20 = vand.u32 2147483648, %v2188_v49 }
 0x1cf   :  { %1623 = vpow2.f32 %v686_v54  ;;  %v688_v21 = vmul.f32 1.442695, %v1465_v10  ;;  %vm857_vm2 = vweird.f32 %v2161_v13  ;;  %v868_v41 = vmul.f32 %v1618_v56, %v2188_v49 }
 0x1d0   :  { %1292 = vst [vmem:[%s2652_s5 + $0x10] sm:$0xff] %v1276_v12  ;;  %v2232_v23 = vadd.f32 %v502_v11, %v2059_v32  ;;  %vm2234_vm3 = vmor %vm857_vm2, %vm858_vm1  ;;  %vm2238_vm4 = vcmp.eq.f32.partialorder %v861_v6, 8.507059e+37  ;;  %v2247_v14 = vadd.f32 %v531_v17, %v2061_v28  ;;  %v864_v31 = vor.u32 1.1754944e-38, %v863_v8  ;;  %v505_v4 = vpop.f32.mrf.mxu0 }
 0x1d1   :  { %1625 = vpow2.f32 %v688_v21  ;;  %v860_v26 = vsel %vm2234_vm3, %v2190_v50, %v856_v39  ;;  %v869_v27 = vsub.f32 1.0, %v868_v41  ;;  %vm872_vm5 = vweird.f32 %v2188_v49 }
 0x1d2   :  { %v1466_v13 = vmul.f32 -1.702, %v2232_v23  ;;  %v1620_v30 = vpop.eup %1619  ;;  %vm2250_vm6 = vcmp.eq.f32.partialorder %v876_v16, 8.507059e+37  ;;  %v879_v34 = vor.u32 1.1754944e-38, %v878_v20  ;;  %vm873_vm7 = vweird.f32 %v1618_v56 }
 0x1d3   :  { %v2254_v7 = vpop.eup %1621  ;;  %v870_v22 = vmul.f32 %v1618_v56, %v869_v27  ;;  %v2256_v35 = vadd.f32 1.0, %v1620_v30  ;;  %v865_v29 = vsel %vm2238_vm4, %v864_v31, %v860_v26  ;;  %vm887_vm8 = vweird.f32 %v2217_v55  ;;  %vm874_vm9 = vmor %vm872_vm5, %vm873_vm7 }
 0x1d4   :  { %v690_v38 = vmul.f32 1.442695, %v1466_v13  ;;  %v883_v48 = vmul.f32 %v2254_v7, %v2217_v55  ;;  %v891_v52 = vand.u32 2147483647, %v2217_v55  ;;  %v893_v50 = vand.u32 2147483648, %v2217_v55 }
 0x1d5   :  { %v1624_v42 = vpop.eup %1623  ;;  %v871_v53 = vadd.f32 %v1618_v56, %v870_v22  ;;  %1627 = vrcp.f32 %v2256_v35  ;;  %v1467_v57 = vmul.f32 -1.702, %v2247_v14  ;;  %v2268_v51 = vadd.f32 %v560_v9, %v2071_v44 }
 0x1d6   :  { %v884_v59 = vsub.f32 1.0, %v883_v48  ;;  %v2273_v60 = vadd.f32 1.0, %v1624_v42  ;;  %1629 = vpow2.f32 %v690_v38  ;;  %v2276_v61 = vadd.f32 %v589_v18, %v2073_v46 }
 0x1d7   :  { %v1626_v58 = vpop.eup %1625  ;;  %v1248_v43 = vmul.f32 %v865_v29, %v2095_v3  ;;  %v875_v36 = vsel %vm874_vm9, %v1618_v56, %v871_v53  ;;  %v906_v62 = vand.u32 2147483647, %v2256_v35  ;;  %vm2285_vm10 = vcmp.eq.f32.partialorder %v891_v52, 8.507059e+37  ;;  %v534_v3 = vpop.f32.mrf.mxu1 }
 0x1d8   :  { %v2280_v63 = vadd.f32 1.0, %v1626_v58  ;;  %v880_v0 = vsel %vm2250_vm6, %v879_v34, %v875_v36  ;;  %v885_v49 = vmul.f32 %v2254_v7, %v884_v59  ;;  %v908_v2 = vand.u32 2147483648, %v2256_v35 }
 0x1d9   :  { %1631 = vrcp.f32 %v2273_v60  ;;  %v1249_v5 = vmul.f32 %v880_v0, %v2103_v15  ;;  %vm888_vm11 = vweird.f32 %v2254_v7  ;;  %v894_v45 = vor.u32 1.1754944e-38, %v893_v50 }
 0x1da   :  { %v692_v6 = vmul.f32 1.442695, %v1467_v57  ;;  %v886_v8 = vadd.f32 %v2254_v7, %v885_v49  ;;  %1633 = vrcp.f32 %v2280_v63  ;;  %v1468_v54 = vmul.f32 -1.702, %v2268_v51  ;;  %vm2317_vm14 = vmor %vm887_vm8, %vm888_vm11 }
 0x1db   :  { %v1469_v10 = vmul.f32 -1.702, %v2276_v61  ;;  %v1628_v11 = vpop.eup %1627  ;;  %v1277_v12 = vpack.c.bf16 %v1249_v5, %v1248_v43  ;;  %vm902_vm12 = vweird.f32 %v2256_v35  ;;  %v2299_v39 = vadd.f32 %v505_v4, %v2059_v32 }
 0x1dc   :  { %v2302_v15 = vadd.f32 %v534_v3, %v2061_v28  ;;  %v1630_v56 = vpop.eup %1629  ;;  %v898_v16 = vmul.f32 %v1628_v11, %v2256_v35  ;;  %vm2305_vm13 = vcmp.eq.f32.partialorder %v906_v62, 8.507059e+37  ;;  %v909_v21 = vor.u32 1.1754944e-38, %v908_v2  ;;  %v563_v35 = vpop.f32.mrf.mxu2 }
 0x1dd   :  { %v921_v17 = vand.u32 2147483647, %v2273_v60  ;;  %1293 = vst [vmem:[%s2652_s5 + $0x18] sm:$0xff] %v1277_v12  ;;  %v923_v24 = vand.u32 2147483648, %v2273_v60  ;;  %v936_v25 = vand.u32 2147483647, %v2280_v63  ;;  %1635 = vpow2.f32 %v692_v6 }
 0x1de   :  { %v2323_v26 = vadd.f32 1.0, %v1630_v56  ;;  %v890_v13 = vsel %vm2317_vm14, %v2254_v7, %v886_v8  ;;  %v899_v30 = vsub.f32 1.0, %v898_v16  ;;  %v694_v31 = vmul.f32 1.442695, %v1468_v54 }
 0x1df   :  { %v1632_v27 = vpop.eup %1631  ;;  %v696_v40 = vmul.f32 1.442695, %v1469_v10  ;;  %vm917_vm15 = vweird.f32 %v2273_v60  ;;  %v938_v34 = vand.u32 2147483648, %v2280_v63  ;;  %vm903_vm0 = vweird.f32 %v1628_v11 }
 0x1e0   :  { %v913_v55 = vmul.f32 %v1632_v27, %v2273_v60  ;;  %1637 = vrcp.f32 %v2323_v26  ;;  %v1634_v9 = vpop.eup %1633  ;;  %v900_v22 = vmul.f32 %v1628_v11, %v899_v30  ;;  %vm932_vm1 = vweird.f32 %v2280_v63  ;;  %vm904_vm4 = vmor %vm902_vm12, %vm903_vm0 }
 0x1e1   :  { %1639 = vpow2.f32 %v694_v31  ;;  %v895_v7 = vsel %vm2285_vm10, %v894_v45, %v890_v13  ;;  %v928_v18 = vmul.f32 %v1634_v9, %v2280_v63  ;;  %vm2336_vm2 = vcmp.eq.f32.partialorder %v921_v17, 8.507059e+37 }
 0x1e2   :  { %v914_v38 = vsub.f32 1.0, %v913_v55  ;;  %1641 = vpow2.f32 %v696_v40  ;;  %v901_v42 = vadd.f32 %v1628_v11, %v900_v22  ;;  %v924_v48 = vor.u32 1.1754944e-38, %v923_v24  ;;  %v592_v24 = vpop.f32.mrf.mxu3 }
 0x1e3   :  { %vm2340_vm3 = vcmp.eq.f32.partialorder %v936_v25, 8.507059e+37  ;;  %v1636_v50 = vpop.eup %1635  ;;  %vm918_vm5 = vweird.f32 %v1632_v27  ;;  %v929_v57 = vsub.f32 1.0, %v928_v18  ;;  %v939_v58 = vor.u32 1.1754944e-38, %v938_v34 }
 0x1e4   :  { %v915_v53 = vmul.f32 %v1632_v27, %v914_v38  ;;  %v1250_v59 = vmul.f32 %v895_v7, %v2109_v19  ;;  %v905_v43 = vsel %vm904_vm4, %v1628_v11, %v901_v42  ;;  %v951_v36 = vand.u32 2147483647, %v2323_v26  ;;  %vm919_vm7 = vmor %vm917_vm15, %vm918_vm5 }
 0x1e5   :  { %v2348_v62 = vadd.f32 1.0, %v1636_v50  ;;  %v910_v49 = vsel %vm2305_vm13, %v909_v21, %v905_v43  ;;  %v930_v2 = vmul.f32 %v1634_v9, %v929_v57  ;;  %vm933_vm6 = vweird.f32 %v1634_v9 }
 0x1e6   :  { %v1638_v0 = vpop.eup %1637  ;;  %v916_v1 = vadd.f32 %v1632_v27, %v915_v53  ;;  %v1251_v3 = vmul.f32 %v910_v49, %v2124_v33  ;;  %v953_v5 = vand.u32 2147483648, %v2323_v26  ;;  %v1470_v54 = vmul.f32 -1.702, %v2299_v39  ;;  %vm934_vm8 = vmor %vm932_vm1, %vm933_vm6 }
 0x1e7   :  { %v1640_v4 = vpop.eup %1639  ;;  %v943_v19 = vmul.f32 %v1638_v0, %v2323_v26  ;;  %1643 = vrcp.f32 %v2348_v62  ;;  %v931_v8 = vadd.f32 %v1634_v9, %v930_v2  ;;  %v1471_v10 = vmul.f32 -1.702, %v2302_v15 }
 0x1e8   :  { %v1642_v45 = vpop.eup %1641  ;;  %v920_v6 = vsel %vm919_vm7, %v1632_v27, %v916_v1  ;;  %v1278_v11 = vpack.c.bf16 %v1251_v3, %v1250_v59  ;;  %v2367_v12 = vadd.f32 %v563_v35, %v2071_v44  ;;  %vm948_vm9 = vweird.f32 %v1638_v0 }
 0x1e9   :  { %v925_v33 = vsel %vm2336_vm2, %v924_v48, %v920_v6  ;;  %v944_v60 = vsub.f32 1.0, %v943_v19  ;;  %v935_v16 = vsel %vm934_vm8, %v1634_v9, %v931_v8  ;;  %v2370_v20 = vadd.f32 1.0, %v1640_v4 }
 0x1ea   :  { %v1252_v56 = vmul.f32 %v925_v33, %v2198_v37  ;;  %1294 = vst [vmem:[%s2652_s5 + $0x20] sm:$0xff] %v1278_v11  ;;  %v940_v21 = vsel %vm2340_vm3, %v939_v58, %v935_v16  ;;  %v966_v63 = vand.u32 2147483647, %v2348_v62  ;;  %v2378_v41 = vadd.f32 1.0, %v1642_v45  ;;  %v536_v33 = vpop.f32.mrf.mxu1 }
 0x1eb   :  { %v945_v17 = vmul.f32 %v1638_v0, %v944_v60  ;;  %v1253_v25 = vmul.f32 %v940_v21, %v2207_v47  ;;  %v968_v37 = vand.u32 2147483648, %v2348_v62  ;;  %1645 = vrcp.f32 %v2370_v20  ;;  %v565_v60 = vpop.f32.mrf.mxu2 }
 0x1ec   :  { %v698_v27 = vmul.f32 1.442695, %v1470_v54  ;;  %vm947_vm10 = vweird.f32 %v2323_v26  ;;  %1647 = vrcp.f32 %v2378_v41  ;;  %v700_v31 = vmul.f32 1.442695, %v1471_v10  ;;  %v507_v26 = vpop.f32.mrf.mxu0 }
 0x1ed   :  { %v1644_v13 = vpop.eup %1643  ;;  %v946_v30 = vadd.f32 %v1638_v0, %v945_v17  ;;  %v1279_v40 = vpack.c.bf16 %v1253_v25, %v1252_v56  ;;  %vm949_vm11 = vmor %vm947_vm10, %vm948_vm9  ;;  %vm952_vm12 = vcmp.eq.f32.partialorder %v951_v36, 8.507059e+37  ;;  %v2388_v47 = vadd.f32 %v592_v24, %v2073_v46 }
 0x1ee   :  { %v958_v55 = vmul.f32 %v1644_v13, %v2348_v62  ;;  %v954_v9 = vor.u32 1.1754944e-38, %v953_v5  ;;  %vm962_vm13 = vweird.f32 %v2348_v62  ;;  %vm2391_vm14 = vcmp.eq.f32.partialorder %v966_v63, 8.507059e+37 }
 0x1ef   :  { %v950_v34 = vsel %vm949_vm11, %v1638_v0, %v946_v30  ;;  %1295 = vst [vmem:[%s2652_s5 + $0x28] sm:$0xff] %v1279_v40  ;;  %v969_v38 = vor.u32 1.1754944e-38, %v968_v37  ;;  %1649 = vpow2.f32 %v698_v27  ;;  %v1472_v18 = vmul.f32 -1.702, %v2367_v12 }
 0x1f0   :  { %v959_v7 = vsub.f32 1.0, %v958_v55  ;;  %v955_v42 = vsel %vm952_vm12, %v954_v9, %v950_v34  ;;  %vm963_vm15 = vweird.f32 %v1644_v13  ;;  %vm977_vm0 = vweird.f32 %v2370_v20 }
 0x1f1   :  { %1651 = vpow2.f32 %v700_v31  ;;  %v1646_v29 = vpop.eup %1645  ;;  %v702_v52 = vmul.f32 1.442695, %v1472_v18  ;;  %v1473_v50 = vmul.f32 -1.702, %v2388_v47  ;;  %v2402_v53 = vadd.f32 %v507_v26, %v2059_v32  ;;  %vm964_vm2 = vmor %vm962_vm13, %vm963_vm15 }
 0x1f2   :  { %v960_v48 = vmul.f32 %v1644_v13, %v959_v7  ;;  %v1648_v57 = vpop.eup %1647  ;;  %v973_v58 = vmul.f32 %v1646_v29, %v2370_v20  ;;  %v981_v59 = vand.u32 2147483647, %v2370_v20  ;;  %v983_v43 = vand.u32 2147483648, %v2370_v20  ;;  %v594_v7 = vpop.f32.mrf.mxu3 }
 0x1f3   :  { %vm992_vm1 = vweird.f32 %v2378_v41  ;;  %v988_v0 = vmul.f32 %v1648_v57, %v2378_v41  ;;  %v996_v49 = vand.u32 2147483647, %v2378_v41  ;;  %1653 = vpow2.f32 %v702_v52 }
 0x1f4   :  { %v961_v36 = vadd.f32 %v1644_v13, %v960_v48  ;;  %v1254_v1 = vmul.f32 %v955_v42, %v2232_v23  ;;  %v974_v2 = vsub.f32 1.0, %v973_v58  ;;  %v998_v35 = vand.u32 2147483648, %v2378_v41 }
 0x1f5   :  { %v704_v4 = vmul.f32 1.442695, %v1473_v50  ;;  %v1650_v3 = vpop.eup %1649  ;;  %vm978_vm3 = vweird.f32 %v1646_v29  ;;  %v989_v5 = vsub.f32 1.0, %v988_v0  ;;  %v1474_v45 = vmul.f32 -1.702, %v2402_v53 }
 0x1f6   :  { %v965_v19 = vsel %vm964_vm2, %v1644_v13, %v961_v36  ;;  %v975_v54 = vmul.f32 %v1646_v29, %v974_v2  ;;  %v2418_v23 = vadd.f32 1.0, %v1650_v3  ;;  %vm993_vm4 = vweird.f32 %v1648_v57  ;;  %vm979_vm6 = vmor %vm977_vm0, %vm978_vm3 }
 0x1f7   :  { %v1652_v6 = vpop.eup %1651  ;;  %v970_v8 = vsel %vm2391_vm14, %v969_v38, %v965_v19  ;;  %1655 = vpow2.f32 %v704_v4  ;;  %v990_v10 = vmul.f32 %v1648_v57, %v989_v5  ;;  %vm982_vm5 = vcmp.eq.f32.partialorder %v981_v59, 8.507059e+37  ;;  %vm994_vm7 = vmor %vm992_vm1, %vm993_vm4 }
 0x1f8   :  { %v1255_v62 = vmul.f32 %v970_v8, %v2247_v14  ;;  %v2421_v11 = vadd.f32 1.0, %v1652_v6  ;;  %v976_v56 = vadd.f32 %v1646_v29, %v975_v54  ;;  %v984_v16 = vor.u32 1.1754944e-38, %v983_v43 }
 0x1f9   :  { %1657 = vrcp.f32 %v2418_v23  ;;  %v1654_v21 = vpop.eup %1653  ;;  %v991_v63 = vadd.f32 %v1648_v57, %v990_v10  ;;  %v706_v14 = vmul.f32 1.442695, %v1474_v45  ;;  %v999_v25 = vor.u32 1.1754944e-38, %v998_v35 }
 0x1fa   :  { %v1280_v17 = vpack.c.bf16 %v1255_v62, %v1254_v1  ;;  %1659 = vrcp.f32 %v2421_v11  ;;  %v980_v24 = vsel %vm979_vm6, %v1646_v29, %v976_v56  ;;  %v2432_v37 = vadd.f32 %v536_v33, %v2061_v28 }
 0x1fb   :  { %v2435_v27 = vadd.f32 %v565_v60, %v2071_v44  ;;  %v985_v20 = vsel %vm982_vm5, %v984_v16, %v980_v24  ;;  %v995_v13 = vsel %vm994_vm7, %v1648_v57, %v991_v63  ;;  %vm997_vm8 = vcmp.eq.f32.partialorder %v996_v49, 8.507059e+37 }
 0x1fc   :  { %1296 = vst [vmem:[%s2652_s5 + $0x30] sm:$0xff] %v1280_v17  ;;  %v1011_v30 = vand.u32 2147483647, %v2418_v23  ;;  %v1256_v41 = vmul.f32 %v985_v20, %v2268_v51  ;;  %v1000_v40 = vsel %vm997_vm8, %v999_v25, %v995_v13  ;;  %v1013_v55 = vand.u32 2147483648, %v2418_v23 }
 0x1fd   :  { %v1656_v31 = vpop.eup %1655  ;;  %v2443_v34 = vadd.f32 1.0, %v1654_v21  ;;  %v1257_v9 = vmul.f32 %v1000_v40, %v2276_v61  ;;  %v1026_v22 = vand.u32 2147483647, %v2421_v11  ;;  %1661 = vpow2.f32 %v706_v14 }
 0x1fe   :  { %v2447_v26 = vadd.f32 1.0, %v1656_v31  ;;  %v1028_v18 = vand.u32 2147483648, %v2421_v11  ;;  %v1475_v51 = vmul.f32 -1.702, %v2432_v37  ;;  %v1476_v42 = vmul.f32 -1.702, %v2435_v27 }
 0x1ff   :  { %v1658_v38 = vpop.eup %1657  ;;  %1663 = vrcp.f32 %v2443_v34  ;;  %v1281_v48 = vpack.c.bf16 %v1257_v9, %v1256_v41  ;;  %vm1007_vm9 = vweird.f32 %v2418_v23  ;;  %vm2456_vm10 = vcmp.eq.f32.partialorder %v1011_v30, 8.507059e+37 }
 0x200   :  { %v1660_v29 = vpop.eup %1659  ;;  %v1003_v52 = vmul.f32 %v1658_v38, %v2418_v23  ;;  %1665 = vrcp.f32 %v2447_v26  ;;  %v2462_v57 = vadd.f32 %v594_v7, %v2073_v46  ;;  %v1014_v59 = vor.u32 1.1754944e-38, %v1013_v55 }
 0x201   :  { %v1018_v50 = vmul.f32 %v1660_v29, %v2421_v11  ;;  %1297 = vst [vmem:[%s2652_s5 + $0x38] sm:$0xff] %v1281_v48  ;;  %vm1022_vm11 = vweird.f32 %v2421_v11  ;;  %vm2468_vm12 = vcmp.eq.f32.partialorder %v1026_v22, 8.507059e+37  ;;  %v1029_v0 = vor.u32 1.1754944e-38, %v1028_v18 }
 0x202   :  { %v1004_v58 = vsub.f32 1.0, %v1003_v52  ;;  %v708_v49 = vmul.f32 1.442695, %v1475_v51  ;;  %v710_v1 = vmul.f32 1.442695, %v1476_v42  ;;  %vm1008_vm13 = vweird.f32 %v1658_v38 }
 0x203   :  { %v1019_v36 = vsub.f32 1.0, %v1018_v50  ;;  %v1662_v2 = vpop.eup %1661  ;;  %vm1037_vm14 = vweird.f32 %v2443_v34  ;;  %v1041_v4 = vand.u32 2147483647, %v2443_v34  ;;  %vm1023_vm15 = vweird.f32 %v1660_v29  ;;  %vm1009_vm0 = vmor %vm1007_vm9, %vm1008_vm13 }
 0x204   :  { %v1005_v35 = vmul.f32 %v1658_v38, %v1004_v58  ;;  %v2474_v5 = vadd.f32 1.0, %v1662_v2  ;;  %1667 = vpow2.f32 %v708_v49  ;;  %v1043_v54 = vand.u32 2147483648, %v2443_v34  ;;  %vm1024_vm1 = vmor %vm1022_vm11, %vm1023_vm15 }
 0x205   :  { %v1664_v3 = vpop.eup %1663  ;;  %v1020_v19 = vmul.f32 %v1660_v29, %v1019_v36  ;;  %1669 = vpow2.f32 %v710_v1  ;;  %v1477_v33 = vmul.f32 -1.702, %v2462_v57  ;;  %vm2485_vm2 = vcmp.eq.f32.partialorder %v1041_v4, 8.507059e+37 }
 0x206   :  { %v1666_v45 = vpop.eup %1665  ;;  %v1006_v6 = vadd.f32 %v1658_v38, %v1005_v35  ;;  %v1033_v8 = vmul.f32 %v1664_v3, %v2443_v34  ;;  %1671 = vrcp.f32 %v2474_v5  ;;  %v1056_v21 = vand.u32 2147483647, %v2447_v26 }
 0x207   :  { %v1021_v62 = vadd.f32 %v1660_v29, %v1020_v19  ;;  %v1048_v10 = vmul.f32 %v1666_v45, %v2447_v26  ;;  %v1058_v14 = vand.u32 2147483648, %v2447_v26  ;;  %vm1038_vm3 = vweird.f32 %v1664_v3 }
 0x208   :  { %v1010_v60 = vsel %vm1009_vm0, %v1658_v38, %v1006_v6  ;;  %v1034_v56 = vsub.f32 1.0, %v1033_v8  ;;  %vm1053_vm4 = vweird.f32 %v1666_v45  ;;  %v712_v31 = vmul.f32 1.442695, %v1477_v33  ;;  %vm1039_vm6 = vmor %vm1037_vm14, %vm1038_vm3 }
 0x209   :  { %v1015_v23 = vsel %vm2456_vm10, %v1014_v59, %v1010_v60  ;;  %v1025_v17 = vsel %vm1024_vm1, %v1660_v29, %v1021_v62  ;;  %v1049_v63 = vsub.f32 1.0, %v1048_v10  ;;  %v1044_v55 = vor.u32 1.1754944e-38, %v1043_v54 }
 0x20a   :  { %v1258_v24 = vmul.f32 %v1015_v23, %v2299_v39  ;;  %v1030_v11 = vsel %vm2468_vm12, %v1029_v0, %v1025_v17  ;;  %v1035_v25 = vmul.f32 %v1664_v3, %v1034_v56  ;;  %v1668_v20 = vpop.eup %1667  ;;  %vm1052_vm5 = vweird.f32 %v2447_v26 }
 0x20b   :  { %v1259_v13 = vmul.f32 %v1030_v11, %v2302_v15  ;;  %v1050_v30 = vmul.f32 %v1666_v45, %v1049_v63  ;;  %v1670_v41 = vpop.eup %1669  ;;  %v751_v9 = vadd.f32 1.0, %v1668_v20  ;;  %1673 = vpow2.f32 %v712_v31  ;;  %vm1054_vm7 = vmor %vm1052_vm5, %vm1053_vm4 }
 0x20c   :  { %v1036_v40 = vadd.f32 %v1664_v3, %v1035_v25  ;;  %v1672_v22 = vpop.eup %1671  ;;  %v2500_v38 = vadd.f32 1.0, %v1670_v41  ;;  %v1059_v15 = vor.u32 1.1754944e-38, %v1058_v14  ;;  %vm1057_vm8 = vcmp.eq.f32.partialorder %v1056_v21, 8.507059e+37 }
 0x20d   :  { %v1282_v7 = vpack.c.bf16 %v1259_v13, %v1258_v24  ;;  %v1051_v39 = vadd.f32 %v1666_v45, %v1050_v30  ;;  %v1063_v51 = vmul.f32 %v1672_v22, %v2474_v5  ;;  %1675 = vrcp.f32 %v751_v9 }
 0x20e   :  { %v1040_v18 = vsel %vm1039_vm6, %v1664_v3, %v1036_v40  ;;  %1677 = vrcp.f32 %v2500_v38  ;;  %v1071_v50 = vand.u32 2147483647, %v2474_v5  ;;  %vm1068_vm9 = vweird.f32 %v1672_v22 }
 0x20f   :  { %1298 = vst [vmem:[%s2652_s5 + $0x40] sm:$0xff] %v1282_v7  ;;  %v1045_v26 = vsel %vm2485_vm2, %v1044_v55, %v1040_v18  ;;  %v1055_v42 = vsel %vm1054_vm7, %v1666_v45, %v1051_v39  ;;  %v1064_v48 = vsub.f32 1.0, %v1063_v51  ;;  %v1073_v43 = vand.u32 2147483648, %v2474_v5 }
 0x210   :  { %v1260_v34 = vmul.f32 %v1045_v26, %v2367_v12  ;;  %v1060_v29 = vsel %vm1057_vm8, %v1059_v15, %v1055_v42  ;;  %vm1067_vm10 = vweird.f32 %v2474_v5  ;;  %vm2523_vm12 = vcmp.eq.f32.partialorder %v1071_v50, 8.507059e+37 }
 0x211   :  { %v1261_v52 = vmul.f32 %v1060_v29, %v2388_v47  ;;  %v1065_v61 = vmul.f32 %v1672_v22, %v1064_v48  ;;  %v1674_v58 = vpop.eup %1673  ;;  %vm2519_vm11 = vmor %vm1067_vm10, %vm1068_vm9  ;;  %v1086_v2 = vand.u32 2147483647, %v751_v9  ;;  %v1074_v19 = vor.u32 1.1754944e-38, %v1073_v43 }
 0x212   :  { %v2513_v49 = vadd.f32 1.0, %v1674_v58  ;;  %vm1082_vm13 = vweird.f32 %v751_v9  ;;  %v1088_v8 = vand.u32 2147483648, %v751_v9  ;;  %v1101_v62 = vand.u32 2147483647, %v2500_v38 }
 0x213   :  { %v1283_v59 = vpack.c.bf16 %v1261_v52, %v1260_v34  ;;  %v1676_v36 = vpop.eup %1675  ;;  %v1066_v0 = vadd.f32 %v1672_v22, %v1065_v61  ;;  %vm2541_vm15 = vcmp.eq.f32.partialorder %v1086_v2, 8.507059e+37  ;;  %v1103_v23 = vand.u32 2147483648, %v2500_v38 }
 0x214   :  { %v1078_v12 = vmul.f32 %v1676_v36, %v751_v9  ;;  %1679 = vrcp.f32 %v2513_v49  ;;  %v1678_v4 = vpop.eup %1677  ;;  %vm1083_vm14 = vweird.f32 %v1676_v36  ;;  %vm1097_vm0 = vweird.f32 %v2500_v38 }
 0x215   :  { %1299 = vst [vmem:[%s2652_s5 + $0x48] sm:$0xff] %v1283_v59  ;;  %v1070_v3 = vsel %vm2519_vm11, %v1672_v22, %v1066_v0  ;;  %v1093_v54 = vmul.f32 %v1678_v4, %v2500_v38  ;;  %vm1084_vm1 = vmor %vm1082_vm13, %vm1083_vm14  ;;  %v1089_v11 = vor.u32 1.1754944e-38, %v1088_v8  ;;  %vm1098_vm2 = vweird.f32 %v1678_v4 }
 0x216   :  { %v1079_v45 = vsub.f32 1.0, %v1078_v12  ;;  %v1075_v56 = vsel %vm2523_vm12, %v1074_v19, %v1070_v3  ;;  %vm2549_vm3 = vcmp.eq.f32.partialorder %v1101_v62, 8.507059e+37  ;;  %v1104_v55 = vor.u32 1.1754944e-38, %v1103_v23  ;;  %vm1099_vm4 = vmor %vm1097_vm0, %vm1098_vm2 }
 0x217   :  { %v1094_v21 = vsub.f32 1.0, %v1093_v54  ;;  %v1262_v13 = vmul.f32 %v1075_v56, %v2402_v53  ;;  %v1116_v18 = vand.u32 2147483647, %v2513_v49  ;;  %v1118_v26 = vand.u32 2147483648, %v2513_v49 }
 0x218   :  { %v510_v35 = vpop.f32.mrf.mxu0  ;;  %v539_v6 = vpop.f32.mrf.mxu1  ;;  %v1080_v10 = vmul.f32 %v1676_v36, %v1079_v45  ;;  %vm1112_vm6 = vweird.f32 %v2513_v49 }
 0x219   :  { %v2531_v5 = vadd.f32 %v510_v35, %v2059_v32  ;;  %v2537_v60 = vadd.f32 %v539_v6, %v2061_v28  ;;  %v1095_v25 = vmul.f32 %v1678_v4, %v1094_v21  ;;  %v1119_v58 = vor.u32 1.1754944e-38, %v1118_v26 }
 0x21a   :  { %v1081_v17 = vadd.f32 %v1676_v36, %v1080_v10  ;;  %v1680_v24 = vpop.eup %1679  ;;  %vm1117_vm8 = vcmp.eq.f32.partialorder %v1116_v18, 8.507059e+37 }
 0x21b   :  { %v1478_v33 = vmul.f32 -1.702, %v2531_v5  ;;  %v1479_v14 = vmul.f32 -1.702, %v2537_v60  ;;  %v1108_v31 = vmul.f32 %v1680_v24, %v2513_v49  ;;  %v1096_v40 = vadd.f32 %v1678_v4, %v1095_v25 }
 0x21c   :  { %v1085_v30 = vsel %vm1084_vm1, %v1676_v36, %v1081_v17  ;;  %vm1113_vm5 = vweird.f32 %v1680_v24 }
 0x21d   :  { %v714_v63 = vmul.f32 1.442695, %v1478_v33  ;;  %v1090_v41 = vsel %vm2541_vm15, %v1089_v11, %v1085_v30  ;;  %v716_v9 = vmul.f32 1.442695, %v1479_v14  ;;  %v1109_v39 = vsub.f32 1.0, %v1108_v31  ;;  %vm1114_vm7 = vmor %vm1112_vm6, %vm1113_vm5 }
 0x21e   :  { %v1263_v7 = vmul.f32 %v1090_v41, %v2432_v37  ;;  %v1100_v51 = vsel %vm1099_vm4, %v1678_v4, %v1096_v40 }
 0x21f   :  { %1681 = vpow2.f32 %v714_v63  ;;  %v568_v22 = vpop.f32.mrf.mxu2  ;;  %v597_v15 = vpop.f32.mrf.mxu3  ;;  %v1110_v29 = vmul.f32 %v1680_v24, %v1109_v39  ;;  %v1105_v38 = vsel %vm2549_vm3, %v1104_v55, %v1100_v51 }
 0x220   :  { %v2562_v53 = vadd.f32 %v568_v22, %v2071_v44  ;;  %1683 = vpow2.f32 %v716_v9  ;;  %v2566_v42 = vadd.f32 %v597_v15, %v2073_v46  ;;  %v1284_v34 = vpack.c.bf16 %v1263_v7, %v1262_v13  ;;  %v512_v1 = vpop.f32.mrf.mxu0  ;;  %v541_v3 = vpop.f32.mrf.mxu1 }
 0x221   :  { %v1111_v61 = vadd.f32 %v1680_v24, %v1110_v29  ;;  %v1264_v36 = vmul.f32 %v1105_v38, %v2435_v27  ;;  %v2579_v49 = vadd.f32 %v512_v1, %v2059_v32  ;;  %v2583_v27 = vadd.f32 %v541_v3, %v2061_v28 }
 0x222   :  { %v1480_v37 = vmul.f32 -1.702, %v2562_v53  ;;  %v1481_v48 = vmul.f32 -1.702, %v2566_v42  ;;  %1300 = vst [vmem:[%s2652_s5 + $0x50] sm:$0xff] %v1284_v34 }
 0x223   :  { %v1115_v0 = vsel %vm1114_vm7, %v1680_v24, %v1111_v61  ;;  %v1482_v19 = vmul.f32 -1.702, %v2579_v49  ;;  %v1483_v62 = vmul.f32 -1.702, %v2583_v27 }
 0x224   :  { %v718_v50 = vmul.f32 1.442695, %v1480_v37  ;;  %v720_v43 = vmul.f32 1.442695, %v1481_v48  ;;  %v1120_v47 = vsel %vm1117_vm8, %v1119_v58, %v1115_v0 }
 0x225   :  { %v1682_v52 = vpop.eup %1681  ;;  %v1265_v2 = vmul.f32 %v1120_v47, %v2462_v57  ;;  %v722_v8 = vmul.f32 1.442695, %v1482_v19  ;;  %v724_v21 = vmul.f32 1.442695, %v1483_v62 }
 0x226   :  { %v754_v59 = vadd.f32 1.0, %v1682_v52  ;;  %1685 = vpow2.f32 %v718_v50  ;;  %v1684_v12 = vpop.eup %1683 }
 0x227   :  { %v755_v35 = vadd.f32 1.0, %v1684_v12  ;;  %v1285_v4 = vpack.c.bf16 %v1265_v2, %v1264_v36  ;;  %v570_v24 = vpop.f32.mrf.mxu2  ;;  %v599_v39 = vpop.f32.mrf.mxu3 }
 0x228   :  { %1687 = vrcp.f32 %v754_v59  ;;  %v1131_v10 = vand.u32 2147483647, %v754_v59  ;;  %v1133_v33 = vand.u32 2147483648, %v754_v59  ;;  %vm1127_vm10 = vweird.f32 %v754_v59 }
 0x229   :  { %1689 = vpow2.f32 %v720_v43  ;;  %1301 = vst [vmem:[%s2652_s5 + $0x58] sm:$0xff] %v1285_v4  ;;  %v1146_v17 = vand.u32 2147483647, %v755_v35  ;;  %v1148_v14 = vand.u32 2147483648, %v755_v35  ;;  %v2596_v25 = vadd.f32 %v570_v24, %v2071_v44 }
 0x22a   :  { %1691 = vrcp.f32 %v755_v35  ;;  %vm1132_vm11 = vcmp.eq.f32.partialorder %v1131_v10, 8.507059e+37  ;;  %v1134_v13 = vor.u32 1.1754944e-38, %v1133_v33  ;;  %vm1142_vm12 = vweird.f32 %v755_v35 }
 0x22b   :  { %vm2598_vm15 = vcmp.eq.f32.partialorder %v1146_v17, 8.507059e+37  ;;  %v1484_v40 = vmul.f32 -1.702, %v2596_v25  ;;  %v1149_v22 = vor.u32 1.1754944e-38, %v1148_v14  ;;  %v2611_v38 = vadd.f32 %v599_v39, %v2073_v46 }
 0x22c   :  { %v1686_v45 = vpop.eup %1685 }
 0x22d   :  { %v2588_v57 = vadd.f32 1.0, %v1686_v45  ;;  %v726_v37 = vmul.f32 1.442695, %v1484_v40  ;;  %v1485_v1 = vmul.f32 -1.702, %v2611_v38 }
 0x22e   :  { %v1688_v6 = vpop.eup %1687 }
 0x22f   :  { %v1690_v54 = vpop.eup %1689  ;;  %v1123_v32 = vmul.f32 %v1688_v6, %v754_v59  ;;  %1693 = vrcp.f32 %v2588_v57  ;;  %vm1128_vm9 = vweird.f32 %v1688_v6  ;;  %v1163_v7 = vand.u32 2147483648, %v2588_v57 }
 0x230   :  { %v1692_v56 = vpop.eup %1691  ;;  %v2592_v16 = vadd.f32 1.0, %v1690_v54  ;;  %1695 = vpow2.f32 %v722_v8  ;;  %vm1129_vm13 = vmor %vm1127_vm10, %vm1128_vm9  ;;  %vm1157_vm0 = vweird.f32 %v2588_v57  ;;  %v1161_v29 = vand.u32 2147483647, %v2588_v57 }
 0x231   :  { %v1124_v28 = vsub.f32 1.0, %v1123_v32  ;;  %v1138_v23 = vmul.f32 %v1692_v56, %v755_v35  ;;  %vm1143_vm14 = vweird.f32 %v1692_v56  ;;  %v1164_v43 = vor.u32 1.1754944e-38, %v1163_v7 }
 0x232   :  { %1697 = vrcp.f32 %v2592_v16  ;;  %vm1144_vm1 = vmor %vm1142_vm12, %vm1143_vm14  ;;  %v1176_v46 = vand.u32 2147483647, %v2592_v16  ;;  %vm1162_vm5 = vcmp.eq.f32.partialorder %v1161_v29, 8.507059e+37  ;;  %vm1172_vm6 = vweird.f32 %v2592_v16 }
 0x233   :  { %v1125_v63 = vmul.f32 %v1688_v6, %v1124_v28  ;;  %v1139_v11 = vsub.f32 1.0, %v1138_v23  ;;  %1699 = vpow2.f32 %v724_v21  ;;  %v728_v45 = vmul.f32 1.442695, %v1485_v1 }
 0x234   :  { %vm1177_vm8 = vcmp.eq.f32.partialorder %v1176_v46, 8.507059e+37 }
 0x235   :  { %v1126_v20 = vadd.f32 %v1688_v6, %v1125_v63  ;;  %v1694_v30 = vpop.eup %1693  ;;  %v1140_v31 = vmul.f32 %v1692_v56, %v1139_v11 }
 0x236   :  { %v1696_v55 = vpop.eup %1695  ;;  %v1153_v44 = vmul.f32 %v1694_v30, %v2588_v57  ;;  %vm1158_vm2 = vweird.f32 %v1694_v30 }
 0x237   :  { %v1130_v9 = vsel %vm1129_vm13, %v1688_v6, %v1126_v20  ;;  %v1141_v15 = vadd.f32 %v1692_v56, %v1140_v31  ;;  %v2606_v51 = vadd.f32 1.0, %v1696_v55  ;;  %vm1159_vm3 = vmor %vm1157_vm0, %vm1158_vm2 }
 0x238   :  { %v1135_v18 = vsel %vm1132_vm11, %v1134_v13, %v1130_v9  ;;  %v1698_v26 = vpop.eup %1697  ;;  %v1154_v34 = vsub.f32 1.0, %v1153_v44 }
 0x239   :  { %v1700_v48 = vpop.eup %1699  ;;  %v1266_v52 = vmul.f32 %v1135_v18, %v2531_v5  ;;  %v1145_v61 = vsel %vm1144_vm1, %v1692_v56, %v1141_v15  ;;  %v1168_v50 = vmul.f32 %v1698_v26, %v2592_v16  ;;  %1701 = vrcp.f32 %v2606_v51 }
 0x23a   :  { %v1150_v58 = vsel %vm2598_vm15, %v1149_v22, %v1145_v61  ;;  %v1155_v59 = vmul.f32 %v1694_v30, %v1154_v34  ;;  %v759_v12 = vadd.f32 1.0, %v1700_v48  ;;  %v1178_v5 = vand.u32 2147483648, %v2592_v16 }
 0x23b   :  { %v1267_v36 = vmul.f32 %v1150_v58, %v2537_v60  ;;  %v1169_v0 = vsub.f32 1.0, %v1168_v50  ;;  %1703 = vpow2.f32 %v726_v37  ;;  %vm1173_vm4 = vweird.f32 %v1698_v26 }
 0x23c   :  { %v1156_v47 = vadd.f32 %v1694_v30, %v1155_v59  ;;  %1705 = vrcp.f32 %v759_v12  ;;  %vm1174_vm7 = vmor %vm1172_vm6, %vm1173_vm4  ;;  %v1179_v6 = vor.u32 1.1754944e-38, %v1178_v5  ;;  %v1191_v28 = vand.u32 2147483647, %v2606_v51 }
 0x23d   :  { %v1286_v2 = vpack.c.bf16 %v1267_v36, %v1266_v52  ;;  %v1170_v35 = vmul.f32 %v1698_v26, %v1169_v0  ;;  %1707 = vpow2.f32 %v728_v45  ;;  %v1193_v16 = vand.u32 2147483648, %v2606_v51 }
 0x23e   :  { %v1160_v4 = vsel %vm1159_vm3, %v1694_v30, %v1156_v47  ;;  %vm1187_vm10 = vweird.f32 %v2606_v51  ;;  %vm1192_vm12 = vcmp.eq.f32.partialorder %v1191_v28, 8.507059e+37  ;;  %v1206_v11 = vand.u32 2147483647, %v759_v12 }
 0x23f   :  { %v1702_v60 = vpop.eup %1701  ;;  %1302 = vst [vmem:[%s2652_s5 + $0x60] sm:$0xff] %v1286_v2  ;;  %v1165_v3 = vsel %vm1162_vm5, %v1164_v43, %v1160_v4  ;;  %v1171_v19 = vadd.f32 %v1698_v26, %v1170_v35  ;;  %v1208_v20 = vand.u32 2147483648, %v759_v12  ;;  %vm1202_vm14 = vweird.f32 %v759_v12 }
 0x240   :  { %v1183_v57 = vmul.f32 %v1702_v60, %v2606_v51  ;;  %v1268_v8 = vmul.f32 %v1165_v3, %v2562_v53  ;;  %vm1188_vm9 = vweird.f32 %v1702_v60  ;;  %vm1207_vm0 = vcmp.eq.f32.partialorder %v1206_v11, 8.507059e+37 }
 0x241   :  { %v1175_v54 = vsel %vm1174_vm7, %v1698_v26, %v1171_v19  ;;  %v1704_v32 = vpop.eup %1703  ;;  %vm1189_vm11 = vmor %vm1187_vm10, %vm1188_vm9  ;;  %v1209_v9 = vor.u32 1.1754944e-38, %v1208_v20 }
 0x242   :  { %v1180_v62 = vsel %vm1177_vm8, %v1179_v6, %v1175_v54  ;;  %v1184_v10 = vsub.f32 1.0, %v1183_v57  ;;  %v1706_v33 = vpop.eup %1705  ;;  %v760_v21 = vadd.f32 1.0, %v1704_v32 }
 0x243   :  { %v1269_v56 = vmul.f32 %v1180_v62, %v2566_v42  ;;  %v1198_v17 = vmul.f32 %v1706_v33, %v759_v12  ;;  %v1708_v24 = vpop.eup %1707  ;;  %v1194_v42 = vor.u32 1.1754944e-38, %v1193_v16  ;;  %vm1203_vm13 = vweird.f32 %v1706_v33 }
 0x244   :  { %v1185_v23 = vmul.f32 %v1702_v60, %v1184_v10  ;;  %1709 = vrcp.f32 %v760_v21  ;;  %v761_v31 = vadd.f32 1.0, %v1708_v24  ;;  %vm1204_vm15 = vmor %vm1202_vm14, %vm1203_vm13  ;;  %v1223_v29 = vand.u32 2147483648, %v760_v21 }
 0x245   :  { %v1287_v63 = vpack.c.bf16 %v1269_v56, %v1268_v8  ;;  %v1199_v14 = vsub.f32 1.0, %v1198_v17  ;;  %v1221_v37 = vand.u32 2147483647, %v760_v21  ;;  %vm1217_vm2 = vweird.f32 %v760_v21 }
 0x246   :  { %v1186_v53 = vadd.f32 %v1702_v60, %v1185_v23  ;;  %1711 = vrcp.f32 %v761_v31  ;;  %v1224_v50 = vor.u32 1.1754944e-38, %v1223_v29  ;;  %v1238_v58 = vand.u32 2147483648, %v761_v31 }
 0x247   :  { %1303 = vst [vmem:[%s2652_s5 + $0x68] sm:$0xff] %v1287_v63  ;;  %v1200_v30 = vmul.f32 %v1706_v33, %v1199_v14  ;;  %vm1222_vm4 = vcmp.eq.f32.partialorder %v1221_v37, 8.507059e+37  ;;  %v1236_v59 = vand.u32 2147483647, %v761_v31  ;;  %vm1232_vm6 = vweird.f32 %v761_v31 }
 0x248   :  { %v1190_v13 = vsel %vm1189_vm11, %v1702_v60, %v1186_v53  ;;  %v1239_v0 = vor.u32 1.1754944e-38, %v1238_v58 }
 0x249   :  { %v1195_v41 = vsel %vm1192_vm12, %v1194_v42, %v1190_v13  ;;  %v1201_v40 = vadd.f32 %v1706_v33, %v1200_v30  ;;  %vm1237_vm8 = vcmp.eq.f32.partialorder %v1236_v59, 8.507059e+37 }
 0x24a   :  { %v1710_v55 = vpop.eup %1709  ;;  %v1270_v22 = vmul.f32 %v1195_v41, %v2579_v49 }
 0x24b   :  { %v1205_v44 = vsel %vm1204_vm15, %v1706_v33, %v1201_v40  ;;  %v1213_v7 = vmul.f32 %v1710_v55, %v760_v21  ;;  %vm1218_vm1 = vweird.f32 %v1710_v55 }
 0x24c   :  { %v1210_v39 = vsel %vm1207_vm0, %v1209_v9, %v1205_v44  ;;  %v1712_v51 = vpop.eup %1711  ;;  %vm1219_vm3 = vmor %vm1217_vm2, %vm1218_vm1 }
 0x24d   :  { %v1271_v18 = vmul.f32 %v1210_v39, %v2583_v27  ;;  %v1214_v15 = vsub.f32 1.0, %v1213_v7  ;;  %v1228_v48 = vmul.f32 %v1712_v51, %v761_v31  ;;  %vm1233_vm5 = vweird.f32 %v1712_v51 }
 0x24e   :  { %vm1234_vm7 = vmor %vm1232_vm6, %vm1233_vm5 }
 0x24f   :  { %v1288_v26 = vpack.c.bf16 %v1271_v18, %v1270_v22  ;;  %v1215_v34 = vmul.f32 %v1710_v55, %v1214_v15  ;;  %v1229_v49 = vsub.f32 1.0, %v1228_v48 }
 0x251   :  { %1304 = vst [vmem:[%s2652_s5 + $0x70] sm:$0xff] %v1288_v26  ;;  %v1216_v52 = vadd.f32 %v1710_v55, %v1215_v34  ;;  %v1230_v27 = vmul.f32 %v1712_v51, %v1229_v49 }
 0x253   :  { %v1220_v61 = vsel %vm1219_vm3, %v1710_v55, %v1216_v52  ;;  %v1231_v36 = vadd.f32 %v1712_v51, %v1230_v27 }
 0x254   :  { %v1225_v43 = vsel %vm1222_vm4, %v1224_v50, %v1220_v61 }
 0x255   :  { %v1272_v46 = vmul.f32 %v1225_v43, %v2596_v25  ;;  %v1235_v12 = vsel %vm1234_vm7, %v1712_v51, %v1231_v36 }
 0x256   :  { %v1240_v47 = vsel %vm1237_vm8, %v1239_v0, %v1235_v12 }
 0x257   :  { %v1273_v5 = vmul.f32 %v1240_v47, %v2611_v38 }
 0x259   :  { %v1289_v1 = vpack.c.bf16 %v1273_v5, %v1272_v46 }
 0x25b   :  { %1305 = vst [vmem:[%s2652_s5 + $0x78] sm:$0xff] %v1289_v1 }

// kernel: vision_transformer_forward.39
= control target key start
LH: loop header
LB: loop body
LE: loop exit
PB: predicated region body
PF: predicated region fallthrough
CT: control target
= control target key end

     0   :  { %8 = vsyncpa [#allocation4], 0  ;;  %s869_s15 = smov [#allocation3]   ;;  %s870_s17 = smov 64   ;;  %s1006_s0 = inlined_call_operand.vmem [shape: bf16[64,512], index: 0, kind: input, shape index: {}]   ;;  %s1007_s1 = inlined_call_operand.hbm [shape: bf16[512,128], index: 1, kind: input, shape index: {}]   ;;  %s1008_s2 = inlined_call_operand.vmem [shape: bf16[1,128], index: 2, kind: input, shape index: {}]   ;;  %s1009_s3 = inlined_call_operand.vmem [shape: bf16[64,128], index: 3, kind: output, shape index: {}]  }
   0x1   :  { %s15_s14 = sshll.u32 %s1007_s1, 4  ;;  %s17_s16 = sshll.u32 %s869_s15, 4  ;;  %s16_s14 = int_to_ptr.hbm [resolvable:$true] %s15_s14  ;;  %s18_s16 = int_to_ptr.vmem [resolvable:$true] %s17_s16 }
   0x2   :  { %s871_s18 = smov 4  }
   0x3   :  { %23 = dma.hbm_to_vmem [thread:$0]  %s16_s14, 4096, %s18_s16, [#allocation4], %s870_s17, %s870_s17, %s871_s18  }
   0x4   :  { %867 = dma.done.wait [#allocation4], 4096  }
   0x5   :  { %868 = vsyncadd [#allocation4], 4294963200  ;;  %v792_v0 = vld [vmem:[#allocation3 + $0x38] sm:$0xff]  ;;  %v791_v4 = vld [vmem:[#allocation3 + $0x30] sm:$0xff] }
   0x6   :  { %v800_v1 = vld [vmem:[#allocation3 + $0x78] sm:$0xff]  ;;  %402 = vmatpush.bf16.msra.mxu0 %v792_v0  ;;  %v799_v5 = vld [vmem:[#allocation3 + $0x70] sm:$0xff]  ;;  %v790_v8 = vld [vmem:[#allocation3 + $0x28] sm:$0xff] }
   0x7   :  { %v808_v2 = vld [vmem:[#allocation3 + $0xb8] sm:$0xff]  ;;  %431 = vmatpush.bf16.msra.mxu1 %v800_v1  ;;  %v807_v6 = vld [vmem:[#allocation3 + $0xb0] sm:$0xff]  ;;  %v798_v9 = vld [vmem:[#allocation3 + $0x68] sm:$0xff] }
   0x8   :  { %v816_v3 = vld [vmem:[#allocation3 + $0xf8] sm:$0xff]  ;;  %460 = vmatpush.bf16.msra.mxu2 %v808_v2  ;;  %v815_v7 = vld [vmem:[#allocation3 + $0xf0] sm:$0xff]  ;;  %v806_v10 = vld [vmem:[#allocation3 + $0xa8] sm:$0xff] }
   0x9   :  { %489 = vmatpush.bf16.msra.mxu3 %v816_v3  ;;  %v814_v11 = vld [vmem:[#allocation3 + $0xe8] sm:$0xff]  ;;  %v789_v12 = vld [vmem:[#allocation3 + $0x20] sm:$0xff]  ;;  %v788_v16 = vld [vmem:[#allocation3 + $0x18] sm:$0xff] }
   0xa   :  { %403 = vmatpush.bf16.msra.mxu0 %v791_v4  ;;  %v797_v13 = vld [vmem:[#allocation3 + $0x60] sm:$0xff]  ;;  %v796_v17 = vld [vmem:[#allocation3 + $0x58] sm:$0xff]  ;;  %v787_v20 = vld [vmem:[#allocation3 + $0x10] sm:$0xff] }
   0xb   :  { %432 = vmatpush.bf16.msra.mxu1 %v799_v5  ;;  %v805_v14 = vld [vmem:[#allocation3 + $0xa0] sm:$0xff]  ;;  %v804_v18 = vld [vmem:[#allocation3 + $0x98] sm:$0xff]  ;;  %v795_v21 = vld [vmem:[#allocation3 + $0x50] sm:$0xff] }
   0xc   :  { %461 = vmatpush.bf16.msra.mxu2 %v807_v6  ;;  %v813_v15 = vld [vmem:[#allocation3 + $0xe0] sm:$0xff]  ;;  %v812_v19 = vld [vmem:[#allocation3 + $0xd8] sm:$0xff]  ;;  %v803_v22 = vld [vmem:[#allocation3 + $0x90] sm:$0xff] }
   0xd   :  { %490 = vmatpush.bf16.msra.mxu3 %v815_v7  ;;  %v811_v23 = vld [vmem:[#allocation3 + $0xd0] sm:$0xff]  ;;  %v786_v24 = vld [vmem:[#allocation3 + $0x8] sm:$0xff]  ;;  %v785_v28 = vld [vmem:[#allocation3] sm:$0xff] }
   0xe   :  { %404 = vmatpush.bf16.msra.mxu0 %v790_v8  ;;  %v794_v25 = vld [vmem:[#allocation3 + $0x48] sm:$0xff]  ;;  %v793_v29 = vld [vmem:[#allocation3 + $0x40] sm:$0xff]  ;;  %v771_v33 = vld [vmem:[%s1006_s0 + $0xc] sm:$0xf0] }
   0xf   :  { %433 = vmatpush.bf16.msra.mxu1 %v798_v9  ;;  %v802_v26 = vld [vmem:[#allocation3 + $0x88] sm:$0xff]  ;;  %v801_v30 = vld [vmem:[#allocation3 + $0x80] sm:$0xff]  ;;  %v581_v35 = vld [vmem:[%s1006_s0 + $0x10] sm:$0xf0] }
  0x10   :  { %462 = vmatpush.bf16.msra.mxu2 %v806_v10  ;;  %v810_v27 = vld [vmem:[#allocation3 + $0xc8] sm:$0xff]  ;;  %v809_v31 = vld [vmem:[#allocation3 + $0xc0] sm:$0xff]  ;;  %v772_v37 = vld [vmem:[%s1006_s0 + $0x14] sm:$0xf0] }
  0x11   :  { %491 = vmatpush.bf16.msra.mxu3 %v814_v11  ;;  %v579_v32 = vld [vmem:[%s1006_s0] sm:$0xf]  ;;  %v769_v34 = vld [vmem:[%s1006_s0 + $0x4] sm:$0xf]  ;;  %v587_v36 = vld [vmem:[%s1006_s0 + $0x8] sm:$0xf] }
  0x12   :  { %405 = vmatpush.bf16.msra.mxu0 %v789_v12  ;;  %v770_v38 = vld [vmem:[%s1006_s0 + $0xc] sm:$0xf]  ;;  %v589_v39 = vld [vmem:[%s1006_s0 + $0x18] sm:$0xf0]  ;;  %v580_v40 = vor.u32 %v771_v33, %v579_v32  ;;  %v584_v41 = vor.u32 %v769_v34, %v581_v35  ;;  %v588_v42 = vor.u32 %v772_v37, %v587_v36  ;;  %v595_v44 = vld [vmem:[%s1006_s0 + $0x20] sm:$0xf] }
  0x13   :  { %434 = vmatpush.bf16.msra.mxu1 %v797_v13  ;;  %v592_v43 = vor.u32 %v770_v38, %v589_v39  ;;  %v775_v45 = vld [vmem:[%s1006_s0 + $0x2c] sm:$0xf0]  ;;  %v773_v46 = vld [vmem:[%s1006_s0 + $0x24] sm:$0xf]  ;;  %v597_v47 = vld [vmem:[%s1006_s0 + $0x30] sm:$0xf0] }
  0x14   :  { %463 = vmatpush.bf16.msra.mxu2 %v805_v14  ;;  %v603_v48 = vld [vmem:[%s1006_s0 + $0x28] sm:$0xf]  ;;  %v776_v49 = vld [vmem:[%s1006_s0 + $0x34] sm:$0xf0]  ;;  %v774_v50 = vld [vmem:[%s1006_s0 + $0x2c] sm:$0xf]  ;;  %v596_v52 = vor.u32 %v775_v45, %v595_v44  ;;  %v600_v53 = vor.u32 %v773_v46, %v597_v47 }
  0x15   :  { %492 = vmatpush.bf16.msra.mxu3 %v813_v15  ;;  %v605_v51 = vld [vmem:[%s1006_s0 + $0x38] sm:$0xf0]  ;;  %v604_v54 = vor.u32 %v776_v49, %v603_v48  ;;  %v611_v56 = vld [vmem:[%s1006_s0 + $0x40] sm:$0xf]  ;;  %v779_v57 = vld [vmem:[%s1006_s0 + $0x4c] sm:$0xf0] }
  0x16   :  { %406 = vmatpush.bf16.msra.mxu0 %v788_v16  ;;  %v608_v55 = vor.u32 %v774_v50, %v605_v51  ;;  %v777_v58 = vld [vmem:[%s1006_s0 + $0x44] sm:$0xf]  ;;  %v613_v59 = vld [vmem:[%s1006_s0 + $0x50] sm:$0xf0]  ;;  %v619_v60 = vld [vmem:[%s1006_s0 + $0x48] sm:$0xf]  ;;  %v612_v0 = vor.u32 %v779_v57, %v611_v56 }
  0x17   :  { %435 = vmatpush.bf16.msra.mxu1 %v796_v17  ;;  %v780_v61 = vld [vmem:[%s1006_s0 + $0x54] sm:$0xf0]  ;;  %v778_v62 = vld [vmem:[%s1006_s0 + $0x4c] sm:$0xf]  ;;  %v621_v63 = vld [vmem:[%s1006_s0 + $0x58] sm:$0xf0]  ;;  %v616_v1 = vor.u32 %v777_v58, %v613_v59 }
  0x18   :  { %464 = vmatpush.bf16.msra.mxu2 %v804_v18  ;;  %v620_v2 = vor.u32 %v780_v61, %v619_v60  ;;  %v624_v3 = vor.u32 %v778_v62, %v621_v63  ;;  %v627_v4 = vld [vmem:[%s1006_s0 + $0x60] sm:$0xf]  ;;  %v783_v5 = vld [vmem:[%s1006_s0 + $0x6c] sm:$0xf0]  ;;  %v781_v6 = vld [vmem:[%s1006_s0 + $0x64] sm:$0xf] }
  0x19   :  { %493 = vmatpush.bf16.msra.mxu3 %v812_v19  ;;  %v629_v7 = vld [vmem:[%s1006_s0 + $0x70] sm:$0xf0]  ;;  %v635_v8 = vld [vmem:[%s1006_s0 + $0x68] sm:$0xf]  ;;  %v784_v9 = vld [vmem:[%s1006_s0 + $0x74] sm:$0xf0]  ;;  %v628_v12 = vor.u32 %v783_v5, %v627_v4 }
  0x1a   :  { %407 = vmatpush.bf16.msra.mxu0 %v787_v20  ;;  %v782_v10 = vld [vmem:[%s1006_s0 + $0x6c] sm:$0xf]  ;;  %v637_v11 = vld [vmem:[%s1006_s0 + $0x78] sm:$0xf0]  ;;  %v632_v13 = vor.u32 %v781_v6, %v629_v7  ;;  %v636_v14 = vor.u32 %v784_v9, %v635_v8 }
  0x1b   :  { %436 = vmatpush.bf16.msra.mxu1 %v795_v21  ;;  %v640_v15 = vor.u32 %v782_v10, %v637_v11 }
  0x1c   :  { %465 = vmatpush.bf16.msra.mxu2 %v803_v22 }
  0x1d   :  { %494 = vmatpush.bf16.msra.mxu3 %v811_v23  ;;  %v545_v23 = vld [vmem:[%s1008_s2] sm:$0x1] }
  0x1e   :  { %408 = vmatpush.bf16.msra.mxu0 %v786_v24 }
  0x1f   :  { %437 = vmatpush.bf16.msra.mxu1 %v794_v25  ;;  %v546_v25 = vunpack.c.l.bf16 %v545_v23 }
  0x20   :  { %466 = vmatpush.bf16.msra.mxu2 %v802_v26 }
  0x21   :  { %495 = vmatpush.bf16.msra.mxu3 %v810_v27 }
  0x22   :  { %409 = vmatpush.bf16.msra.mxu0 %v785_v28 }
  0x23   :  { %438 = vmatpush.bf16.msra.mxu1 %v793_v29 }
  0x24   :  { %467 = vmatpush.bf16.msra.mxu2 %v801_v30  ;;  %v547_v30 = vperm.slane %v546_v25, 0 }
  0x25   :  { %496 = vmatpush.bf16.msra.mxu3 %v809_v31  ;;  %410 = vmatmul.bf16.vlgmr.msra.gmra.mxu0 %v580_v40 }
  0x26   :  { %439 = vmatmul.bf16.vlgmr.msra.gmra.mxu1 %v584_v41 }
  0x27   :  { %468 = vmatmul.bf16.vlgmr.msra.gmra.mxu2 %v588_v42 }
  0x28   :  { %497 = vmatmul.bf16.vlgmr.msra.gmra.mxu3 %v592_v43 }
  0x35   :  { %415 = vmatmul.bf16.gmra.mxu0 %v596_v52 }
  0x36   :  { %444 = vmatmul.bf16.gmra.mxu1 %v600_v53 }
  0x37   :  { %473 = vmatmul.bf16.gmra.mxu2 %v604_v54 }
  0x38   :  { %502 = vmatmul.bf16.gmra.mxu3 %v608_v55 }
  0x45   :  { %420 = vmatmul.bf16.gmra.mxu0 %v612_v0 }
  0x46   :  { %449 = vmatmul.bf16.gmra.mxu1 %v616_v1 }
  0x47   :  { %478 = vmatmul.bf16.gmra.mxu2 %v620_v2 }
  0x48   :  { %507 = vmatmul.bf16.gmra.mxu3 %v624_v3 }
  0x55   :  { %425 = vmatmul.bf16.gmra.mxu0 %v628_v12 }
  0x56   :  { %454 = vmatmul.bf16.gmra.mxu1 %v632_v13 }
  0x57   :  { %483 = vmatmul.bf16.gmra.mxu2 %v636_v14 }
  0x58   :  { %512 = vmatmul.bf16.gmra.mxu3 %v640_v15 }
  0xa2   :  { %v411_v16 = vpop.f32.mrf.mxu0 }
  0xa3   :  { %v440_v17 = vpop.f32.mrf.mxu1 }
  0xa4   :  { %v441_v20 = vadd.f32 %v440_v17, %v411_v16 }
  0xaa   :  { %v469_v18 = vpop.f32.mrf.mxu2  ;;  %v413_v21 = vpop.f32.mrf.mxu0 }
  0xab   :  { %v498_v19 = vpop.f32.mrf.mxu3  ;;  %v442_v22 = vpop.f32.mrf.mxu1  ;;  %v470_v24 = vadd.f32 %v469_v18, %v441_v20 }
  0xac   :  { %v443_v26 = vadd.f32 %v442_v22, %v413_v21 }
  0xad   :  { %v499_v29 = vadd.f32 %v498_v19, %v470_v24 }
  0xaf   :  { %v548_v35 = vadd.f32 %v547_v30, %v499_v29 }
  0xb2   :  { %v471_v27 = vpop.f32.mrf.mxu2  ;;  %v416_v32 = vpop.f32.mrf.mxu0 }
  0xb3   :  { %v500_v28 = vpop.f32.mrf.mxu3  ;;  %v472_v31 = vadd.f32 %v471_v27, %v443_v26  ;;  %v445_v33 = vpop.f32.mrf.mxu1 }
  0xb4   :  { %v446_v40 = vadd.f32 %v445_v33, %v416_v32 }
  0xb5   :  { %v501_v34 = vadd.f32 %v500_v28, %v472_v31 }
  0xb7   :  { %v549_v36 = vadd.f32 %v547_v30, %v501_v34 }
  0xb9   :  { %v820_v37 = vpack.c.bf16 %v549_v36, %v548_v35 }
  0xba   :  { %v474_v38 = vpop.f32.mrf.mxu2  ;;  %v418_v41 = vpop.f32.mrf.mxu0 }
  0xbb   :  { %v503_v39 = vpop.f32.mrf.mxu3  ;;  %821 = vst [vmem:[%s1009_s3] sm:$0xff] %v820_v37   ;;  %v447_v42 = vpop.f32.mrf.mxu1  ;;  %v475_v43 = vadd.f32 %v474_v38, %v446_v40 }
  0xbc   :  { %v448_v44 = vadd.f32 %v447_v42, %v418_v41 }
  0xbd   :  { %v504_v47 = vadd.f32 %v503_v39, %v475_v43 }
  0xbf   :  { %v550_v52 = vadd.f32 %v547_v30, %v504_v47 }
  0xc2   :  { %v476_v45 = vpop.f32.mrf.mxu2  ;;  %v421_v49 = vpop.f32.mrf.mxu0 }
  0xc3   :  { %v505_v46 = vpop.f32.mrf.mxu3  ;;  %v477_v48 = vadd.f32 %v476_v45, %v448_v44  ;;  %v450_v50 = vpop.f32.mrf.mxu1 }
  0xc4   :  { %v451_v57 = vadd.f32 %v450_v50, %v421_v49 }
  0xc5   :  { %v506_v51 = vadd.f32 %v505_v46, %v477_v48 }
  0xc7   :  { %v551_v53 = vadd.f32 %v547_v30, %v506_v51 }
  0xc9   :  { %v825_v54 = vpack.c.bf16 %v551_v53, %v550_v52 }
  0xca   :  { %v479_v55 = vpop.f32.mrf.mxu2  ;;  %v423_v58 = vpop.f32.mrf.mxu0 }
  0xcb   :  { %v508_v56 = vpop.f32.mrf.mxu3  ;;  %837 = vst [vmem:[%s1009_s3 + $0x8] sm:$0xff] %v825_v54   ;;  %v452_v59 = vpop.f32.mrf.mxu1  ;;  %v480_v60 = vadd.f32 %v479_v55, %v451_v57 }
  0xcc   :  { %v453_v61 = vadd.f32 %v452_v59, %v423_v58 }
  0xcd   :  { %v509_v0 = vadd.f32 %v508_v56, %v480_v60 }
  0xcf   :  { %v552_v5 = vadd.f32 %v547_v30, %v509_v0 }
  0xd2   :  { %v481_v62 = vpop.f32.mrf.mxu2  ;;  %v426_v2 = vpop.f32.mrf.mxu0 }
  0xd3   :  { %v510_v63 = vpop.f32.mrf.mxu3  ;;  %v482_v1 = vadd.f32 %v481_v62, %v453_v61  ;;  %v455_v3 = vpop.f32.mrf.mxu1 }
  0xd4   :  { %v456_v10 = vadd.f32 %v455_v3, %v426_v2 }
  0xd5   :  { %v511_v4 = vadd.f32 %v510_v63, %v482_v1 }
  0xd7   :  { %v553_v6 = vadd.f32 %v547_v30, %v511_v4 }
  0xd9   :  { %v830_v7 = vpack.c.bf16 %v553_v6, %v552_v5 }
  0xda   :  { %v484_v8 = vpop.f32.mrf.mxu2  ;;  %v428_v11 = vpop.f32.mrf.mxu0 }
  0xdb   :  { %v513_v9 = vpop.f32.mrf.mxu3  ;;  %838 = vst [vmem:[%s1009_s3 + $0x10] sm:$0xff] %v830_v7   ;;  %v457_v12 = vpop.f32.mrf.mxu1  ;;  %v485_v13 = vadd.f32 %v484_v8, %v456_v10 }
  0xdc   :  { %v458_v14 = vadd.f32 %v457_v12, %v428_v11 }
  0xdd   :  { %v514_v16 = vadd.f32 %v513_v9, %v485_v13 }
  0xdf   :  { %v554_v20 = vadd.f32 %v547_v30, %v514_v16 }
  0xe2   :  { %v486_v15 = vpop.f32.mrf.mxu2 }
  0xe3   :  { %v487_v17 = vadd.f32 %v486_v15, %v458_v14  ;;  %v515_v18 = vpop.f32.mrf.mxu3 }
  0xe5   :  { %v516_v19 = vadd.f32 %v515_v18, %v487_v17 }
  0xe7   :  { %v555_v21 = vadd.f32 %v547_v30, %v516_v19 }
  0xe9   :  { %v835_v22 = vpack.c.bf16 %v555_v21, %v554_v20 }
  0xeb   :  { %839 = vst [vmem:[%s1009_s3 + $0x18] sm:$0xff] %v835_v22  }
  0xec   :  { %576 = vsyncpa [#allocation4], 1 }

// kernel: vision_transformer_forward.33
= control target key start
LH: loop header
LB: loop body
LE: loop exit
PB: predicated region body
PF: predicated region fallthrough
CT: control target
= control target key end

     0   :  { %10 = vsyncpa [#allocation4], 0  ;;  %s831_s21 = smov [#allocation3]   ;;  %s832_s23 = smov 192   ;;  %s1069_s0 = inlined_call_operand.vmem [shape: bf16[64,128], index: 0, kind: input, shape index: {}]   ;;  %s1070_s1 = inlined_call_operand.vmem [shape: f32[1,128], index: 1, kind: input, shape index: {}]   ;;  %s1071_s2 = inlined_call_operand.vmem [shape: f32[1,128], index: 2, kind: input, shape index: {}]   ;;  %s1072_s3 = inlined_call_operand.hbm [shape: bf16[128,384], index: 3, kind: input, shape index: {}]   ;;  %s1073_s4 = inlined_call_operand.vmem [shape: bf16[1,384], index: 4, kind: input, shape index: {}]   ;;  %s1074_s5 = inlined_call_operand.vmem [shape: bf16[64,384], index: 5, kind: output, shape index: {}]  }
   0x1   :  { %s21_s20 = sshll.u32 %s1072_s3, 4  ;;  %s23_s22 = sshll.u32 %s831_s21, 4  ;;  %s22_s20 = int_to_ptr.hbm [resolvable:$true] %s21_s20  ;;  %s24_s22 = int_to_ptr.vmem [resolvable:$true] %s23_s22 }
   0x2   :  { %s833_s24 = smov 12  }
   0x3   :  { %29 = dma.hbm_to_vmem [thread:$0]  %s22_s20, 3072, %s24_s22, [#allocation4], %s832_s23, %s832_s23, %s833_s24  }
   0x4   :  { %829 = dma.done.wait [#allocation4], 3072  }
   0x5   :  { %830 = vsyncadd [#allocation4], 4294964224  ;;  %v768_v0 = vld [vmem:[%s1069_s0 + $0x10] sm:$0xff]   ;;  %v767_v1 = vld [vmem:[%s1069_s0 + $0x8] sm:$0xff]   ;;  %v834_v11 = vmov 128.0  }
   0x6   :  { %v732_v2 = vld [vmem:[%s1069_s0] sm:$0xff]   ;;  %v741_v3 = vunpack.c.l.bf16 %v768_v0  ;;  %v737_v4 = vunpack.c.l.bf16 %v767_v1  ;;  %v742_v6 = vunpack.c.h.bf16 %v768_v0  ;;  %v738_v7 = vunpack.c.h.bf16 %v767_v1  ;;  %v880_v9 = vld [vmem:[%s1069_s0 + $0x18] sm:$0xff]   ;;  %v693_v47 = vld [vmem:[#allocation3 + $0xa8] sm:$0xf] }
   0x7   :  { %v733_v5 = vunpack.c.l.bf16 %v732_v2  ;;  %v734_v8 = vunpack.c.h.bf16 %v732_v2  ;;  %v745_v10 = vunpack.c.l.bf16 %v880_v9  ;;  %787 = vrcp.f32 %v834_v11  ;;  %v729_v48 = vld [vmem:[#allocation3 + $0xb0] sm:$0xf0]  ;;  %v728_v49 = vld [vmem:[#allocation3 + $0xac] sm:$0xf]  ;;  %v695_v51 = vld [vmem:[#allocation3 + $0xb4] sm:$0xf0] }
   0x8   :  { %64 = vadd.xlane.f32.xlu2 %v741_v3  ;;  %60 = vadd.xlane.f32.xlu1 %v737_v4  ;;  %v746_v33 = vunpack.c.h.bf16 %v880_v9  ;;  %v694_v50 = vor.u32 %v729_v48, %v693_v47  ;;  %v701_v52 = vld [vmem:[#allocation3 + $0xb0] sm:$0xf]  ;;  %v730_v53 = vld [vmem:[#allocation3 + $0xb8] sm:$0xf0]  ;;  %v698_v54 = vor.u32 %v728_v49, %v695_v51  ;;  %v725_v58 = vld [vmem:[#allocation3 + $0x94] sm:$0xf] }
   0x9   :  { %56 = vadd.xlane.f32.xlu0 %v733_v5  ;;  %v702_v55 = vor.u32 %v730_v53, %v701_v52  ;;  %v681_v56 = vld [vmem:[#allocation3 + $0x90] sm:$0xf]  ;;  %v726_v57 = vld [vmem:[#allocation3 + $0x98] sm:$0xf0]  ;;  %v683_v60 = vld [vmem:[#allocation3 + $0x9c] sm:$0xf0] }
   0xa   :  { %467 = vmatpush.bf16.msra.mxu0 %v694_v50  ;;  %773 = vmatpush.bf16.msra.mxu3 %v694_v50  ;;  %v682_v59 = vor.u32 %v726_v57, %v681_v56  ;;  %v689_v61 = vld [vmem:[#allocation3 + $0x98] sm:$0xf]  ;;  %v727_v62 = vld [vmem:[#allocation3 + $0xa0] sm:$0xf0]  ;;  %v686_v63 = vor.u32 %v725_v58, %v683_v60  ;;  %v657_v11 = vld [vmem:[#allocation3 + $0x60] sm:$0xf] }
   0xb   :  { %496 = vmatpush.bf16.msra.mxu1 %v698_v54  ;;  %525 = vmatpush.bf16.msra.mxu2 %v702_v55  ;;  %v690_v0 = vor.u32 %v727_v62, %v689_v61  ;;  %v669_v1 = vld [vmem:[#allocation3 + $0x78] sm:$0xf]  ;;  %v723_v2 = vld [vmem:[#allocation3 + $0x80] sm:$0xf0]  ;;  %v710_v53 = vld [vmem:[#allocation3 + $0x1c] sm:$0xf] }
   0xc   :  { %v715_v48 = vld [vmem:[#allocation3 + $0x40] sm:$0xf0]  ;;  %v621_v51 = vld [vmem:[#allocation3 + $0x18] sm:$0xf]  ;;  %v623_v58 = vld [vmem:[#allocation3 + $0x24] sm:$0xf0] }
   0xd   :  { %v788_v12 = vpop.eup %787  ;;  %v711_v52 = vld [vmem:[#allocation3 + $0x20] sm:$0xf0]  ;;  %v712_v60 = vld [vmem:[#allocation3 + $0x28] sm:$0xf0] }
   0xe   :  { %v73_v13 = vmul.f32 128.0, %v788_v12  ;;  %vm77_vm0 = vweird.f32 %v788_v12  ;;  %468 = vmatpush.bf16.msra.mxu0 %v682_v59  ;;  %774 = vmatpush.bf16.msra.mxu3 %v682_v59  ;;  %v622_v57 = vor.u32 %v711_v52, %v621_v51  ;;  %v629_v59 = vld [vmem:[#allocation3 + $0x20] sm:$0xf] }
   0xf   :  { %497 = vmatpush.bf16.msra.mxu1 %v686_v63  ;;  %526 = vmatpush.bf16.msra.mxu2 %v690_v0  ;;  %v626_v63 = vor.u32 %v710_v53, %v623_v58  ;;  %v630_v0 = vor.u32 %v712_v60, %v629_v59 }
  0x10   :  { %66 = vadd.xlane.f32.xlu2 %v742_v6  ;;  %62 = vadd.xlane.f32.xlu1 %v738_v7  ;;  %v74_v14 = vsub.f32 1.0, %v73_v13  ;;  %v719_v13 = vld [vmem:[#allocation3 + $0x64] sm:$0xf] }
  0x11   :  { %58 = vadd.xlane.f32.xlu0 %v734_v8 }
  0x12   :  { %v75_v15 = vmul.f32 %v788_v12, %v74_v14 }
  0x14   :  { %v76_v16 = vadd.f32 %v788_v12, %v75_v15  ;;  %v659_v15 = vld [vmem:[#allocation3 + $0x6c] sm:$0xf0] }
  0x16   :  { %v883_v17 = vsel %vm77_vm0, %v788_v12, %v76_v16  ;;  %v720_v12 = vld [vmem:[#allocation3 + $0x68] sm:$0xf0]  ;;  %v665_v16 = vld [vmem:[#allocation3 + $0x68] sm:$0xf] }
  0x17   :  { %v658_v14 = vor.u32 %v720_v12, %v657_v11  ;;  %v617_v11 = vld [vmem:[#allocation3 + $0x8] sm:$0xf] }
  0x18   :  { %68 = vadd.xlane.f32.xlu2 %v745_v10 }
  0x7b   :  { %v65_v18 = vpop.xlane.xlu2 %64  ;;  %v61_v19 = vpop.xlane.xlu1 %60 }
  0x7c   :  { %v57_v20 = vpop.xlane.xlu0 %56  ;;  %v83_v30 = vmul.f32 %v883_v17, %v65_v18  ;;  %v81_v31 = vmul.f32 %v883_v17, %v61_v19  ;;  %v721_v18 = vld [vmem:[#allocation3 + $0x70] sm:$0xf0]  ;;  %v662_v19 = vor.u32 %v719_v13, %v659_v15 }
  0x7d   :  { %v79_v21 = vmul.f32 %v883_v17, %v57_v20  ;;  %v666_v20 = vor.u32 %v721_v18, %v665_v16 }
  0x7e   :  { %v903_v36 = vsub.f32 %v741_v3, %v83_v30  ;;  %v905_v37 = vsub.f32 %v737_v4, %v81_v31  ;;  %v722_v3 = vld [vmem:[#allocation3 + $0x7c] sm:$0xf]  ;;  %v670_v4 = vor.u32 %v723_v2, %v669_v1 }
  0x7f   :  { %v886_v22 = vsub.f32 %v733_v5, %v79_v21  ;;  %v671_v5 = vld [vmem:[#allocation3 + $0x84] sm:$0xf0]  ;;  %v718_v30 = vld [vmem:[#allocation3 + $0x58] sm:$0xf0] }
  0x80   :  { %v99_v42 = vmul.f32 %v903_v36, %v903_v36  ;;  %v97_v43 = vmul.f32 %v905_v37, %v905_v37  ;;  %469 = vmatpush.bf16.msra.mxu0 %v670_v4  ;;  %775 = vmatpush.bf16.msra.mxu3 %v670_v4  ;;  %v645_v21 = vld [vmem:[#allocation3 + $0x48] sm:$0xf] }
  0x81   :  { %v95_v23 = vmul.f32 %v886_v22, %v886_v22 }
  0x83   :  { %103 = vadd.xlane.f32.xlu0 %v95_v23  ;;  %v67_v24 = vpop.xlane.xlu2 %66  ;;  %v63_v25 = vpop.xlane.xlu1 %62  ;;  %v717_v23 = vld [vmem:[#allocation3 + $0x50] sm:$0xf0] }
  0x84   :  { %v82_v26 = vmul.f32 %v883_v17, %v63_v25  ;;  %v59_v27 = vpop.xlane.xlu0 %58  ;;  %v84_v41 = vmul.f32 %v883_v17, %v67_v24  ;;  %470 = vmatpush.bf16.msra.mxu0 %v658_v14  ;;  %776 = vmatpush.bf16.msra.mxu3 %v658_v14  ;;  %v716_v24 = vld [vmem:[#allocation3 + $0x4c] sm:$0xf]  ;;  %v709_v14 = vld [vmem:[#allocation3 + $0x10] sm:$0xf0] }
  0x85   :  { %v80_v28 = vmul.f32 %v883_v17, %v59_v27  ;;  %v647_v27 = vld [vmem:[#allocation3 + $0x54] sm:$0xf0]  ;;  %v618_v15 = vor.u32 %v709_v14, %v617_v11 }
  0x86   :  { %v892_v29 = vsub.f32 %v738_v7, %v82_v26  ;;  %v919_v45 = vsub.f32 %v742_v6, %v84_v41  ;;  %v677_v6 = vld [vmem:[#allocation3 + $0x80] sm:$0xf]  ;;  %v724_v7 = vld [vmem:[#allocation3 + $0x88] sm:$0xf0]  ;;  %v646_v26 = vor.u32 %v717_v23, %v645_v21  ;;  %v714_v41 = vld [vmem:[#allocation3 + $0x38] sm:$0xf0] }
  0x87   :  { %v896_v32 = vsub.f32 %v734_v8, %v80_v28  ;;  %v674_v8 = vor.u32 %v722_v3, %v671_v5  ;;  %v653_v28 = vld [vmem:[#allocation3 + $0x50] sm:$0xf]  ;;  %v609_v5 = vld [vmem:[#allocation3] sm:$0xf] }
  0x88   :  { %v98_v34 = vmul.f32 %v892_v29, %v892_v29  ;;  %v100_v46 = vmul.f32 %v919_v45, %v919_v45  ;;  %471 = vmatpush.bf16.msra.mxu0 %v646_v26  ;;  %777 = vmatpush.bf16.msra.mxu3 %v646_v26 }
  0x89   :  { %v96_v35 = vmul.f32 %v896_v32, %v896_v32  ;;  %498 = vmatpush.bf16.msra.mxu1 %v674_v8  ;;  %v707_v8 = vld [vmem:[#allocation3 + $0x4] sm:$0xf] }
  0x8a   :  { %109 = vadd.xlane.f32.xlu2 %v98_v34  ;;  %v650_v34 = vor.u32 %v716_v24, %v647_v27 }
  0x8b   :  { %70 = vadd.xlane.f32.xlu0 %v746_v33  ;;  %105 = vadd.xlane.f32.xlu1 %v96_v35  ;;  %v69_v38 = vpop.xlane.xlu2 %68  ;;  %v654_v35 = vor.u32 %v718_v30, %v653_v28 }
  0x8c   :  { %v85_v39 = vmul.f32 %v883_v17, %v69_v38 }
  0x8d   :  { %499 = vmatpush.bf16.msra.mxu1 %v662_v19 }
  0x8e   :  { %v910_v40 = vsub.f32 %v745_v10, %v85_v39  ;;  %v678_v10 = vor.u32 %v724_v7, %v677_v6  ;;  %v633_v39 = vld [vmem:[#allocation3 + $0x30] sm:$0xf]  ;;  %v708_v6 = vld [vmem:[#allocation3 + $0x8] sm:$0xf0] }
  0x8f   :  { %v610_v13 = vor.u32 %v708_v6, %v609_v5 }
  0x90   :  { %v101_v44 = vmul.f32 %v910_v40, %v910_v40  ;;  %527 = vmatpush.bf16.msra.mxu2 %v678_v10  ;;  %v611_v10 = vld [vmem:[#allocation3 + $0xc] sm:$0xf0] }
  0x91   :  { %500 = vmatpush.bf16.msra.mxu1 %v650_v34 }
  0x92   :  { %115 = vadd.xlane.f32.xlu2 %v101_v44  ;;  %v635_v44 = vld [vmem:[#allocation3 + $0x3c] sm:$0xf0] }
  0x93   :  { %111 = vadd.xlane.f32.xlu0 %v99_v42  ;;  %107 = vadd.xlane.f32.xlu1 %v97_v43  ;;  %v634_v42 = vor.u32 %v714_v41, %v633_v39  ;;  %v713_v43 = vld [vmem:[#allocation3 + $0x34] sm:$0xf] }
  0x94   :  { %528 = vmatpush.bf16.msra.mxu2 %v666_v20  ;;  %v638_v47 = vor.u32 %v713_v43, %v635_v44 }
  0x95   :  { %472 = vmatpush.bf16.msra.mxu0 %v634_v42  ;;  %778 = vmatpush.bf16.msra.mxu3 %v634_v42 }
  0x96   :  { %501 = vmatpush.bf16.msra.mxu1 %v638_v47  ;;  %v948_v47 = vld [vmem:[%s1070_s1] ss:$0 sm:$0xff] }
  0x98   :  { %529 = vmatpush.bf16.msra.mxu2 %v654_v35 }
  0x99   :  { %473 = vmatpush.bf16.msra.mxu0 %v622_v57  ;;  %779 = vmatpush.bf16.msra.mxu3 %v622_v57 }
  0x9a   :  { %502 = vmatpush.bf16.msra.mxu1 %v626_v63 }
  0x9b   :  { %113 = vadd.xlane.f32.xlu1 %v100_v46  ;;  %v641_v46 = vld [vmem:[#allocation3 + $0x38] sm:$0xf] }
  0x9c   :  { %v642_v49 = vor.u32 %v715_v48, %v641_v46 }
  0x9d   :  { %474 = vmatpush.bf16.msra.mxu0 %v610_v13  ;;  %780 = vmatpush.bf16.msra.mxu3 %v610_v13 }
  0x9e   :  { %530 = vmatpush.bf16.msra.mxu2 %v642_v49 }
  0xa2   :  { %531 = vmatpush.bf16.msra.mxu2 %v630_v0 }
  0xa6   :  { %532 = vmatpush.bf16.msra.mxu2 %v618_v15 }
  0xf6   :  { %v104_v25 = vpop.xlane.xlu0 %103 }
  0xf7   :  { %v119_v31 = vmul.f32 %v104_v25, %v883_v17 }
  0xf9   :  { %v924_v38 = vadd.f32 1e-05, %v119_v31 }
  0xfb   :  { %789 = vrsqrt.f32 %v924_v38  ;;  %vm141_vm2 = vweird.f32 %v924_v38 }
  0xfd   :  { %v110_v50 = vpop.xlane.xlu2 %109 }
  0xfe   :  { %v122_v54 = vmul.f32 %v110_v50, %v883_v17  ;;  %v106_v55 = vpop.xlane.xlu1 %105  ;;  %v71_v56 = vpop.xlane.xlu0 %70 }
  0xff   :  { %v120_v61 = vmul.f32 %v106_v55, %v883_v17  ;;  %v86_v62 = vmul.f32 %v883_v17, %v71_v56 }
 0x100   :  { %v930_v1 = vadd.f32 1e-05, %v122_v54 }
 0x101   :  { %v790_v2 = vpop.eup %789  ;;  %v128_v3 = vadd.f32 1e-05, %v120_v61  ;;  %v934_v4 = vsub.f32 %v746_v33, %v86_v62  ;;  %v614_v33 = vor.u32 %v707_v8, %v611_v10 }
 0x102   :  { %v136_v7 = vmul.f32 %v790_v2, %v924_v38  ;;  %791 = vrsqrt.f32 %v930_v1  ;;  %vm142_vm1 = vweird.f32 %v790_v2  ;;  %vm171_vm6 = vweird.f32 %v930_v1 }
 0x103   :  { %793 = vrsqrt.f32 %v128_v3  ;;  %v102_v12 = vmul.f32 %v934_v4, %v934_v4  ;;  %503 = vmatpush.bf16.msra.mxu1 %v614_v33  ;;  %vm143_vm3 = vmor %vm141_vm2, %vm142_vm1  ;;  %vm151_vm4 = vweird.f32 %v128_v3 }
 0x104   :  { %v137_v9 = vmul.f32 %v790_v2, %v136_v7 }
 0x105   :  { %117 = vadd.xlane.f32.xlu0 %v102_v12 }
 0x106   :  { %v138_v16 = vmul.f32 0.5, %v137_v9  ;;  %v108_v18 = vpop.xlane.xlu1 %107  ;;  %v112_v19 = vpop.xlane.xlu0 %111 }
 0x107   :  { %v121_v20 = vmul.f32 %v108_v18, %v883_v17  ;;  %v123_v21 = vmul.f32 %v112_v19, %v883_v17 }
 0x108   :  { %v792_v23 = vpop.eup %791  ;;  %v139_v24 = vsub.f32 1.5, %v138_v16 }
 0x109   :  { %v794_v25 = vpop.eup %793  ;;  %v166_v26 = vmul.f32 %v792_v23, %v930_v1  ;;  %v129_v27 = vadd.f32 1e-05, %v121_v20  ;;  %v131_v28 = vadd.f32 1e-05, %v123_v21  ;;  %vm172_vm7 = vweird.f32 %v792_v23 }
 0x10a   :  { %v140_v30 = vmul.f32 %v790_v2, %v139_v24  ;;  %v146_v31 = vmul.f32 %v794_v25, %v128_v3  ;;  %vm152_vm5 = vweird.f32 %v794_v25  ;;  %vm952_vm9 = vmor %vm171_vm6, %vm172_vm7 }
 0x10b   :  { %v167_v34 = vmul.f32 %v792_v23, %v166_v26  ;;  %795 = vrsqrt.f32 %v129_v27  ;;  %vm153_vm8 = vmor %vm151_vm4, %vm152_vm5  ;;  %vm161_vm10 = vweird.f32 %v129_v27  ;;  %vm181_vm12 = vweird.f32 %v131_v28 }
 0x10c   :  { %v147_v35 = vmul.f32 %v794_v25, %v146_v31  ;;  %797 = vrsqrt.f32 %v131_v28  ;;  %v144_v39 = vsel %vm143_vm3, %v790_v2, %v140_v30 }
 0x10d   :  { %v168_v41 = vmul.f32 0.5, %v167_v34  ;;  %v215_v38 = vmul.f32 %v144_v39, %v886_v22  ;;  %v959_v22 = vld [vmem:[%s1071_s2] ss:$0 sm:$0xff] }
 0x10e   :  { %v148_v42 = vmul.f32 0.5, %v147_v35  ;;  %v114_v43 = vpop.xlane.xlu1 %113 }
 0x10f   :  { %v169_v44 = vsub.f32 1.5, %v168_v41  ;;  %v124_v46 = vmul.f32 %v114_v43, %v883_v17  ;;  %v227_v57 = vmul.f32 %v948_v47, %v215_v38 }
 0x110   :  { %v149_v48 = vsub.f32 1.5, %v148_v42 }
 0x111   :  { %v796_v49 = vpop.eup %795  ;;  %v170_v51 = vmul.f32 %v792_v23, %v169_v44  ;;  %v132_v54 = vadd.f32 1e-05, %v124_v46  ;;  %v239_v2 = vadd.f32 %v959_v22, %v227_v57 }
 0x112   :  { %v798_v50 = vpop.eup %797  ;;  %v150_v52 = vmul.f32 %v794_v25, %v149_v48  ;;  %v156_v53 = vmul.f32 %v796_v49, %v129_v27  ;;  %vm162_vm11 = vweird.f32 %v796_v49 }
 0x113   :  { %v176_v56 = vmul.f32 %v798_v50, %v131_v28  ;;  %799 = vrsqrt.f32 %v132_v54  ;;  %v174_v62 = vsel %vm952_vm9, %v792_v23, %v170_v51  ;;  %vm163_vm13 = vmor %vm161_vm10, %vm162_vm11  ;;  %vm182_vm14 = vweird.f32 %v798_v50 }
 0x114   :  { %v154_v58 = vsel %vm153_vm8, %v794_v25, %v150_v52  ;;  %v157_v59 = vmul.f32 %v796_v49, %v156_v53  ;;  %v218_v5 = vmul.f32 %v174_v62, %v892_v29  ;;  %vm183_vm15 = vmor %vm181_vm12, %vm182_vm14  ;;  %vm191_vm0 = vweird.f32 %v132_v54 }
 0x115   :  { %v216_v60 = vmul.f32 %v154_v58, %v896_v32  ;;  %v177_v61 = vmul.f32 %v798_v50, %v176_v56 }
 0x116   :  { %v158_v63 = vmul.f32 0.5, %v157_v59  ;;  %v230_v14 = vmul.f32 %v948_v47, %v218_v5 }
 0x117   :  { %v228_v0 = vmul.f32 %v948_v47, %v216_v60  ;;  %v178_v1 = vmul.f32 0.5, %v177_v61 }
 0x118   :  { %v159_v3 = vsub.f32 1.5, %v158_v63  ;;  %v242_v18 = vadd.f32 %v959_v22, %v230_v14 }
 0x119   :  { %v240_v6 = vadd.f32 %v959_v22, %v228_v0  ;;  %v179_v32 = vsub.f32 1.5, %v178_v1  ;;  %v800_v7 = vpop.eup %799 }
 0x11a   :  { %v160_v8 = vmul.f32 %v796_v49, %v159_v3  ;;  %v186_v12 = vmul.f32 %v800_v7, %v132_v54  ;;  %vm192_vm1 = vweird.f32 %v800_v7 }
 0x11b   :  { %v750_v10 = vpack.c.bf16 %v240_v6, %v239_v2  ;;  %v180_v11 = vmul.f32 %v798_v50, %v179_v32  ;;  %vm193_vm2 = vmor %vm191_vm0, %vm192_vm1  ;;  %v303_v2 = vld [vmem:[%s1073_s4] sm:$0x7] }
 0x11c   :  { %v164_v13 = vsel %vm163_vm13, %v796_v49, %v160_v8  ;;  %v187_v33 = vmul.f32 %v800_v7, %v186_v12 }
 0x11d   :  { %751 = vst [vmem:[#allocation2 + $0x10] sm:$0xff] %v750_v10   ;;  %v217_v9 = vmul.f32 %v164_v13, %v905_v37  ;;  %v184_v15 = vsel %vm183_vm15, %v798_v50, %v180_v11 }
 0x11e   :  { %v188_v16 = vmul.f32 0.5, %v187_v33  ;;  %v219_v21 = vmul.f32 %v184_v15, %v903_v36 }
 0x11f   :  { %v229_v29 = vmul.f32 %v948_v47, %v217_v9 }
 0x120   :  { %v189_v20 = vsub.f32 1.5, %v188_v16  ;;  %v231_v26 = vmul.f32 %v948_v47, %v219_v21 }
 0x121   :  { %v241_v19 = vadd.f32 %v959_v22, %v229_v29 }
 0x122   :  { %v190_v24 = vmul.f32 %v800_v7, %v189_v20  ;;  %v243_v30 = vadd.f32 %v959_v22, %v231_v26 }
 0x123   :  { %v755_v23 = vpack.c.bf16 %v242_v18, %v241_v19 }
 0x124   :  { %v703_v25 = vld [vmem:[#allocation2 + $0x10] sm:$0xff]  ;;  %v194_v37 = vsel %vm193_vm2, %v800_v7, %v190_v24 }
 0x125   :  { %770 = vst [vmem:[#allocation2] sm:$0xff] %v755_v23   ;;  %v220_v27 = vmul.f32 %v194_v37, %v919_v45  ;;  %475 = vmatmul.bf16.vlgmr.msra.gmra.mxu0 %v703_v25  ;;  %504 = vmatmul.bf16.vlgmr.msra.gmra.mxu1 %v703_v25  ;;  %v116_v45 = vpop.xlane.xlu2 %115 }
 0x126   :  { %533 = vmatmul.bf16.vlgmr.msra.gmra.mxu2 %v703_v25  ;;  %v125_v39 = vmul.f32 %v116_v45, %v883_v17 }
 0x127   :  { %v232_v28 = vmul.f32 %v948_v47, %v220_v27 }
 0x128   :  { %v133_v41 = vadd.f32 1e-05, %v125_v39 }
 0x129   :  { %v244_v31 = vadd.f32 %v959_v22, %v232_v28 }
 0x12a   :  { %801 = vrsqrt.f32 %v133_v41  ;;  %vm201_vm3 = vweird.f32 %v133_v41 }
 0x12b   :  { %v760_v36 = vpack.c.bf16 %v244_v31, %v243_v30 }
 0x12c   :  { %v704_v34 = vld [vmem:[#allocation2] sm:$0xff] }
 0x12d   :  { %771 = vst [vmem:[#allocation2 + $0x18] sm:$0xff] %v760_v36   ;;  %480 = vmatmul.bf16.vlgmr.msra.gmra.mxu3 %v704_v34 }
 0x130   :  { %v802_v42 = vpop.eup %801 }
 0x131   :  { %v196_v43 = vmul.f32 %v802_v42, %v133_v41  ;;  %vm202_vm4 = vweird.f32 %v802_v42 }
 0x132   :  { %vm203_vm5 = vmor %vm201_vm3, %vm202_vm4 }
 0x133   :  { %v197_v44 = vmul.f32 %v802_v42, %v196_v43 }
 0x134   :  { %v705_v35 = vld [vmem:[#allocation2 + $0x18] sm:$0xff] }
 0x135   :  { %509 = vmatmul.bf16.gmra.mxu1 %v704_v34  ;;  %v198_v49 = vmul.f32 0.5, %v197_v44 }
 0x136   :  { %538 = vmatmul.bf16.gmra.mxu2 %v704_v34 }
 0x137   :  { %v199_v50 = vsub.f32 1.5, %v198_v49 }
 0x139   :  { %v200_v52 = vmul.f32 %v802_v42, %v199_v50 }
 0x13b   :  { %v204_v55 = vsel %vm203_vm5, %v802_v42, %v200_v52 }
 0x13c   :  { %v221_v58 = vmul.f32 %v204_v55, %v910_v40  ;;  %v304_v40 = vunpack.c.l.bf16 %v303_v2 }
 0x13d   :  { %485 = vmatmul.bf16.gmra.mxu3 %v705_v35 }
 0x13e   :  { %v233_v60 = vmul.f32 %v948_v47, %v221_v58  ;;  %v306_v3 = vperm.slane %v304_v40, 0  ;;  %v307_v5 = vperm.slane %v304_v40, 2 }
 0x140   :  { %v245_v63 = vadd.f32 %v959_v22, %v233_v60  ;;  %v991_v32 = vperm.slane %v306_v3, 0 }
 0x145   :  { %514 = vmatmul.bf16.gmra.mxu1 %v705_v35 }
 0x146   :  { %543 = vmatmul.bf16.gmra.mxu2 %v705_v35 }
 0x178   :  { %v118_v46 = vpop.xlane.xlu0 %117 }
 0x179   :  { %v126_v38 = vmul.f32 %v118_v46, %v883_v17 }
 0x17b   :  { %v134_v48 = vadd.f32 1e-05, %v126_v38 }
 0x17d   :  { %803 = vrsqrt.f32 %v134_v48  ;;  %vm211_vm7 = vweird.f32 %v134_v48 }
 0x183   :  { %v804_v51 = vpop.eup %803 }
 0x184   :  { %v206_v53 = vmul.f32 %v804_v51, %v134_v48  ;;  %vm212_vm6 = vweird.f32 %v804_v51 }
 0x185   :  { %vm213_vm8 = vmor %vm211_vm7, %vm212_vm6 }
 0x186   :  { %v207_v54 = vmul.f32 %v804_v51, %v206_v53 }
 0x188   :  { %v208_v56 = vmul.f32 0.5, %v207_v54 }
 0x18a   :  { %v209_v57 = vsub.f32 1.5, %v208_v56 }
 0x18c   :  { %v210_v59 = vmul.f32 %v804_v51, %v209_v57 }
 0x18e   :  { %v214_v17 = vsel %vm213_vm8, %v804_v51, %v210_v59 }
 0x18f   :  { %v222_v61 = vmul.f32 %v214_v17, %v934_v4  ;;  %v993_v4 = vperm.slane %v307_v5, 0 }
 0x191   :  { %v234_v62 = vmul.f32 %v948_v47, %v222_v61 }
 0x193   :  { %v246_v0 = vadd.f32 %v959_v22, %v234_v62  ;;  %v308_v22 = vperm.slane %v304_v40, 4 }
 0x195   :  { %v765_v1 = vpack.c.bf16 %v246_v0, %v245_v63  ;;  %v997_v12 = vperm.slane %v308_v22, 0 }
 0x197   :  { %772 = vst [vmem:[#allocation2 + $0x8] sm:$0xff] %v765_v1  }
 0x19e   :  { %v706_v6 = vld [vmem:[#allocation2 + $0x8] sm:$0xff] }
 0x19f   :  { %490 = vmatmul.bf16.gmra.mxu3 %v706_v6  ;;  %519 = vmatmul.bf16.gmra.mxu1 %v706_v6 }
 0x1a0   :  { %548 = vmatmul.bf16.gmra.mxu2 %v706_v6 }
 0x1a2   :  { %v476_v47 = vpop.f32.mrf.mxu0  ;;  %v505_v7 = vpop.f32.mrf.mxu1 }
 0x1a3   :  { %v477_v8 = vadd.f32 %v476_v47, %v991_v32  ;;  %v506_v10 = vadd.f32 %v505_v7, %v993_v4 }
 0x1a5   :  { %v554_v11 = vpack.c.bf16 %v506_v10, %v477_v8 }
 0x1a7   :  { %570 = vst [vmem:[%s1074_s5] sm:$0xff] %v554_v11 }
 0x1a9   :  { %v534_v13 = vpop.f32.mrf.mxu2 }
 0x1aa   :  { %v535_v14 = vadd.f32 %v534_v13, %v997_v12  ;;  %v478_v9 = vpop.f32.mrf.mxu0  ;;  %v507_v33 = vpop.f32.mrf.mxu1 }
 0x1ab   :  { %v479_v29 = vadd.f32 %v478_v9, %v991_v32  ;;  %v508_v15 = vadd.f32 %v507_v33, %v993_v4 }
 0x1ac   :  { %v555_v16 = vpack.c.bf16 %v535_v14, %v535_v14 }
 0x1ad   :  { %v556_v18 = vpack.c.bf16 %v508_v15, %v479_v29 }
 0x1ae   :  { %571 = vst [vmem:[%s1074_s5 + $0x8] sm:$0xf] %v555_v16 }
 0x1af   :  { %572 = vst [vmem:[%s1074_s5 + $0xc] sm:$0xff] %v556_v18 }
 0x1b0   :  { %v481_v19 = vpop.f32.mrf.mxu3 }
 0x1b1   :  { %v536_v20 = vpop.f32.mrf.mxu2  ;;  %v482_v24 = vadd.f32 %v481_v19, %v991_v32 }
 0x1b2   :  { %v537_v21 = vadd.f32 %v536_v20, %v997_v12  ;;  %v510_v23 = vpop.f32.mrf.mxu1 }
 0x1b3   :  { %v511_v25 = vadd.f32 %v510_v23, %v993_v4 }
 0x1b4   :  { %v557_v37 = vpack.c.bf16 %v537_v21, %v537_v21 }
 0x1b5   :  { %v558_v26 = vpack.c.bf16 %v511_v25, %v482_v24 }
 0x1b6   :  { %573 = vst [vmem:[%s1074_s5 + $0x14] sm:$0xf] %v557_v37 }
 0x1b7   :  { %574 = vst [vmem:[%s1074_s5 + $0x18] sm:$0xff] %v558_v26 }
 0x1b8   :  { %v483_v27 = vpop.f32.mrf.mxu3 }
 0x1b9   :  { %v539_v28 = vpop.f32.mrf.mxu2  ;;  %v484_v36 = vadd.f32 %v483_v27, %v991_v32 }
 0x1ba   :  { %v540_v30 = vadd.f32 %v539_v28, %v997_v12  ;;  %v512_v31 = vpop.f32.mrf.mxu1 }
 0x1bb   :  { %v513_v34 = vadd.f32 %v512_v31, %v993_v4 }
 0x1bc   :  { %v559_v35 = vpack.c.bf16 %v540_v30, %v540_v30 }
 0x1bd   :  { %v560_v45 = vpack.c.bf16 %v513_v34, %v484_v36 }
 0x1be   :  { %575 = vst [vmem:[%s1074_s5 + $0x20] sm:$0xf] %v559_v35 }
 0x1bf   :  { %576 = vst [vmem:[%s1074_s5 + $0x24] sm:$0xff] %v560_v45 }
 0x1c0   :  { %v486_v39 = vpop.f32.mrf.mxu3 }
 0x1c1   :  { %v541_v41 = vpop.f32.mrf.mxu2  ;;  %v487_v44 = vadd.f32 %v486_v39, %v991_v32 }
 0x1c2   :  { %v542_v42 = vadd.f32 %v541_v41, %v997_v12  ;;  %v515_v43 = vpop.f32.mrf.mxu1 }
 0x1c3   :  { %v516_v46 = vadd.f32 %v515_v43, %v993_v4 }
 0x1c4   :  { %v561_v38 = vpack.c.bf16 %v542_v42, %v542_v42 }
 0x1c5   :  { %v562_v48 = vpack.c.bf16 %v516_v46, %v487_v44 }
 0x1c6   :  { %577 = vst [vmem:[%s1074_s5 + $0x2c] sm:$0xf] %v561_v38 }
 0x1c7   :  { %578 = vst [vmem:[%s1074_s5 + $0x30] sm:$0xff] %v562_v48 }
 0x1c8   :  { %v488_v49 = vpop.f32.mrf.mxu3 }
 0x1c9   :  { %v544_v50 = vpop.f32.mrf.mxu2  ;;  %v489_v53 = vadd.f32 %v488_v49, %v991_v32 }
 0x1ca   :  { %v545_v51 = vadd.f32 %v544_v50, %v997_v12  ;;  %v517_v52 = vpop.f32.mrf.mxu1 }
 0x1cb   :  { %v518_v54 = vadd.f32 %v517_v52, %v993_v4 }
 0x1cc   :  { %v563_v55 = vpack.c.bf16 %v545_v51, %v545_v51 }
 0x1cd   :  { %v564_v56 = vpack.c.bf16 %v518_v54, %v489_v53 }
 0x1ce   :  { %579 = vst [vmem:[%s1074_s5 + $0x38] sm:$0xf] %v563_v55 }
 0x1cf   :  { %580 = vst [vmem:[%s1074_s5 + $0x3c] sm:$0xff] %v564_v56 }
 0x1d1   :  { %v546_v57 = vpop.f32.mrf.mxu2 }
 0x1d2   :  { %v547_v58 = vadd.f32 %v546_v57, %v997_v12 }
 0x1d4   :  { %v565_v59 = vpack.c.bf16 %v547_v58, %v547_v58 }
 0x1d6   :  { %581 = vst [vmem:[%s1074_s5 + $0x44] sm:$0xf] %v565_v59 }
 0x21c   :  { %v520_v17 = vpop.f32.mrf.mxu1 }
 0x21d   :  { %v521_v61 = vadd.f32 %v520_v17, %v993_v4 }
 0x222   :  { %v491_v60 = vpop.f32.mrf.mxu3 }
 0x223   :  { %v492_v62 = vadd.f32 %v491_v60, %v991_v32  ;;  %v549_v63 = vpop.f32.mrf.mxu2 }
 0x224   :  { %v550_v0 = vadd.f32 %v549_v63, %v997_v12  ;;  %v522_v40 = vpop.f32.mrf.mxu1 }
 0x225   :  { %v566_v1 = vpack.c.bf16 %v521_v61, %v492_v62  ;;  %v523_v5 = vadd.f32 %v522_v40, %v993_v4 }
 0x226   :  { %v567_v2 = vpack.c.bf16 %v550_v0, %v550_v0 }
 0x227   :  { %582 = vst [vmem:[%s1074_s5 + $0x48] sm:$0xff] %v566_v1 }
 0x228   :  { %583 = vst [vmem:[%s1074_s5 + $0x50] sm:$0xf] %v567_v2 }
 0x22a   :  { %v493_v3 = vpop.f32.mrf.mxu3 }
 0x22b   :  { %v494_v6 = vadd.f32 %v493_v3, %v991_v32  ;;  %v551_v47 = vpop.f32.mrf.mxu2 }
 0x22c   :  { %v552_v7 = vadd.f32 %v551_v47, %v997_v12 }
 0x22d   :  { %v568_v22 = vpack.c.bf16 %v523_v5, %v494_v6 }
 0x22e   :  { %v569_v8 = vpack.c.bf16 %v552_v7, %v552_v7 }
 0x22f   :  { %584 = vst [vmem:[%s1074_s5 + $0x54] sm:$0xff] %v568_v22 }
 0x230   :  { %585 = vst [vmem:[%s1074_s5 + $0x5c] sm:$0xf] %v569_v8 }
 0x231   :  { %590 = vsyncpa [#allocation4], 1 }

// kernel: vision_transformer_forward.42
= control target key start
LH: loop header
LB: loop body
LE: loop exit
PB: predicated region body
PF: predicated region fallthrough
CT: control target
= control target key end

     0   :  { %v103_v3 = vmov 128.0   ;;  %s136_s0 = inlined_call_operand.vmem [shape: bf16[16,128], index: 0, kind: input, shape index: {}]   ;;  %s137_s1 = inlined_call_operand.vmem [shape: f32[1,128], index: 1, kind: input, shape index: {}]   ;;  %s138_s2 = inlined_call_operand.vmem [shape: f32[1,128], index: 2, kind: input, shape index: {}]   ;;  %s139_s3 = inlined_call_operand.vmem [shape: bf16[16,128], index: 3, kind: output, shape index: {}]  }
   0x1   :  { %v86_v0 = vld [vmem:[%s136_s0] sm:$0xff]   ;;  %97 = vrcp.f32 %v103_v3 }
   0x2   :  { %v87_v1 = vunpack.c.l.bf16 %v86_v0  ;;  %v88_v2 = vunpack.c.h.bf16 %v86_v0  ;;  %v95_v36 = vld [vmem:[%s137_s1] ss:$0 sm:$0xff] }
   0x3   :  { %v96_v40 = vld [vmem:[%s138_s2] ss:$0 sm:$0xff] }
   0x4   :  { %18 = vadd.xlane.f32.xlu0 %v87_v1 }
   0x7   :  { %v98_v4 = vpop.eup %97 }
   0x8   :  { %v23_v5 = vmul.f32 128.0, %v98_v4  ;;  %vm27_vm0 = vweird.f32 %v98_v4 }
   0xa   :  { %v24_v6 = vsub.f32 1.0, %v23_v5 }
   0xc   :  { %20 = vadd.xlane.f32.xlu0 %v88_v2  ;;  %v25_v7 = vmul.f32 %v98_v4, %v24_v6 }
   0xe   :  { %v26_v8 = vadd.f32 %v98_v4, %v25_v7 }
  0x10   :  { %v28_v9 = vsel %vm27_vm0, %v98_v4, %v26_v8 }
  0x77   :  { %v19_v10 = vpop.xlane.xlu0 %18 }
  0x78   :  { %v29_v11 = vmul.f32 %v28_v9, %v19_v10 }
  0x7a   :  { %v31_v12 = vsub.f32 %v87_v1, %v29_v11 }
  0x7c   :  { %v33_v13 = vmul.f32 %v31_v12, %v31_v12 }
  0x7e   :  { %35 = vadd.xlane.f32.xlu1 %v33_v13 }
  0x7f   :  { %v21_v14 = vpop.xlane.xlu0 %20 }
  0x80   :  { %v30_v15 = vmul.f32 %v28_v9, %v21_v14 }
  0x82   :  { %v32_v16 = vsub.f32 %v88_v2, %v30_v15 }
  0x84   :  { %v34_v17 = vmul.f32 %v32_v16, %v32_v16 }
  0x86   :  { %37 = vadd.xlane.f32.xlu1 %v34_v17 }
  0xf1   :  { %v36_v18 = vpop.xlane.xlu1 %35 }
  0xf2   :  { %v39_v19 = vmul.f32 %v36_v18, %v28_v9 }
  0xf4   :  { %v41_v20 = vadd.f32 1e-05, %v39_v19 }
  0xf6   :  { %99 = vrsqrt.f32 %v41_v20  ;;  %vm49_vm2 = vweird.f32 %v41_v20 }
  0xf9   :  { %v38_v21 = vpop.xlane.xlu1 %37 }
  0xfa   :  { %v40_v22 = vmul.f32 %v38_v21, %v28_v9 }
  0xfc   :  { %v100_v23 = vpop.eup %99  ;;  %v42_v24 = vadd.f32 1e-05, %v40_v22 }
  0xfd   :  { %v44_v25 = vmul.f32 %v100_v23, %v41_v20  ;;  %vm50_vm1 = vweird.f32 %v100_v23 }
  0xfe   :  { %101 = vrsqrt.f32 %v42_v24  ;;  %vm51_vm3 = vmor %vm49_vm2, %vm50_vm1  ;;  %vm59_vm5 = vweird.f32 %v42_v24 }
  0xff   :  { %v45_v26 = vmul.f32 %v100_v23, %v44_v25 }
 0x101   :  { %v46_v27 = vmul.f32 0.5, %v45_v26 }
 0x103   :  { %v47_v28 = vsub.f32 1.5, %v46_v27 }
 0x104   :  { %v102_v29 = vpop.eup %101 }
 0x105   :  { %v48_v30 = vmul.f32 %v100_v23, %v47_v28  ;;  %v54_v31 = vmul.f32 %v102_v29, %v42_v24  ;;  %vm60_vm4 = vweird.f32 %v102_v29 }
 0x106   :  { %vm61_vm6 = vmor %vm59_vm5, %vm60_vm4 }
 0x107   :  { %v55_v32 = vmul.f32 %v102_v29, %v54_v31  ;;  %v52_v33 = vsel %vm51_vm3, %v100_v23, %v48_v30 }
 0x108   :  { %v63_v37 = vmul.f32 %v52_v33, %v31_v12 }
 0x109   :  { %v56_v34 = vmul.f32 0.5, %v55_v32 }
 0x10a   :  { %v69_v41 = vmul.f32 %v95_v36, %v63_v37 }
 0x10b   :  { %v57_v35 = vsub.f32 1.5, %v56_v34 }
 0x10c   :  { %v75_v44 = vadd.f32 %v96_v40, %v69_v41 }
 0x10d   :  { %v58_v38 = vmul.f32 %v102_v29, %v57_v35 }
 0x10f   :  { %v62_v39 = vsel %vm61_vm6, %v102_v29, %v58_v38 }
 0x110   :  { %v64_v42 = vmul.f32 %v62_v39, %v32_v16 }
 0x112   :  { %v70_v43 = vmul.f32 %v95_v36, %v64_v42 }
 0x114   :  { %v76_v45 = vadd.f32 %v96_v40, %v70_v43 }
 0x116   :  { %v92_v46 = vpack.c.bf16 %v76_v45, %v75_v44 }
 0x118   :  { %93 = vst [vmem:[%s139_s3] sm:$0xff] %v92_v46  }

// kernel: vision_transformer_forward.43
= control target key start
LH: loop header
LB: loop body
LE: loop exit
PB: predicated region body
PF: predicated region fallthrough
CT: control target
= control target key end

     0   :  { %vm15_vm0 = vcmask 130048   ;;  %v171_v2 = vmov 0.0   ;;  %vm118_vm1 = vcmask 125952   ;;  %s224_s1 = inlined_call_operand.vmem [shape: bf16[128,16], index: 1, kind: input, shape index: {}]   ;;  %s225_s0 = inlined_call_operand.vmem [shape: bf16[16,128], index: 0, kind: input, shape index: {}]   ;;  %s226_s2 = inlined_call_operand.vmem [shape: bf16[16,16], index: 2, kind: output, shape index: {}]  }
   0x1   :  { %v169_v0 = vld [vmem:[%s224_s1 + $0x38] sm:$0xff]  ;;  %v168_v1 = vld [vmem:[%s224_s1 + $0x30] sm:$0xff]  ;;  %16 = vst.msk [vmem:[#allocation2] sm:$0xff] %vm15_vm0, %v171_v2  ;;  %v167_v3 = vld [vmem:[%s224_s1 + $0x28] sm:$0xff] }
   0x2   :  { %92 = vmatpush.bf16.msra.mxu0 %v169_v0  ;;  %17 = vst.msk [vmem:[#allocation2 + $0x8] sm:$0xff] %vm15_vm0, %v171_v2  ;;  %v166_v4 = vld [vmem:[%s224_s1 + $0x20] sm:$0xff]  ;;  %v165_v5 = vld [vmem:[%s224_s1 + $0x18] sm:$0xff]  ;;  %v164_v6 = vld [vmem:[%s224_s1 + $0x10] sm:$0xff] }
   0x3   :  { %v163_v7 = vld [vmem:[%s224_s1 + $0x8] sm:$0xff]  ;;  %v162_v8 = vld [vmem:[%s224_s1] sm:$0xff] }
   0x4   :  { %v161_v9 = vld [vmem:[%s225_s0] sm:$0xff] }
   0x6   :  { %93 = vmatpush.bf16.msra.mxu0 %v168_v1 }
   0x8   :  { %v18_v10 = vld [vmem:[#allocation2] sm:$0xff] }
   0x9   :  { %v19_v13 = vld [vmem:[#allocation2 + $0x8] sm:$0xff] }
   0xa   :  { %94 = vmatpush.bf16.msra.mxu0 %v167_v3 }
   0xe   :  { %95 = vmatpush.bf16.msra.mxu0 %v166_v4 }
  0x12   :  { %96 = vmatpush.bf16.msra.mxu0 %v165_v5 }
  0x16   :  { %97 = vmatpush.bf16.msra.mxu0 %v164_v6 }
  0x1a   :  { %98 = vmatpush.bf16.msra.mxu0 %v163_v7 }
  0x1e   :  { %99 = vmatpush.bf16.msra.mxu0 %v162_v8 }
  0x21   :  { %100 = vmatmul.bf16.vlgmr.msra.gmra.mxu0 %v161_v9 }
  0x9e   :  { %v101_v11 = vpop.f32.mrf.mxu0 }
  0x9f   :  { %v106_v12 = vadd.f32 %v101_v11, %v18_v10 }
  0xa1   :  { %109 = vst.msk [vmem:[#allocation2] sm:$0xff] %vm15_vm0, %v106_v12 }
  0xa6   :  { %v103_v14 = vpop.f32.mrf.mxu0 }
  0xa7   :  { %v107_v15 = vadd.f32 %v103_v14, %v19_v13 }
  0xa8   :  { %v114_v16 = vld [vmem:[#allocation2] sm:$0xff] }
  0xa9   :  { %v116_v17 = vpack.c.bf16 %v114_v16, %v114_v16  ;;  %110 = vst.msk [vmem:[#allocation2 + $0x8] sm:$0xff] %vm15_vm0, %v107_v15 }
  0xab   :  { %119 = vst.msk [vmem:[%s226_s2] sm:$0xf] %vm118_vm1, %v116_v17 }
  0xb0   :  { %v115_v18 = vld [vmem:[#allocation2 + $0x8] sm:$0xff] }
  0xb1   :  { %v117_v19 = vpack.c.bf16 %v115_v18, %v115_v18 }
  0xb3   :  { %120 = vst.msk [vmem:[%s226_s2 + $0x4] sm:$0xf] %vm118_vm1, %v117_v19 }

</bundles_post_ra>
